<compile_context>
chip_gen: v7x
topology: tpu7x:2x2x1
jax: 0.10.0
libtpu: 0.0.40
codegen_flags: <defaults>
</compile_context>

<pallas_src>
import functools
import math

import jax
import jax.numpy as jnp
from jax.experimental import pallas as pl
from jax.experimental.pallas import tpu as pltpu


# ------------------------- generation-aware knobs ---------------------------

# bf16 MXU operands (f32 accumulation) on every generation: all TPU MXUs are
# bf16-native; f32 matmul would run via multi-pass emulation on v5e/v6e.
MXU_DTYPE = jnp.bfloat16


def _device_kind():
    try:
        return jax.devices()[0].device_kind.lower()
    except Exception:
        return ""


_KIND = _device_kind()
_BIG_VMEM = any(tag in _KIND for tag in ("v5", "v6"))   # 128 MiB VMEM parts

if _BIG_VMEM:
    VMEM_LIMIT_BYTES = 64 * 1024 * 1024
    LINEAR_ROW_TILE = 1024
    FFN_ROW_TILE = 512
    NORM_ROW_TILE = 2048
else:  # v7x (64 MiB VMEM) and unknown targets: conservative
    VMEM_LIMIT_BYTES = 32 * 1024 * 1024
    LINEAR_ROW_TILE = 512
    FFN_ROW_TILE = 256
    NORM_ROW_TILE = 1024

# Max query tile for the decoder self-attention (bounds the per-head [tq, Lq]
# f32 score block and gives v7x a second parallel grid axis).
SELF_ATTN_Q_TILE = 128


def _cparams(n_grid_axes=1):
    return pltpu.CompilerParams(
        dimension_semantics=("parallel",) * n_grid_axes,
        vmem_limit_bytes=VMEM_LIMIT_BYTES)


def _round_up(x, m):
    return ((x + m - 1) // m) * m


def _row_tile(rows, target):
    return min(_round_up(rows, 8), _round_up(target, 8))


def _pad_rows(x, rows_padded):
    pad = rows_padded - x.shape[0]
    if pad == 0:
        return x
    cfg = [(0, pad)] + [(0, 0)] * (x.ndim - 1)
    return jnp.pad(x, cfg)


# ----------------------------- Pallas kernels ------------------------------

def _linear_kernel(*refs, activation, has_scale):
    if has_scale:
        x_ref, s_ref, w_ref, b_ref, o_ref = refs
    else:
        x_ref, w_ref, b_ref, o_ref = refs
    x = x_ref[...].astype(jnp.float32)
    y = jnp.dot(x.astype(MXU_DTYPE), w_ref[...],
                preferred_element_type=jnp.float32) + b_ref[...].astype(jnp.float32)
    if activation == "relu":
        y = jnp.maximum(y, 0.0)
    if has_scale:
        y = y * s_ref[...].astype(jnp.float32)   # fused padding-mask zeroing
    o_ref[...] = y.astype(o_ref.dtype)


def pallas_linear(x, w, b, activation=None, scale_rows=None, row_tile=None):
    """y = (x @ w + b) [* per-row scale], row-tiled, rows 'parallel'.
    Weights are pre-cast to bf16 once in this wrapper (not per grid step)."""
    lead = x.shape[:-1]
    K = x.shape[-1]
    N = w.shape[-1]
    x2 = x.reshape(-1, K)
    R = x2.shape[0]
    tile = _row_tile(R, LINEAR_ROW_TILE if row_tile is None else row_tile)
    Rp = _round_up(R, tile)
    x2 = _pad_rows(x2, Rp)
    row_spec = pl.BlockSpec((tile, K), lambda i: (i, 0))
    operands = [x2]
    in_specs = [row_spec]
    has_scale = scale_rows is not None
    if has_scale:
        operands.append(_pad_rows(scale_rows.reshape(-1, 1).astype(jnp.float32), Rp))
        in_specs.append(pl.BlockSpec((tile, 1), lambda i: (i, 0)))
    operands += [w.astype(MXU_DTYPE), b.reshape(1, N).astype(jnp.float32)]
    in_specs += [pl.BlockSpec((K, N), lambda i: (0, 0)),
                 pl.BlockSpec((1, N), lambda i: (0, 0))]
    out = pl.pallas_call(
        functools.partial(_linear_kernel, activation=activation, has_scale=has_scale),
        out_shape=jax.ShapeDtypeStruct((Rp, N), jnp.float32),
        grid=(Rp // tile,),
        in_specs=in_specs,
        out_specs=pl.BlockSpec((tile, N), lambda i: (i, 0)),
        compiler_params=_cparams(1),
    )(*operands)
    return out[:R].reshape(*lead, N)


def _add_layernorm_kernel(x_ref, r_ref, g_ref, b_ref, o_ref, *, eps):
    x = x_ref[...].astype(jnp.float32) + r_ref[...].astype(jnp.float32)
    mean = jnp.mean(x, axis=-1, keepdims=True)
    xc = x - mean
    var = jnp.mean(xc * xc, axis=-1, keepdims=True)
    y = xc * jax.lax.rsqrt(var + eps)
    o_ref[...] = (y * g_ref[...] + b_ref[...]).astype(o_ref.dtype)


def pallas_add_layernorm(x, res, gamma, beta, eps=1e-5, row_tile=None):
    """LayerNorm(x + res): the residual add is fused into the norm kernel."""
    lead = x.shape[:-1]
    C = x.shape[-1]
    x2 = x.reshape(-1, C)
    r2 = res.reshape(-1, C)
    R = x2.shape[0]
    tile = _row_tile(R, NORM_ROW_TILE if row_tile is None else row_tile)
    Rp = _round_up(R, tile)
    x2 = _pad_rows(x2, Rp)
    r2 = _pad_rows(r2, Rp)
    row_spec = pl.BlockSpec((tile, C), lambda i: (i, 0))
    vec_spec = pl.BlockSpec((1, C), lambda i: (0, 0))
    out = pl.pallas_call(
        functools.partial(_add_layernorm_kernel, eps=eps),
        out_shape=jax.ShapeDtypeStruct((Rp, C), jnp.float32),
        grid=(Rp // tile,),
        in_specs=[row_spec, row_spec, vec_spec, vec_spec],
        out_specs=row_spec,
        compiler_params=_cparams(1),
    )(x2, r2, gamma.reshape(1, C), beta.reshape(1, C))
    return out[:R].reshape(*lead, C)


def _ffn_kernel(x_ref, w1_ref, b1_ref, w2_ref, b2_ref, g_ref, be_ref, o_ref, *, eps):
    x = x_ref[...].astype(jnp.float32)
    h = jnp.dot(x.astype(MXU_DTYPE), w1_ref[...],
                preferred_element_type=jnp.float32) + b1_ref[...].astype(jnp.float32)
    # ReLU; cast to bf16 immediately so the live [tile, d_ffn] intermediate is
    # half-size (it is only consumed by the second MXU matmul).
    h = jnp.maximum(h, 0.0).astype(MXU_DTYPE)
    y = jnp.dot(h, w2_ref[...],
                preferred_element_type=jnp.float32) + b2_ref[...].astype(jnp.float32)
    z = x + y                                                 # residual
    mean = jnp.mean(z, axis=-1, keepdims=True)
    zc = z - mean
    var = jnp.mean(zc * zc, axis=-1, keepdims=True)
    out = zc * jax.lax.rsqrt(var + eps) * g_ref[...] + be_ref[...]
    o_ref[...] = out.astype(o_ref.dtype)


def pallas_ffn(x, w1, b1, w2, b2, gamma, beta, eps=1e-5, row_tile=None):
    """Fused FFN: linear1 + ReLU + linear2 + residual + LayerNorm; the
    [tile, d_ffn] intermediate stays on-chip (bf16)."""
    lead = x.shape[:-1]
    C = x.shape[-1]
    F = w1.shape[-1]
    x2 = x.reshape(-1, C)
    R = x2.shape[0]
    tile = _row_tile(R, FFN_ROW_TILE if row_tile is None else row_tile)
    Rp = _round_up(R, tile)
    x2 = _pad_rows(x2, Rp)
    row_spec = pl.BlockSpec((tile, C), lambda i: (i, 0))
    out = pl.pallas_call(
        functools.partial(_ffn_kernel, eps=eps),
        out_shape=jax.ShapeDtypeStruct((Rp, C), jnp.float32),
        grid=(Rp // tile,),
        in_specs=[row_spec,
                  pl.BlockSpec((C, F), lambda i: (0, 0)),
                  pl.BlockSpec((1, F), lambda i: (0, 0)),
                  pl.BlockSpec((F, C), lambda i: (0, 0)),
                  pl.BlockSpec((1, C), lambda i: (0, 0)),
                  pl.BlockSpec((1, C), lambda i: (0, 0)),
                  pl.BlockSpec((1, C), lambda i: (0, 0))],
        out_specs=row_spec,
        compiler_params=_cparams(1),
    )(x2, w1.astype(MXU_DTYPE), b1.reshape(1, F), w2.astype(MXU_DTYPE),
      b2.reshape(1, C), gamma.reshape(1, C), beta.reshape(1, C))
    return out[:R].reshape(*lead, C)


def _off_attn_kernel(x_ref, pos_ref, wo_ref, bo_ref, wa_ref, ba_ref,
                     off_ref, attn_ref, *, n_heads, lp):
    # (query + pos) add, sampling_offsets + attention_weights projections and
    # the per-head softmax over L*P, all fused in one kernel.
    x = x_ref[...].astype(jnp.float32) + pos_ref[...].astype(jnp.float32)
    xm = x.astype(MXU_DTYPE)
    off = jnp.dot(xm, wo_ref[...],
                  preferred_element_type=jnp.float32) + bo_ref[...].astype(jnp.float32)
    a = jnp.dot(xm, wa_ref[...],
                preferred_element_type=jnp.float32) + ba_ref[...].astype(jnp.float32)
    segs = []
    for m in range(n_heads):                                  # softmax over each L*P group
        seg = a[:, m * lp:(m + 1) * lp]
        seg = seg - jnp.max(seg, axis=-1, keepdims=True)
        e = jnp.exp(seg)
        e = e * pl.reciprocal(jnp.sum(e, axis=-1, keepdims=True), approx=True)
        segs.append(e)
    attn_ref[...] = jnp.concatenate(segs, axis=-1).astype(attn_ref.dtype)
    off_ref[...] = off.astype(off_ref.dtype)


def pallas_off_attn(query, query_pos, w_off, b_off, w_attn, b_attn,
                    n_heads, n_levels, n_points, row_tile=None):
    B, Lq, d = query.shape
    lp = n_levels * n_points
    n_off = n_heads * lp * 2
    n_attn = n_heads * lp
    x2 = query.reshape(-1, d)
    p2 = query_pos.reshape(-1, d)
    R = x2.shape[0]
    tile = _row_tile(R, LINEAR_ROW_TILE if row_tile is None else row_tile)
    Rp = _round_up(R, tile)
    x2 = _pad_rows(x2, Rp)
    p2 = _pad_rows(p2, Rp)
    row_spec = pl.BlockSpec((tile, d), lambda i: (i, 0))
    off, attn = pl.pallas_call(
        functools.partial(_off_attn_kernel, n_heads=n_heads, lp=lp),
        out_shape=(jax.ShapeDtypeStruct((Rp, n_off), jnp.float32),
                   jax.ShapeDtypeStruct((Rp, n_attn), jnp.float32)),
        grid=(Rp // tile,),
        in_specs=[row_spec, row_spec,
                  pl.BlockSpec((d, n_off), lambda i: (0, 0)),
                  pl.BlockSpec((1, n_off), lambda i: (0, 0)),
                  pl.BlockSpec((d, n_attn), lambda i: (0, 0)),
                  pl.BlockSpec((1, n_attn), lambda i: (0, 0))],
        out_specs=(pl.BlockSpec((tile, n_off), lambda i: (i, 0)),
                   pl.BlockSpec((tile, n_attn), lambda i: (i, 0))),
        compiler_params=_cparams(1),
    )(x2, p2, w_off.astype(MXU_DTYPE), b_off.reshape(1, n_off),
      w_attn.astype(MXU_DTYPE), b_attn.reshape(1, n_attn))
    return (off[:R].reshape(B, Lq, n_off), attn[:R].reshape(B, Lq, n_attn))


def _self_attn_kernel(t_ref, pos_ref, wi_ref, bi_ref, wo_ref, bo_ref, o_ref, *,
                      n_heads, scale, lq_actual, q_tile, fuse_qk):
    # Fused nn.MultiheadAttention for one (batch, query-tile) grid point:
    # q = k = tgt + pos, v = tgt ; QKV proj + per-head softmax attn + out proj.
    t = t_ref[0].astype(jnp.float32)                          # [Lp, d]
    pos = pos_ref[0].astype(jnp.float32)
    x_qk = t + pos
    Lp, d = t.shape
    dh = d // n_heads
    wi = wi_ref[...]                                          # bf16 [d, 3d]
    bi = bi_ref[...].astype(jnp.float32)
    xqk_m = x_qk.astype(MXU_DTYPE)
    if fuse_qk:
        # single query tile: fuse Q and K into one [Lp,d] x [d,2d] matmul
        qk = jnp.dot(xqk_m, wi[:, :2 * d],
                     preferred_element_type=jnp.float32) + bi[:, :2 * d]
        q = qk[:, :d]
        k = qk[:, d:]
    else:
        k = jnp.dot(xqk_m, wi[:, d:2 * d],
                    preferred_element_type=jnp.float32) + bi[:, d:2 * d]
        qi = pl.program_id(1)
        qs = pl.multiple_of(qi * q_tile, q_tile)
        xq = (t_ref[0, pl.ds(qs, q_tile), :].astype(jnp.float32)
              + pos_ref[0, pl.ds(qs, q_tile), :].astype(jnp.float32))
        q = jnp.dot(xq.astype(MXU_DTYPE), wi[:, :d],
                    preferred_element_type=jnp.float32) + bi[:, :d]
    v = jnp.dot(t.astype(MXU_DTYPE), wi[:, 2 * d:],
                preferred_element_type=jnp.float32) + bi[:, 2 * d:]
    if Lp > lq_actual:   # mask padded key columns
        key_ok = jax.lax.broadcasted_iota(jnp.int32, (1, Lp), 1) < lq_actual
    else:
        key_ok = None
    ctx_heads = []
    for h in range(n_heads):
        lo, hi = h * dh, (h + 1) * dh
        qh = q[:, lo:hi] * scale
        kh = k[:, lo:hi]
        vh = v[:, lo:hi]
        s = jax.lax.dot_general(qh.astype(MXU_DTYPE), kh.astype(MXU_DTYPE),
                                (((1,), (1,)), ((), ())),
                                preferred_element_type=jnp.float32)    # [tq, Lp]
        if key_ok is not None:
            s = jnp.where(key_ok, s, -1e30)
        s = s - jnp.max(s, axis=-1, keepdims=True)
        pr = jnp.exp(s)
        pr = pr * pl.reciprocal(jnp.sum(pr, axis=-1, keepdims=True), approx=True)
        ctx_heads.append(jnp.dot(pr.astype(MXU_DTYPE), vh.astype(MXU_DTYPE),
                                 preferred_element_type=jnp.float32))  # [tq, dh]
    # concat heads -> one K=d_model output-projection matmul (MXU-friendly)
    ctx = jnp.concatenate(ctx_heads, axis=-1)
    out = jnp.dot(ctx.astype(MXU_DTYPE), wo_ref[...],
                  preferred_element_type=jnp.float32) + bo_ref[...].astype(jnp.float32)
    o_ref[0] = out.astype(o_ref.dtype)


def pallas_self_attention(tgt, query_pos, p, n_heads):
    B, Lq, d = tgt.shape
    dh = d // n_heads
    scale = 1.0 / math.sqrt(dh)
    q_tile = min(_round_up(Lq, 8), _round_up(SELF_ATTN_Q_TILE, 8))
    Lp = _round_up(Lq, q_tile)
    n_q_tiles = Lp // q_tile
    fuse_qk = (n_q_tiles == 1)
    if Lp != Lq:
        pad = [(0, 0), (0, Lp - Lq), (0, 0)]
        tgt_p = jnp.pad(tgt, pad)
        pos_p = jnp.pad(query_pos, pad)
    else:
        tgt_p, pos_p = tgt, query_pos
    seq_spec = pl.BlockSpec((1, Lp, d), lambda b, qi: (b, 0, 0))
    out = pl.pallas_call(
        functools.partial(_self_attn_kernel, n_heads=n_heads, scale=scale,
                          lq_actual=Lq, q_tile=q_tile, fuse_qk=fuse_qk),
        out_shape=jax.ShapeDtypeStruct((B, Lp, d), jnp.float32),
        grid=(B, n_q_tiles),
        in_specs=[seq_spec, seq_spec,
                  pl.BlockSpec((d, 3 * d), lambda b, qi: (0, 0)),
                  pl.BlockSpec((1, 3 * d), lambda b, qi: (0, 0)),
                  pl.BlockSpec((d, d), lambda b, qi: (0, 0)),
                  pl.BlockSpec((1, d), lambda b, qi: (0, 0))],
        out_specs=pl.BlockSpec((1, q_tile, d), lambda b, qi: (b, qi, 0)),
        compiler_params=_cparams(2),
    )(tgt_p, pos_p, p["in_proj_w"].astype(MXU_DTYPE), p["in_proj_b"].reshape(1, 3 * d),
      p["out_proj_w"].astype(MXU_DTYPE), p["out_proj_b"].reshape(1, d))
    return out[:, :Lq]


# --------------------------- model building blocks -------------------------

def ms_deform_attn_sample_reduce(value, spatial_shapes, sampling_locations, attn):
    """Bilinear sampling matching grid_sample(bilinear, padding='zeros',
    align_corners=False), with the attention weights applied and the (L*P)
    reduction done right in the gather epilogue: the L*P-expanded sampled
    tensor is never materialized in HBM — only the reduced [B, Lq, d_model]
    activation reaches the Pallas output-projection kernel."""
    B, S, M, D = value.shape
    _, Lq, _, L, P, _ = sampling_locations.shape
    head_idx = jnp.arange(M, dtype=jnp.int32).reshape(1, 1, M, 1)
    red = jnp.zeros((B, Lq, M, D), jnp.float32)
    start = 0
    for lvl, (H, W) in enumerate(spatial_shapes):
        HW = H * W
        val_l = value[:, start:start + HW].reshape(B, HW * M, D)   # free reshape
        start += HW
        loc_l = sampling_locations[:, :, :, lvl]                   # [B, Lq, M, P, 2]
        attn_l = attn[:, :, :, lvl * P:(lvl + 1) * P]              # [B, Lq, M, P]
        px = loc_l[..., 0] * W - 0.5
        py = loc_l[..., 1] * H - 0.5
        x0 = jnp.floor(px)
        y0 = jnp.floor(py)
        x1 = x0 + 1.0
        y1 = y0 + 1.0
        lx = px - x0
        ly = py - y0
        corners = [(y0, x0, (1.0 - ly) * (1.0 - lx)),
                   (y0, x1, (1.0 - ly) * lx),
                   (y1, x0, ly * (1.0 - lx)),
                   (y1, x1, ly * lx)]
        for yy, xx, ww in corners:
            valid = ((xx >= 0) & (xx <= W - 1) & (yy >= 0) & (yy <= H - 1))
            xi = jnp.clip(xx, 0, W - 1).astype(jnp.int32)
            yi = jnp.clip(yy, 0, H - 1).astype(jnp.int32)
            idx = ((yi * W + xi) * M + head_idx).reshape(B, Lq * M * P)
            # TODO(synk): data-dependent gather stays in XLA; a fully-fused
            # in-kernel DMA gather (pl.ANY + make_async_copy) would be needed
            # to avoid this HBM pass entirely.
            g = jnp.take_along_axis(val_l, idx[..., None], axis=1)  # [B, Lq*M*P, D]
            g = g.reshape(B, Lq, M, P, D)
            w_full = ww * valid.astype(jnp.float32) * attn_l        # [B, Lq, M, P]
            red = red + jnp.sum(w_full[..., None] * g, axis=3)
    return red.reshape(B, Lq, M * D)


def ms_deform_attn_forward(p, query, query_pos, reference_points, input_flatten,
                           spatial_shapes, padding_mask, n_heads, n_levels, n_points):
    B, Lq, d = query.shape
    Lin = input_flatten.shape[1]
    M, L, P = n_heads, n_levels, n_points
    Dh = d // M

    # value projection with the padding-mask zeroing fused into the kernel
    keep = None
    if padding_mask is not None:
        keep = 1.0 - padding_mask.reshape(-1).astype(jnp.float32)
    value = pallas_linear(input_flatten, p["value_proj_w"], p["value_proj_b"],
                          scale_rows=keep)
    value = value.reshape(B, Lin, M, Dh)

    # fused (query+pos), sampling_offsets + attention_weights projections and
    # the per-head (L*P) softmax — one Pallas kernel.
    sampling_offsets, attn = pallas_off_attn(
        query, query_pos, p["off_w"], p["off_b"], p["attn_w"], p["attn_b"], M, L, P)
    sampling_offsets = sampling_offsets.reshape(B, Lq, M, L, P, 2)
    attn = attn.reshape(B, Lq, M, L * P)

    ss = jnp.asarray(spatial_shapes, dtype=jnp.float32)            # [L, 2] (H, W)
    offset_normalizer = jnp.stack([ss[:, 1], ss[:, 0]], axis=-1)   # (W, H)
    sampling_locations = (reference_points[:, :, None, :, None, :]
                          + sampling_offsets / offset_normalizer[None, None, None, :, None, :])

    red = ms_deform_attn_sample_reduce(value, spatial_shapes, sampling_locations, attn)
    out = pallas_linear(red, p["output_proj_w"], p["output_proj_b"])
    return out                                                     # [B, Lq, d]


def encoder_layer_forward(p, src, pos, reference_points, spatial_shapes, padding_mask,
                          n_heads, n_levels, n_points):
    src2 = ms_deform_attn_forward(p["self_attn"], src, pos, reference_points, src,
                                  spatial_shapes, padding_mask, n_heads, n_levels, n_points)
    src = pallas_add_layernorm(src, src2, p["norm1_g"], p["norm1_b"])
    src = pallas_ffn(src, p["linear1_w"], p["linear1_b"], p["linear2_w"], p["linear2_b"],
                     p["norm2_g"], p["norm2_b"])
    return src


def decoder_layer_forward(p, tgt, query_pos, reference_points, src, spatial_shapes,
                          padding_mask, n_heads, n_levels, n_points):
    tgt2 = pallas_self_attention(tgt, query_pos, p["self_attn"], n_heads)
    tgt = pallas_add_layernorm(tgt, tgt2, p["norm2_g"], p["norm2_b"])
    tgt2 = ms_deform_attn_forward(p["cross_attn"], tgt, query_pos, reference_points, src,
                                  spatial_shapes, padding_mask, n_heads, n_levels, n_points)
    tgt = pallas_add_layernorm(tgt, tgt2, p["norm1_g"], p["norm1_b"])
    tgt = pallas_ffn(tgt, p["linear1_w"], p["linear1_b"], p["linear2_w"], p["linear2_b"],
                     p["norm3_g"], p["norm3_b"])
    return tgt


def get_valid_ratio(mask):
    _, H, W = mask.shape
    valid_H = jnp.sum(~mask[:, :, 0], axis=1).astype(jnp.float32)
    valid_W = jnp.sum(~mask[:, 0, :], axis=1).astype(jnp.float32)
    return jnp.stack([valid_W / W, valid_H / H], axis=-1)


def get_reference_points(spatial_shapes, valid_ratios):
    ref_list = []
    for lvl, (H, W) in enumerate(spatial_shapes):
        ref_y, ref_x = jnp.meshgrid(
            jnp.linspace(0.5, H - 0.5, H, dtype=jnp.float32),
            jnp.linspace(0.5, W - 0.5, W, dtype=jnp.float32),
            indexing="ij")
        ref_y = ref_y.reshape(-1)[None] / (valid_ratios[:, None, lvl, 1] * H)
        ref_x = ref_x.reshape(-1)[None] / (valid_ratios[:, None, lvl, 0] * W)
        ref_list.append(jnp.stack((ref_x, ref_y), axis=-1))
    reference_points = jnp.concatenate(ref_list, axis=1)
    reference_points = reference_points[:, :, None] * valid_ratios[:, None]
    return reference_points                                        # [B, S, L, 2]


def deformable_transformer_forward(params, srcs, masks, pos_embeds, query_embed, cfg):
    nhead = cfg["nhead"]
    n_levels = cfg["num_feature_levels"]
    n_points = cfg["n_points"]

    src_flatten, mask_flatten, lvl_pos_flatten, spatial_shapes = [], [], [], []
    for lvl, (src, mask, pos) in enumerate(zip(srcs, masks, pos_embeds)):
        b, c, h, w = src.shape
        spatial_shapes.append((h, w))
        src_f = src.reshape(b, c, h * w).transpose(0, 2, 1)
        mask_f = mask.reshape(b, h * w)
        pos_f = pos.reshape(b, c, h * w).transpose(0, 2, 1)
        lvl_pos_flatten.append(pos_f + params["level_embed"][lvl][None, None, :])
        src_flatten.append(src_f)
        mask_flatten.append(mask_f)
    src_flatten = jnp.concatenate(src_flatten, axis=1)
    mask_flatten = jnp.concatenate(mask_flatten, axis=1)
    lvl_pos = jnp.concatenate(lvl_pos_flatten, axis=1)
    valid_ratios = jnp.stack([get_valid_ratio(m) for m in masks], axis=1)   # [B, L, 2]

    # ---- encoder ----
    reference_points = get_reference_points(spatial_shapes, valid_ratios)
    output = src_flatten
    for lp in params["encoder_layers"]:
        output = encoder_layer_forward(lp, output, lvl_pos, reference_points,
                                       spatial_shapes, mask_flatten,
                                       nhead, n_levels, n_points)
    memory = output

    bs, _, c = memory.shape
    query_pos, tgt = query_embed[:, :c], query_embed[:, c:]
    query_pos = jnp.broadcast_to(query_pos[None], (bs,) + query_pos.shape)
    tgt = jnp.broadcast_to(tgt[None], (bs,) + tgt.shape)
    # tiny N=2 projection: lane-sparse output, left in XLA on purpose
    reference_points_dec = jax.nn.sigmoid(
        jnp.dot(query_pos, params["reference_points_w"]) + params["reference_points_b"])
    init_reference_out = reference_points_dec

    # ---- decoder (bbox_embed is None, return_intermediate=False) ----
    output = tgt
    for lp in params["decoder_layers"]:
        reference_points_input = reference_points_dec[:, :, None] * valid_ratios[:, None]
        output = decoder_layer_forward(lp, output, query_pos, reference_points_input,
                                       memory, spatial_shapes, mask_flatten,
                                       nhead, n_levels, n_points)
    hs = output
    inter_references_out = reference_points_dec
    return hs, init_reference_out, inter_references_out, None, None


# ----------------------------- parameter init ------------------------------

def _lin_init(key, fin, fout, scale=None):
    s = scale if scale is not None else 1.0 / math.sqrt(fin)
    w = jax.random.normal(key, (fin, fout), jnp.float32) * s
    b = jnp.zeros((fout,), jnp.float32)
    return w, b


def init_msdeform(key, d_model, n_heads, n_levels, n_points):
    ks = jax.random.split(key, 4)
    so_w, so_b = _lin_init(ks[0], d_model, n_heads * n_levels * n_points * 2, scale=0.01)
    aw_w, aw_b = _lin_init(ks[1], d_model, n_heads * n_levels * n_points)
    vp_w, vp_b = _lin_init(ks[2], d_model, d_model)
    op_w, op_b = _lin_init(ks[3], d_model, d_model)
    return dict(off_w=so_w, off_b=so_b, attn_w=aw_w, attn_b=aw_b,
                value_proj_w=vp_w, value_proj_b=vp_b,
                output_proj_w=op_w, output_proj_b=op_b)


def init_encoder_layer(key, d_model, d_ffn, n_heads, n_levels, n_points):
    ks = jax.random.split(key, 3)
    l1_w, l1_b = _lin_init(ks[1], d_model, d_ffn)
    l2_w, l2_b = _lin_init(ks[2], d_ffn, d_model)
    return dict(self_attn=init_msdeform(ks[0], d_model, n_heads, n_levels, n_points),
                norm1_g=jnp.ones((d_model,), jnp.float32), norm1_b=jnp.zeros((d_model,), jnp.float32),
                linear1_w=l1_w, linear1_b=l1_b, linear2_w=l2_w, linear2_b=l2_b,
                norm2_g=jnp.ones((d_model,), jnp.float32), norm2_b=jnp.zeros((d_model,), jnp.float32))


def init_decoder_layer(key, d_model, d_ffn, n_heads, n_levels, n_points):
    ks = jax.random.split(key, 5)
    in_w, in_b = _lin_init(ks[1], d_model, 3 * d_model)
    out_w, out_b = _lin_init(ks[2], d_model, d_model)
    l1_w, l1_b = _lin_init(ks[3], d_model, d_ffn)
    l2_w, l2_b = _lin_init(ks[4], d_ffn, d_model)
    ones = jnp.ones((d_model,), jnp.float32)
    zeros = jnp.zeros((d_model,), jnp.float32)
    return dict(cross_attn=init_msdeform(ks[0], d_model, n_heads, n_levels, n_points),
                self_attn=dict(in_proj_w=in_w, in_proj_b=in_b,
                               out_proj_w=out_w, out_proj_b=out_b),
                norm1_g=ones, norm1_b=zeros, norm2_g=ones, norm2_b=zeros,
                norm3_g=ones, norm3_b=zeros,
                linear1_w=l1_w, linear1_b=l1_b, linear2_w=l2_w, linear2_b=l2_b)


def init_params(key, cfg):
    d, ffn = cfg["d_model"], cfg["dim_feedforward"]
    nhead, L, P = cfg["nhead"], cfg["num_feature_levels"], cfg["n_points"]
    ks = jax.random.split(key, cfg["num_encoder_layers"] + cfg["num_decoder_layers"] + 2)
    enc = [init_encoder_layer(ks[i], d, ffn, nhead, L, P)
           for i in range(cfg["num_encoder_layers"])]
    dec = [init_decoder_layer(ks[cfg["num_encoder_layers"] + i], d, ffn, nhead, L, P)
           for i in range(cfg["num_decoder_layers"])]
    level_embed = jax.random.normal(ks[-2], (L, d), jnp.float32)
    rp_w, rp_b = _lin_init(ks[-1], d, 2)
    return dict(encoder_layers=enc, decoder_layers=dec, level_embed=level_embed,
                reference_points_w=rp_w, reference_points_b=rp_b)


# ---------------------------------- main ------------------------------------

if __name__ == "__main__":
    cfg = dict(d_model=32, nhead=4, num_encoder_layers=2, num_decoder_layers=2,
               dim_feedforward=64, num_feature_levels=2, n_points=2,
               num_queries=8, batch=2)

    key = jax.random.PRNGKey(0)
    kp, k1, k2, k3 = jax.random.split(key, 4)
    params = init_params(kp, cfg)

    B, C = cfg["batch"], cfg["d_model"]
    shapes = [(8, 8), (4, 4)]            # two feature levels
    srcs = [jax.random.normal(k1, (B, C, h, w), jnp.float32) for (h, w) in shapes]
    pos_embeds = [jax.random.normal(k2, (B, C, h, w), jnp.float32) for (h, w) in shapes]
    masks = [jnp.zeros((B, h, w), dtype=bool) for (h, w) in shapes]   # no padding
    query_embed = jax.random.normal(k3, (cfg["num_queries"], 2 * C), jnp.float32)

    fwd = jax.jit(lambda prm, s, m, pe, qe:
                  deformable_transformer_forward(prm, s, m, pe, qe, cfg))
    hs, init_ref, inter_ref, _, _ = fwd(params, srcs, masks, pos_embeds, query_embed)

    jax.block_until_ready(hs)
    jax.block_until_ready(init_ref)
    jax.block_until_ready(inter_ref)

    assert hs.shape == (B, cfg["num_queries"], C)
    assert init_ref.shape == (B, cfg["num_queries"], 2)
    assert inter_ref.shape == (B, cfg["num_queries"], 2)
    assert bool(jnp.all(jnp.isfinite(hs)))
    print("KERNEL_OK")
</pallas_src>

<mosaic_0001>
module attributes {stable_mosaic.version = 11 : i64} {
  func.func @_add_layernorm_kernel(%arg0: i32, %arg1: memref<16x32xf32, #tpu.memory_space<vmem>>, %arg2: memref<16x32xf32, #tpu.memory_space<vmem>>, %arg3: memref<1x32xf32, #tpu.memory_space<vmem>>, %arg4: memref<1x32xf32, #tpu.memory_space<vmem>>, %arg5: memref<16x32xf32, #tpu.memory_space<vmem>>) attributes {dimension_semantics = [#tpu.dimension_semantics<parallel>], iteration_bounds = array<i64: 1>, scalar_prefetch = 0 : i64, scratch_operands = 0 : i64, tpu.core_type = #tpu.core_type<tc>, window_params = [{transform_indices = @transform_0, window_bounds = array<i64: 16, 32>}, {transform_indices = @transform_1, window_bounds = array<i64: 16, 32>}, {pipeline_mode = #tpu.pipeline_mode<synchronous>, transform_indices = @transform_2, window_bounds = array<i64: 1, 32>}, {pipeline_mode = #tpu.pipeline_mode<synchronous>, transform_indices = @transform_3, window_bounds = array<i64: 1, 32>}, {transform_indices = @transform_4, window_bounds = array<i64: 16, 32>}]} {
    %c0 = arith.constant 0 : index
    %c0_0 = arith.constant 0 : index
    %0 = vector.load %arg1[%c0, %c0_0] : memref<16x32xf32, #tpu.memory_space<vmem>>, vector<16x32xf32>
    %c0_1 = arith.constant 0 : index
    %c0_2 = arith.constant 0 : index
    %1 = vector.load %arg2[%c0_1, %c0_2] : memref<16x32xf32, #tpu.memory_space<vmem>>, vector<16x32xf32>
    %2 = arith.addf %0, %1 : vector<16x32xf32>
    %cst = arith.constant dense<0.000000e+00> : vector<16xf32>
    %3 = vector.multi_reduction <add>, %2, %cst [1] : vector<16x32xf32> to vector<16xf32>
    %4 = vector.shape_cast %3 : vector<16xf32> to vector<16x1xf32>
    %cst_3 = arith.constant 3.200000e+01 : f32
    %5 = vector.broadcast %cst_3 : f32 to vector<16x1xf32>
    %6 = arith.divf %4, %5 : vector<16x1xf32>
    %7 = vector.broadcast %6 : vector<16x1xf32> to vector<16x32xf32>
    %8 = arith.subf %2, %7 : vector<16x32xf32>
    %9 = arith.mulf %8, %8 : vector<16x32xf32>
    %cst_4 = arith.constant dense<0.000000e+00> : vector<16xf32>
    %10 = vector.multi_reduction <add>, %9, %cst_4 [1] : vector<16x32xf32> to vector<16xf32>
    %11 = vector.shape_cast %10 : vector<16xf32> to vector<16x1xf32>
    %cst_5 = arith.constant 3.200000e+01 : f32
    %12 = vector.broadcast %cst_5 : f32 to vector<16x1xf32>
    %13 = arith.divf %11, %12 : vector<16x1xf32>
    %cst_6 = arith.constant 9.99999974E-6 : f32
    %14 = vector.broadcast %cst_6 : f32 to vector<16x1xf32>
    %15 = arith.addf %13, %14 : vector<16x1xf32>
    %16 = math.rsqrt %15 : vector<16x1xf32>
    %17 = vector.broadcast %16 : vector<16x1xf32> to vector<16x32xf32>
    %18 = arith.mulf %8, %17 : vector<16x32xf32>
    %c0_7 = arith.constant 0 : index
    %c0_8 = arith.constant 0 : index
    %19 = vector.load %arg3[%c0_7, %c0_8] : memref<1x32xf32, #tpu.memory_space<vmem>>, vector<1x32xf32>
    %20 = vector.broadcast %19 : vector<1x32xf32> to vector<16x32xf32>
    %21 = arith.mulf %18, %20 : vector<16x32xf32>
    %c0_9 = arith.constant 0 : index
    %c0_10 = arith.constant 0 : index
    %22 = vector.load %arg4[%c0_9, %c0_10] : memref<1x32xf32, #tpu.memory_space<vmem>>, vector<1x32xf32>
    %23 = vector.broadcast %22 : vector<1x32xf32> to vector<16x32xf32>
    %24 = arith.addf %21, %23 : vector<16x32xf32>
    %c0_11 = arith.constant 0 : index
    %c0_12 = arith.constant 0 : index
    %25 = vector.load %arg5[%c0_11, %c0_12] : memref<16x32xf32, #tpu.memory_space<vmem>>, vector<16x32xf32>
    tpu.vector_store %arg5[%c0_11, %c0_12], %24 {strides = array<i32>} : memref<16x32xf32, #tpu.memory_space<vmem>>, vector<16x32xf32>,
    return
  }
  func.func @transform_0(%arg0: i32) -> (i32, i32) {
    %c0_i32 = arith.constant 0 : i32
    %c0_i32_0 = arith.constant 0 : i32
    return %arg0, %c0_i32 : i32, i32
  }
  func.func @transform_1(%arg0: i32) -> (i32, i32) {
    %c0_i32 = arith.constant 0 : i32
    %c0_i32_0 = arith.constant 0 : i32
    return %arg0, %c0_i32 : i32, i32
  }
  func.func @transform_2(%arg0: i32) -> (i32, i32) {
    %c0_i32 = arith.constant 0 : i32
    %c0_i32_0 = arith.constant 0 : i32
    %c0_i32_1 = arith.constant 0 : i32
    return %c0_i32, %c0_i32_0 : i32, i32
  }
  func.func @transform_3(%arg0: i32) -> (i32, i32) {
    %c0_i32 = arith.constant 0 : i32
    %c0_i32_0 = arith.constant 0 : i32
    %c0_i32_1 = arith.constant 0 : i32
    return %c0_i32, %c0_i32_0 : i32, i32
  }
  func.func @transform_4(%arg0: i32) -> (i32, i32) {
    %c0_i32 = arith.constant 0 : i32
    %c0_i32_0 = arith.constant 0 : i32
    return %arg0, %c0_i32 : i32, i32
  }
}

module attributes {stable_mosaic.version = 11 : i64} {
  func.func @_self_attn_kernel(%arg0: i32, %arg1: i32, %arg2: memref<1x8x32xf32, #tpu.memory_space<vmem>>, %arg3: memref<1x8x32xf32, #tpu.memory_space<vmem>>, %arg4: memref<32x96xbf16, #tpu.memory_space<vmem>>, %arg5: memref<1x96xf32, #tpu.memory_space<vmem>>, %arg6: memref<32x32xbf16, #tpu.memory_space<vmem>>, %arg7: memref<1x32xf32, #tpu.memory_space<vmem>>, %arg8: memref<1x8x32xf32, #tpu.memory_space<vmem>>) attributes {dimension_semantics = [#tpu.dimension_semantics<parallel>, #tpu.dimension_semantics<parallel>], iteration_bounds = array<i64: 2, 1>, scalar_prefetch = 0 : i64, scratch_operands = 0 : i64, tpu.core_type = #tpu.core_type<tc>, window_params = [{transform_indices = @transform_0, window_bounds = array<i64: 1, 8, 32>}, {transform_indices = @transform_1, window_bounds = array<i64: 1, 8, 32>}, {pipeline_mode = #tpu.pipeline_mode<synchronous>, transform_indices = @transform_2, window_bounds = array<i64: 32, 96>}, {pipeline_mode = #tpu.pipeline_mode<synchronous>, transform_indices = @transform_3, window_bounds = array<i64: 1, 96>}, {pipeline_mode = #tpu.pipeline_mode<synchronous>, transform_indices = @transform_4, window_bounds = array<i64: 32, 32>}, {pipeline_mode = #tpu.pipeline_mode<synchronous>, transform_indices = @transform_5, window_bounds = array<i64: 1, 32>}, {transform_indices = @transform_6, window_bounds = array<i64: 1, 8, 32>}]} {
    %c0 = arith.constant 0 : index
    %c0_0 = arith.constant 0 : index
    %c0_1 = arith.constant 0 : index
    %0 = vector.load %arg2[%c0, %c0_0, %c0_1] : memref<1x8x32xf32, #tpu.memory_space<vmem>>, vector<1x8x32xf32>
    %1 = vector.shape_cast %0 : vector<1x8x32xf32> to vector<8x32xf32>
    %c0_2 = arith.constant 0 : index
    %c0_3 = arith.constant 0 : index
    %c0_4 = arith.constant 0 : index
    %2 = vector.load %arg3[%c0_2, %c0_3, %c0_4] : memref<1x8x32xf32, #tpu.memory_space<vmem>>, vector<1x8x32xf32>
    %3 = vector.shape_cast %2 : vector<1x8x32xf32> to vector<8x32xf32>
    %4 = arith.addf %1, %3 : vector<8x32xf32>
    %c0_5 = arith.constant 0 : index
    %c0_6 = arith.constant 0 : index
    %5 = vector.load %arg4[%c0_5, %c0_6] : memref<32x96xbf16, #tpu.memory_space<vmem>>, vector<32x96xbf16>
    %c0_7 = arith.constant 0 : index
    %c0_8 = arith.constant 0 : index
    %6 = vector.load %arg5[%c0_7, %c0_8] : memref<1x96xf32, #tpu.memory_space<vmem>>, vector<1x96xf32>
    %7 = arith.truncf %4 : vector<8x32xf32> to vector<8x32xbf16>
    %8 = vector.extract_strided_slice %5 {offsets = [0, 0], sizes = [32, 64], strides = [1, 1]} : vector<32x96xbf16> to vector<32x64xbf16>
    %cst = arith.constant dense<0.000000e+00> : vector<8x64xf32>
    %9 = tpu.matmul %7, %8, %cst {dimension_numbers = #tpu.dot_dimension_numbers<[1], [0], [0], [1], [0, 0, 1, 1], [], []>} : vector<8x32xbf16>, vector<32x64xbf16>, vector<8x64xf32> -> vector<8x64xf32>
    %10 = vector.extract_strided_slice %6 {offsets = [0, 0], sizes = [1, 64], strides = [1, 1]} : vector<1x96xf32> to vector<1x64xf32>
    %11 = vector.broadcast %10 : vector<1x64xf32> to vector<8x64xf32>
    %12 = arith.addf %9, %11 : vector<8x64xf32>
    %13 = vector.extract_strided_slice %12 {offsets = [0, 0], sizes = [8, 32], strides = [1, 1]} : vector<8x64xf32> to vector<8x32xf32>
    %14 = vector.extract_strided_slice %12 {offsets = [0, 32], sizes = [8, 32], strides = [1, 1]} : vector<8x64xf32> to vector<8x32xf32>
    %15 = arith.truncf %1 : vector<8x32xf32> to vector<8x32xbf16>
    %16 = vector.extract_strided_slice %5 {offsets = [0, 64], sizes = [32, 32], strides = [1, 1]} : vector<32x96xbf16> to vector<32x32xbf16>
    %cst_9 = arith.constant dense<0.000000e+00> : vector<8x32xf32>
    %17 = tpu.matmul %15, %16, %cst_9 {dimension_numbers = #tpu.dot_dimension_numbers<[1], [0], [0], [1], [0, 0, 1, 1], [], []>} : vector<8x32xbf16>, vector<32x32xbf16>, vector<8x32xf32> -> vector<8x32xf32>
    %18 = vector.extract_strided_slice %6 {offsets = [0, 64], sizes = [1, 32], strides = [1, 1]} : vector<1x96xf32> to vector<1x32xf32>
    %19 = vector.broadcast %18 : vector<1x32xf32> to vector<8x32xf32>
    %20 = arith.addf %17, %19 : vector<8x32xf32>
    %21 = vector.extract_strided_slice %13 {offsets = [0, 0], sizes = [8, 8], strides = [1, 1]} : vector<8x32xf32> to vector<8x8xf32>
    %cst_10 = arith.constant 0.353553385 : f32
    %22 = vector.broadcast %cst_10 : f32 to vector<8x8xf32>
    %23 = arith.mulf %21, %22 : vector<8x8xf32>
    %24 = vector.extract_strided_slice %14 {offsets = [0, 0], sizes = [8, 8], strides = [1, 1]} : vector<8x32xf32> to vector<8x8xf32>
    %25 = vector.extract_strided_slice %20 {offsets = [0, 0], sizes = [8, 8], strides = [1, 1]} : vector<8x32xf32> to vector<8x8xf32>
    %26 = arith.truncf %23 : vector<8x8xf32> to vector<8x8xbf16>
    %27 = arith.truncf %24 : vector<8x8xf32> to vector<8x8xbf16>
    %cst_11 = arith.constant dense<0.000000e+00> : vector<8x8xf32>
    %28 = tpu.matmul %26, %27, %cst_11 {dimension_numbers = #tpu.dot_dimension_numbers<[1], [1], [0], [0], [0, 0, 1, 0], [], []>} : vector<8x8xbf16>, vector<8x8xbf16>, vector<8x8xf32> -> vector<8x8xf32>
    %cst_12 = arith.constant dense<0xFF800000> : vector<8xf32>
    %29 = vector.multi_reduction <maximumf>, %28, %cst_12 [1] : vector<8x8xf32> to vector<8xf32>
    %30 = vector.shape_cast %29 : vector<8xf32> to vector<8x1xf32>
    %31 = vector.broadcast %30 : vector<8x1xf32> to vector<8x8xf32>
    %32 = arith.subf %28, %31 : vector<8x8xf32>
    %33 = math.exp %32 : vector<8x8xf32>
    %cst_13 = arith.constant dense<0.000000e+00> : vector<8xf32>
    %34 = vector.multi_reduction <add>, %33, %cst_13 [1] : vector<8x8xf32> to vector<8xf32>
    %35 = vector.shape_cast %34 : vector<8xf32> to vector<8x1xf32>
    %36 = tpu.reciprocal %35 {approx = true} : vector<8x1xf32> -> vector<8x1xf32>
    %37 = vector.broadcast %36 : vector<8x1xf32> to vector<8x8xf32>
    %38 = arith.mulf %33, %37 : vector<8x8xf32>
    %39 = arith.truncf %38 : vector<8x8xf32> to vector<8x8xbf16>
    %40 = arith.truncf %25 : vector<8x8xf32> to vector<8x8xbf16>
    %cst_14 = arith.constant dense<0.000000e+00> : vector<8x8xf32>
    %41 = tpu.matmul %39, %40, %cst_14 {dimension_numbers = #tpu.dot_dimension_numbers<[1], [0], [0], [1], [0, 0, 1, 1], [], []>} : vector<8x8xbf16>, vector<8x8xbf16>, vector<8x8xf32> -> vector<8x8xf32>
    %42 = vector.extract_strided_slice %13 {offsets = [0, 8], sizes = [8, 8], strides = [1, 1]} : vector<8x32xf32> to vector<8x8xf32>
    %cst_15 = arith.constant 0.353553385 : f32
    %43 = vector.broadcast %cst_15 : f32 to vector<8x8xf32>
    %44 = arith.mulf %42, %43 : vector<8x8xf32>
    %45 = vector.extract_strided_slice %14 {offsets = [0, 8], sizes = [8, 8], strides = [1, 1]} : vector<8x32xf32> to vector<8x8xf32>
    %46 = vector.extract_strided_slice %20 {offsets = [0, 8], sizes = [8, 8], strides = [1, 1]} : vector<8x32xf32> to vector<8x8xf32>
    %47 = arith.truncf %44 : vector<8x8xf32> to vector<8x8xbf16>
    %48 = arith.truncf %45 : vector<8x8xf32> to vector<8x8xbf16>
    %cst_16 = arith.constant dense<0.000000e+00> : vector<8x8xf32>
    %49 = tpu.matmul %47, %48, %cst_16 {dimension_numbers = #tpu.dot_dimension_numbers<[1], [1], [0], [0], [0, 0, 1, 0], [], []>} : vector<8x8xbf16>, vector<8x8xbf16>, vector<8x8xf32> -> vector<8x8xf32>
    %cst_17 = arith.constant dense<0xFF800000> : vector<8xf32>
    %50 = vector.multi_reduction <maximumf>, %49, %cst_17 [1] : vector<8x8xf32> to vector<8xf32>
    %51 = vector.shape_cast %50 : vector<8xf32> to vector<8x1xf32>
    %52 = vector.broadcast %51 : vector<8x1xf32> to vector<8x8xf32>
    %53 = arith.subf %49, %52 : vector<8x8xf32>
    %54 = math.exp %53 : vector<8x8xf32>
    %cst_18 = arith.constant dense<0.000000e+00> : vector<8xf32>
    %55 = vector.multi_reduction <add>, %54, %cst_18 [1] : vector<8x8xf32> to vector<8xf32>
    %56 = vector.shape_cast %55 : vector<8xf32> to vector<8x1xf32>
    %57 = tpu.reciprocal %56 {approx = true} : vector<8x1xf32> -> vector<8x1xf32>
    %58 = vector.broadcast %57 : vector<8x1xf32> to vector<8x8xf32>
    %59 = arith.mulf %54, %58 : vector<8x8xf32>
    %60 = arith.truncf %59 : vector<8x8xf32> to vector<8x8xbf16>
    %61 = arith.truncf %46 : vector<8x8xf32> to vector<8x8xbf16>
    %cst_19 = arith.constant dense<0.000000e+00> : vector<8x8xf32>
    %62 = tpu.matmul %60, %61, %cst_19 {dimension_numbers = #tpu.dot_dimension_numbers<[1], [0], [0], [1], [0, 0, 1, 1], [], []>} : vector<8x8xbf16>, vector<8x8xbf16>, vector<8x8xf32> -> vector<8x8xf32>
    %63 = vector.extract_strided_slice %13 {offsets = [0, 16], sizes = [8, 8], strides = [1, 1]} : vector<8x32xf32> to vector<8x8xf32>
    %cst_20 = arith.constant 0.353553385 : f32
    %64 = vector.broadcast %cst_20 : f32 to vector<8x8xf32>
    %65 = arith.mulf %63, %64 : vector<8x8xf32>
    %66 = vector.extract_strided_slice %14 {offsets = [0, 16], sizes = [8, 8], strides = [1, 1]} : vector<8x32xf32> to vector<8x8xf32>
    %67 = vector.extract_strided_slice %20 {offsets = [0, 16], sizes = [8, 8], strides = [1, 1]} : vector<8x32xf32> to vector<8x8xf32>
    %68 = arith.truncf %65 : vector<8x8xf32> to vector<8x8xbf16>
    %69 = arith.truncf %66 : vector<8x8xf32> to vector<8x8xbf16>
    %cst_21 = arith.constant dense<0.000000e+00> : vector<8x8xf32>
    %70 = tpu.matmul %68, %69, %cst_21 {dimension_numbers = #tpu.dot_dimension_numbers<[1], [1], [0], [0], [0, 0, 1, 0], [], []>} : vector<8x8xbf16>, vector<8x8xbf16>, vector<8x8xf32> -> vector<8x8xf32>
    %cst_22 = arith.constant dense<0xFF800000> : vector<8xf32>
    %71 = vector.multi_reduction <maximumf>, %70, %cst_22 [1] : vector<8x8xf32> to vector<8xf32>
    %72 = vector.shape_cast %71 : vector<8xf32> to vector<8x1xf32>
    %73 = vector.broadcast %72 : vector<8x1xf32> to vector<8x8xf32>
    %74 = arith.subf %70, %73 : vector<8x8xf32>
    %75 = math.exp %74 : vector<8x8xf32>
    %cst_23 = arith.constant dense<0.000000e+00> : vector<8xf32>
    %76 = vector.multi_reduction <add>, %75, %cst_23 [1] : vector<8x8xf32> to vector<8xf32>
    %77 = vector.shape_cast %76 : vector<8xf32> to vector<8x1xf32>
    %78 = tpu.reciprocal %77 {approx = true} : vector<8x1xf32> -> vector<8x1xf32>
    %79 = vector.broadcast %78 : vector<8x1xf32> to vector<8x8xf32>
    %80 = arith.mulf %75, %79 : vector<8x8xf32>
    %81 = arith.truncf %80 : vector<8x8xf32> to vector<8x8xbf16>
    %82 = arith.truncf %67 : vector<8x8xf32> to vector<8x8xbf16>
    %cst_24 = arith.constant dense<0.000000e+00> : vector<8x8xf32>
    %83 = tpu.matmul %81, %82, %cst_24 {dimension_numbers = #tpu.dot_dimension_numbers<[1], [0], [0], [1], [0, 0, 1, 1], [], []>} : vector<8x8xbf16>, vector<8x8xbf16>, vector<8x8xf32> -> vector<8x8xf32>
    %84 = vector.extract_strided_slice %13 {offsets = [0, 24], sizes = [8, 8], strides = [1, 1]} : vector<8x32xf32> to vector<8x8xf32>
    %cst_25 = arith.constant 0.353553385 : f32
    %85 = vector.broadcast %cst_25 : f32 to vector<8x8xf32>
    %86 = arith.mulf %84, %85 : vector<8x8xf32>
    %87 = vector.extract_strided_slice %14 {offsets = [0, 24], sizes = [8, 8], strides = [1, 1]} : vector<8x32xf32> to vector<8x8xf32>
    %88 = vector.extract_strided_slice %20 {offsets = [0, 24], sizes = [8, 8], strides = [1, 1]} : vector<8x32xf32> to vector<8x8xf32>
    %89 = arith.truncf %86 : vector<8x8xf32> to vector<8x8xbf16>
    %90 = arith.truncf %87 : vector<8x8xf32> to vector<8x8xbf16>
    %cst_26 = arith.constant dense<0.000000e+00> : vector<8x8xf32>
    %91 = tpu.matmul %89, %90, %cst_26 {dimension_numbers = #tpu.dot_dimension_numbers<[1], [1], [0], [0], [0, 0, 1, 0], [], []>} : vector<8x8xbf16>, vector<8x8xbf16>, vector<8x8xf32> -> vector<8x8xf32>
    %cst_27 = arith.constant dense<0xFF800000> : vector<8xf32>
    %92 = vector.multi_reduction <maximumf>, %91, %cst_27 [1] : vector<8x8xf32> to vector<8xf32>
    %93 = vector.shape_cast %92 : vector<8xf32> to vector<8x1xf32>
    %94 = vector.broadcast %93 : vector<8x1xf32> to vector<8x8xf32>
    %95 = arith.subf %91, %94 : vector<8x8xf32>
    %96 = math.exp %95 : vector<8x8xf32>
    %cst_28 = arith.constant dense<0.000000e+00> : vector<8xf32>
    %97 = vector.multi_reduction <add>, %96, %cst_28 [1] : vector<8x8xf32> to vector<8xf32>
    %98 = vector.shape_cast %97 : vector<8xf32> to vector<8x1xf32>
    %99 = tpu.reciprocal %98 {approx = true} : vector<8x1xf32> -> vector<8x1xf32>
    %100 = vector.broadcast %99 : vector<8x1xf32> to vector<8x8xf32>
    %101 = arith.mulf %96, %100 : vector<8x8xf32>
    %102 = arith.truncf %101 : vector<8x8xf32> to vector<8x8xbf16>
    %103 = arith.truncf %88 : vector<8x8xf32> to vector<8x8xbf16>
    %cst_29 = arith.constant dense<0.000000e+00> : vector<8x8xf32>
    %104 = tpu.matmul %102, %103, %cst_29 {dimension_numbers = #tpu.dot_dimension_numbers<[1], [0], [0], [1], [0, 0, 1, 1], [], []>} : vector<8x8xbf16>, vector<8x8xbf16>, vector<8x8xf32> -> vector<8x8xf32>
    %105 = tpu.concatenate %41, %62, %83, %104 in 1 : vector<8x8xf32>, vector<8x8xf32>, vector<8x8xf32>, vector<8x8xf32> -> vector<8x32xf32>
    %106 = arith.truncf %105 : vector<8x32xf32> to vector<8x32xbf16>
    %c0_30 = arith.constant 0 : index
    %c0_31 = arith.constant 0 : index
    %107 = vector.load %arg6[%c0_30, %c0_31] : memref<32x32xbf16, #tpu.memory_space<vmem>>, vector<32x32xbf16>
    %cst_32 = arith.constant dense<0.000000e+00> : vector<8x32xf32>
    %108 = tpu.matmul %106, %107, %cst_32 {dimension_numbers = #tpu.dot_dimension_numbers<[1], [0], [0], [1], [0, 0, 1, 1], [], []>} : vector<8x32xbf16>, vector<32x32xbf16>, vector<8x32xf32> -> vector<8x32xf32>
    %c0_33 = arith.constant 0 : index
    %c0_34 = arith.constant 0 : index
    %109 = vector.load %arg7[%c0_33, %c0_34] : memref<1x32xf32, #tpu.memory_space<vmem>>, vector<1x32xf32>
    %110 = vector.broadcast %109 : vector<1x32xf32> to vector<8x32xf32>
    %111 = arith.addf %108, %110 : vector<8x32xf32>
    %c0_35 = arith.constant 0 : index
    %c0_36 = arith.constant 0 : index
    %c0_37 = arith.constant 0 : index
    %112 = vector.load %arg8[%c0_35, %c0_36, %c0_37] : memref<1x8x32xf32, #tpu.memory_space<vmem>>, vector<1x8x32xf32>
    %113 = vector.shape_cast %112 : vector<1x8x32xf32> to vector<8x32xf32>
    %114 = vector.shape_cast %111 : vector<8x32xf32> to vector<1x8x32xf32>
    tpu.vector_store %arg8[%c0_35, %c0_36, %c0_37], %114 {strides = array<i32>} : memref<1x8x32xf32, #tpu.memory_space<vmem>>, vector<1x8x32xf32>,
    return
  }
  func.func @transform_0(%arg0: i32, %arg1: i32) -> (i32, i32, i32) {
    %c0_i32 = arith.constant 0 : i32
    %c0_i32_0 = arith.constant 0 : i32
    %c0_i32_1 = arith.constant 0 : i32
    return %arg0, %c0_i32, %c0_i32_0 : i32, i32, i32
  }
  func.func @transform_1(%arg0: i32, %arg1: i32) -> (i32, i32, i32) {
    %c0_i32 = arith.constant 0 : i32
    %c0_i32_0 = arith.constant 0 : i32
    %c0_i32_1 = arith.constant 0 : i32
    return %arg0, %c0_i32, %c0_i32_0 : i32, i32, i32
  }
  func.func @transform_2(%arg0: i32, %arg1: i32) -> (i32, i32) {
    %c0_i32 = arith.constant 0 : i32
    %c0_i32_0 = arith.constant 0 : i32
    %c0_i32_1 = arith.constant 0 : i32
    return %c0_i32, %c0_i32_0 : i32, i32
  }
  func.func @transform_3(%arg0: i32, %arg1: i32) -> (i32, i32) {
    %c0_i32 = arith.constant 0 : i32
    %c0_i32_0 = arith.constant 0 : i32
    %c0_i32_1 = arith.constant 0 : i32
    return %c0_i32, %c0_i32_0 : i32, i32
  }
  func.func @transform_4(%arg0: i32, %arg1: i32) -> (i32, i32) {
    %c0_i32 = arith.constant 0 : i32
    %c0_i32_0 = arith.constant 0 : i32
    %c0_i32_1 = arith.constant 0 : i32
    return %c0_i32, %c0_i32_0 : i32, i32
  }
  func.func @transform_5(%arg0: i32, %arg1: i32) -> (i32, i32) {
    %c0_i32 = arith.constant 0 : i32
    %c0_i32_0 = arith.constant 0 : i32
    %c0_i32_1 = arith.constant 0 : i32
    return %c0_i32, %c0_i32_0 : i32, i32
  }
  func.func @transform_6(%arg0: i32, %arg1: i32) -> (i32, i32, i32) {
    %c0_i32 = arith.constant 0 : i32
    %c0_i32_0 = arith.constant 0 : i32
    return %arg0, %arg1, %c0_i32 : i32, i32, i32
  }
}

module attributes {stable_mosaic.version = 11 : i64} {
  func.func @_linear_kernel(%arg0: i32, %arg1: memref<160x32xf32, #tpu.memory_space<vmem>>, %arg2: memref<160x1xf32, #tpu.memory_space<vmem>>, %arg3: memref<32x32xbf16, #tpu.memory_space<vmem>>, %arg4: memref<1x32xf32, #tpu.memory_space<vmem>>, %arg5: memref<160x32xf32, #tpu.memory_space<vmem>>) attributes {dimension_semantics = [#tpu.dimension_semantics<parallel>], iteration_bounds = array<i64: 1>, scalar_prefetch = 0 : i64, scratch_operands = 0 : i64, tpu.core_type = #tpu.core_type<tc>, window_params = [{transform_indices = @transform_0, window_bounds = array<i64: 160, 32>}, {transform_indices = @transform_1, window_bounds = array<i64: 160, 1>}, {pipeline_mode = #tpu.pipeline_mode<synchronous>, transform_indices = @transform_2, window_bounds = array<i64: 32, 32>}, {pipeline_mode = #tpu.pipeline_mode<synchronous>, transform_indices = @transform_3, window_bounds = array<i64: 1, 32>}, {transform_indices = @transform_4, window_bounds = array<i64: 160, 32>}]} {
    %c0 = arith.constant 0 : index
    %c0_0 = arith.constant 0 : index
    %0 = vector.load %arg1[%c0, %c0_0] : memref<160x32xf32, #tpu.memory_space<vmem>>, vector<160x32xf32>
    %1 = arith.truncf %0 : vector<160x32xf32> to vector<160x32xbf16>
    %c0_1 = arith.constant 0 : index
    %c0_2 = arith.constant 0 : index
    %2 = vector.load %arg3[%c0_1, %c0_2] : memref<32x32xbf16, #tpu.memory_space<vmem>>, vector<32x32xbf16>
    %cst = arith.constant dense<0.000000e+00> : vector<160x32xf32>
    %3 = tpu.matmul %1, %2, %cst {dimension_numbers = #tpu.dot_dimension_numbers<[1], [0], [0], [1], [0, 0, 1, 1], [], []>} : vector<160x32xbf16>, vector<32x32xbf16>, vector<160x32xf32> -> vector<160x32xf32>
    %c0_3 = arith.constant 0 : index
    %c0_4 = arith.constant 0 : index
    %4 = vector.load %arg4[%c0_3, %c0_4] : memref<1x32xf32, #tpu.memory_space<vmem>>, vector<1x32xf32>
    %5 = vector.broadcast %4 : vector<1x32xf32> to vector<160x32xf32>
    %6 = arith.addf %3, %5 : vector<160x32xf32>
    %c0_5 = arith.constant 0 : index
    %c0_6 = arith.constant 0 : index
    %7 = vector.load %arg2[%c0_5, %c0_6] : memref<160x1xf32, #tpu.memory_space<vmem>>, vector<160x1xf32>
    %8 = vector.broadcast %7 : vector<160x1xf32> to vector<160x32xf32>
    %9 = arith.mulf %6, %8 : vector<160x32xf32>
    %c0_7 = arith.constant 0 : index
    %c0_8 = arith.constant 0 : index
    %10 = vector.load %arg5[%c0_7, %c0_8] : memref<160x32xf32, #tpu.memory_space<vmem>>, vector<160x32xf32>
    tpu.vector_store %arg5[%c0_7, %c0_8], %9 {strides = array<i32>} : memref<160x32xf32, #tpu.memory_space<vmem>>, vector<160x32xf32>,
    return
  }
  func.func @transform_0(%arg0: i32) -> (i32, i32) {
    %c0_i32 = arith.constant 0 : i32
    %c0_i32_0 = arith.constant 0 : i32
    return %arg0, %c0_i32 : i32, i32
  }
  func.func @transform_1(%arg0: i32) -> (i32, i32) {
    %c0_i32 = arith.constant 0 : i32
    %c0_i32_0 = arith.constant 0 : i32
    return %arg0, %c0_i32 : i32, i32
  }
  func.func @transform_2(%arg0: i32) -> (i32, i32) {
    %c0_i32 = arith.constant 0 : i32
    %c0_i32_0 = arith.constant 0 : i32
    %c0_i32_1 = arith.constant 0 : i32
    return %c0_i32, %c0_i32_0 : i32, i32
  }
  func.func @transform_3(%arg0: i32) -> (i32, i32) {
    %c0_i32 = arith.constant 0 : i32
    %c0_i32_0 = arith.constant 0 : i32
    %c0_i32_1 = arith.constant 0 : i32
    return %c0_i32, %c0_i32_0 : i32, i32
  }
  func.func @transform_4(%arg0: i32) -> (i32, i32) {
    %c0_i32 = arith.constant 0 : i32
    %c0_i32_0 = arith.constant 0 : i32
    return %arg0, %c0_i32 : i32, i32
  }
}

module attributes {stable_mosaic.version = 11 : i64} {
  func.func @_off_attn_kernel(%arg0: i32, %arg1: memref<160x32xf32, #tpu.memory_space<vmem>>, %arg2: memref<160x32xf32, #tpu.memory_space<vmem>>, %arg3: memref<32x32xbf16, #tpu.memory_space<vmem>>, %arg4: memref<1x32xf32, #tpu.memory_space<vmem>>, %arg5: memref<32x16xbf16, #tpu.memory_space<vmem>>, %arg6: memref<1x16xf32, #tpu.memory_space<vmem>>, %arg7: memref<160x32xf32, #tpu.memory_space<vmem>>, %arg8: memref<160x16xf32, #tpu.memory_space<vmem>>) attributes {dimension_semantics = [#tpu.dimension_semantics<parallel>], iteration_bounds = array<i64: 1>, scalar_prefetch = 0 : i64, scratch_operands = 0 : i64, tpu.core_type = #tpu.core_type<tc>, window_params = [{transform_indices = @transform_0, window_bounds = array<i64: 160, 32>}, {transform_indices = @transform_1, window_bounds = array<i64: 160, 32>}, {pipeline_mode = #tpu.pipeline_mode<synchronous>, transform_indices = @transform_2, window_bounds = array<i64: 32, 32>}, {pipeline_mode = #tpu.pipeline_mode<synchronous>, transform_indices = @transform_3, window_bounds = array<i64: 1, 32>}, {pipeline_mode = #tpu.pipeline_mode<synchronous>, transform_indices = @transform_4, window_bounds = array<i64: 32, 16>}, {pipeline_mode = #tpu.pipeline_mode<synchronous>, transform_indices = @transform_5, window_bounds = array<i64: 1, 16>}, {transform_indices = @transform_6, window_bounds = array<i64: 160, 32>}, {transform_indices = @transform_7, window_bounds = array<i64: 160, 16>}]} {
    %c0 = arith.constant 0 : index
    %c0_0 = arith.constant 0 : index
    %0 = vector.load %arg1[%c0, %c0_0] : memref<160x32xf32, #tpu.memory_space<vmem>>, vector<160x32xf32>
    %c0_1 = arith.constant 0 : index
    %c0_2 = arith.constant 0 : index
    %1 = vector.load %arg2[%c0_1, %c0_2] : memref<160x32xf32, #tpu.memory_space<vmem>>, vector<160x32xf32>
    %2 = arith.addf %0, %1 : vector<160x32xf32>
    %3 = arith.truncf %2 : vector<160x32xf32> to vector<160x32xbf16>
    %c0_3 = arith.constant 0 : index
    %c0_4 = arith.constant 0 : index
    %4 = vector.load %arg3[%c0_3, %c0_4] : memref<32x32xbf16, #tpu.memory_space<vmem>>, vector<32x32xbf16>
    %cst = arith.constant dense<0.000000e+00> : vector<160x32xf32>
    %5 = tpu.matmul %3, %4, %cst {dimension_numbers = #tpu.dot_dimension_numbers<[1], [0], [0], [1], [0, 0, 1, 1], [], []>} : vector<160x32xbf16>, vector<32x32xbf16>, vector<160x32xf32> -> vector<160x32xf32>
    %c0_5 = arith.constant 0 : index
    %c0_6 = arith.constant 0 : index
    %6 = vector.load %arg4[%c0_5, %c0_6] : memref<1x32xf32, #tpu.memory_space<vmem>>, vector<1x32xf32>
    %7 = vector.broadcast %6 : vector<1x32xf32> to vector<160x32xf32>
    %8 = arith.addf %5, %7 : vector<160x32xf32>
    %c0_7 = arith.constant 0 : index
    %c0_8 = arith.constant 0 : index
    %9 = vector.load %arg5[%c0_7, %c0_8] : memref<32x16xbf16, #tpu.memory_space<vmem>>, vector<32x16xbf16>
    %cst_9 = arith.constant dense<0.000000e+00> : vector<160x16xf32>
    %10 = tpu.matmul %3, %9, %cst_9 {dimension_numbers = #tpu.dot_dimension_numbers<[1], [0], [0], [1], [0, 0, 1, 1], [], []>} : vector<160x32xbf16>, vector<32x16xbf16>, vector<160x16xf32> -> vector<160x16xf32>
    %c0_10 = arith.constant 0 : index
    %c0_11 = arith.constant 0 : index
    %11 = vector.load %arg6[%c0_10, %c0_11] : memref<1x16xf32, #tpu.memory_space<vmem>>, vector<1x16xf32>
    %12 = vector.broadcast %11 : vector<1x16xf32> to vector<160x16xf32>
    %13 = arith.addf %10, %12 : vector<160x16xf32>
    %14 = vector.extract_strided_slice %13 {offsets = [0, 0], sizes = [160, 4], strides = [1, 1]} : vector<160x16xf32> to vector<160x4xf32>
    %cst_12 = arith.constant dense<0xFF800000> : vector<160xf32>
    %15 = vector.multi_reduction <maximumf>, %14, %cst_12 [1] : vector<160x4xf32> to vector<160xf32>
    %16 = vector.shape_cast %15 : vector<160xf32> to vector<160x1xf32>
    %17 = vector.broadcast %16 : vector<160x1xf32> to vector<160x4xf32>
    %18 = arith.subf %14, %17 : vector<160x4xf32>
    %19 = math.exp %18 : vector<160x4xf32>
    %cst_13 = arith.constant dense<0.000000e+00> : vector<160xf32>
    %20 = vector.multi_reduction <add>, %19, %cst_13 [1] : vector<160x4xf32> to vector<160xf32>
    %21 = vector.shape_cast %20 : vector<160xf32> to vector<160x1xf32>
    %22 = tpu.reciprocal %21 {approx = true} : vector<160x1xf32> -> vector<160x1xf32>
    %23 = vector.broadcast %22 : vector<160x1xf32> to vector<160x4xf32>
    %24 = arith.mulf %19, %23 : vector<160x4xf32>
    %25 = vector.extract_strided_slice %13 {offsets = [0, 4], sizes = [160, 4], strides = [1, 1]} : vector<160x16xf32> to vector<160x4xf32>
    %cst_14 = arith.constant dense<0xFF800000> : vector<160xf32>
    %26 = vector.multi_reduction <maximumf>, %25, %cst_14 [1] : vector<160x4xf32> to vector<160xf32>
    %27 = vector.shape_cast %26 : vector<160xf32> to vector<160x1xf32>
    %28 = vector.broadcast %27 : vector<160x1xf32> to vector<160x4xf32>
    %29 = arith.subf %25, %28 : vector<160x4xf32>
    %30 = math.exp %29 : vector<160x4xf32>
    %cst_15 = arith.constant dense<0.000000e+00> : vector<160xf32>
    %31 = vector.multi_reduction <add>, %30, %cst_15 [1] : vector<160x4xf32> to vector<160xf32>
    %32 = vector.shape_cast %31 : vector<160xf32> to vector<160x1xf32>
    %33 = tpu.reciprocal %32 {approx = true} : vector<160x1xf32> -> vector<160x1xf32>
    %34 = vector.broadcast %33 : vector<160x1xf32> to vector<160x4xf32>
    %35 = arith.mulf %30, %34 : vector<160x4xf32>
    %36 = vector.extract_strided_slice %13 {offsets = [0, 8], sizes = [160, 4], strides = [1, 1]} : vector<160x16xf32> to vector<160x4xf32>
    %cst_16 = arith.constant dense<0xFF800000> : vector<160xf32>
    %37 = vector.multi_reduction <maximumf>, %36, %cst_16 [1] : vector<160x4xf32> to vector<160xf32>
    %38 = vector.shape_cast %37 : vector<160xf32> to vector<160x1xf32>
    %39 = vector.broadcast %38 : vector<160x1xf32> to vector<160x4xf32>
    %40 = arith.subf %36, %39 : vector<160x4xf32>
    %41 = math.exp %40 : vector<160x4xf32>
    %cst_17 = arith.constant dense<0.000000e+00> : vector<160xf32>
    %42 = vector.multi_reduction <add>, %41, %cst_17 [1] : vector<160x4xf32> to vector<160xf32>
    %43 = vector.shape_cast %42 : vector<160xf32> to vector<160x1xf32>
    %44 = tpu.reciprocal %43 {approx = true} : vector<160x1xf32> -> vector<160x1xf32>
    %45 = vector.broadcast %44 : vector<160x1xf32> to vector<160x4xf32>
    %46 = arith.mulf %41, %45 : vector<160x4xf32>
    %47 = vector.extract_strided_slice %13 {offsets = [0, 12], sizes = [160, 4], strides = [1, 1]} : vector<160x16xf32> to vector<160x4xf32>
    %cst_18 = arith.constant dense<0xFF800000> : vector<160xf32>
    %48 = vector.multi_reduction <maximumf>, %47, %cst_18 [1] : vector<160x4xf32> to vector<160xf32>
    %49 = vector.shape_cast %48 : vector<160xf32> to vector<160x1xf32>
    %50 = vector.broadcast %49 : vector<160x1xf32> to vector<160x4xf32>
    %51 = arith.subf %47, %50 : vector<160x4xf32>
    %52 = math.exp %51 : vector<160x4xf32>
    %cst_19 = arith.constant dense<0.000000e+00> : vector<160xf32>
    %53 = vector.multi_reduction <add>, %52, %cst_19 [1] : vector<160x4xf32> to vector<160xf32>
    %54 = vector.shape_cast %53 : vector<160xf32> to vector<160x1xf32>
    %55 = tpu.reciprocal %54 {approx = true} : vector<160x1xf32> -> vector<160x1xf32>
    %56 = vector.broadcast %55 : vector<160x1xf32> to vector<160x4xf32>
    %57 = arith.mulf %52, %56 : vector<160x4xf32>
    %58 = tpu.concatenate %24, %35, %46, %57 in 1 : vector<160x4xf32>, vector<160x4xf32>, vector<160x4xf32>, vector<160x4xf32> -> vector<160x16xf32>
    %c0_20 = arith.constant 0 : index
    %c0_21 = arith.constant 0 : index
    %59 = vector.load %arg8[%c0_20, %c0_21] : memref<160x16xf32, #tpu.memory_space<vmem>>, vector<160x16xf32>
    tpu.vector_store %arg8[%c0_20, %c0_21], %58 {strides = array<i32>} : memref<160x16xf32, #tpu.memory_space<vmem>>, vector<160x16xf32>,
    %c0_22 = arith.constant 0 : index
    %c0_23 = arith.constant 0 : index
    %60 = vector.load %arg7[%c0_22, %c0_23] : memref<160x32xf32, #tpu.memory_space<vmem>>, vector<160x32xf32>
    tpu.vector_store %arg7[%c0_22, %c0_23], %8 {strides = array<i32>} : memref<160x32xf32, #tpu.memory_space<vmem>>, vector<160x32xf32>,
    return
  }
  func.func @transform_0(%arg0: i32) -> (i32, i32) {
    %c0_i32 = arith.constant 0 : i32
    %c0_i32_0 = arith.constant 0 : i32
    return %arg0, %c0_i32 : i32, i32
  }
  func.func @transform_1(%arg0: i32) -> (i32, i32) {
    %c0_i32 = arith.constant 0 : i32
    %c0_i32_0 = arith.constant 0 : i32
    return %arg0, %c0_i32 : i32, i32
  }
  func.func @transform_2(%arg0: i32) -> (i32, i32) {
    %c0_i32 = arith.constant 0 : i32
    %c0_i32_0 = arith.constant 0 : i32
    %c0_i32_1 = arith.constant 0 : i32
    return %c0_i32, %c0_i32_0 : i32, i32
  }
  func.func @transform_3(%arg0: i32) -> (i32, i32) {
    %c0_i32 = arith.constant 0 : i32
    %c0_i32_0 = arith.constant 0 : i32
    %c0_i32_1 = arith.constant 0 : i32
    return %c0_i32, %c0_i32_0 : i32, i32
  }
  func.func @transform_4(%arg0: i32) -> (i32, i32) {
    %c0_i32 = arith.constant 0 : i32
    %c0_i32_0 = arith.constant 0 : i32
    %c0_i32_1 = arith.constant 0 : i32
    return %c0_i32, %c0_i32_0 : i32, i32
  }
  func.func @transform_5(%arg0: i32) -> (i32, i32) {
    %c0_i32 = arith.constant 0 : i32
    %c0_i32_0 = arith.constant 0 : i32
    %c0_i32_1 = arith.constant 0 : i32
    return %c0_i32, %c0_i32_0 : i32, i32
  }
  func.func @transform_6(%arg0: i32) -> (i32, i32) {
    %c0_i32 = arith.constant 0 : i32
    %c0_i32_0 = arith.constant 0 : i32
    return %arg0, %c0_i32 : i32, i32
  }
  func.func @transform_7(%arg0: i32) -> (i32, i32) {
    %c0_i32 = arith.constant 0 : i32
    %c0_i32_0 = arith.constant 0 : i32
    return %arg0, %c0_i32 : i32, i32
  }
}

module attributes {stable_mosaic.version = 11 : i64} {
  func.func @_linear_kernel(%arg0: i32, %arg1: memref<160x32xf32, #tpu.memory_space<vmem>>, %arg2: memref<32x32xbf16, #tpu.memory_space<vmem>>, %arg3: memref<1x32xf32, #tpu.memory_space<vmem>>, %arg4: memref<160x32xf32, #tpu.memory_space<vmem>>) attributes {dimension_semantics = [#tpu.dimension_semantics<parallel>], iteration_bounds = array<i64: 1>, scalar_prefetch = 0 : i64, scratch_operands = 0 : i64, tpu.core_type = #tpu.core_type<tc>, window_params = [{transform_indices = @transform_0, window_bounds = array<i64: 160, 32>}, {pipeline_mode = #tpu.pipeline_mode<synchronous>, transform_indices = @transform_1, window_bounds = array<i64: 32, 32>}, {pipeline_mode = #tpu.pipeline_mode<synchronous>, transform_indices = @transform_2, window_bounds = array<i64: 1, 32>}, {transform_indices = @transform_3, window_bounds = array<i64: 160, 32>}]} {
    %c0 = arith.constant 0 : index
    %c0_0 = arith.constant 0 : index
    %0 = vector.load %arg1[%c0, %c0_0] : memref<160x32xf32, #tpu.memory_space<vmem>>, vector<160x32xf32>
    %1 = arith.truncf %0 : vector<160x32xf32> to vector<160x32xbf16>
    %c0_1 = arith.constant 0 : index
    %c0_2 = arith.constant 0 : index
    %2 = vector.load %arg2[%c0_1, %c0_2] : memref<32x32xbf16, #tpu.memory_space<vmem>>, vector<32x32xbf16>
    %cst = arith.constant dense<0.000000e+00> : vector<160x32xf32>
    %3 = tpu.matmul %1, %2, %cst {dimension_numbers = #tpu.dot_dimension_numbers<[1], [0], [0], [1], [0, 0, 1, 1], [], []>} : vector<160x32xbf16>, vector<32x32xbf16>, vector<160x32xf32> -> vector<160x32xf32>
    %c0_3 = arith.constant 0 : index
    %c0_4 = arith.constant 0 : index
    %4 = vector.load %arg3[%c0_3, %c0_4] : memref<1x32xf32, #tpu.memory_space<vmem>>, vector<1x32xf32>
    %5 = vector.broadcast %4 : vector<1x32xf32> to vector<160x32xf32>
    %6 = arith.addf %3, %5 : vector<160x32xf32>
    %c0_5 = arith.constant 0 : index
    %c0_6 = arith.constant 0 : index
    %7 = vector.load %arg4[%c0_5, %c0_6] : memref<160x32xf32, #tpu.memory_space<vmem>>, vector<160x32xf32>
    tpu.vector_store %arg4[%c0_5, %c0_6], %6 {strides = array<i32>} : memref<160x32xf32, #tpu.memory_space<vmem>>, vector<160x32xf32>,
    return
  }
  func.func @transform_0(%arg0: i32) -> (i32, i32) {
    %c0_i32 = arith.constant 0 : i32
    %c0_i32_0 = arith.constant 0 : i32
    return %arg0, %c0_i32 : i32, i32
  }
  func.func @transform_1(%arg0: i32) -> (i32, i32) {
    %c0_i32 = arith.constant 0 : i32
    %c0_i32_0 = arith.constant 0 : i32
    %c0_i32_1 = arith.constant 0 : i32
    return %c0_i32, %c0_i32_0 : i32, i32
  }
  func.func @transform_2(%arg0: i32) -> (i32, i32) {
    %c0_i32 = arith.constant 0 : i32
    %c0_i32_0 = arith.constant 0 : i32
    %c0_i32_1 = arith.constant 0 : i32
    return %c0_i32, %c0_i32_0 : i32, i32
  }
  func.func @transform_3(%arg0: i32) -> (i32, i32) {
    %c0_i32 = arith.constant 0 : i32
    %c0_i32_0 = arith.constant 0 : i32
    return %arg0, %c0_i32 : i32, i32
  }
}

module attributes {stable_mosaic.version = 11 : i64} {
  func.func @_add_layernorm_kernel(%arg0: i32, %arg1: memref<160x32xf32, #tpu.memory_space<vmem>>, %arg2: memref<160x32xf32, #tpu.memory_space<vmem>>, %arg3: memref<1x32xf32, #tpu.memory_space<vmem>>, %arg4: memref<1x32xf32, #tpu.memory_space<vmem>>, %arg5: memref<160x32xf32, #tpu.memory_space<vmem>>) attributes {dimension_semantics = [#tpu.dimension_semantics<parallel>], iteration_bounds = array<i64: 1>, scalar_prefetch = 0 : i64, scratch_operands = 0 : i64, tpu.core_type = #tpu.core_type<tc>, window_params = [{transform_indices = @transform_0, window_bounds = array<i64: 160, 32>}, {transform_indices = @transform_1, window_bounds = array<i64: 160, 32>}, {pipeline_mode = #tpu.pipeline_mode<synchronous>, transform_indices = @transform_2, window_bounds = array<i64: 1, 32>}, {pipeline_mode = #tpu.pipeline_mode<synchronous>, transform_indices = @transform_3, window_bounds = array<i64: 1, 32>}, {transform_indices = @transform_4, window_bounds = array<i64: 160, 32>}]} {
    %c0 = arith.constant 0 : index
    %c0_0 = arith.constant 0 : index
    %0 = vector.load %arg1[%c0, %c0_0] : memref<160x32xf32, #tpu.memory_space<vmem>>, vector<160x32xf32>
    %c0_1 = arith.constant 0 : index
    %c0_2 = arith.constant 0 : index
    %1 = vector.load %arg2[%c0_1, %c0_2] : memref<160x32xf32, #tpu.memory_space<vmem>>, vector<160x32xf32>
    %2 = arith.addf %0, %1 : vector<160x32xf32>
    %cst = arith.constant dense<0.000000e+00> : vector<160xf32>
    %3 = vector.multi_reduction <add>, %2, %cst [1] : vector<160x32xf32> to vector<160xf32>
    %4 = vector.shape_cast %3 : vector<160xf32> to vector<160x1xf32>
    %cst_3 = arith.constant 3.200000e+01 : f32
    %5 = vector.broadcast %cst_3 : f32 to vector<160x1xf32>
    %6 = arith.divf %4, %5 : vector<160x1xf32>
    %7 = vector.broadcast %6 : vector<160x1xf32> to vector<160x32xf32>
    %8 = arith.subf %2, %7 : vector<160x32xf32>
    %9 = arith.mulf %8, %8 : vector<160x32xf32>
    %cst_4 = arith.constant dense<0.000000e+00> : vector<160xf32>
    %10 = vector.multi_reduction <add>, %9, %cst_4 [1] : vector<160x32xf32> to vector<160xf32>
    %11 = vector.shape_cast %10 : vector<160xf32> to vector<160x1xf32>
    %cst_5 = arith.constant 3.200000e+01 : f32
    %12 = vector.broadcast %cst_5 : f32 to vector<160x1xf32>
    %13 = arith.divf %11, %12 : vector<160x1xf32>
    %cst_6 = arith.constant 9.99999974E-6 : f32
    %14 = vector.broadcast %cst_6 : f32 to vector<160x1xf32>
    %15 = arith.addf %13, %14 : vector<160x1xf32>
    %16 = math.rsqrt %15 : vector<160x1xf32>
    %17 = vector.broadcast %16 : vector<160x1xf32> to vector<160x32xf32>
    %18 = arith.mulf %8, %17 : vector<160x32xf32>
    %c0_7 = arith.constant 0 : index
    %c0_8 = arith.constant 0 : index
    %19 = vector.load %arg3[%c0_7, %c0_8] : memref<1x32xf32, #tpu.memory_space<vmem>>, vector<1x32xf32>
    %20 = vector.broadcast %19 : vector<1x32xf32> to vector<160x32xf32>
    %21 = arith.mulf %18, %20 : vector<160x32xf32>
    %c0_9 = arith.constant 0 : index
    %c0_10 = arith.constant 0 : index
    %22 = vector.load %arg4[%c0_9, %c0_10] : memref<1x32xf32, #tpu.memory_space<vmem>>, vector<1x32xf32>
    %23 = vector.broadcast %22 : vector<1x32xf32> to vector<160x32xf32>
    %24 = arith.addf %21, %23 : vector<160x32xf32>
    %c0_11 = arith.constant 0 : index
    %c0_12 = arith.constant 0 : index
    %25 = vector.load %arg5[%c0_11, %c0_12] : memref<160x32xf32, #tpu.memory_space<vmem>>, vector<160x32xf32>
    tpu.vector_store %arg5[%c0_11, %c0_12], %24 {strides = array<i32>} : memref<160x32xf32, #tpu.memory_space<vmem>>, vector<160x32xf32>,
    return
  }
  func.func @transform_0(%arg0: i32) -> (i32, i32) {
    %c0_i32 = arith.constant 0 : i32
    %c0_i32_0 = arith.constant 0 : i32
    return %arg0, %c0_i32 : i32, i32
  }
  func.func @transform_1(%arg0: i32) -> (i32, i32) {
    %c0_i32 = arith.constant 0 : i32
    %c0_i32_0 = arith.constant 0 : i32
    return %arg0, %c0_i32 : i32, i32
  }
  func.func @transform_2(%arg0: i32) -> (i32, i32) {
    %c0_i32 = arith.constant 0 : i32
    %c0_i32_0 = arith.constant 0 : i32
    %c0_i32_1 = arith.constant 0 : i32
    return %c0_i32, %c0_i32_0 : i32, i32
  }
  func.func @transform_3(%arg0: i32) -> (i32, i32) {
    %c0_i32 = arith.constant 0 : i32
    %c0_i32_0 = arith.constant 0 : i32
    %c0_i32_1 = arith.constant 0 : i32
    return %c0_i32, %c0_i32_0 : i32, i32
  }
  func.func @transform_4(%arg0: i32) -> (i32, i32) {
    %c0_i32 = arith.constant 0 : i32
    %c0_i32_0 = arith.constant 0 : i32
    return %arg0, %c0_i32 : i32, i32
  }
}

module attributes {stable_mosaic.version = 11 : i64} {
  func.func @_ffn_kernel(%arg0: i32, %arg1: memref<160x32xf32, #tpu.memory_space<vmem>>, %arg2: memref<32x64xbf16, #tpu.memory_space<vmem>>, %arg3: memref<1x64xf32, #tpu.memory_space<vmem>>, %arg4: memref<64x32xbf16, #tpu.memory_space<vmem>>, %arg5: memref<1x32xf32, #tpu.memory_space<vmem>>, %arg6: memref<1x32xf32, #tpu.memory_space<vmem>>, %arg7: memref<1x32xf32, #tpu.memory_space<vmem>>, %arg8: memref<160x32xf32, #tpu.memory_space<vmem>>) attributes {dimension_semantics = [#tpu.dimension_semantics<parallel>], iteration_bounds = array<i64: 1>, scalar_prefetch = 0 : i64, scratch_operands = 0 : i64, tpu.core_type = #tpu.core_type<tc>, window_params = [{transform_indices = @transform_0, window_bounds = array<i64: 160, 32>}, {pipeline_mode = #tpu.pipeline_mode<synchronous>, transform_indices = @transform_1, window_bounds = array<i64: 32, 64>}, {pipeline_mode = #tpu.pipeline_mode<synchronous>, transform_indices = @transform_2, window_bounds = array<i64: 1, 64>}, {pipeline_mode = #tpu.pipeline_mode<synchronous>, transform_indices = @transform_3, window_bounds = array<i64: 64, 32>}, {pipeline_mode = #tpu.pipeline_mode<synchronous>, transform_indices = @transform_4, window_bounds = array<i64: 1, 32>}, {pipeline_mode = #tpu.pipeline_mode<synchronous>, transform_indices = @transform_5, window_bounds = array<i64: 1, 32>}, {pipeline_mode = #tpu.pipeline_mode<synchronous>, transform_indices = @transform_6, window_bounds = array<i64: 1, 32>}, {transform_indices = @transform_7, window_bounds = array<i64: 160, 32>}]} {
    %c0 = arith.constant 0 : index
    %c0_0 = arith.constant 0 : index
    %0 = vector.load %arg1[%c0, %c0_0] : memref<160x32xf32, #tpu.memory_space<vmem>>, vector<160x32xf32>
    %1 = arith.truncf %0 : vector<160x32xf32> to vector<160x32xbf16>
    %c0_1 = arith.constant 0 : index
    %c0_2 = arith.constant 0 : index
    %2 = vector.load %arg2[%c0_1, %c0_2] : memref<32x64xbf16, #tpu.memory_space<vmem>>, vector<32x64xbf16>
    %cst = arith.constant dense<0.000000e+00> : vector<160x64xf32>
    %3 = tpu.matmul %1, %2, %cst {dimension_numbers = #tpu.dot_dimension_numbers<[1], [0], [0], [1], [0, 0, 1, 1], [], []>} : vector<160x32xbf16>, vector<32x64xbf16>, vector<160x64xf32> -> vector<160x64xf32>
    %c0_3 = arith.constant 0 : index
    %c0_4 = arith.constant 0 : index
    %4 = vector.load %arg3[%c0_3, %c0_4] : memref<1x64xf32, #tpu.memory_space<vmem>>, vector<1x64xf32>
    %5 = vector.broadcast %4 : vector<1x64xf32> to vector<160x64xf32>
    %6 = arith.addf %3, %5 : vector<160x64xf32>
    %cst_5 = arith.constant 0.000000e+00 : f32
    %7 = vector.broadcast %cst_5 : f32 to vector<160x64xf32>
    %8 = arith.maximumf %6, %7 : vector<160x64xf32>
    %9 = arith.truncf %8 : vector<160x64xf32> to vector<160x64xbf16>
    %c0_6 = arith.constant 0 : index
    %c0_7 = arith.constant 0 : index
    %10 = vector.load %arg4[%c0_6, %c0_7] : memref<64x32xbf16, #tpu.memory_space<vmem>>, vector<64x32xbf16>
    %cst_8 = arith.constant dense<0.000000e+00> : vector<160x32xf32>
    %11 = tpu.matmul %9, %10, %cst_8 {dimension_numbers = #tpu.dot_dimension_numbers<[1], [0], [0], [1], [0, 0, 1, 1], [], []>} : vector<160x64xbf16>, vector<64x32xbf16>, vector<160x32xf32> -> vector<160x32xf32>
    %c0_9 = arith.constant 0 : index
    %c0_10 = arith.constant 0 : index
    %12 = vector.load %arg5[%c0_9, %c0_10] : memref<1x32xf32, #tpu.memory_space<vmem>>, vector<1x32xf32>
    %13 = vector.broadcast %12 : vector<1x32xf32> to vector<160x32xf32>
    %14 = arith.addf %11, %13 : vector<160x32xf32>
    %15 = arith.addf %0, %14 : vector<160x32xf32>
    %cst_11 = arith.constant dense<0.000000e+00> : vector<160xf32>
    %16 = vector.multi_reduction <add>, %15, %cst_11 [1] : vector<160x32xf32> to vector<160xf32>
    %17 = vector.shape_cast %16 : vector<160xf32> to vector<160x1xf32>
    %cst_12 = arith.constant 3.200000e+01 : f32
    %18 = vector.broadcast %cst_12 : f32 to vector<160x1xf32>
    %19 = arith.divf %17, %18 : vector<160x1xf32>
    %20 = vector.broadcast %19 : vector<160x1xf32> to vector<160x32xf32>
    %21 = arith.subf %15, %20 : vector<160x32xf32>
    %22 = arith.mulf %21, %21 : vector<160x32xf32>
    %cst_13 = arith.constant dense<0.000000e+00> : vector<160xf32>
    %23 = vector.multi_reduction <add>, %22, %cst_13 [1] : vector<160x32xf32> to vector<160xf32>
    %24 = vector.shape_cast %23 : vector<160xf32> to vector<160x1xf32>
    %cst_14 = arith.constant 3.200000e+01 : f32
    %25 = vector.broadcast %cst_14 : f32 to vector<160x1xf32>
    %26 = arith.divf %24, %25 : vector<160x1xf32>
    %cst_15 = arith.constant 9.99999974E-6 : f32
    %27 = vector.broadcast %cst_15 : f32 to vector<160x1xf32>
    %28 = arith.addf %26, %27 : vector<160x1xf32>
    %29 = math.rsqrt %28 : vector<160x1xf32>
    %30 = vector.broadcast %29 : vector<160x1xf32> to vector<160x32xf32>
    %31 = arith.mulf %21, %30 : vector<160x32xf32>
    %c0_16 = arith.constant 0 : index
    %c0_17 = arith.constant 0 : index
    %32 = vector.load %arg6[%c0_16, %c0_17] : memref<1x32xf32, #tpu.memory_space<vmem>>, vector<1x32xf32>
    %33 = vector.broadcast %32 : vector<1x32xf32> to vector<160x32xf32>
    %34 = arith.mulf %31, %33 : vector<160x32xf32>
    %c0_18 = arith.constant 0 : index
    %c0_19 = arith.constant 0 : index
    %35 = vector.load %arg7[%c0_18, %c0_19] : memref<1x32xf32, #tpu.memory_space<vmem>>, vector<1x32xf32>
    %36 = vector.broadcast %35 : vector<1x32xf32> to vector<160x32xf32>
    %37 = arith.addf %34, %36 : vector<160x32xf32>
    %c0_20 = arith.constant 0 : index
    %c0_21 = arith.constant 0 : index
    %38 = vector.load %arg8[%c0_20, %c0_21] : memref<160x32xf32, #tpu.memory_space<vmem>>, vector<160x32xf32>
    tpu.vector_store %arg8[%c0_20, %c0_21], %37 {strides = array<i32>} : memref<160x32xf32, #tpu.memory_space<vmem>>, vector<160x32xf32>,
    return
  }
  func.func @transform_0(%arg0: i32) -> (i32, i32) {
    %c0_i32 = arith.constant 0 : i32
    %c0_i32_0 = arith.constant 0 : i32
    return %arg0, %c0_i32 : i32, i32
  }
  func.func @transform_1(%arg0: i32) -> (i32, i32) {
    %c0_i32 = arith.constant 0 : i32
    %c0_i32_0 = arith.constant 0 : i32
    %c0_i32_1 = arith.constant 0 : i32
    return %c0_i32, %c0_i32_0 : i32, i32
  }
  func.func @transform_2(%arg0: i32) -> (i32, i32) {
    %c0_i32 = arith.constant 0 : i32
    %c0_i32_0 = arith.constant 0 : i32
    %c0_i32_1 = arith.constant 0 : i32
    return %c0_i32, %c0_i32_0 : i32, i32
  }
  func.func @transform_3(%arg0: i32) -> (i32, i32) {
    %c0_i32 = arith.constant 0 : i32
    %c0_i32_0 = arith.constant 0 : i32
    %c0_i32_1 = arith.constant 0 : i32
    return %c0_i32, %c0_i32_0 : i32, i32
  }
  func.func @transform_4(%arg0: i32) -> (i32, i32) {
    %c0_i32 = arith.constant 0 : i32
    %c0_i32_0 = arith.constant 0 : i32
    %c0_i32_1 = arith.constant 0 : i32
    return %c0_i32, %c0_i32_0 : i32, i32
  }
  func.func @transform_5(%arg0: i32) -> (i32, i32) {
    %c0_i32 = arith.constant 0 : i32
    %c0_i32_0 = arith.constant 0 : i32
    %c0_i32_1 = arith.constant 0 : i32
    return %c0_i32, %c0_i32_0 : i32, i32
  }
  func.func @transform_6(%arg0: i32) -> (i32, i32) {
    %c0_i32 = arith.constant 0 : i32
    %c0_i32_0 = arith.constant 0 : i32
    %c0_i32_1 = arith.constant 0 : i32
    return %c0_i32, %c0_i32_0 : i32, i32
  }
  func.func @transform_7(%arg0: i32) -> (i32, i32) {
    %c0_i32 = arith.constant 0 : i32
    %c0_i32_0 = arith.constant 0 : i32
    return %arg0, %c0_i32 : i32, i32
  }
}

module attributes {stable_mosaic.version = 11 : i64} {
  func.func @_off_attn_kernel(%arg0: i32, %arg1: memref<16x32xf32, #tpu.memory_space<vmem>>, %arg2: memref<16x32xf32, #tpu.memory_space<vmem>>, %arg3: memref<32x32xbf16, #tpu.memory_space<vmem>>, %arg4: memref<1x32xf32, #tpu.memory_space<vmem>>, %arg5: memref<32x16xbf16, #tpu.memory_space<vmem>>, %arg6: memref<1x16xf32, #tpu.memory_space<vmem>>, %arg7: memref<16x32xf32, #tpu.memory_space<vmem>>, %arg8: memref<16x16xf32, #tpu.memory_space<vmem>>) attributes {dimension_semantics = [#tpu.dimension_semantics<parallel>], iteration_bounds = array<i64: 1>, scalar_prefetch = 0 : i64, scratch_operands = 0 : i64, tpu.core_type = #tpu.core_type<tc>, window_params = [{transform_indices = @transform_0, window_bounds = array<i64: 16, 32>}, {transform_indices = @transform_1, window_bounds = array<i64: 16, 32>}, {pipeline_mode = #tpu.pipeline_mode<synchronous>, transform_indices = @transform_2, window_bounds = array<i64: 32, 32>}, {pipeline_mode = #tpu.pipeline_mode<synchronous>, transform_indices = @transform_3, window_bounds = array<i64: 1, 32>}, {pipeline_mode = #tpu.pipeline_mode<synchronous>, transform_indices = @transform_4, window_bounds = array<i64: 32, 16>}, {pipeline_mode = #tpu.pipeline_mode<synchronous>, transform_indices = @transform_5, window_bounds = array<i64: 1, 16>}, {transform_indices = @transform_6, window_bounds = array<i64: 16, 32>}, {transform_indices = @transform_7, window_bounds = array<i64: 16, 16>}]} {
    %c0 = arith.constant 0 : index
    %c0_0 = arith.constant 0 : index
    %0 = vector.load %arg1[%c0, %c0_0] : memref<16x32xf32, #tpu.memory_space<vmem>>, vector<16x32xf32>
    %c0_1 = arith.constant 0 : index
    %c0_2 = arith.constant 0 : index
    %1 = vector.load %arg2[%c0_1, %c0_2] : memref<16x32xf32, #tpu.memory_space<vmem>>, vector<16x32xf32>
    %2 = arith.addf %0, %1 : vector<16x32xf32>
    %3 = arith.truncf %2 : vector<16x32xf32> to vector<16x32xbf16>
    %c0_3 = arith.constant 0 : index
    %c0_4 = arith.constant 0 : index
    %4 = vector.load %arg3[%c0_3, %c0_4] : memref<32x32xbf16, #tpu.memory_space<vmem>>, vector<32x32xbf16>
    %cst = arith.constant dense<0.000000e+00> : vector<16x32xf32>
    %5 = tpu.matmul %3, %4, %cst {dimension_numbers = #tpu.dot_dimension_numbers<[1], [0], [0], [1], [0, 0, 1, 1], [], []>} : vector<16x32xbf16>, vector<32x32xbf16>, vector<16x32xf32> -> vector<16x32xf32>
    %c0_5 = arith.constant 0 : index
    %c0_6 = arith.constant 0 : index
    %6 = vector.load %arg4[%c0_5, %c0_6] : memref<1x32xf32, #tpu.memory_space<vmem>>, vector<1x32xf32>
    %7 = vector.broadcast %6 : vector<1x32xf32> to vector<16x32xf32>
    %8 = arith.addf %5, %7 : vector<16x32xf32>
    %c0_7 = arith.constant 0 : index
    %c0_8 = arith.constant 0 : index
    %9 = vector.load %arg5[%c0_7, %c0_8] : memref<32x16xbf16, #tpu.memory_space<vmem>>, vector<32x16xbf16>
    %cst_9 = arith.constant dense<0.000000e+00> : vector<16x16xf32>
    %10 = tpu.matmul %3, %9, %cst_9 {dimension_numbers = #tpu.dot_dimension_numbers<[1], [0], [0], [1], [0, 0, 1, 1], [], []>} : vector<16x32xbf16>, vector<32x16xbf16>, vector<16x16xf32> -> vector<16x16xf32>
    %c0_10 = arith.constant 0 : index
    %c0_11 = arith.constant 0 : index
    %11 = vector.load %arg6[%c0_10, %c0_11] : memref<1x16xf32, #tpu.memory_space<vmem>>, vector<1x16xf32>
    %12 = vector.broadcast %11 : vector<1x16xf32> to vector<16x16xf32>
    %13 = arith.addf %10, %12 : vector<16x16xf32>
    %14 = vector.extract_strided_slice %13 {offsets = [0, 0], sizes = [16, 4], strides = [1, 1]} : vector<16x16xf32> to vector<16x4xf32>
    %cst_12 = arith.constant dense<0xFF800000> : vector<16xf32>
    %15 = vector.multi_reduction <maximumf>, %14, %cst_12 [1] : vector<16x4xf32> to vector<16xf32>
    %16 = vector.shape_cast %15 : vector<16xf32> to vector<16x1xf32>
    %17 = vector.broadcast %16 : vector<16x1xf32> to vector<16x4xf32>
    %18 = arith.subf %14, %17 : vector<16x4xf32>
    %19 = math.exp %18 : vector<16x4xf32>
    %cst_13 = arith.constant dense<0.000000e+00> : vector<16xf32>
    %20 = vector.multi_reduction <add>, %19, %cst_13 [1] : vector<16x4xf32> to vector<16xf32>
    %21 = vector.shape_cast %20 : vector<16xf32> to vector<16x1xf32>
    %22 = tpu.reciprocal %21 {approx = true} : vector<16x1xf32> -> vector<16x1xf32>
    %23 = vector.broadcast %22 : vector<16x1xf32> to vector<16x4xf32>
    %24 = arith.mulf %19, %23 : vector<16x4xf32>
    %25 = vector.extract_strided_slice %13 {offsets = [0, 4], sizes = [16, 4], strides = [1, 1]} : vector<16x16xf32> to vector<16x4xf32>
    %cst_14 = arith.constant dense<0xFF800000> : vector<16xf32>
    %26 = vector.multi_reduction <maximumf>, %25, %cst_14 [1] : vector<16x4xf32> to vector<16xf32>
    %27 = vector.shape_cast %26 : vector<16xf32> to vector<16x1xf32>
    %28 = vector.broadcast %27 : vector<16x1xf32> to vector<16x4xf32>
    %29 = arith.subf %25, %28 : vector<16x4xf32>
    %30 = math.exp %29 : vector<16x4xf32>
    %cst_15 = arith.constant dense<0.000000e+00> : vector<16xf32>
    %31 = vector.multi_reduction <add>, %30, %cst_15 [1] : vector<16x4xf32> to vector<16xf32>
    %32 = vector.shape_cast %31 : vector<16xf32> to vector<16x1xf32>
    %33 = tpu.reciprocal %32 {approx = true} : vector<16x1xf32> -> vector<16x1xf32>
    %34 = vector.broadcast %33 : vector<16x1xf32> to vector<16x4xf32>
    %35 = arith.mulf %30, %34 : vector<16x4xf32>
    %36 = vector.extract_strided_slice %13 {offsets = [0, 8], sizes = [16, 4], strides = [1, 1]} : vector<16x16xf32> to vector<16x4xf32>
    %cst_16 = arith.constant dense<0xFF800000> : vector<16xf32>
    %37 = vector.multi_reduction <maximumf>, %36, %cst_16 [1] : vector<16x4xf32> to vector<16xf32>
    %38 = vector.shape_cast %37 : vector<16xf32> to vector<16x1xf32>
    %39 = vector.broadcast %38 : vector<16x1xf32> to vector<16x4xf32>
    %40 = arith.subf %36, %39 : vector<16x4xf32>
    %41 = math.exp %40 : vector<16x4xf32>
    %cst_17 = arith.constant dense<0.000000e+00> : vector<16xf32>
    %42 = vector.multi_reduction <add>, %41, %cst_17 [1] : vector<16x4xf32> to vector<16xf32>
    %43 = vector.shape_cast %42 : vector<16xf32> to vector<16x1xf32>
    %44 = tpu.reciprocal %43 {approx = true} : vector<16x1xf32> -> vector<16x1xf32>
    %45 = vector.broadcast %44 : vector<16x1xf32> to vector<16x4xf32>
    %46 = arith.mulf %41, %45 : vector<16x4xf32>
    %47 = vector.extract_strided_slice %13 {offsets = [0, 12], sizes = [16, 4], strides = [1, 1]} : vector<16x16xf32> to vector<16x4xf32>
    %cst_18 = arith.constant dense<0xFF800000> : vector<16xf32>
    %48 = vector.multi_reduction <maximumf>, %47, %cst_18 [1] : vector<16x4xf32> to vector<16xf32>
    %49 = vector.shape_cast %48 : vector<16xf32> to vector<16x1xf32>
    %50 = vector.broadcast %49 : vector<16x1xf32> to vector<16x4xf32>
    %51 = arith.subf %47, %50 : vector<16x4xf32>
    %52 = math.exp %51 : vector<16x4xf32>
    %cst_19 = arith.constant dense<0.000000e+00> : vector<16xf32>
    %53 = vector.multi_reduction <add>, %52, %cst_19 [1] : vector<16x4xf32> to vector<16xf32>
    %54 = vector.shape_cast %53 : vector<16xf32> to vector<16x1xf32>
    %55 = tpu.reciprocal %54 {approx = true} : vector<16x1xf32> -> vector<16x1xf32>
    %56 = vector.broadcast %55 : vector<16x1xf32> to vector<16x4xf32>
    %57 = arith.mulf %52, %56 : vector<16x4xf32>
    %58 = tpu.concatenate %24, %35, %46, %57 in 1 : vector<16x4xf32>, vector<16x4xf32>, vector<16x4xf32>, vector<16x4xf32> -> vector<16x16xf32>
    %c0_20 = arith.constant 0 : index
    %c0_21 = arith.constant 0 : index
    %59 = vector.load %arg8[%c0_20, %c0_21] : memref<16x16xf32, #tpu.memory_space<vmem>>, vector<16x16xf32>
    tpu.vector_store %arg8[%c0_20, %c0_21], %58 {strides = array<i32>} : memref<16x16xf32, #tpu.memory_space<vmem>>, vector<16x16xf32>,
    %c0_22 = arith.constant 0 : index
    %c0_23 = arith.constant 0 : index
    %60 = vector.load %arg7[%c0_22, %c0_23] : memref<16x32xf32, #tpu.memory_space<vmem>>, vector<16x32xf32>
    tpu.vector_store %arg7[%c0_22, %c0_23], %8 {strides = array<i32>} : memref<16x32xf32, #tpu.memory_space<vmem>>, vector<16x32xf32>,
    return
  }
  func.func @transform_0(%arg0: i32) -> (i32, i32) {
    %c0_i32 = arith.constant 0 : i32
    %c0_i32_0 = arith.constant 0 : i32
    return %arg0, %c0_i32 : i32, i32
  }
  func.func @transform_1(%arg0: i32) -> (i32, i32) {
    %c0_i32 = arith.constant 0 : i32
    %c0_i32_0 = arith.constant 0 : i32
    return %arg0, %c0_i32 : i32, i32
  }
  func.func @transform_2(%arg0: i32) -> (i32, i32) {
    %c0_i32 = arith.constant 0 : i32
    %c0_i32_0 = arith.constant 0 : i32
    %c0_i32_1 = arith.constant 0 : i32
    return %c0_i32, %c0_i32_0 : i32, i32
  }
  func.func @transform_3(%arg0: i32) -> (i32, i32) {
    %c0_i32 = arith.constant 0 : i32
    %c0_i32_0 = arith.constant 0 : i32
    %c0_i32_1 = arith.constant 0 : i32
    return %c0_i32, %c0_i32_0 : i32, i32
  }
  func.func @transform_4(%arg0: i32) -> (i32, i32) {
    %c0_i32 = arith.constant 0 : i32
    %c0_i32_0 = arith.constant 0 : i32
    %c0_i32_1 = arith.constant 0 : i32
    return %c0_i32, %c0_i32_0 : i32, i32
  }
  func.func @transform_5(%arg0: i32) -> (i32, i32) {
    %c0_i32 = arith.constant 0 : i32
    %c0_i32_0 = arith.constant 0 : i32
    %c0_i32_1 = arith.constant 0 : i32
    return %c0_i32, %c0_i32_0 : i32, i32
  }
  func.func @transform_6(%arg0: i32) -> (i32, i32) {
    %c0_i32 = arith.constant 0 : i32
    %c0_i32_0 = arith.constant 0 : i32
    return %arg0, %c0_i32 : i32, i32
  }
  func.func @transform_7(%arg0: i32) -> (i32, i32) {
    %c0_i32 = arith.constant 0 : i32
    %c0_i32_0 = arith.constant 0 : i32
    return %arg0, %c0_i32 : i32, i32
  }
}

module attributes {stable_mosaic.version = 11 : i64} {
  func.func @_ffn_kernel(%arg0: i32, %arg1: memref<16x32xf32, #tpu.memory_space<vmem>>, %arg2: memref<32x64xbf16, #tpu.memory_space<vmem>>, %arg3: memref<1x64xf32, #tpu.memory_space<vmem>>, %arg4: memref<64x32xbf16, #tpu.memory_space<vmem>>, %arg5: memref<1x32xf32, #tpu.memory_space<vmem>>, %arg6: memref<1x32xf32, #tpu.memory_space<vmem>>, %arg7: memref<1x32xf32, #tpu.memory_space<vmem>>, %arg8: memref<16x32xf32, #tpu.memory_space<vmem>>) attributes {dimension_semantics = [#tpu.dimension_semantics<parallel>], iteration_bounds = array<i64: 1>, scalar_prefetch = 0 : i64, scratch_operands = 0 : i64, tpu.core_type = #tpu.core_type<tc>, window_params = [{transform_indices = @transform_0, window_bounds = array<i64: 16, 32>}, {pipeline_mode = #tpu.pipeline_mode<synchronous>, transform_indices = @transform_1, window_bounds = array<i64: 32, 64>}, {pipeline_mode = #tpu.pipeline_mode<synchronous>, transform_indices = @transform_2, window_bounds = array<i64: 1, 64>}, {pipeline_mode = #tpu.pipeline_mode<synchronous>, transform_indices = @transform_3, window_bounds = array<i64: 64, 32>}, {pipeline_mode = #tpu.pipeline_mode<synchronous>, transform_indices = @transform_4, window_bounds = array<i64: 1, 32>}, {pipeline_mode = #tpu.pipeline_mode<synchronous>, transform_indices = @transform_5, window_bounds = array<i64: 1, 32>}, {pipeline_mode = #tpu.pipeline_mode<synchronous>, transform_indices = @transform_6, window_bounds = array<i64: 1, 32>}, {transform_indices = @transform_7, window_bounds = array<i64: 16, 32>}]} {
    %c0 = arith.constant 0 : index
    %c0_0 = arith.constant 0 : index
    %0 = vector.load %arg1[%c0, %c0_0] : memref<16x32xf32, #tpu.memory_space<vmem>>, vector<16x32xf32>
    %1 = arith.truncf %0 : vector<16x32xf32> to vector<16x32xbf16>
    %c0_1 = arith.constant 0 : index
    %c0_2 = arith.constant 0 : index
    %2 = vector.load %arg2[%c0_1, %c0_2] : memref<32x64xbf16, #tpu.memory_space<vmem>>, vector<32x64xbf16>
    %cst = arith.constant dense<0.000000e+00> : vector<16x64xf32>
    %3 = tpu.matmul %1, %2, %cst {dimension_numbers = #tpu.dot_dimension_numbers<[1], [0], [0], [1], [0, 0, 1, 1], [], []>} : vector<16x32xbf16>, vector<32x64xbf16>, vector<16x64xf32> -> vector<16x64xf32>
    %c0_3 = arith.constant 0 : index
    %c0_4 = arith.constant 0 : index
    %4 = vector.load %arg3[%c0_3, %c0_4] : memref<1x64xf32, #tpu.memory_space<vmem>>, vector<1x64xf32>
    %5 = vector.broadcast %4 : vector<1x64xf32> to vector<16x64xf32>
    %6 = arith.addf %3, %5 : vector<16x64xf32>
    %cst_5 = arith.constant 0.000000e+00 : f32
    %7 = vector.broadcast %cst_5 : f32 to vector<16x64xf32>
    %8 = arith.maximumf %6, %7 : vector<16x64xf32>
    %9 = arith.truncf %8 : vector<16x64xf32> to vector<16x64xbf16>
    %c0_6 = arith.constant 0 : index
    %c0_7 = arith.constant 0 : index
    %10 = vector.load %arg4[%c0_6, %c0_7] : memref<64x32xbf16, #tpu.memory_space<vmem>>, vector<64x32xbf16>
    %cst_8 = arith.constant dense<0.000000e+00> : vector<16x32xf32>
    %11 = tpu.matmul %9, %10, %cst_8 {dimension_numbers = #tpu.dot_dimension_numbers<[1], [0], [0], [1], [0, 0, 1, 1], [], []>} : vector<16x64xbf16>, vector<64x32xbf16>, vector<16x32xf32> -> vector<16x32xf32>
    %c0_9 = arith.constant 0 : index
    %c0_10 = arith.constant 0 : index
    %12 = vector.load %arg5[%c0_9, %c0_10] : memref<1x32xf32, #tpu.memory_space<vmem>>, vector<1x32xf32>
    %13 = vector.broadcast %12 : vector<1x32xf32> to vector<16x32xf32>
    %14 = arith.addf %11, %13 : vector<16x32xf32>
    %15 = arith.addf %0, %14 : vector<16x32xf32>
    %cst_11 = arith.constant dense<0.000000e+00> : vector<16xf32>
    %16 = vector.multi_reduction <add>, %15, %cst_11 [1] : vector<16x32xf32> to vector<16xf32>
    %17 = vector.shape_cast %16 : vector<16xf32> to vector<16x1xf32>
    %cst_12 = arith.constant 3.200000e+01 : f32
    %18 = vector.broadcast %cst_12 : f32 to vector<16x1xf32>
    %19 = arith.divf %17, %18 : vector<16x1xf32>
    %20 = vector.broadcast %19 : vector<16x1xf32> to vector<16x32xf32>
    %21 = arith.subf %15, %20 : vector<16x32xf32>
    %22 = arith.mulf %21, %21 : vector<16x32xf32>
    %cst_13 = arith.constant dense<0.000000e+00> : vector<16xf32>
    %23 = vector.multi_reduction <add>, %22, %cst_13 [1] : vector<16x32xf32> to vector<16xf32>
    %24 = vector.shape_cast %23 : vector<16xf32> to vector<16x1xf32>
    %cst_14 = arith.constant 3.200000e+01 : f32
    %25 = vector.broadcast %cst_14 : f32 to vector<16x1xf32>
    %26 = arith.divf %24, %25 : vector<16x1xf32>
    %cst_15 = arith.constant 9.99999974E-6 : f32
    %27 = vector.broadcast %cst_15 : f32 to vector<16x1xf32>
    %28 = arith.addf %26, %27 : vector<16x1xf32>
    %29 = math.rsqrt %28 : vector<16x1xf32>
    %30 = vector.broadcast %29 : vector<16x1xf32> to vector<16x32xf32>
    %31 = arith.mulf %21, %30 : vector<16x32xf32>
    %c0_16 = arith.constant 0 : index
    %c0_17 = arith.constant 0 : index
    %32 = vector.load %arg6[%c0_16, %c0_17] : memref<1x32xf32, #tpu.memory_space<vmem>>, vector<1x32xf32>
    %33 = vector.broadcast %32 : vector<1x32xf32> to vector<16x32xf32>
    %34 = arith.mulf %31, %33 : vector<16x32xf32>
    %c0_18 = arith.constant 0 : index
    %c0_19 = arith.constant 0 : index
    %35 = vector.load %arg7[%c0_18, %c0_19] : memref<1x32xf32, #tpu.memory_space<vmem>>, vector<1x32xf32>
    %36 = vector.broadcast %35 : vector<1x32xf32> to vector<16x32xf32>
    %37 = arith.addf %34, %36 : vector<16x32xf32>
    %c0_20 = arith.constant 0 : index
    %c0_21 = arith.constant 0 : index
    %38 = vector.load %arg8[%c0_20, %c0_21] : memref<16x32xf32, #tpu.memory_space<vmem>>, vector<16x32xf32>
    tpu.vector_store %arg8[%c0_20, %c0_21], %37 {strides = array<i32>} : memref<16x32xf32, #tpu.memory_space<vmem>>, vector<16x32xf32>,
    return
  }
  func.func @transform_0(%arg0: i32) -> (i32, i32) {
    %c0_i32 = arith.constant 0 : i32
    %c0_i32_0 = arith.constant 0 : i32
    return %arg0, %c0_i32 : i32, i32
  }
  func.func @transform_1(%arg0: i32) -> (i32, i32) {
    %c0_i32 = arith.constant 0 : i32
    %c0_i32_0 = arith.constant 0 : i32
    %c0_i32_1 = arith.constant 0 : i32
    return %c0_i32, %c0_i32_0 : i32, i32
  }
  func.func @transform_2(%arg0: i32) -> (i32, i32) {
    %c0_i32 = arith.constant 0 : i32
    %c0_i32_0 = arith.constant 0 : i32
    %c0_i32_1 = arith.constant 0 : i32
    return %c0_i32, %c0_i32_0 : i32, i32
  }
  func.func @transform_3(%arg0: i32) -> (i32, i32) {
    %c0_i32 = arith.constant 0 : i32
    %c0_i32_0 = arith.constant 0 : i32
    %c0_i32_1 = arith.constant 0 : i32
    return %c0_i32, %c0_i32_0 : i32, i32
  }
  func.func @transform_4(%arg0: i32) -> (i32, i32) {
    %c0_i32 = arith.constant 0 : i32
    %c0_i32_0 = arith.constant 0 : i32
    %c0_i32_1 = arith.constant 0 : i32
    return %c0_i32, %c0_i32_0 : i32, i32
  }
  func.func @transform_5(%arg0: i32) -> (i32, i32) {
    %c0_i32 = arith.constant 0 : i32
    %c0_i32_0 = arith.constant 0 : i32
    %c0_i32_1 = arith.constant 0 : i32
    return %c0_i32, %c0_i32_0 : i32, i32
  }
  func.func @transform_6(%arg0: i32) -> (i32, i32) {
    %c0_i32 = arith.constant 0 : i32
    %c0_i32_0 = arith.constant 0 : i32
    %c0_i32_1 = arith.constant 0 : i32
    return %c0_i32, %c0_i32_0 : i32, i32
  }
  func.func @transform_7(%arg0: i32) -> (i32, i32) {
    %c0_i32 = arith.constant 0 : i32
    %c0_i32_0 = arith.constant 0 : i32
    return %arg0, %c0_i32 : i32, i32
  }
}

module attributes {stable_mosaic.version = 11 : i64} {
  func.func @_linear_kernel(%arg0: i32, %arg1: memref<16x32xf32, #tpu.memory_space<vmem>>, %arg2: memref<32x32xbf16, #tpu.memory_space<vmem>>, %arg3: memref<1x32xf32, #tpu.memory_space<vmem>>, %arg4: memref<16x32xf32, #tpu.memory_space<vmem>>) attributes {dimension_semantics = [#tpu.dimension_semantics<parallel>], iteration_bounds = array<i64: 1>, scalar_prefetch = 0 : i64, scratch_operands = 0 : i64, tpu.core_type = #tpu.core_type<tc>, window_params = [{transform_indices = @transform_0, window_bounds = array<i64: 16, 32>}, {pipeline_mode = #tpu.pipeline_mode<synchronous>, transform_indices = @transform_1, window_bounds = array<i64: 32, 32>}, {pipeline_mode = #tpu.pipeline_mode<synchronous>, transform_indices = @transform_2, window_bounds = array<i64: 1, 32>}, {transform_indices = @transform_3, window_bounds = array<i64: 16, 32>}]} {
    %c0 = arith.constant 0 : index
    %c0_0 = arith.constant 0 : index
    %0 = vector.load %arg1[%c0, %c0_0] : memref<16x32xf32, #tpu.memory_space<vmem>>, vector<16x32xf32>
    %1 = arith.truncf %0 : vector<16x32xf32> to vector<16x32xbf16>
    %c0_1 = arith.constant 0 : index
    %c0_2 = arith.constant 0 : index
    %2 = vector.load %arg2[%c0_1, %c0_2] : memref<32x32xbf16, #tpu.memory_space<vmem>>, vector<32x32xbf16>
    %cst = arith.constant dense<0.000000e+00> : vector<16x32xf32>
    %3 = tpu.matmul %1, %2, %cst {dimension_numbers = #tpu.dot_dimension_numbers<[1], [0], [0], [1], [0, 0, 1, 1], [], []>} : vector<16x32xbf16>, vector<32x32xbf16>, vector<16x32xf32> -> vector<16x32xf32>
    %c0_3 = arith.constant 0 : index
    %c0_4 = arith.constant 0 : index
    %4 = vector.load %arg3[%c0_3, %c0_4] : memref<1x32xf32, #tpu.memory_space<vmem>>, vector<1x32xf32>
    %5 = vector.broadcast %4 : vector<1x32xf32> to vector<16x32xf32>
    %6 = arith.addf %3, %5 : vector<16x32xf32>
    %c0_5 = arith.constant 0 : index
    %c0_6 = arith.constant 0 : index
    %7 = vector.load %arg4[%c0_5, %c0_6] : memref<16x32xf32, #tpu.memory_space<vmem>>, vector<16x32xf32>
    tpu.vector_store %arg4[%c0_5, %c0_6], %6 {strides = array<i32>} : memref<16x32xf32, #tpu.memory_space<vmem>>, vector<16x32xf32>,
    return
  }
  func.func @transform_0(%arg0: i32) -> (i32, i32) {
    %c0_i32 = arith.constant 0 : i32
    %c0_i32_0 = arith.constant 0 : i32
    return %arg0, %c0_i32 : i32, i32
  }
  func.func @transform_1(%arg0: i32) -> (i32, i32) {
    %c0_i32 = arith.constant 0 : i32
    %c0_i32_0 = arith.constant 0 : i32
    %c0_i32_1 = arith.constant 0 : i32
    return %c0_i32, %c0_i32_0 : i32, i32
  }
  func.func @transform_2(%arg0: i32) -> (i32, i32) {
    %c0_i32 = arith.constant 0 : i32
    %c0_i32_0 = arith.constant 0 : i32
    %c0_i32_1 = arith.constant 0 : i32
    return %c0_i32, %c0_i32_0 : i32, i32
  }
  func.func @transform_3(%arg0: i32) -> (i32, i32) {
    %c0_i32 = arith.constant 0 : i32
    %c0_i32_0 = arith.constant 0 : i32
    return %arg0, %c0_i32 : i32, i32
  }
}

module attributes {stable_mosaic.version = 11 : i64} {
  func.func @_ffn_kernel(%arg0: i32, %arg1: memref<16x32xf32, #tpu.memory_space<vmem>>, %arg2: memref<32x64xbf16, #tpu.memory_space<vmem>>, %arg3: memref<1x64xf32, #tpu.memory_space<vmem>>, %arg4: memref<64x32xbf16, #tpu.memory_space<vmem>>, %arg5: memref<1x32xf32, #tpu.memory_space<vmem>>, %arg6: memref<1x32xf32, #tpu.memory_space<vmem>>, %arg7: memref<1x32xf32, #tpu.memory_space<vmem>>, %arg8: memref<16x32xf32, #tpu.memory_space<vmem>>) attributes {dimension_semantics = [#tpu.dimension_semantics<parallel>], iteration_bounds = array<i64: 1>, scalar_prefetch = 0 : i64, scratch_operands = 0 : i64, tpu.core_type = #tpu.core_type<tc>, window_params = [{transform_indices = @transform_0, window_bounds = array<i64: 16, 32>}, {pipeline_mode = #tpu.pipeline_mode<synchronous>, transform_indices = @transform_1, window_bounds = array<i64: 32, 64>}, {pipeline_mode = #tpu.pipeline_mode<synchronous>, transform_indices = @transform_2, window_bounds = array<i64: 1, 64>}, {pipeline_mode = #tpu.pipeline_mode<synchronous>, transform_indices = @transform_3, window_bounds = array<i64: 64, 32>}, {pipeline_mode = #tpu.pipeline_mode<synchronous>, transform_indices = @transform_4, window_bounds = array<i64: 1, 32>}, {pipeline_mode = #tpu.pipeline_mode<synchronous>, transform_indices = @transform_5, window_bounds = array<i64: 1, 32>}, {pipeline_mode = #tpu.pipeline_mode<synchronous>, transform_indices = @transform_6, window_bounds = array<i64: 1, 32>}, {transform_indices = @transform_7, window_bounds = array<i64: 16, 32>}]} {
    %c0 = arith.constant 0 : index
    %c0_0 = arith.constant 0 : index
    %0 = vector.load %arg1[%c0, %c0_0] : memref<16x32xf32, #tpu.memory_space<vmem>>, vector<16x32xf32>
    %1 = arith.truncf %0 : vector<16x32xf32> to vector<16x32xbf16>
    %c0_1 = arith.constant 0 : index
    %c0_2 = arith.constant 0 : index
    %2 = vector.load %arg2[%c0_1, %c0_2] : memref<32x64xbf16, #tpu.memory_space<vmem>>, vector<32x64xbf16>
    %cst = arith.constant dense<0.000000e+00> : vector<16x64xf32>
    %3 = tpu.matmul %1, %2, %cst {dimension_numbers = #tpu.dot_dimension_numbers<[1], [0], [0], [1], [0, 0, 1, 1], [], []>} : vector<16x32xbf16>, vector<32x64xbf16>, vector<16x64xf32> -> vector<16x64xf32>
    %c0_3 = arith.constant 0 : index
    %c0_4 = arith.constant 0 : index
    %4 = vector.load %arg3[%c0_3, %c0_4] : memref<1x64xf32, #tpu.memory_space<vmem>>, vector<1x64xf32>
    %5 = vector.broadcast %4 : vector<1x64xf32> to vector<16x64xf32>
    %6 = arith.addf %3, %5 : vector<16x64xf32>
    %cst_5 = arith.constant 0.000000e+00 : f32
    %7 = vector.broadcast %cst_5 : f32 to vector<16x64xf32>
    %8 = arith.maximumf %6, %7 : vector<16x64xf32>
    %9 = arith.truncf %8 : vector<16x64xf32> to vector<16x64xbf16>
    %c0_6 = arith.constant 0 : index
    %c0_7 = arith.constant 0 : index
    %10 = vector.load %arg4[%c0_6, %c0_7] : memref<64x32xbf16, #tpu.memory_space<vmem>>, vector<64x32xbf16>
    %cst_8 = arith.constant dense<0.000000e+00> : vector<16x32xf32>
    %11 = tpu.matmul %9, %10, %cst_8 {dimension_numbers = #tpu.dot_dimension_numbers<[1], [0], [0], [1], [0, 0, 1, 1], [], []>} : vector<16x64xbf16>, vector<64x32xbf16>, vector<16x32xf32> -> vector<16x32xf32>
    %c0_9 = arith.constant 0 : index
    %c0_10 = arith.constant 0 : index
    %12 = vector.load %arg5[%c0_9, %c0_10] : memref<1x32xf32, #tpu.memory_space<vmem>>, vector<1x32xf32>
    %13 = vector.broadcast %12 : vector<1x32xf32> to vector<16x32xf32>
    %14 = arith.addf %11, %13 : vector<16x32xf32>
    %15 = arith.addf %0, %14 : vector<16x32xf32>
    %cst_11 = arith.constant dense<0.000000e+00> : vector<16xf32>
    %16 = vector.multi_reduction <add>, %15, %cst_11 [1] : vector<16x32xf32> to vector<16xf32>
    %17 = vector.shape_cast %16 : vector<16xf32> to vector<16x1xf32>
    %cst_12 = arith.constant 3.200000e+01 : f32
    %18 = vector.broadcast %cst_12 : f32 to vector<16x1xf32>
    %19 = arith.divf %17, %18 : vector<16x1xf32>
    %20 = vector.broadcast %19 : vector<16x1xf32> to vector<16x32xf32>
    %21 = arith.subf %15, %20 : vector<16x32xf32>
    %22 = arith.mulf %21, %21 : vector<16x32xf32>
    %cst_13 = arith.constant dense<0.000000e+00> : vector<16xf32>
    %23 = vector.multi_reduction <add>, %22, %cst_13 [1] : vector<16x32xf32> to vector<16xf32>
    %24 = vector.shape_cast %23 : vector<16xf32> to vector<16x1xf32>
    %cst_14 = arith.constant 3.200000e+01 : f32
    %25 = vector.broadcast %cst_14 : f32 to vector<16x1xf32>
    %26 = arith.divf %24, %25 : vector<16x1xf32>
    %cst_15 = arith.constant 9.99999974E-6 : f32
    %27 = vector.broadcast %cst_15 : f32 to vector<16x1xf32>
    %28 = arith.addf %26, %27 : vector<16x1xf32>
    %29 = math.rsqrt %28 : vector<16x1xf32>
    %30 = vector.broadcast %29 : vector<16x1xf32> to vector<16x32xf32>
    %31 = arith.mulf %21, %30 : vector<16x32xf32>
    %c0_16 = arith.constant 0 : index
    %c0_17 = arith.constant 0 : index
    %32 = vector.load %arg6[%c0_16, %c0_17] : memref<1x32xf32, #tpu.memory_space<vmem>>, vector<1x32xf32>
    %33 = vector.broadcast %32 : vector<1x32xf32> to vector<16x32xf32>
    %34 = arith.mulf %31, %33 : vector<16x32xf32>
    %c0_18 = arith.constant 0 : index
    %c0_19 = arith.constant 0 : index
    %35 = vector.load %arg7[%c0_18, %c0_19] : memref<1x32xf32, #tpu.memory_space<vmem>>, vector<1x32xf32>
    %36 = vector.broadcast %35 : vector<1x32xf32> to vector<16x32xf32>
    %37 = arith.addf %34, %36 : vector<16x32xf32>
    %c0_20 = arith.constant 0 : index
    %c0_21 = arith.constant 0 : index
    %38 = vector.load %arg8[%c0_20, %c0_21] : memref<16x32xf32, #tpu.memory_space<vmem>>, vector<16x32xf32>
    tpu.vector_store %arg8[%c0_20, %c0_21], %37 {strides = array<i32>} : memref<16x32xf32, #tpu.memory_space<vmem>>, vector<16x32xf32>,
    return
  }
  func.func @transform_0(%arg0: i32) -> (i32, i32) {
    %c0_i32 = arith.constant 0 : i32
    %c0_i32_0 = arith.constant 0 : i32
    return %arg0, %c0_i32 : i32, i32
  }
  func.func @transform_1(%arg0: i32) -> (i32, i32) {
    %c0_i32 = arith.constant 0 : i32
    %c0_i32_0 = arith.constant 0 : i32
    %c0_i32_1 = arith.constant 0 : i32
    return %c0_i32, %c0_i32_0 : i32, i32
  }
  func.func @transform_2(%arg0: i32) -> (i32, i32) {
    %c0_i32 = arith.constant 0 : i32
    %c0_i32_0 = arith.constant 0 : i32
    %c0_i32_1 = arith.constant 0 : i32
    return %c0_i32, %c0_i32_0 : i32, i32
  }
  func.func @transform_3(%arg0: i32) -> (i32, i32) {
    %c0_i32 = arith.constant 0 : i32
    %c0_i32_0 = arith.constant 0 : i32
    %c0_i32_1 = arith.constant 0 : i32
    return %c0_i32, %c0_i32_0 : i32, i32
  }
  func.func @transform_4(%arg0: i32) -> (i32, i32) {
    %c0_i32 = arith.constant 0 : i32
    %c0_i32_0 = arith.constant 0 : i32
    %c0_i32_1 = arith.constant 0 : i32
    return %c0_i32, %c0_i32_0 : i32, i32
  }
  func.func @transform_5(%arg0: i32) -> (i32, i32) {
    %c0_i32 = arith.constant 0 : i32
    %c0_i32_0 = arith.constant 0 : i32
    %c0_i32_1 = arith.constant 0 : i32
    return %c0_i32, %c0_i32_0 : i32, i32
  }
  func.func @transform_6(%arg0: i32) -> (i32, i32) {
    %c0_i32 = arith.constant 0 : i32
    %c0_i32_0 = arith.constant 0 : i32
    %c0_i32_1 = arith.constant 0 : i32
    return %c0_i32, %c0_i32_0 : i32, i32
  }
  func.func @transform_7(%arg0: i32) -> (i32, i32) {
    %c0_i32 = arith.constant 0 : i32
    %c0_i32_0 = arith.constant 0 : i32
    return %arg0, %c0_i32 : i32, i32
  }
}

</mosaic_0001>

<bundles_post_ra>
// kernel: _lambda_.35
= control target key start
LH: loop header
LB: loop body
LE: loop exit
PB: predicated region body
PF: predicated region fallthrough
CT: control target
= control target key end

     0   :  { %vm23_vm0 = vcmask 261120   ;;  %s136_s0 = inlined_call_operand.vmem [shape: f32[16,32], index: 0, kind: input, shape index: {}]   ;;  %s137_s1 = inlined_call_operand.vmem [shape: f32[16,32], index: 1, kind: input, shape index: {}]   ;;  %s138_s2 = inlined_call_operand.vmem [shape: f32[1,32], index: 2, kind: input, shape index: {}]   ;;  %s139_s3 = inlined_call_operand.vmem [shape: f32[1,32], index: 3, kind: input, shape index: {}]   ;;  %s140_s4 = inlined_call_operand.vmem [shape: f32[16,32], index: 4, kind: output, shape index: {}]  }
   0x1   :  { %v17_v0 = vld [vmem:[%s136_s0] sm:$0xff]  ;;  %v18_v2 = vld [vmem:[%s136_s0 + $0x8] sm:$0xff] }
   0x2   :  { %v19_v1 = vld [vmem:[%s137_s1] sm:$0xff]  ;;  %v20_v4 = vld [vmem:[%s137_s1 + $0x8] sm:$0xff] }
   0x3   :  { %v21_v3 = vadd.f32 %v19_v1, %v17_v0  ;;  %v22_v5 = vadd.f32 %v20_v4, %v18_v2  ;;  %v75_v25 = vld [vmem:[%s138_s2] ss:$0 sm:$0xff] }
   0x4   :  { %v76_v27 = vld [vmem:[%s139_s3] ss:$0 sm:$0xff] }
   0x5   :  { %v24_v6 = vsel %vm23_vm0, %v21_v3, 0.0  ;;  %v27_v7 = vsel %vm23_vm0, %v22_v5, 0.0 }
   0x6   :  { %25 = vadd.xlane.f32.xlu0 %v24_v6 }
   0xa   :  { %28 = vadd.xlane.f32.xlu0 %v27_v7 }
  0x93   :  { %v26_v8 = vpop.xlane.xlu0 %25 }
  0x94   :  { %v31_v9 = vmul.f32 0.03125, %v26_v8 }
  0x96   :  { %v33_v10 = vsub.f32 %v21_v3, %v31_v9 }
  0x97   :  { %v29_v11 = vpop.xlane.xlu0 %28 }
  0x98   :  { %v32_v12 = vmul.f32 0.03125, %v29_v11  ;;  %v35_v13 = vmul.f32 %v33_v10, %v33_v10 }
  0x9a   :  { %v34_v14 = vsub.f32 %v22_v5, %v32_v12  ;;  %v37_v15 = vsel %vm23_vm0, %v35_v13, 0.0 }
  0x9b   :  { %38 = vadd.xlane.f32.xlu1 %v37_v15 }
  0x9c   :  { %v36_v16 = vmul.f32 %v34_v14, %v34_v14 }
  0x9e   :  { %v40_v17 = vsel %vm23_vm0, %v36_v16, 0.0 }
  0x9f   :  { %41 = vadd.xlane.f32.xlu1 %v40_v17 }
 0x128   :  { %v39_v18 = vpop.xlane.xlu1 %38 }
 0x129   :  { %v43_v19 = vmul.f32 0.03125, %v39_v18 }
 0x12b   :  { %v45_v20 = vadd.f32 1e-05, %v43_v19 }
 0x12c   :  { %v42_v21 = vpop.xlane.xlu1 %41 }
 0x12d   :  { %77 = vrsqrt.f32 %v45_v20  ;;  %v44_v22 = vmul.f32 0.03125, %v42_v21 }
 0x12f   :  { %v46_v23 = vadd.f32 1e-05, %v44_v22 }
 0x131   :  { %79 = vrsqrt.f32 %v46_v23 }
 0x137   :  { %v78_v24 = vpop.eup %77 }
 0x138   :  { %v49_v26 = vmul.f32 %v78_v24, %v33_v10 }
 0x13a   :  { %v58_v28 = vmul.f32 %v75_v25, %v49_v26 }
 0x13b   :  { %v80_v29 = vpop.eup %79 }
 0x13c   :  { %v67_v30 = vadd.f32 %v76_v27, %v58_v28  ;;  %v50_v31 = vmul.f32 %v80_v29, %v34_v14 }
 0x13e   :  { %69 = vst.msk [vmem:[%s140_s4] sm:$0xff] %vm23_vm0, %v67_v30  ;;  %v59_v32 = vmul.f32 %v75_v25, %v50_v31 }
 0x140   :  { %v68_v33 = vadd.f32 %v76_v27, %v59_v32 }
 0x142   :  { %70 = vst.msk [vmem:[%s140_s4 + $0x8] sm:$0xff] %vm23_vm0, %v68_v33 }

// kernel: _lambda_.24
= control target key start
LH: loop header
LB: loop body
LE: loop exit
PB: predicated region body
PF: predicated region fallthrough
CT: control target
= control target key end

     0   :  { %v437_v1 = vmov 0   ;;  %vm71_vm0 = vcmask 261120   ;;  %s725_s2 = inlined_call_operand.vmem [shape: bf16[32,32], index: 2, kind: input, shape index: {}]   ;;  %s726_s0 = inlined_call_operand.vmem [shape: f32[160,32], index: 0, kind: input, shape index: {}]   ;;  %s727_s1 = inlined_call_operand.vmem [shape: f32[160,1], index: 1, kind: input, shape index: {}]   ;;  %s728_s3 = inlined_call_operand.vmem [shape: f32[1,32], index: 3, kind: input, shape index: {}]   ;;  %s729_s4 = inlined_call_operand.vmem [shape: f32[160,32], index: 4, kind: output, shape index: {}]  }
   0x1   :  { %v435_v0 = vld [vmem:[%s725_s2] sm:$0xff]   ;;  %434 = vset.pattern.permute.xlu1 %v437_v1  ;;  %433 = vset.pattern.permute.xlu0 %v437_v1  ;;  %v436_v2 = vld [vmem:[%s725_s2 + $0x8] sm:$0xff]   ;;  %v20_v8 = vld [vmem:[%s726_s0 + $0x10] sm:$0xff] }
   0x2   :  { %404 = vmatprep.subr.bf16.mxu0 %v435_v0  ;;  %428 = vmatprep.subr.bf16.mxu1 %v435_v0  ;;  %v18_v3 = vld [vmem:[%s726_s0] sm:$0xff]  ;;  %v19_v4 = vld [vmem:[%s726_s0 + $0x8] sm:$0xff]  ;;  %v21_v9 = vld [vmem:[%s726_s0 + $0x18] sm:$0xff] }
   0x3   :  { %v30_v5 = vld [vmem:[%s726_s0 + $0x60] sm:$0xff]  ;;  %405 = vmatpush3.bf16.msra.mxu0 %v435_v0  ;;  %430 = vmatpush3.bf16.msra.mxu1 %v435_v0  ;;  %v38_v6 = vpack.c.bf16 %v19_v4, %v18_v3  ;;  %v31_v7 = vld [vmem:[%s726_s0 + $0x68] sm:$0xff]  ;;  %v32_v11 = vld [vmem:[%s726_s0 + $0x70] sm:$0xff]  ;;  %v39_v17 = vpack.c.bf16 %v21_v9, %v20_v8 }
   0x4   :  { %406 = vmatprep.subr.bf16.mxu0 %v436_v2  ;;  %429 = vmatprep.subr.bf16.mxu1 %v436_v2  ;;  %v44_v10 = vpack.c.bf16 %v31_v7, %v30_v5  ;;  %v33_v12 = vld [vmem:[%s726_s0 + $0x78] sm:$0xff]  ;;  %v22_v13 = vld [vmem:[%s726_s0 + $0x20] sm:$0xff]  ;;  %v23_v14 = vld [vmem:[%s726_s0 + $0x28] sm:$0xff] }
   0x5   :  { %408 = vmatprep.mubr.msk.bf16.mxu0 %vm71_vm0, %v38_v6  ;;  %v34_v15 = vld [vmem:[%s726_s0 + $0x80] sm:$0xff]  ;;  %v35_v16 = vld [vmem:[%s726_s0 + $0x88] sm:$0xff]  ;;  %v45_v18 = vpack.c.bf16 %v33_v12, %v32_v11  ;;  %v40_v19 = vpack.c.bf16 %v23_v14, %v22_v13  ;;  %v217_v21 = vld [vmem:[%s727_s1 + $0x10] sm:$0xff] }
   0x6   :  { %420 = vmatprep.mubr.msk.bf16.mxu1 %vm71_vm0, %v44_v10  ;;  %v46_v20 = vpack.c.bf16 %v35_v16, %v34_v15  ;;  %247 = vperm.xlu1 %434, %v217_v21   ;;  %v215_v22 = vld [vmem:[%s727_s1] sm:$0xff]  ;;  %v24_v23 = vld [vmem:[%s726_s0 + $0x30] sm:$0xff]  ;;  %v218_v24 = vld [vmem:[%s727_s1 + $0x18] sm:$0xff] }
   0x7   :  { %407 = vmatpush3.bf16.msra.mxu0 %v436_v2  ;;  %431 = vmatpush3.bf16.msra.mxu1 %v436_v2  ;;  %v25_v25 = vld [vmem:[%s726_s0 + $0x38] sm:$0xff]  ;;  %v36_v26 = vld [vmem:[%s726_s0 + $0x90] sm:$0xff]  ;;  %v26_v28 = vld [vmem:[%s726_s0 + $0x40] sm:$0xff] }
   0x8   :  { %v37_v27 = vld [vmem:[%s726_s0 + $0x98] sm:$0xff]  ;;  %v27_v29 = vld [vmem:[%s726_s0 + $0x48] sm:$0xff]  ;;  %237 = vperm.xlu0 %433, %v215_v22   ;;  %v41_v31 = vpack.c.bf16 %v25_v25, %v24_v23  ;;  %v219_v35 = vld [vmem:[%s727_s1 + $0x20] sm:$0xff] }
   0x9   :  { %v216_v30 = vld [vmem:[%s727_s1 + $0x8] sm:$0xff]  ;;  %v47_v32 = vpack.c.bf16 %v37_v27, %v36_v26  ;;  %v42_v34 = vpack.c.bf16 %v27_v29, %v26_v28  ;;  %v222_v36 = vld [vmem:[%s727_s1 + $0x38] sm:$0xff]  ;;  %v28_v37 = vld [vmem:[%s726_s0 + $0x50] sm:$0xff] }
   0xa   :  { %409 = vmatmul.mubr.msk.bf16.vlgmr.msra.gmra.mrb[0].mxu0 %vm71_vm0, %v39_v17  ;;  %421 = vmatmul.mubr.msk.bf16.vlgmr.msra.gmra.mrb[0].mxu1 %vm71_vm0, %v45_v18  ;;  %v220_v33 = vld [vmem:[%s727_s1 + $0x28] sm:$0xff]  ;;  %v29_v38 = vld [vmem:[%s726_s0 + $0x58] sm:$0xff]  ;;  %v221_v39 = vld [vmem:[%s727_s1 + $0x30] sm:$0xff] }
   0xb   :  { %412 = vmatprep.mubr.msk.bf16.mxu0 %vm71_vm0, %v40_v19  ;;  %424 = vmatprep.mubr.msk.bf16.mxu1 %vm71_vm0, %v46_v20  ;;  %v43_v40 = vpack.c.bf16 %v29_v38, %v28_v37  ;;  %v224_v41 = vld [vmem:[%s727_s1 + $0x48] sm:$0xff]  ;;  %v223_v42 = vld [vmem:[%s727_s1 + $0x40] sm:$0xff]  ;;  %v226_v43 = vld [vmem:[%s727_s1 + $0x58] sm:$0xff] }
   0xc   :  { %252 = vperm.xlu1 %434, %v218_v24   ;;  %242 = vperm.xlu0 %433, %v216_v30   ;;  %v225_v44 = vld [vmem:[%s727_s1 + $0x50] sm:$0xff]  ;;  %v228_v45 = vld [vmem:[%s727_s1 + $0x68] sm:$0xff]  ;;  %v227_v46 = vld [vmem:[%s727_s1 + $0x60] sm:$0xff] }
   0xd   :  { %v230_v47 = vld [vmem:[%s727_s1 + $0x78] sm:$0xff]  ;;  %v229_v48 = vld [vmem:[%s727_s1 + $0x70] sm:$0xff]  ;;  %v232_v49 = vld [vmem:[%s727_s1 + $0x88] sm:$0xff] }
   0xe   :  { %v231_v50 = vld [vmem:[%s727_s1 + $0x80] sm:$0xff]  ;;  %v234_v51 = vld [vmem:[%s727_s1 + $0x98] sm:$0xff]  ;;  %v233_v52 = vld [vmem:[%s727_s1 + $0x90] sm:$0xff] }
   0xf   :  { %v616_v4 = vld [vmem:[%s728_s3] ss:$0 sm:$0xff] }
  0x10   :  { %262 = vperm.xlu1 %434, %v220_v33   ;;  %257 = vperm.xlu0 %433, %v219_v35  }
  0x12   :  { %413 = vmatmul.mubr.msk.bf16.gmra.mrb[4].mxu0 %vm71_vm0, %v41_v31  ;;  %425 = vmatmul.mubr.msk.bf16.gmra.mrb[4].mxu1 %vm71_vm0, %v47_v32 }
  0x13   :  { %416 = vmatprep.mubr.msk.bf16.mxu0 %vm71_vm0, %v42_v34 }
  0x14   :  { %272 = vperm.xlu1 %434, %v222_v36   ;;  %267 = vperm.xlu0 %433, %v221_v39  }
  0x18   :  { %282 = vperm.xlu1 %434, %v224_v41   ;;  %277 = vperm.xlu0 %433, %v223_v42  }
  0x1a   :  { %417 = vmatmul.mubr.msk.bf16.gmra.mrb[8].mxu0 %vm71_vm0, %v43_v40 }
  0x1c   :  { %292 = vperm.xlu1 %434, %v226_v43   ;;  %287 = vperm.xlu0 %433, %v225_v44  }
  0x20   :  { %302 = vperm.xlu1 %434, %v228_v45   ;;  %297 = vperm.xlu0 %433, %v227_v46  }
  0x24   :  { %312 = vperm.xlu1 %434, %v230_v47   ;;  %307 = vperm.xlu0 %433, %v229_v48  }
  0x28   :  { %322 = vperm.xlu1 %434, %v232_v49   ;;  %317 = vperm.xlu0 %433, %v231_v50  }
  0x2c   :  { %332 = vperm.xlu1 %434, %v234_v51   ;;  %327 = vperm.xlu0 %433, %v233_v52  }
  0x85   :  { %v248_v54 = vpop.permute.xlu1 %247 }
  0x87   :  { %v238_v53 = vpop.permute.xlu0 %237 }
  0x8b   :  { %v243_v55 = vpop.permute.xlu0 %242  ;;  %v253_v56 = vpop.permute.xlu1 %252 }
  0x8f   :  { %v599_v57 = vpop.permute.xlu0 %257  ;;  %v601_v58 = vpop.permute.xlu1 %262 }
  0x93   :  { %v268_v59 = vpop.permute.xlu0 %267  ;;  %v603_v60 = vpop.permute.xlu1 %272 }
  0x97   :  { %v605_v61 = vpop.permute.xlu0 %277  ;;  %v607_v62 = vpop.permute.xlu1 %282 }
  0x9b   :  { %v609_v63 = vpop.permute.xlu0 %287  ;;  %v611_v0 = vpop.permute.xlu1 %292 }
  0x9f   :  { %v298_v1 = vpop.permute.xlu0 %297  ;;  %v303_v2 = vpop.permute.xlu1 %302 }
  0xa3   :  { %v308_v3 = vpop.permute.xlu0 %307  ;;  %v313_v5 = vpop.permute.xlu1 %312 }
  0xa7   :  { %v318_v6 = vpop.permute.xlu0 %317  ;;  %v323_v29 = vpop.permute.xlu1 %322 }
  0xab   :  { %v328_v32 = vpop.permute.xlu0 %327  ;;  %v333_v49 = vpop.permute.xlu1 %332 }
  0xdd   :  { %v410_v7 = vpop.f32.mrb[0].mxu0  ;;  %v422_v8 = vpop.f32.mrb[0].mxu1 }
  0xde   :  { %v145_v9 = vadd.f32 %v410_v7, %v616_v4  ;;  %v193_v10 = vadd.f32 %v422_v8, %v616_v4  ;;  %v136_v11 = vpop.f32.mrb[1].mxu0  ;;  %v184_v12 = vpop.f32.mrb[1].mxu1 }
  0xdf   :  { %v137_v13 = vadd.f32 %v616_v4, %v136_v11  ;;  %v185_v14 = vadd.f32 %v616_v4, %v184_v12  ;;  %v411_v15 = vpop.f32.mrb[2].mxu0  ;;  %v423_v16 = vpop.f32.mrb[2].mxu1 }
  0xe0   :  { %v337_v17 = vmul.f32 %v248_v54, %v145_v9  ;;  %v349_v18 = vmul.f32 %v308_v3, %v193_v10  ;;  %v148_v19 = vadd.f32 %v411_v15, %v616_v4  ;;  %v196_v20 = vadd.f32 %v423_v16, %v616_v4  ;;  %v139_v21 = vpop.f32.mrb[3].mxu0  ;;  %v187_v22 = vpop.f32.mrb[3].mxu1 }
  0xe1   :  { %v335_v23 = vmul.f32 %v238_v53, %v137_v13  ;;  %v347_v24 = vmul.f32 %v298_v1, %v185_v14  ;;  %v140_v25 = vadd.f32 %v616_v4, %v139_v21  ;;  %v188_v26 = vadd.f32 %v616_v4, %v187_v22 }
  0xe2   :  { %357 = vst.msk [vmem:[%s729_s4 + $0x10] sm:$0xff] %vm71_vm0, %v337_v17  ;;  %369 = vst.msk [vmem:[%s729_s4 + $0x70] sm:$0xff] %vm71_vm0, %v349_v18  ;;  %v338_v27 = vmul.f32 %v253_v56, %v148_v19  ;;  %v350_v28 = vmul.f32 %v313_v5, %v196_v20 }
  0xe3   :  { %355 = vst.msk [vmem:[%s729_s4] sm:$0xff] %vm71_vm0, %v335_v23  ;;  %367 = vst.msk [vmem:[%s729_s4 + $0x60] sm:$0xff] %vm71_vm0, %v347_v24  ;;  %v336_v30 = vmul.f32 %v243_v55, %v140_v25  ;;  %v348_v31 = vmul.f32 %v303_v2, %v188_v26 }
  0xe4   :  { %358 = vst.msk [vmem:[%s729_s4 + $0x18] sm:$0xff] %vm71_vm0, %v338_v27  ;;  %370 = vst.msk [vmem:[%s729_s4 + $0x78] sm:$0xff] %vm71_vm0, %v350_v28 }
  0xe5   :  { %356 = vst.msk [vmem:[%s729_s4 + $0x8] sm:$0xff] %vm71_vm0, %v336_v30  ;;  %368 = vst.msk [vmem:[%s729_s4 + $0x68] sm:$0xff] %vm71_vm0, %v348_v31  ;;  %v414_v33 = vpop.f32.mrb[4].mxu0  ;;  %v426_v34 = vpop.f32.mrb[4].mxu1 }
  0xe6   :  { %v161_v35 = vadd.f32 %v414_v33, %v616_v4  ;;  %v209_v36 = vadd.f32 %v426_v34, %v616_v4  ;;  %v152_v37 = vpop.f32.mrb[5].mxu0  ;;  %v200_v38 = vpop.f32.mrb[5].mxu1 }
  0xe7   :  { %v153_v39 = vadd.f32 %v616_v4, %v152_v37  ;;  %v201_v40 = vadd.f32 %v616_v4, %v200_v38  ;;  %v415_v41 = vpop.f32.mrb[6].mxu0  ;;  %v427_v42 = vpop.f32.mrb[6].mxu1 }
  0xe8   :  { %v341_v43 = vmul.f32 %v268_v59, %v161_v35  ;;  %v353_v44 = vmul.f32 %v328_v32, %v209_v36  ;;  %v164_v45 = vadd.f32 %v415_v41, %v616_v4  ;;  %v212_v46 = vadd.f32 %v427_v42, %v616_v4  ;;  %v155_v47 = vpop.f32.mrb[7].mxu0  ;;  %v203_v48 = vpop.f32.mrb[7].mxu1 }
  0xe9   :  { %v339_v50 = vmul.f32 %v599_v57, %v153_v39  ;;  %v351_v51 = vmul.f32 %v318_v6, %v201_v40  ;;  %v156_v52 = vadd.f32 %v616_v4, %v155_v47  ;;  %v204_v53 = vadd.f32 %v616_v4, %v203_v48 }
  0xea   :  { %361 = vst.msk [vmem:[%s729_s4 + $0x30] sm:$0xff] %vm71_vm0, %v341_v43  ;;  %373 = vst.msk [vmem:[%s729_s4 + $0x90] sm:$0xff] %vm71_vm0, %v353_v44  ;;  %v342_v54 = vmul.f32 %v603_v60, %v164_v45  ;;  %v354_v55 = vmul.f32 %v333_v49, %v212_v46 }
  0xeb   :  { %359 = vst.msk [vmem:[%s729_s4 + $0x20] sm:$0xff] %vm71_vm0, %v339_v50  ;;  %371 = vst.msk [vmem:[%s729_s4 + $0x80] sm:$0xff] %vm71_vm0, %v351_v51  ;;  %v340_v56 = vmul.f32 %v601_v58, %v156_v52  ;;  %v352_v57 = vmul.f32 %v323_v29, %v204_v53 }
  0xec   :  { %362 = vst.msk [vmem:[%s729_s4 + $0x38] sm:$0xff] %vm71_vm0, %v342_v54  ;;  %374 = vst.msk [vmem:[%s729_s4 + $0x98] sm:$0xff] %vm71_vm0, %v354_v55 }
  0xed   :  { %360 = vst.msk [vmem:[%s729_s4 + $0x28] sm:$0xff] %vm71_vm0, %v340_v56  ;;  %372 = vst.msk [vmem:[%s729_s4 + $0x88] sm:$0xff] %vm71_vm0, %v352_v57  ;;  %v418_v58 = vpop.f32.mrb[8].mxu0 }
  0xee   :  { %v177_v59 = vadd.f32 %v418_v58, %v616_v4  ;;  %v168_v60 = vpop.f32.mrb[9].mxu0 }
  0xef   :  { %v169_v1 = vadd.f32 %v616_v4, %v168_v60  ;;  %v419_v2 = vpop.f32.mrb[10].mxu0 }
  0xf0   :  { %v345_v3 = vmul.f32 %v609_v63, %v177_v59  ;;  %v180_v5 = vadd.f32 %v419_v2, %v616_v4  ;;  %v171_v6 = vpop.f32.mrb[11].mxu0 }
  0xf1   :  { %v343_v7 = vmul.f32 %v605_v61, %v169_v1  ;;  %v172_v8 = vadd.f32 %v616_v4, %v171_v6 }
  0xf2   :  { %365 = vst.msk [vmem:[%s729_s4 + $0x50] sm:$0xff] %vm71_vm0, %v345_v3  ;;  %v346_v9 = vmul.f32 %v611_v0, %v180_v5 }
  0xf3   :  { %363 = vst.msk [vmem:[%s729_s4 + $0x40] sm:$0xff] %vm71_vm0, %v343_v7  ;;  %v344_v63 = vmul.f32 %v607_v62, %v172_v8 }
  0xf4   :  { %366 = vst.msk [vmem:[%s729_s4 + $0x58] sm:$0xff] %vm71_vm0, %v346_v9 }
  0xf5   :  { %364 = vst.msk [vmem:[%s729_s4 + $0x48] sm:$0xff] %vm71_vm0, %v344_v63 }

// kernel: _lambda_.34
= control target key start
LH: loop header
LB: loop body
LE: loop exit
PB: predicated region body
PF: predicated region fallthrough
CT: control target
= control target key end

     0   :  { %s1275_s21 = smov 0   ;;  %s1277_s22 = smov 0   ;;  %s1417_s0 = inlined_call_operand.vmem [shape: f32[2,8,32], index: 0, kind: input, shape index: {}]   ;;  %s1418_s1 = inlined_call_operand.vmem [shape: f32[2,8,32], index: 1, kind: input, shape index: {}]   ;;  %s1419_s2 = inlined_call_operand.vmem [shape: bf16[32,96], index: 2, kind: input, shape index: {}]   ;;  %s1420_s3 = inlined_call_operand.vmem [shape: f32[1,96], index: 3, kind: input, shape index: {}]   ;;  %s1421_s4 = inlined_call_operand.vmem [shape: bf16[32,32], index: 4, kind: input, shape index: {}]   ;;  %s1422_s5 = inlined_call_operand.vmem [shape: f32[1,32], index: 5, kind: input, shape index: {}]   ;;  %s1423_s6 = inlined_call_operand.vmem [shape: f32[2,8,32], index: 6, kind: output, shape index: {}]  }
   0x1   :  { %s1279_s23 = smov 0  }
   0x2 LB: > { %s28_s24 = sadd.s32 1, %s1221_s22  ;;  %p1026_p0 = scmp.ge.s32.totalorder %s1225_s23, 1  ;;  %s1225_s23 = sphi %s1279_s23, %s16_s23   ;;  %s1221_s22 = sphi %s1277_s22, %s1425_s22   ;;  %s1217_s21 = sphi %s1275_s21, %s1424_s21  }
   0x3   : > { %p30_p1 = scmp.ge.s32.totalorder %s28_s24, 2  ;;  %p234_p2 = scmp.lt.s32.totalorder %s1225_s23, 3 }
   0x5   : > { %s1427_s24 = smov (%p30_p1, %s28_s24), 0  ;;  %p235_p3 = pnand %p1026_p0, %p234_p2 }
   0x6   : > { %v1183_v0 = vld [vmem:[%s1419_s2] sm:$0xff] (!%p235_p3)   ;;  %v1227_v1 = vmov (!%p235_p3), 0.0   ;;  %v1184_v2 = vld [vmem:[%s1419_s2 + $0x8] sm:$0xff] (!%p235_p3)   ;;  %vm1228_vm0 = vmmov (!%p235_p3), 0   ;;  %p269_p4 = scmp.lt.s32.totalorder (!%p235_p3), %s1217_s21, 1  ;;  %vm312_vm1 = vcmask (!%p235_p3), 261120  }
   0x7   : > { %238 = sbr.rel (%p235_p3) target bundleno = 1468 (0x5bc), region = 44  ;;  %1074 = vmatprep.subr.bf16.mxu0 (!%p235_p3), %v1227_v1  ;;  %1082 = vmatprep.subr.bf16.mxu1 (!%p235_p3), %v1227_v1  ;;  %v1326_v7 = vld [vmem:[%s1420_s3] ss:$0 sm:$0xff] (!%p235_p3)  ;;  %s1229_s14 = smov (!%p235_p3), 96   ;;  %vm415_vm2 = vcmask (!%p235_p3), 64512   ;;  %vm478_vm3 = vcmask (!%p235_p3), 1043456  }
   0x8   : > { %1075 = vmatpush3.bf16.msra.mxu0 (!%p235_p3), %v1183_v0  ;;  %1078 = vmatprep.mubr.msk.bf16.mxu0 (!%p235_p3), %vm1228_vm0, %v1227_v1  ;;  %s1230_s15 = smov (!%p235_p3), 120   ;;  %s1231_s16 = smov (!%p235_p3), 88   ;;  %vm867_vm4 = vcmask (!%p235_p3), 130048   ;;  %vm869_vm5 = vcmask (!%p235_p3), 195584  }
   0x9   : > { %1076 = vmatprep.subr.bf16.mxu0 (!%p235_p3), %v1227_v1  ;;  %1086 = vmatprep.mubr.msk.bf16.mxu1 (!%p235_p3), %vm1228_vm0, %v1227_v1  ;;  %s1232_s17 = smov (!%p235_p3), 80   ;;  %s1233_s18 = smov (!%p235_p3), 112  }
   0xa   : > { %s1234_s19 = smov (!%p235_p3), 72   ;;  %s1235_s20 = smov (!%p235_p3), 104  }
   0xb   : > { %s1237_s27 = smov (!%p235_p3), 8   ;;  %s1238_s7 = smov (!%p235_p3), 16  }
   0xc   : > { %1077 = vmatpush3.bf16.msra.mxu0 (!%p235_p3), %v1184_v2 }
   0xd   : > { %1090 = vmatprep.subr.bf16.mxu0 (!%p235_p3), %v1227_v1 }
   0xe   : > { %s1429_s21 = smov (!%p269_p4, %s1217_s21), 1 }
   0xf   : > { %s1306_s29 = sshll.u32 %s1429_s21, 3  ;;  %s1236_s21 = smov 64  }
  0x10   : > { %s272_s8 = scalar_lea.vmem %s1417_s0, %s1306_s29  ;;  %s276_s11 = scalar_lea.vmem %s1418_s1, %s1306_s29 }
  0x11   : > { %v1317_v3 = vld [vmem:[%s272_s8] sm:$0xff]  ;;  %s1239_s8 = smov 24   ;;  %s283_s13 = scalar_lea.vmem %s1423_s6, %s1306_s29 }
  0x12   : > { %v286_v4 = vld [vmem:[%s276_s11] sm:$0xff]  ;;  %v356_v28 = vpack.c.bf16 %v1317_v3, %v1317_v3 }
  0x13   : > { %v287_v5 = vadd.f32 %v286_v4, %v1317_v3 }
  0x15   : > { %v293_v6 = vpack.c.bf16 %v287_v5, %v287_v5 }
  0x17   : > { %1079 = vmatmul.mubr.msk.bf16.vlgmr.msra.gmra.mrb[0].mxu0 %vm312_vm1, %v293_v6 }
  0x18   : > { %1092 = vmatprep.mubr.msk.bf16.mxu0 %vm1228_vm0, %v1227_v1 }
  0xea   : > { %v350_v8 = vpop.f32.mrb[0].mxu0 }
  0xeb   : > { %v351_v9 = vadd.f32 %v1326_v7, %v350_v8  ;;  %v1080_v10 = vpop.f32.mrb[1].mxu0 }
  0xec   : > { %v353_v11 = vpop.f32.mrb[2].mxu0 }
  0xed   : > { %v409_v12 = vmul.f32 0.35355338, %v351_v9  ;;  %v411_v13 = vpack.c.bf16 %v351_v9, %v351_v9  ;;  %v1081_v14 = vpop.f32.mrb[3].mxu0 }
  0xef   : > { %v410_v15 = vpack.c.bf16 %v409_v12, %v409_v12  ;;  %413 = vrot.lane.b32.xlu0 %v411_v13, %s1229_s14 }
  0xf1   : > { %523 = vrot.lane.b32.xlu1 %v410_v15, %s1230_s15 }
  0xf3   : > { %525 = vrot.lane.b32.xlu0 %v411_v13, %s1231_s16 }
  0xf5   : > { %636 = vrot.lane.b32.xlu1 %v411_v13, %s1232_s17 }
  0xf7   : > { %634 = vrot.lane.b32.xlu0 %v410_v15, %s1233_s18 }
  0xf9   : > { %746 = vrot.lane.b32.xlu1 %v411_v13, %s1234_s19 }
  0xfb   : > { %744 = vrot.lane.b32.xlu0 %v410_v15, %s1235_s20 }
  0xfd   : > { %357 = vrot.lane.b32.xlu1 %v1183_v0, %s1236_s21 }
  0xff   : > { %359 = vrot.lane.b32.xlu0 %v1184_v2, %s1236_s21 }
 0x161   : > { %v414_v16 = vpop.permute.xlu0 %413 }
 0x162   : > { %v420_v17 = vsel %vm415_vm2, %v414_v16, 0 }
 0x163   : > { %1091 = vmatpush3.bf16.xpose.msra.mxu0 %v420_v17  ;;  %v524_v18 = vpop.permute.xlu1 %523 }
 0x164   : > { %1102 = vmatprep.subr.bf16.mxu0 %v1227_v1 }
 0x165   : > { %v526_v19 = vpop.permute.xlu0 %525 }
 0x166   : > { %v531_v20 = vsel %vm415_vm2, %v526_v19, 0 }
 0x167   : > { %v637_v21 = vpop.permute.xlu1 %636 }
 0x168   : > { %v642_v24 = vsel %vm415_vm2, %v637_v21, 0 }
 0x169   : > { %v635_v22 = vpop.permute.xlu0 %634 }
 0x16a   : > { %1093 = vmatmul.mubr.msk.bf16.vlgmr.msra.gmra.mrb[4].mxu0 %vm415_vm2, %v410_v15 }
 0x16b   : > { %1103 = vmatpush3.bf16.xpose.msra.mxu0 %v531_v20  ;;  %1104 = vmatprep.mubr.msk.bf16.mxu0 %vm1228_vm0, %v1227_v1  ;;  %v747_v23 = vpop.permute.xlu1 %746 }
 0x16c   : > { %1114 = vmatprep.subr.bf16.mxu0 %v1227_v1  ;;  %v752_v29 = vsel %vm415_vm2, %v747_v23, 0 }
 0x16d   : > { %v745_v25 = vpop.permute.xlu0 %744 }
 0x16f   : > { %v358_v26 = vpop.permute.xlu1 %357 }
 0x170   : > { %1083 = vmatpush3.bf16.msra.mxu1 %v358_v26 }
 0x171   : > { %v360_v27 = vpop.permute.xlu0 %359  ;;  %1084 = vmatprep.subr.bf16.mxu1 %v1227_v1 }
 0x172   : > { %1105 = vmatmul.mubr.msk.bf16.vlgmr.msra.gmra.mrb[8].mxu0 %vm415_vm2, %v524_v18 }
 0x173   : > { %1115 = vmatpush3.bf16.xpose.msra.mxu0 %v642_v24  ;;  %1116 = vmatprep.mubr.msk.bf16.mxu0 %vm1228_vm0, %v1227_v1 }
 0x174   : > { %1126 = vmatprep.subr.bf16.mxu0 %v1227_v1  ;;  %1085 = vmatpush3.bf16.msra.mxu1 %v360_v27 }
 0x175   : > { %1096 = vmatprep.subr.bf16.mxu1 %v1227_v1 }
 0x177   : > { %1087 = vmatmul.mubr.msk.bf16.vlgmr.msra.gmra.mrb[0].mxu1 %vm312_vm1, %v356_v28 }
 0x178   : > { %1098 = vmatprep.mubr.msk.bf16.mxu1 %vm1228_vm0, %v1227_v1 }
 0x17a   : > { %1117 = vmatmul.mubr.msk.bf16.vlgmr.msra.gmra.mrb[12].mxu0 %vm415_vm2, %v635_v22 }
 0x17b   : > { %1127 = vmatpush3.bf16.xpose.msra.mxu0 %v752_v29  ;;  %1128 = vmatprep.mubr.msk.bf16.mxu0 %vm1228_vm0, %v1227_v1 }
 0x17c   : > { %1138 = vmatprep.subr.bf16.mxu0 %v1227_v1 }
 0x182   : > { %1129 = vmatmul.mubr.msk.bf16.vlgmr.msra.gmra.mrb[16].mxu0 %vm415_vm2, %v745_v25 }
 0x183   : > { %1142 = vmatprep.mubr.msk.bf16.mxu0 %vm1228_vm0, %v1227_v1 }
 0x23d   : > { %v456_v30 = vpop.f32.mrb[4].mxu0 }
 0x23e   : > { %v1094_v31 = vpop.f32.mrb[5].mxu0  ;;  %v462_v32 = vsel %vm415_vm2, %v456_v30, -inf }
 0x23f   : > { %463 = vmax.xlane.f32.xlu1 %v462_v32  ;;  %v459_v33 = vpop.f32.mrb[6].mxu0 }
 0x240   : > { %v1095_v34 = vpop.f32.mrb[7].mxu0 }
 0x245   : > { %v567_v35 = vpop.f32.mrb[8].mxu0 }
 0x246   : > { %v1106_v36 = vpop.f32.mrb[9].mxu0  ;;  %v573_v37 = vsel %vm415_vm2, %v567_v35, -inf }
 0x247   : > { %574 = vmax.xlane.f32.xlu0 %v573_v37  ;;  %v570_v38 = vpop.f32.mrb[10].mxu0 }
 0x248   : > { %v1107_v39 = vpop.f32.mrb[11].mxu0 }
 0x24a   : > { %v403_v50 = vpop.f32.mrb[0].mxu1 }
 0x24b   : > { %v1088_v51 = vpop.f32.mrb[1].mxu1 }
 0x24c   : > { %v406_v52 = vpop.f32.mrb[2].mxu1 }
 0x24d   : > { %v678_v40 = vpop.f32.mrb[12].mxu0  ;;  %v1089_v53 = vpop.f32.mrb[3].mxu1 }
 0x24e   : > { %v1118_v41 = vpop.f32.mrb[13].mxu0  ;;  %v684_v42 = vsel %vm415_vm2, %v678_v40, -inf }
 0x24f   : > { %685 = vmax.xlane.f32.xlu0 %v684_v42  ;;  %v681_v43 = vpop.f32.mrb[14].mxu0  ;;  %v1185_v41 = vld [vmem:[%s1421_s4] sm:$0xff]  }
 0x250   : > { %v1119_v44 = vpop.f32.mrb[15].mxu0  ;;  %1139 = vmatpush3.bf16.msra.mxu0 %v1185_v41 }
 0x251   : > { %1140 = vmatprep.subr.bf16.mxu0 %v1227_v1 }
 0x255   : > { %v788_v45 = vpop.f32.mrb[16].mxu0 }
 0x256   : > { %v1130_v46 = vpop.f32.mrb[17].mxu0  ;;  %v794_v47 = vsel %vm415_vm2, %v788_v45, -inf }
 0x257   : > { %795 = vmax.xlane.f32.xlu1 %v794_v47  ;;  %v791_v48 = vpop.f32.mrb[18].mxu0  ;;  %v1186_v46 = vld [vmem:[%s1421_s4 + $0x8] sm:$0xff]  }
 0x258   : > { %v1131_v49 = vpop.f32.mrb[19].mxu0  ;;  %1141 = vmatpush3.bf16.msra.mxu0 %v1186_v46 }
 0x265   : > { %363 = vrot.lane.b32.xlu0 %v1326_v7, %s1236_s21 }
 0x2cc   : > { %v464_v54 = vpop.xlane.xlu1 %463 }
 0x2cd   : > { %v465_v55 = vsub.f32 %v456_v30, %v464_v54 }
 0x2cf   : > { %v466_v56 = vmul.f32 1.442695, %v465_v55 }
 0x2d1   : > { %1187 = vpow2.f32 %v466_v56 }
 0x2d4   : > { %v575_v57 = vpop.xlane.xlu0 %574 }
 0x2d5   : > { %v576_v58 = vsub.f32 %v567_v35, %v575_v57 }
 0x2d7   : > { %v577_v59 = vmul.f32 1.442695, %v576_v58 }
 0x2d9   : > { %1189 = vpow2.f32 %v577_v59 }
 0x2db   : > { %v1188_v60 = vpop.eup %1187 }
 0x2dc   : > { %v686_v61 = vpop.xlane.xlu0 %685  ;;  %v468_v62 = vsel %vm415_vm2, %v1188_v60, 0.0 }
 0x2dd   : > { %v687_v63 = vsub.f32 %v678_v40, %v686_v61  ;;  %469 = vadd.xlane.f32.xlu1 %v468_v62  ;;  %v1043_v61 = vld [vmem:[%s1422_s5] ss:$0 sm:$0xff] }
 0x2df   : > { %v688_v0 = vmul.f32 1.442695, %v687_v63 }
 0x2e0   : > { %v364_v2 = vpop.permute.xlu0 %363 }
 0x2e1   : > { %1191 = vpow2.f32 %v688_v0  ;;  %v404_v3 = vadd.f32 %v403_v50, %v364_v2 }
 0x2e3   : > { %v1190_v4 = vpop.eup %1189  ;;  %v474_v5 = vpack.c.bf16 %v404_v3, %v404_v3 }
 0x2e4   : > { %v796_v6 = vpop.xlane.xlu1 %795  ;;  %v579_v7 = vsel %vm415_vm2, %v1190_v4, 0.0 }
 0x2e5   : > { %v797_v8 = vsub.f32 %v788_v45, %v796_v6  ;;  %580 = vadd.xlane.f32.xlu1 %v579_v7  ;;  %696 = vrot.lane.b32.xlu0 %v474_v5, %s1233_s18  ;;  %v480_v9 = vsel %vm478_vm3, %v474_v5, 0 }
 0x2e6   : > { %1097 = vmatpush3.bf16.msra.mxu1 %v480_v9 }
 0x2e7   : > { %v798_v10 = vmul.f32 1.442695, %v797_v8  ;;  %1108 = vmatprep.subr.bf16.mxu1 %v1227_v1 }
 0x2e9   : > { %1193 = vpow2.f32 %v798_v10  ;;  %806 = vrot.lane.b32.xlu0 %v474_v5, %s1235_s20 }
 0x2eb   : > { %v1192_v11 = vpop.eup %1191 }
 0x2ec   : > { %v690_v12 = vsel %vm415_vm2, %v1192_v11, 0.0 }
 0x2ed   : > { %691 = vadd.xlane.f32.xlu1 %v690_v12 }
 0x2f3   : > { %v1194_v13 = vpop.eup %1193 }
 0x2f4   : > { %v800_v14 = vsel %vm415_vm2, %v1194_v13, 0.0 }
 0x2f5   : > { %801 = vadd.xlane.f32.xlu1 %v800_v14 }
 0x306   : > { %586 = vrot.lane.b32.xlu1 %v474_v5, %s1230_s15 }
 0x357   : > { %v697_v28 = vpop.permute.xlu0 %696 }
 0x358   : > { %v702_v29 = vsel %vm478_vm3, %v697_v28, 0 }
 0x35b   : > { %v807_v31 = vpop.permute.xlu0 %806 }
 0x35c   : > { %v812_v34 = vsel %vm478_vm3, %v807_v31, 0 }
 0x36a   : > { %v470_v15 = vpop.xlane.xlu1 %469 }
 0x36b   : > { %1195 = vrcp.f32 %v470_v15 }
 0x372   : > { %v581_v17 = vpop.xlane.xlu1 %580 }
 0x373   : > { %1197 = vrcp.f32 %v581_v17 }
 0x375   : > { %v1196_v16 = vpop.eup %1195 }
 0x376   : > { %v472_v18 = vmul.f32 %v1196_v16, %v1188_v60 }
 0x378   : > { %v473_v19 = vpack.c.bf16 %v472_v18, %v472_v18 }
 0x37a   : > { %1099 = vmatmul.mubr.msk.bf16.vlgmr.msra.gmra.mrb[4].mxu1 %vm415_vm2, %v473_v19  ;;  %v692_v20 = vpop.xlane.xlu1 %691 }
 0x37b   : > { %1110 = vmatprep.mubr.msk.bf16.mxu1 %vm1228_vm0, %v1227_v1  ;;  %1199 = vrcp.f32 %v692_v20 }
 0x37d   : > { %v1198_v21 = vpop.eup %1197 }
 0x37e   : > { %v583_v23 = vmul.f32 %v1198_v21, %v1190_v4 }
 0x380   : > { %v584_v26 = vpack.c.bf16 %v583_v23, %v583_v23 }
 0x382   : > { %v802_v22 = vpop.xlane.xlu1 %801 }
 0x383   : > { %1201 = vrcp.f32 %v802_v22 }
 0x385   : > { %v1200_v27 = vpop.eup %1199 }
 0x386   : > { %v587_v24 = vpop.permute.xlu1 %586  ;;  %v694_v30 = vmul.f32 %v1200_v27, %v1192_v11 }
 0x387   : > { %v592_v25 = vsel %vm478_vm3, %v587_v24, 0 }
 0x388   : > { %1109 = vmatpush3.bf16.msra.mxu1 %v592_v25  ;;  %v695_v32 = vpack.c.bf16 %v694_v30, %v694_v30 }
 0x389   : > { %1120 = vmatprep.subr.bf16.mxu1 %v1227_v1 }
 0x38b   : > { %1111 = vmatmul.mubr.msk.bf16.vlgmr.msra.gmra.mrb[8].mxu1 %vm415_vm2, %v584_v26 }
 0x38c   : > { %1121 = vmatpush3.bf16.msra.mxu1 %v702_v29  ;;  %1122 = vmatprep.mubr.msk.bf16.mxu1 %vm1228_vm0, %v1227_v1 }
 0x38d   : > { %1132 = vmatprep.subr.bf16.mxu1 %v1227_v1  ;;  %v1202_v33 = vpop.eup %1201 }
 0x38e   : > { %v804_v35 = vmul.f32 %v1202_v33, %v1194_v13 }
 0x390   : > { %v805_v36 = vpack.c.bf16 %v804_v35, %v804_v35 }
 0x393   : > { %1123 = vmatmul.mubr.msk.bf16.vlgmr.msra.gmra.mrb[12].mxu1 %vm415_vm2, %v695_v32 }
 0x394   : > { %1133 = vmatpush3.bf16.msra.mxu1 %v812_v34  ;;  %1134 = vmatprep.mubr.msk.bf16.mxu1 %vm1228_vm0, %v1227_v1 }
 0x39b   : > { %1135 = vmatmul.mubr.msk.bf16.vlgmr.msra.gmra.mrb[16].mxu1 %vm415_vm2, %v805_v36 }
 0x44d   : > { %v516_v37 = vpop.f32.mrb[4].mxu1 }
 0x44e   : > { %v1100_v38 = vpop.f32.mrb[5].mxu1 }
 0x44f   : > { %v519_v39 = vpop.f32.mrb[6].mxu1 }
 0x450   : > { %v1101_v40 = vpop.f32.mrb[7].mxu1 }
 0x45e   : > { %v628_v42 = vpop.f32.mrb[8].mxu1 }
 0x45f   : > { %855 = vrot.lane.b32.xlu0 %v628_v42, %s1237_s27  ;;  %v1112_v43 = vpop.f32.mrb[9].mxu1 }
 0x460   : > { %v631_v44 = vpop.f32.mrb[10].mxu1 }
 0x461   : > { %v1113_v45 = vpop.f32.mrb[11].mxu1 }
 0x466   : > { %v738_v47 = vpop.f32.mrb[12].mxu1 }
 0x467   : > { %859 = vrot.lane.b32.xlu0 %v738_v47, %s1238_s7  ;;  %v1124_v48 = vpop.f32.mrb[13].mxu1 }
 0x468   : > { %v741_v49 = vpop.f32.mrb[14].mxu1 }
 0x469   : > { %v1125_v50 = vpop.f32.mrb[15].mxu1 }
 0x46e   : > { %v848_v51 = vpop.f32.mrb[16].mxu1 }
 0x46f   : > { %863 = vrot.lane.b32.xlu1 %v848_v51, %s1239_s8  ;;  %v1136_v1 = vpop.f32.mrb[17].mxu1 }
 0x470   : > { %v851_v52 = vpop.f32.mrb[18].mxu1 }
 0x471   : > { %v1137_v53 = vpop.f32.mrb[19].mxu1 }
 0x4d1   : > { %v856_v54 = vpop.permute.xlu0 %855 }
 0x4d2   : > { %v866_v56 = vsel %vm415_vm2, %v516_v37, %v856_v54 }
 0x4d9   : > { %v860_v55 = vpop.permute.xlu0 %859 }
 0x4da   : > { %v868_v57 = vsel %vm867_vm4, %v866_v56, %v860_v55 }
 0x4e1   : > { %v864_v58 = vpop.permute.xlu1 %863 }
 0x4e2   : > { %v870_v59 = vsel %vm869_vm5, %v868_v57, %v864_v58 }
 0x4e3   : > { %v871_v60 = vpack.c.bf16 %v870_v59, %v870_v59 }
 0x4e5   : > { %1143 = vmatmul.mubr.msk.bf16.vlgmr.msra.gmra.mrb[20].mxu0 %vm312_vm1, %v871_v60 }
 0x5b8   : > { %v932_v62 = vpop.f32.mrb[20].mxu0 }
 0x5b9   : > { %v933_v63 = vadd.f32 %v1043_v61, %v932_v62  ;;  %v1144_v0 = vpop.f32.mrb[21].mxu0 }
 0x5ba   : > { %v935_v2 = vpop.f32.mrb[22].mxu0 }
 0x5bb   : > { %938 = vst.msk [vmem:[%s283_s13] sm:$0xff] %vm312_vm1, %v933_v63  ;;  %v1145_v3 = vpop.f32.mrb[23].mxu0 }
 0x5bc PF: > { %s16_s23 = sadd.s32 1, %s1225_s23   ;;  %s1424_s21 = smov %s1221_s22 }
 0x5bd   : > { %p13_p5 = scmp.ge.s32.totalorder %s16_s23, 4   ;;  %s1425_s22 = smov %s1427_s24 }
 0x5bf   :  { %15 = sbr.rel (!%p13_p5) target bundleno = 2 (0x2), region = 77 }

// kernel: _lambda_.25
= control target key start
LH: loop header
LB: loop body
LE: loop exit
PB: predicated region body
PF: predicated region fallthrough
CT: control target
= control target key end

     0   :  { %vm119_vm0 = vcmask 261120   ;;  %vm620_vm1 = vcmask 64544   ;;  %vm399_vm2 = vcmask 31744   ;;  %vm921_vm3 = vcmask 97344   ;;  %s2061_s13 = smov 116   ;;  %s3639_s4 = inlined_call_operand.vmem [shape: bf16[32,16], index: 4, kind: input, shape index: {}]   ;;  %s3640_s0 = inlined_call_operand.vmem [shape: f32[160,32], index: 0, kind: input, shape index: {}]   ;;  %s3641_s1 = inlined_call_operand.vmem [shape: f32[160,32], index: 1, kind: input, shape index: {}]   ;;  %s3642_s5 = inlined_call_operand.vmem [shape: f32[1,16], index: 5, kind: input, shape index: {}]   ;;  %s3643_s2 = inlined_call_operand.vmem [shape: bf16[32,32], index: 2, kind: input, shape index: {}]   ;;  %s3644_s3 = inlined_call_operand.vmem [shape: f32[1,32], index: 3, kind: input, shape index: {}]   ;;  %s3645_s6 = inlined_call_operand.vmem [shape: f32[160,32], index: 6, kind: output, shape index: {0}]   ;;  %s3646_s7 = inlined_call_operand.vmem [shape: f32[160,16], index: 7, kind: output, shape index: {1}]  }
   0x1   :  { %v1735_v0 = vld [vmem:[%s3639_s4] sm:$0xff]   ;;  %v1736_v1 = vld [vmem:[%s3639_s4 + $0x8] sm:$0xff]   ;;  %v28_v7 = vld [vmem:[%s3640_s0 + $0x10] sm:$0xff]  ;;  %vm1222_vm4 = vcmask 130144   ;;  %vm1543_vm5 = vcmask 64512   ;;  %vm1564_vm6 = vcmask 97280  }
   0x2   :  { %1708 = vmatprep.subr.bf16.mxu1 %v1735_v0  ;;  %v26_v2 = vld [vmem:[%s3640_s0] sm:$0xff]  ;;  %v27_v3 = vld [vmem:[%s3640_s0 + $0x8] sm:$0xff]  ;;  %v29_v8 = vld [vmem:[%s3640_s0 + $0x18] sm:$0xff]  ;;  %vm1585_vm7 = vcmask 130048  }
   0x3   :  { %v46_v4 = vld [vmem:[%s3641_s1] sm:$0xff]  ;;  %1709 = vmatpush3.bf16.msra.mxu1 %v1735_v0  ;;  %v47_v5 = vld [vmem:[%s3641_s1 + $0x8] sm:$0xff]  ;;  %v48_v10 = vld [vmem:[%s3641_s1 + $0x10] sm:$0xff] }
   0x4   :  { %v66_v6 = vadd.f32 %v46_v4, %v26_v2  ;;  %1710 = vmatprep.subr.bf16.mxu1 %v1736_v1  ;;  %v67_v9 = vadd.f32 %v47_v5, %v27_v3  ;;  %v49_v11 = vld [vmem:[%s3641_s1 + $0x18] sm:$0xff]  ;;  %v30_v12 = vld [vmem:[%s3640_s0 + $0x20] sm:$0xff]  ;;  %v68_v13 = vadd.f32 %v48_v10, %v28_v7  ;;  %v31_v15 = vld [vmem:[%s3640_s0 + $0x28] sm:$0xff] }
   0x5   :  { %v69_v14 = vadd.f32 %v49_v11, %v29_v8  ;;  %v50_v16 = vld [vmem:[%s3641_s1 + $0x20] sm:$0xff]  ;;  %v51_v17 = vld [vmem:[%s3641_s1 + $0x28] sm:$0xff]  ;;  %v32_v21 = vld [vmem:[%s3640_s0 + $0x30] sm:$0xff] }
   0x6   :  { %v86_v18 = vpack.c.bf16 %v67_v9, %v66_v6  ;;  %v70_v19 = vadd.f32 %v50_v16, %v30_v12  ;;  %v71_v20 = vadd.f32 %v51_v17, %v31_v15  ;;  %v33_v22 = vld [vmem:[%s3640_s0 + $0x38] sm:$0xff]  ;;  %v52_v24 = vld [vmem:[%s3641_s1 + $0x30] sm:$0xff]  ;;  %v34_v26 = vld [vmem:[%s3640_s0 + $0x40] sm:$0xff] }
   0x7   :  { %1711 = vmatpush3.bf16.msra.mxu1 %v1736_v1  ;;  %v2150_v23 = vpack.c.bf16 %v69_v14, %v68_v13  ;;  %v53_v25 = vld [vmem:[%s3641_s1 + $0x38] sm:$0xff]  ;;  %v35_v28 = vld [vmem:[%s3640_s0 + $0x48] sm:$0xff]  ;;  %v54_v29 = vld [vmem:[%s3641_s1 + $0x40] sm:$0xff]  ;;  %v72_v31 = vadd.f32 %v52_v24, %v32_v21 }
   0x8   :  { %1712 = vmatprep.mubr.msk.bf16.mxu1 %vm119_vm0, %v86_v18  ;;  %v2162_v27 = vpack.c.bf16 %v71_v20, %v70_v19  ;;  %v55_v30 = vld [vmem:[%s3641_s1 + $0x48] sm:$0xff]  ;;  %1688 = vmatprep.mubr.msk.bf16.mxu0 %vm119_vm0, %v86_v18  ;;  %v73_v32 = vadd.f32 %v53_v25, %v33_v22  ;;  %v74_v33 = vadd.f32 %v54_v29, %v34_v26  ;;  %v36_v36 = vld [vmem:[%s3640_s0 + $0x50] sm:$0xff]  ;;  %v37_v37 = vld [vmem:[%s3640_s0 + $0x58] sm:$0xff] }
   0x9   :  { %v75_v34 = vadd.f32 %v55_v30, %v35_v28  ;;  %v56_v39 = vld [vmem:[%s3641_s1 + $0x50] sm:$0xff]  ;;  %v57_v40 = vld [vmem:[%s3641_s1 + $0x58] sm:$0xff]  ;;  %v38_v41 = vld [vmem:[%s3640_s0 + $0x60] sm:$0xff] }
   0xa   :  { %1713 = vmatmul.mubr.msk.bf16.vlgmr.msra.gmra.mrb[0].mxu1 %vm119_vm0, %v2150_v23  ;;  %v2178_v35 = vpack.c.bf16 %v73_v32, %v72_v31  ;;  %v39_v42 = vld [vmem:[%s3640_s0 + $0x68] sm:$0xff]  ;;  %v58_v43 = vld [vmem:[%s3641_s1 + $0x60] sm:$0xff]  ;;  %v76_v45 = vadd.f32 %v56_v39, %v36_v36  ;;  %v77_v46 = vadd.f32 %v57_v40, %v37_v37  ;;  %v40_v50 = vld [vmem:[%s3640_s0 + $0x70] sm:$0xff] }
   0xb   :  { %1716 = vmatprep.mubr.msk.bf16.mxu1 %vm119_vm0, %v2162_v27  ;;  %v2186_v38 = vpack.c.bf16 %v75_v34, %v74_v33  ;;  %v59_v44 = vld [vmem:[%s3641_s1 + $0x68] sm:$0xff]  ;;  %v78_v47 = vadd.f32 %v58_v43, %v38_v41  ;;  %v41_v51 = vld [vmem:[%s3640_s0 + $0x78] sm:$0xff]  ;;  %v60_v53 = vld [vmem:[%s3641_s1 + $0x70] sm:$0xff] }
   0xc   :  { %v79_v48 = vadd.f32 %v59_v44, %v39_v42  ;;  %v2210_v49 = vpack.c.bf16 %v77_v46, %v76_v45  ;;  %v61_v54 = vld [vmem:[%s3641_s1 + $0x78] sm:$0xff]  ;;  %v42_v55 = vld [vmem:[%s3640_s0 + $0x80] sm:$0xff]  ;;  %v43_v56 = vld [vmem:[%s3640_s0 + $0x88] sm:$0xff]  ;;  %v80_v59 = vadd.f32 %v60_v53, %v40_v50 }
   0xd   :  { %v62_v57 = vld [vmem:[%s3641_s1 + $0x80] sm:$0xff]  ;;  %v63_v58 = vld [vmem:[%s3641_s1 + $0x88] sm:$0xff]  ;;  %v81_v60 = vadd.f32 %v61_v54, %v41_v51  ;;  %v44_v0 = vld [vmem:[%s3640_s0 + $0x90] sm:$0xff] }
   0xe   :  { %v2218_v52 = vpack.c.bf16 %v79_v48, %v78_v47  ;;  %v82_v61 = vadd.f32 %v62_v57, %v42_v55  ;;  %v83_v62 = vadd.f32 %v63_v58, %v43_v56  ;;  %v45_v2 = vld [vmem:[%s3640_s0 + $0x98] sm:$0xff]  ;;  %v64_v3 = vld [vmem:[%s3641_s1 + $0x90] sm:$0xff]  ;;  %v2269_v8 = vld [vmem:[%s3642_s5] ss:$0 sm:$0xff]  ;;  %s2060_s5 = smov 120  }
   0xf   :  { %v2242_v63 = vpack.c.bf16 %v81_v60, %v80_v59  ;;  %v65_v4 = vld [vmem:[%s3641_s1 + $0x98] sm:$0xff]  ;;  %v84_v5 = vadd.f32 %v64_v3, %v44_v0  ;;  %s2059_s1 = smov 124  }
  0x10   :  { %v2247_v1 = vpack.c.bf16 %v83_v62, %v82_v61  ;;  %v85_v6 = vadd.f32 %v65_v4, %v45_v2 }
  0x12   :  { %1717 = vmatmul.mubr.msk.bf16.gmra.mrb[4].mxu1 %vm119_vm0, %v2178_v35  ;;  %v2262_v7 = vpack.c.bf16 %v85_v6, %v84_v5 }
  0x13   :  { %1720 = vmatprep.mubr.msk.bf16.mxu1 %vm119_vm0, %v2186_v38 }
  0x1a   :  { %1721 = vmatmul.mubr.msk.bf16.gmra.mrb[8].mxu1 %vm119_vm0, %v2210_v49 }
  0x1b   :  { %1724 = vmatprep.mubr.msk.bf16.mxu1 %vm119_vm0, %v2218_v52 }
  0x22   :  { %1725 = vmatmul.mubr.msk.bf16.gmra.mrb[12].mxu1 %vm119_vm0, %v2242_v63 }
  0x23   :  { %1728 = vmatprep.mubr.msk.bf16.mxu1 %vm119_vm0, %v2247_v1 }
  0x2a   :  { %1729 = vmatmul.mubr.msk.bf16.gmra.mrb[16].mxu1 %vm119_vm0, %v2262_v7 }
  0xdd   :  { %v1714_v9 = vpop.f32.mrb[0].mxu1 }
  0xde   :  { %v2272_v10 = vadd.f32 %v1714_v9, %v2269_v8  ;;  %v320_v11 = vpop.f32.mrb[1].mxu1 }
  0xdf   :  { %v1715_v12 = vpop.f32.mrb[2].mxu1  ;;  %v2275_v13 = vadd.f32 %v2269_v8, %v320_v11 }
  0xe0   :  { %v323_v14 = vpop.f32.mrb[3].mxu1  ;;  %v627_v15 = vsel %vm620_vm1, %v2272_v10, -inf  ;;  %v406_v16 = vsel %vm399_vm2, %v2272_v10, -inf  ;;  %v2282_v17 = vadd.f32 %v1715_v12, %v2269_v8  ;;  %v928_v18 = vsel %vm921_vm3, %v2272_v10, -inf }
  0xe1   :  { %628 = vmax.xlane.f32.xlu0 %v627_v15  ;;  %407 = vmax.xlane.f32.xlu1 %v406_v16  ;;  %v1223_v19 = vsel %vm1222_vm4, %v2275_v13, -inf  ;;  %v1229_v24 = vsel %vm1222_vm4, %v2272_v10, -inf  ;;  %v400_v29 = vsel %vm399_vm2, %v2275_v13, -inf  ;;  %v2302_v34 = vadd.f32 %v2269_v8, %v323_v14 }
  0xe2   :  { %v409_v25 = vsel %vm399_vm2, %v2282_v17, -inf  ;;  %v630_v28 = vsel %vm620_vm1, %v2282_v17, -inf  ;;  %v931_v36 = vsel %vm921_vm3, %v2282_v17, -inf  ;;  %v621_v37 = vsel %vm620_vm1, %v2275_v13, -inf }
  0xe3   :  { %v624_v42 = vsel %vm620_vm1, %v2302_v34, -inf  ;;  %v922_v43 = vsel %vm921_vm3, %v2275_v13, -inf  ;;  %v925_v51 = vsel %vm921_vm3, %v2302_v34, -inf  ;;  %v1232_v53 = vsel %vm1222_vm4, %v2282_v17, -inf }
  0xe4   :  { %v403_v59 = vsel %vm399_vm2, %v2302_v34, -inf  ;;  %v1226_v5 = vsel %vm1222_vm4, %v2302_v34, -inf }
  0xe5   :  { %929 = vmax.xlane.f32.xlu0 %v928_v18  ;;  %1224 = vmax.xlane.f32.xlu1 %v1223_v19  ;;  %v1718_v20 = vpop.f32.mrb[4].mxu1 }
  0xe6   :  { %v336_v21 = vpop.f32.mrb[5].mxu1  ;;  %v2319_v45 = vadd.f32 %v1718_v20, %v2269_v8 }
  0xe7   :  { %v1719_v22 = vpop.f32.mrb[6].mxu1  ;;  %v2340_v58 = vadd.f32 %v2269_v8, %v336_v21 }
  0xe8   :  { %v339_v26 = vpop.f32.mrb[7].mxu1  ;;  %v1241_v57 = vsel %vm1222_vm4, %v2319_v45, -inf  ;;  %v2351_v3 = vadd.f32 %v1719_v22, %v2269_v8  ;;  %v418_v14 = vsel %vm399_vm2, %v2319_v45, -inf  ;;  %v639_v16 = vsel %vm620_vm1, %v2319_v45, -inf }
  0xe9   :  { %1230 = vmax.xlane.f32.xlu0 %v1229_v24  ;;  %410 = vmax.xlane.f32.xlu1 %v409_v25  ;;  %v1235_v4 = vsel %vm1222_vm4, %v2340_v58, -inf  ;;  %v2372_v18 = vadd.f32 %v2269_v8, %v339_v26  ;;  %v940_v20 = vsel %vm921_vm3, %v2319_v45, -inf  ;;  %v412_v22 = vsel %vm399_vm2, %v2340_v58, -inf }
  0xea   :  { %v421_v12 = vsel %vm399_vm2, %v2351_v3, -inf  ;;  %v642_v15 = vsel %vm620_vm1, %v2351_v3, -inf  ;;  %v943_v19 = vsel %vm921_vm3, %v2351_v3, -inf  ;;  %v633_v25 = vsel %vm620_vm1, %v2340_v58, -inf }
  0xeb   :  { %v415_v21 = vsel %vm399_vm2, %v2372_v18, -inf  ;;  %v636_v24 = vsel %vm620_vm1, %v2372_v18, -inf }
  0xed   :  { %631 = vmax.xlane.f32.xlu1 %v630_v28  ;;  %401 = vmax.xlane.f32.xlu0 %v400_v29  ;;  %v2296_v30 = vpop.f32.mrb[8].mxu1  ;;  %v937_v28 = vsel %vm921_vm3, %v2372_v18, -inf  ;;  %v934_v29 = vsel %vm921_vm3, %v2340_v58, -inf }
  0xee   :  { %v352_v31 = vpop.f32.mrb[9].mxu1  ;;  %v2388_v26 = vadd.f32 %v2296_v30, %v2269_v8  ;;  %v1238_v30 = vsel %vm1222_vm4, %v2372_v18, -inf }
  0xef   :  { %v2299_v32 = vadd.f32 %v2269_v8, %v352_v31  ;;  %v1723_v33 = vpop.f32.mrb[10].mxu1 }
  0xf0   :  { %v2309_v39 = vadd.f32 %v1723_v33, %v2269_v8  ;;  %v355_v40 = vpop.f32.mrb[11].mxu1  ;;  %v1253_v31 = vsel %vm1222_vm4, %v2388_v26, -inf  ;;  %v1244_v33 = vsel %vm1222_vm4, %v2351_v3, -inf }
  0xf1   :  { %932 = vmax.xlane.f32.xlu1 %v931_v36  ;;  %622 = vmax.xlane.f32.xlu0 %v621_v37  ;;  %v2312_v41 = vadd.f32 %v2269_v8, %v355_v40  ;;  %v430_v37 = vsel %vm399_vm2, %v2388_v26, -inf }
  0xf2   :  { %v433_v36 = vsel %vm399_vm2, %v2309_v39, -inf  ;;  %v654_v40 = vsel %vm620_vm1, %v2309_v39, -inf }
  0xf5   :  { %625 = vmax.xlane.f32.xlu1 %v624_v42  ;;  %923 = vmax.xlane.f32.xlu0 %v922_v43  ;;  %v1726_v44 = vpop.f32.mrb[12].mxu1  ;;  %v651_v42 = vsel %vm620_vm1, %v2388_v26, -inf  ;;  %v955_v43 = vsel %vm921_vm3, %v2309_v39, -inf }
  0xf6   :  { %v2322_v46 = vadd.f32 %v1726_v44, %v2269_v8  ;;  %v368_v47 = vpop.f32.mrb[13].mxu1  ;;  %v952_v44 = vsel %vm921_vm3, %v2388_v26, -inf }
  0xf7   :  { %v2325_v48 = vadd.f32 %v2269_v8, %v368_v47  ;;  %v1727_v50 = vpop.f32.mrb[14].mxu1  ;;  %v427_v47 = vsel %vm399_vm2, %v2312_v41, -inf }
  0xf8   :  { %v2332_v54 = vadd.f32 %v1727_v50, %v2269_v8  ;;  %v371_v55 = vpop.f32.mrb[15].mxu1  ;;  %v424_v50 = vsel %vm399_vm2, %v2299_v32, -inf }
  0xf9   :  { %926 = vmax.xlane.f32.xlu1 %v925_v51  ;;  %1233 = vmax.xlane.f32.xlu0 %v1232_v53  ;;  %v2335_v56 = vadd.f32 %v2269_v8, %v371_v55  ;;  %v648_v51 = vsel %vm620_vm1, %v2312_v41, -inf  ;;  %v645_v53 = vsel %vm620_vm1, %v2299_v32, -inf  ;;  %v949_v55 = vsel %vm921_vm3, %v2312_v41, -inf }
  0xfd   :  { %1242 = vmax.xlane.f32.xlu1 %v1241_v57  ;;  %404 = vmax.xlane.f32.xlu0 %v403_v59  ;;  %v1730_v60 = vpop.f32.mrb[16].mxu1  ;;  %v946_v57 = vsel %vm921_vm3, %v2299_v32, -inf  ;;  %v1265_v59 = vsel %vm1222_vm4, %v2322_v46, -inf }
  0xfe   :  { %v2345_v61 = vadd.f32 %v1730_v60, %v2269_v8  ;;  %v384_v62 = vpop.f32.mrb[17].mxu1  ;;  %v1256_v60 = vsel %vm1222_vm4, %v2309_v39, -inf }
  0xff   :  { %v2348_v0 = vadd.f32 %v2269_v8, %v384_v62  ;;  %v1731_v2 = vpop.f32.mrb[18].mxu1  ;;  %v1259_v62 = vsel %vm1222_vm4, %v2325_v48, -inf }
 0x100   :  { %v2358_v6 = vadd.f32 %v1731_v2, %v2269_v8  ;;  %v387_v9 = vpop.f32.mrb[19].mxu1  ;;  %v1250_v2 = vsel %vm1222_vm4, %v2312_v41, -inf }
 0x101   :  { %1236 = vmax.xlane.f32.xlu1 %v1235_v4  ;;  %1227 = vmax.xlane.f32.xlu0 %v1226_v5  ;;  %v2361_v11 = vadd.f32 %v2269_v8, %v387_v9  ;;  %v1247_v8 = vsel %vm1222_vm4, %v2299_v32, -inf  ;;  %v445_v4 = vsel %vm399_vm2, %v2332_v54, -inf  ;;  %v442_v5 = vsel %vm399_vm2, %v2322_v46, -inf }
 0x102   :  { %v666_v9 = vsel %vm620_vm1, %v2332_v54, -inf }
 0x105   :  { %422 = vmax.xlane.f32.xlu1 %v421_v12  ;;  %419 = vmax.xlane.f32.xlu0 %v418_v14  ;;  %v663_v12 = vsel %vm620_vm1, %v2322_v46, -inf  ;;  %v967_v14 = vsel %vm921_vm3, %v2332_v54, -inf }
 0x109   :  { %643 = vmax.xlane.f32.xlu1 %v642_v15  ;;  %640 = vmax.xlane.f32.xlu0 %v639_v16  ;;  %v964_v15 = vsel %vm921_vm3, %v2322_v46, -inf  ;;  %v439_v16 = vsel %vm399_vm2, %v2335_v56, -inf }
 0x10d   :  { %944 = vmax.xlane.f32.xlu1 %v943_v19  ;;  %941 = vmax.xlane.f32.xlu0 %v940_v20  ;;  %v436_v19 = vsel %vm399_vm2, %v2325_v48, -inf  ;;  %v660_v20 = vsel %vm620_vm1, %v2335_v56, -inf }
 0x111   :  { %416 = vmax.xlane.f32.xlu1 %v415_v21  ;;  %413 = vmax.xlane.f32.xlu0 %v412_v22  ;;  %v657_v21 = vsel %vm620_vm1, %v2325_v48, -inf  ;;  %v961_v22 = vsel %vm921_vm3, %v2335_v56, -inf }
 0x115   :  { %637 = vmax.xlane.f32.xlu1 %v636_v24  ;;  %634 = vmax.xlane.f32.xlu0 %v633_v25  ;;  %v958_v24 = vsel %vm921_vm3, %v2325_v48, -inf  ;;  %v1277_v25 = vsel %vm1222_vm4, %v2345_v61, -inf }
 0x119   :  { %938 = vmax.xlane.f32.xlu1 %v937_v28  ;;  %935 = vmax.xlane.f32.xlu0 %v934_v29  ;;  %v1268_v28 = vsel %vm1222_vm4, %v2332_v54, -inf  ;;  %v1271_v29 = vsel %vm1222_vm4, %v2348_v0, -inf }
 0x11d   :  { %1254 = vmax.xlane.f32.xlu1 %v1253_v31  ;;  %1245 = vmax.xlane.f32.xlu0 %v1244_v33  ;;  %v1262_v31 = vsel %vm1222_vm4, %v2335_v56, -inf  ;;  %v457_v33 = vsel %vm399_vm2, %v2358_v6, -inf }
 0x121   :  { %1248 = vmax.xlane.f32.xlu1 %v1247_v8  ;;  %1239 = vmax.xlane.f32.xlu0 %v1238_v30  ;;  %v454_v8 = vsel %vm399_vm2, %v2345_v61, -inf  ;;  %v678_v30 = vsel %vm620_vm1, %v2358_v6, -inf }
 0x125   :  { %434 = vmax.xlane.f32.xlu1 %v433_v36  ;;  %431 = vmax.xlane.f32.xlu0 %v430_v37  ;;  %v675_v36 = vsel %vm620_vm1, %v2345_v61, -inf  ;;  %v979_v37 = vsel %vm921_vm3, %v2358_v6, -inf }
 0x129   :  { %655 = vmax.xlane.f32.xlu1 %v654_v40  ;;  %652 = vmax.xlane.f32.xlu0 %v651_v42  ;;  %v976_v40 = vsel %vm921_vm3, %v2345_v61, -inf }
 0x12d   :  { %956 = vmax.xlane.f32.xlu1 %v955_v43  ;;  %953 = vmax.xlane.f32.xlu0 %v952_v44  ;;  %v451_v44 = vsel %vm399_vm2, %v2361_v11, -inf }
 0x131   :  { %428 = vmax.xlane.f32.xlu1 %v427_v47  ;;  %425 = vmax.xlane.f32.xlu0 %v424_v50  ;;  %v448_v47 = vsel %vm399_vm2, %v2348_v0, -inf }
 0x135   :  { %649 = vmax.xlane.f32.xlu1 %v648_v51  ;;  %646 = vmax.xlane.f32.xlu0 %v645_v53  ;;  %v672_v53 = vsel %vm620_vm1, %v2361_v11, -inf }
 0x139   :  { %950 = vmax.xlane.f32.xlu1 %v949_v55  ;;  %947 = vmax.xlane.f32.xlu0 %v946_v57  ;;  %v669_v55 = vsel %vm620_vm1, %v2348_v0, -inf }
 0x13d   :  { %1266 = vmax.xlane.f32.xlu1 %v1265_v59  ;;  %1257 = vmax.xlane.f32.xlu0 %v1256_v60 }
 0x141   :  { %1260 = vmax.xlane.f32.xlu1 %v1259_v62  ;;  %1251 = vmax.xlane.f32.xlu0 %v1250_v2  ;;  %v973_v62 = vsel %vm921_vm3, %v2361_v11, -inf  ;;  %v970_v2 = vsel %vm921_vm3, %v2348_v0, -inf }
 0x145   :  { %446 = vmax.xlane.f32.xlu1 %v445_v4  ;;  %443 = vmax.xlane.f32.xlu0 %v442_v5 }
 0x149   :  { %667 = vmax.xlane.f32.xlu1 %v666_v9  ;;  %664 = vmax.xlane.f32.xlu0 %v663_v12 }
 0x14d   :  { %968 = vmax.xlane.f32.xlu1 %v967_v14  ;;  %965 = vmax.xlane.f32.xlu0 %v964_v15  ;;  %v1280_v14 = vsel %vm1222_vm4, %v2358_v6, -inf }
 0x151   :  { %440 = vmax.xlane.f32.xlu1 %v439_v16  ;;  %437 = vmax.xlane.f32.xlu0 %v436_v19 }
 0x155   :  { %661 = vmax.xlane.f32.xlu1 %v660_v20  ;;  %658 = vmax.xlane.f32.xlu0 %v657_v21  ;;  %v1274_v21 = vsel %vm1222_vm4, %v2361_v11, -inf }
 0x159   :  { %962 = vmax.xlane.f32.xlu1 %v961_v22  ;;  %959 = vmax.xlane.f32.xlu0 %v958_v24 }
 0x15d   :  { %1278 = vmax.xlane.f32.xlu1 %v1277_v25  ;;  %1269 = vmax.xlane.f32.xlu0 %v1268_v28 }
 0x161   :  { %1272 = vmax.xlane.f32.xlu1 %v1271_v29  ;;  %1263 = vmax.xlane.f32.xlu0 %v1262_v31 }
 0x165   :  { %458 = vmax.xlane.f32.xlu1 %v457_v33  ;;  %455 = vmax.xlane.f32.xlu0 %v454_v8 }
 0x169   :  { %679 = vmax.xlane.f32.xlu1 %v678_v30  ;;  %676 = vmax.xlane.f32.xlu0 %v675_v36 }
 0x16d   :  { %980 = vmax.xlane.f32.xlu1 %v979_v37  ;;  %977 = vmax.xlane.f32.xlu0 %v976_v40 }
 0x16e   :  { %v629_v42 = vpop.xlane.xlu0 %628  ;;  %v408_v43 = vpop.xlane.xlu1 %407 }
 0x16f   :  { %v683_v60 = vsub.f32 %v2272_v10, %v629_v42 }
 0x171   :  { %452 = vmax.xlane.f32.xlu1 %v451_v44  ;;  %449 = vmax.xlane.f32.xlu0 %v448_v47  ;;  %v705_v9 = vmul.f32 1.442695, %v683_v60 }
 0x172   :  { %v930_v50 = vpop.xlane.xlu0 %929  ;;  %v2482_v51 = vpop.xlane.xlu1 %1224 }
 0x173   :  { %v984_v12 = vsub.f32 %v2272_v10, %v930_v50  ;;  %1739 = vpow2.f32 %v705_v9  ;;  %v462_v50 = vsub.f32 %v2272_v10, %v408_v43 }
 0x175   :  { %673 = vmax.xlane.f32.xlu1 %v672_v53  ;;  %670 = vmax.xlane.f32.xlu0 %v669_v55  ;;  %v1006_v16 = vmul.f32 1.442695, %v984_v12  ;;  %v484_v53 = vmul.f32 1.442695, %v462_v50 }
 0x176   :  { %v1231_v57 = vpop.xlane.xlu0 %1230  ;;  %v411_v59 = vpop.xlane.xlu1 %410 }
 0x177   :  { %1741 = vpow2.f32 %v1006_v16  ;;  %v1285_v28 = vsub.f32 %v2272_v10, %v1231_v57  ;;  %v463_v55 = vsub.f32 %v2282_v17, %v411_v59 }
 0x179   :  { %974 = vmax.xlane.f32.xlu1 %v973_v62  ;;  %971 = vmax.xlane.f32.xlu0 %v970_v2  ;;  %v1307_v8 = vmul.f32 1.442695, %v1285_v28  ;;  %v486_v57 = vmul.f32 1.442695, %v463_v55 }
 0x17a   :  { %v632_v4 = vpop.xlane.xlu1 %631  ;;  %v2493_v5 = vpop.xlane.xlu0 %401 }
 0x17b   :  { %v684_v19 = vsub.f32 %v2282_v17, %v632_v4  ;;  %v460_v50 = vsub.f32 %v2275_v13, %v2493_v5 }
 0x17d   :  { %1281 = vmax.xlane.f32.xlu0 %v1280_v14  ;;  %v707_v24 = vmul.f32 1.442695, %v684_v19  ;;  %v2504_v30 = vpop.eup %1739  ;;  %v480_v55 = vmul.f32 1.442695, %v460_v50 }
 0x17e   :  { %v623_v15 = vpop.xlane.xlu0 %622  ;;  %v933_v20 = vpop.xlane.xlu1 %932 }
 0x17f   :  { %v985_v25 = vsub.f32 %v2282_v17, %v933_v20  ;;  %1743 = vpow2.f32 %v707_v24  ;;  %v681_v4 = vsub.f32 %v2275_v13, %v623_v15  ;;  %v1283_v20 = vsub.f32 %v2275_v13, %v2482_v51 }
 0x181   :  { %1275 = vmax.xlane.f32.xlu0 %v1274_v21  ;;  %v1008_v31 = vmul.f32 1.442695, %v985_v25  ;;  %v2508_v37 = vpop.eup %1741  ;;  %v701_v43 = vmul.f32 1.442695, %v681_v4  ;;  %v1303_v28 = vmul.f32 1.442695, %v1283_v20 }
 0x182   :  { %v924_v22 = vpop.xlane.xlu0 %923  ;;  %v626_v2 = vpop.xlane.xlu1 %625 }
 0x183   :  { %1745 = vpow2.f32 %v1008_v31  ;;  %v682_v10 = vsub.f32 %v2302_v34, %v626_v2  ;;  %v982_v14 = vsub.f32 %v2275_v13, %v924_v22 }
 0x184   :  { %1747 = vpow2.f32 %v1307_v8 }
 0x185   :  { %v703_v16 = vmul.f32 1.442695, %v682_v10  ;;  %v1002_v15 = vmul.f32 1.442695, %v982_v14 }
 0x186   :  { %v1234_v29 = vpop.xlane.xlu0 %1233 }
 0x187   :  { %v1286_v33 = vsub.f32 %v2282_v17, %v1234_v29  ;;  %v927_v17 = vpop.xlane.xlu1 %926 }
 0x188   :  { %v983_v19 = vsub.f32 %v2302_v34, %v927_v17 }
 0x189   :  { %v1309_v36 = vmul.f32 1.442695, %v1286_v33  ;;  %v2512_v40 = vpop.eup %1743 }
 0x18a   :  { %765 = vrot.lane.b32.xlu1 %v2504_v30, %s2059_s1  ;;  %v405_v12 = vpop.xlane.xlu0 %404  ;;  %v1004_v24 = vmul.f32 1.442695, %v983_v19 }
 0x18b   :  { %1749 = vpow2.f32 %v1309_v36  ;;  %v1243_v2 = vpop.xlane.xlu1 %1242 }
 0x18c   :  { %1751 = vpow2.f32 %v484_v53  ;;  %v1289_v20 = vsub.f32 %v2319_v45, %v1243_v2 }
 0x18d   :  { %v2516_v42 = vpop.eup %1745  ;;  %1753 = vpow2.f32 %v486_v57 }
 0x18e   :  { %1066 = vrot.lane.b32.xlu1 %v2508_v37, %s2060_s5  ;;  %v2518_v44 = vpop.eup %1747  ;;  %1755 = vpow2.f32 %v701_v43  ;;  %v1228_v21 = vpop.xlane.xlu0 %1227 }
 0x18f   :  { %3711 = vst [vmem:[#allocation2_spill] sm:$0xff] %v2518_v44  ;;  %1757 = vpow2.f32 %v703_v16  ;;  %v1284_v25 = vsub.f32 %v2302_v34, %v1228_v21  ;;  %v2572_v43 = vpop.xlane.xlu1 %1236 }
 0x190   :  { %1759 = vpow2.f32 %v1002_v15 }
 0x191   :  { %1761 = vpow2.f32 %v1004_v24  ;;  %v1305_v22 = vmul.f32 1.442695, %v1284_v25 }
 0x192   :  { %767 = vrot.lane.b32.xlu1 %v2512_v40, %s2059_s1  ;;  %1763 = vpow2.f32 %v1303_v28  ;;  %v420_v53 = vpop.xlane.xlu0 %419 }
 0x193   :  { %1765 = vpow2.f32 %v1305_v22  ;;  %v1315_v22 = vmul.f32 1.442695, %v1289_v20 }
 0x194   :  { %1767 = vpow2.f32 %v480_v55 }
 0x195   :  { %v2524_v47 = vpop.eup %1749 }
 0x196   :  { %1068 = vrot.lane.b32.xlu1 %v2516_v42, %s2060_s5  ;;  %3712 = vst [vmem:[#allocation3_spill] sm:$0xff] %v2524_v47  ;;  %v2530_v60 = vpop.eup %1751  ;;  %v641_v57 = vpop.xlane.xlu0 %640 }
 0x197   :  { %1367 = vrot.lane.b32.xlu0 %v2518_v44, %s2061_s13  ;;  %v526_v62 = vsel %vm399_vm2, %v2530_v60, 0.0  ;;  %v2535_v9 = vpop.eup %1753  ;;  %v687_v5 = vsub.f32 %v2319_v45, %v641_v57 }
 0x198   :  { %v529_v59 = vsel %vm399_vm2, %v2535_v9, 0.0  ;;  %v2545_v29 = vpop.eup %1755 }
 0x199   :  { %v2549_v31 = vpop.eup %1757  ;;  %v713_v15 = vmul.f32 1.442695, %v687_v5 }
 0x19a   :  { %1369 = vrot.lane.b32.xlu1 %v2524_v47, %s2061_s13  ;;  %3713 = vst [vmem:[#allocation4_spill] sm:$0xff] %v2549_v31  ;;  %v2551_v51 = vpop.eup %1759  ;;  %v942_v10 = vpop.xlane.xlu0 %941 }
 0x19b   :  { %v2557_v33 = vpop.eup %1761 }
 0x19c   :  { %3714 = vst [vmem:[#allocation5_spill] sm:$0xff] %v2557_v33  ;;  %v2559_v8 = vpop.eup %1763 }
 0x19d   :  { %3715 = vst [vmem:[#allocation6_spill] sm:$0xff] %v2559_v8  ;;  %v2565_v36 = vpop.eup %1765 }
 0x19e   :  { %3716 = vst [vmem:[#allocation7_spill] sm:$0xff] %v2565_v36  ;;  %v2574_v14 = vpop.eup %1767  ;;  %v2576_v17 = vpop.xlane.xlu0 %413 }
 0x19f   :  { %v520_v13 = vsel %vm399_vm2, %v2574_v14, 0.0 }
 0x1a2   :  { %v635_v16 = vpop.xlane.xlu0 %634 }
 0x1a6   :  { %v936_v24 = vpop.xlane.xlu0 %935 }
 0x1b6   :  { %527 = vadd.xlane.f32.xlu0 %v526_v62  ;;  %v461_v62 = vsub.f32 %v2302_v34, %v405_v12  ;;  %v988_v12 = vsub.f32 %v2319_v45, %v942_v10 }
 0x1b8   :  { %v482_v4 = vmul.f32 1.442695, %v461_v62  ;;  %v1014_v28 = vmul.f32 1.442695, %v988_v12  ;;  %v1246_v62 = vpop.xlane.xlu0 %1245 }
 0x1ba   :  { %1769 = vpow2.f32 %v482_v4  ;;  %v1290_v4 = vsub.f32 %v2351_v3, %v1246_v62  ;;  %v986_v62 = vsub.f32 %v2340_v58, %v936_v24 }
 0x1bb   :  { %1771 = vpow2.f32 %v713_v15  ;;  %v466_v15 = vsub.f32 %v2319_v45, %v420_v53  ;;  %v685_v45 = vsub.f32 %v2340_v58, %v635_v16 }
 0x1bc   :  { %1773 = vpow2.f32 %v1014_v28 }
 0x1bd   :  { %1775 = vpow2.f32 %v1315_v22  ;;  %v709_v53 = vmul.f32 1.442695, %v685_v45 }
 0x1be   :  { %530 = vadd.xlane.f32.xlu1 %v529_v59  ;;  %v423_v59 = vpop.xlane.xlu1 %422 }
 0x1bf   :  { %v467_v28 = vsub.f32 %v2351_v3, %v423_v59 }
 0x1c2   :  { %v644_v34 = vpop.xlane.xlu1 %643 }
 0x1c3   :  { %v688_v25 = vsub.f32 %v2351_v3, %v644_v34 }
 0x1c4   :  { %v2581_v19 = vpop.eup %1769 }
 0x1c5   :  { %3717 = vst [vmem:[#allocation8_spill] sm:$0xff] %v2581_v19  ;;  %v523_v21 = vsel %vm399_vm2, %v2581_v19, 0.0  ;;  %v715_v55 = vmul.f32 1.442695, %v688_v25  ;;  %v2590_v10 = vpop.eup %1771  ;;  %v492_v25 = vmul.f32 1.442695, %v466_v15 }
 0x1c6   :  { %v945_v50 = vpop.xlane.xlu1 %944  ;;  %v2594_v5 = vpop.eup %1773 }
 0x1c7   :  { %v989_v57 = vsub.f32 %v2351_v3, %v945_v50  ;;  %1777 = vpow2.f32 %v715_v55  ;;  %v2596_v34 = vpop.eup %1775  ;;  %v494_v50 = vmul.f32 1.442695, %v467_v28  ;;  %v1010_v3 = vmul.f32 1.442695, %v986_v62 }
 0x1c8   :  { %3718 = vst [vmem:[#allocation9_spill] sm:$0xff] %v2596_v34 }
 0x1c9   :  { %v1016_v2 = vmul.f32 1.442695, %v989_v57 }
 0x1ca   :  { %v417_v57 = vpop.xlane.xlu1 %416 }
 0x1cb   :  { %1779 = vpow2.f32 %v1016_v2 }
 0x1cc   :  { %761 = vrot.lane.b32.xlu0 %v2545_v29, %s2059_s1 }
 0x1ce   :  { %v638_v2 = vpop.xlane.xlu1 %637 }
 0x1cf   :  { %763 = vrot.lane.b32.xlu1 %v2549_v31, %s2059_s1 }
 0x1d0   :  { %1062 = vrot.lane.b32.xlu0 %v2551_v51, %s2060_s5 }
 0x1d1   :  { %v2602_v12 = vpop.eup %1777 }
 0x1d3   :  { %1064 = vrot.lane.b32.xlu1 %v2557_v33, %s2060_s5 }
 0x1d4   :  { %1363 = vrot.lane.b32.xlu0 %v2559_v8, %s2061_s13 }
 0x1d5   :  { %v2606_v20 = vpop.eup %1779 }
 0x1d7   :  { %1365 = vrot.lane.b32.xlu1 %v2565_v36, %s2061_s13 }
 0x1f3   :  { %521 = vadd.xlane.f32.xlu0 %v520_v13  ;;  %v1317_v13 = vmul.f32 1.442695, %v1290_v4  ;;  %v1287_v4 = vsub.f32 %v2340_v58, %v2572_v43 }
 0x1f5   :  { %1781 = vpow2.f32 %v1317_v13  ;;  %v686_v13 = vsub.f32 %v2372_v18, %v638_v2  ;;  %v1311_v15 = vmul.f32 1.442695, %v1287_v4 }
 0x1f6   :  { %1783 = vpow2.f32 %v492_v25  ;;  %v939_v25 = vpop.xlane.xlu1 %938 }
 0x1f7   :  { %1785 = vpow2.f32 %v494_v50  ;;  %v711_v16 = vmul.f32 1.442695, %v686_v13  ;;  %v987_v24 = vsub.f32 %v2372_v18, %v939_v25  ;;  %v1240_v50 = vpop.xlane.xlu0 %1239  ;;  %v464_v13 = vsub.f32 %v2340_v58, %v2576_v17 }
 0x1f8   :  { %1787 = vpow2.f32 %v709_v53  ;;  %v1288_v45 = vsub.f32 %v2372_v18, %v1240_v50  ;;  %v465_v50 = vsub.f32 %v2372_v18, %v417_v57 }
 0x1f9   :  { %1789 = vpow2.f32 %v1010_v3  ;;  %v1012_v43 = vmul.f32 1.442695, %v987_v24  ;;  %v488_v25 = vmul.f32 1.442695, %v464_v13 }
 0x1fa   :  { %1791 = vpow2.f32 %v1311_v15  ;;  %v1313_v62 = vmul.f32 1.442695, %v1288_v45  ;;  %v1255_v24 = vpop.xlane.xlu1 %1254 }
 0x1fb   :  { %524 = vadd.xlane.f32.xlu1 %v523_v21  ;;  %1793 = vpow2.f32 %v711_v16 }
 0x1fc   :  { %1795 = vpow2.f32 %v1012_v43 }
 0x1fd   :  { %1797 = vpow2.f32 %v1313_v62 }
 0x1fe   :  { %1799 = vpow2.f32 %v488_v25  ;;  %v2660_v62 = vpop.xlane.xlu1 %1248 }
 0x1ff   :  { %v2611_v21 = vpop.eup %1781 }
 0x200   :  { %3719 = vst [vmem:[#allocation10_spill] sm:$0xff] %v2611_v21  ;;  %v2616_v22 = vpop.eup %1783 }
 0x201   :  { %v538_v55 = vsel %vm399_vm2, %v2616_v22, 0.0  ;;  %v2624_v59 = vpop.eup %1785 }
 0x202   :  { %v541_v28 = vsel %vm399_vm2, %v2624_v59, 0.0  ;;  %v435_v13 = vpop.xlane.xlu1 %434 }
 0x206   :  { %v656_v57 = vpop.xlane.xlu1 %655 }
 0x209   :  { %773 = vrot.lane.b32.xlu0 %v2590_v10, %s2059_s1 }
 0x20c   :  { %1074 = vrot.lane.b32.xlu1 %v2594_v5, %s2060_s5 }
 0x20d   :  { %1375 = vrot.lane.b32.xlu0 %v2596_v34, %s2061_s13  ;;  %v1293_v34 = vsub.f32 %v2388_v26, %v1255_v24 }
 0x210   :  { %775 = vrot.lane.b32.xlu1 %v2602_v12, %s2059_s1 }
 0x214   :  { %1076 = vrot.lane.b32.xlu1 %v2606_v20, %s2060_s5 }
 0x218   :  { %1377 = vrot.lane.b32.xlu1 %v2611_v21, %s2061_s13  ;;  %v490_v21 = vmul.f32 1.442695, %v465_v50 }
 0x21a   :  { %1801 = vpow2.f32 %v490_v21 }
 0x22c   :  { %539 = vadd.xlane.f32.xlu0 %v538_v55  ;;  %v2630_v55 = vpop.eup %1787 }
 0x22d   :  { %3720 = vst [vmem:[#allocation11_spill] sm:$0xff] %v2630_v55  ;;  %v2635_v53 = vpop.eup %1789 }
 0x22e   :  { %3721 = vst [vmem:[#allocation12_spill] sm:$0xff] %v2635_v53  ;;  %v2639_v2 = vpop.eup %1791 }
 0x22f   :  { %3722 = vst [vmem:[#allocation13_spill] sm:$0xff] %v2639_v2  ;;  %v2643_v4 = vpop.eup %1793 }
 0x230   :  { %v2647_v3 = vpop.eup %1795 }
 0x231   :  { %3723 = vst [vmem:[#allocation14_spill] sm:$0xff] %v2647_v3  ;;  %v2653_v15 = vpop.eup %1797 }
 0x232   :  { %3724 = vst [vmem:[#allocation15_spill] sm:$0xff] %v2653_v15  ;;  %v2658_v45 = vpop.eup %1799 }
 0x233   :  { %3725 = vst [vmem:[#allocation16_spill] sm:$0xff] %v2658_v45  ;;  %v532_v58 = vsel %vm399_vm2, %v2658_v45, 0.0  ;;  %v2669_v50 = vpop.eup %1801  ;;  %v1323_v45 = vmul.f32 1.442695, %v1293_v34 }
 0x234   :  { %3726 = vst [vmem:[#allocation17_spill] sm:$0xff] %v2669_v50  ;;  %v535_v21 = vsel %vm399_vm2, %v2669_v50, 0.0 }
 0x23c   :  { %542 = vadd.xlane.f32.xlu1 %v541_v28  ;;  %v432_v28 = vpop.xlane.xlu0 %431 }
 0x240   :  { %v653_v16 = vpop.xlane.xlu0 %652 }
 0x241   :  { %v691_v25 = vsub.f32 %v2388_v26, %v653_v16 }
 0x242   :  { %769 = vrot.lane.b32.xlu0 %v2630_v55, %s2059_s1  ;;  %v957_v55 = vpop.xlane.xlu1 %956 }
 0x244   :  { %v954_v43 = vpop.xlane.xlu0 %953 }
 0x245   :  { %v992_v47 = vsub.f32 %v2388_v26, %v954_v43  ;;  %v993_v43 = vsub.f32 %v2309_v39, %v957_v55 }
 0x246   :  { %1070 = vrot.lane.b32.xlu0 %v2635_v53, %s2060_s5 }
 0x248   :  { %v2664_v17 = vpop.xlane.xlu0 %425 }
 0x24a   :  { %1371 = vrot.lane.b32.xlu0 %v2639_v2, %s2061_s13  ;;  %v1022_v2 = vmul.f32 1.442695, %v992_v47  ;;  %v1024_v47 = vmul.f32 1.442695, %v993_v43  ;;  %v471_v43 = vsub.f32 %v2309_v39, %v435_v13 }
 0x24c   :  { %v647_v18 = vpop.xlane.xlu0 %646 }
 0x24d   :  { %771 = vrot.lane.b32.xlu1 %v2643_v4, %s2059_s1 }
 0x250   :  { %v948_v53 = vpop.xlane.xlu0 %947 }
 0x251   :  { %1072 = vrot.lane.b32.xlu1 %v2647_v3, %s2060_s5 }
 0x255   :  { %1373 = vrot.lane.b32.xlu1 %v2653_v15, %s2061_s13  ;;  %v721_v15 = vmul.f32 1.442695, %v691_v25  ;;  %v1258_v25 = vpop.xlane.xlu0 %1257 }
 0x257   :  { %1803 = vpow2.f32 %v721_v15  ;;  %v1294_v15 = vsub.f32 %v2309_v39, %v1258_v25 }
 0x258   :  { %1805 = vpow2.f32 %v1022_v2 }
 0x259   :  { %1807 = vpow2.f32 %v1323_v45  ;;  %v1325_v2 = vmul.f32 1.442695, %v1294_v15 }
 0x261   :  { %v2675_v24 = vpop.eup %1803 }
 0x262   :  { %3727 = vst [vmem:[#allocation18_spill] sm:$0xff] %v2675_v24  ;;  %v2680_v34 = vpop.eup %1805 }
 0x263   :  { %3728 = vst [vmem:[#allocation19_spill] sm:$0xff] %v2680_v34 }
 0x269   :  { %533 = vadd.xlane.f32.xlu0 %v532_v58  ;;  %v692_v58 = vsub.f32 %v2309_v39, %v656_v57  ;;  %v2684_v57 = vpop.eup %1807 }
 0x26a   :  { %3729 = vst [vmem:[#allocation20_spill] sm:$0xff] %v2684_v57 }
 0x26b   :  { %v723_v16 = vmul.f32 1.442695, %v692_v58  ;;  %v470_v58 = vsub.f32 %v2388_v26, %v432_v28  ;;  %v689_v26 = vsub.f32 %v2299_v32, %v647_v18 }
 0x26d   :  { %1809 = vpow2.f32 %v723_v16  ;;  %v500_v16 = vmul.f32 1.442695, %v470_v58  ;;  %v717_v28 = vmul.f32 1.442695, %v689_v26  ;;  %v1291_v58 = vsub.f32 %v2299_v32, %v2660_v62 }
 0x26e   :  { %1811 = vpow2.f32 %v1024_v47  ;;  %v502_v47 = vmul.f32 1.442695, %v471_v43 }
 0x26f   :  { %1813 = vpow2.f32 %v1325_v2  ;;  %v429_v2 = vpop.xlane.xlu1 %428  ;;  %v1319_v43 = vmul.f32 1.442695, %v1291_v58 }
 0x270   :  { %1815 = vpow2.f32 %v500_v16 }
 0x271   :  { %1817 = vpow2.f32 %v502_v47 }
 0x272   :  { %1819 = vpow2.f32 %v717_v28 }
 0x273   :  { %v650_v44 = vpop.xlane.xlu1 %649 }
 0x274   :  { %v690_v16 = vsub.f32 %v2312_v41, %v650_v44 }
 0x276   :  { %v719_v18 = vmul.f32 1.442695, %v690_v16  ;;  %v468_v16 = vsub.f32 %v2299_v32, %v2664_v17 }
 0x277   :  { %v2688_v55 = vpop.eup %1809 }
 0x278   :  { %3730 = vst [vmem:[#allocation21_spill] sm:$0xff] %v2688_v55  ;;  %v2692_v45 = vpop.eup %1811 }
 0x279   :  { %536 = vadd.xlane.f32.xlu1 %v535_v21  ;;  %3731 = vst [vmem:[#allocation22_spill] sm:$0xff] %v2692_v45  ;;  %v2697_v21 = vpop.eup %1813 }
 0x27a   :  { %3732 = vst [vmem:[#allocation23_spill] sm:$0xff] %v2697_v21  ;;  %v2702_v25 = vpop.eup %1815 }
 0x27b   :  { %3733 = vst [vmem:[#allocation24_spill] sm:$0xff] %v2702_v25  ;;  %v550_v15 = vsel %vm399_vm2, %v2702_v25, 0.0  ;;  %v2710_v13 = vpop.eup %1817 }
 0x27c   :  { %3734 = vst [vmem:[#allocation25_spill] sm:$0xff] %v2710_v13  ;;  %v553_v47 = vsel %vm399_vm2, %v2710_v13, 0.0  ;;  %v2716_v26 = vpop.eup %1819 }
 0x27d   :  { %3735 = vst [vmem:[#allocation26_spill] sm:$0xff] %v2716_v26 }
 0x27f   :  { %781 = vrot.lane.b32.xlu0 %v2675_v24, %s2059_s1 }
 0x283   :  { %1082 = vrot.lane.b32.xlu0 %v2680_v34, %s2060_s5 }
 0x287   :  { %1383 = vrot.lane.b32.xlu0 %v2684_v57, %s2061_s13  ;;  %v990_v57 = vsub.f32 %v2299_v32, %v948_v53 }
 0x289   :  { %v1018_v39 = vmul.f32 1.442695, %v990_v57 }
 0x28a   :  { %783 = vrot.lane.b32.xlu1 %v2688_v55, %s2059_s1 }
 0x28b   :  { %1821 = vpow2.f32 %v1018_v39 }
 0x28c   :  { %1823 = vpow2.f32 %v1319_v43 }
 0x28d   :  { %1825 = vpow2.f32 %v719_v18 }
 0x28e   :  { %1084 = vrot.lane.b32.xlu1 %v2692_v45, %s2060_s5 }
 0x292   :  { %1385 = vrot.lane.b32.xlu1 %v2697_v21, %s2061_s13  ;;  %v951_v21 = vpop.xlane.xlu1 %950 }
 0x293   :  { %v991_v53 = vsub.f32 %v2312_v41, %v951_v21 }
 0x295   :  { %v1020_v62 = vmul.f32 1.442695, %v991_v53  ;;  %v2721_v44 = vpop.eup %1821 }
 0x296   :  { %3736 = vst [vmem:[#allocation27_spill] sm:$0xff] %v2721_v44  ;;  %v2725_v58 = vpop.eup %1823 }
 0x297   :  { %1827 = vpow2.f32 %v1020_v62  ;;  %3737 = vst [vmem:[#allocation28_spill] sm:$0xff] %v2725_v58  ;;  %v2729_v21 = vpop.eup %1825  ;;  %v469_v62 = vsub.f32 %v2312_v41, %v429_v2 }
 0x298   :  { %3738 = vst [vmem:[#allocation29_spill] sm:$0xff] %v2729_v21 }
 0x2a1   :  { %v2733_v39 = vpop.eup %1827 }
 0x2a2   :  { %3739 = vst [vmem:[#allocation30_spill] sm:$0xff] %v2733_v39 }
 0x2a6   :  { %551 = vadd.xlane.f32.xlu0 %v550_v15  ;;  %v1252_v15 = vpop.xlane.xlu0 %1251 }
 0x2a7   :  { %v1292_v57 = vsub.f32 %v2312_v41, %v1252_v15  ;;  %v1267_v15 = vpop.xlane.xlu1 %1266 }
 0x2a8   :  { %v1297_v8 = vsub.f32 %v2322_v46, %v1267_v15 }
 0x2a9   :  { %v1321_v28 = vmul.f32 1.442695, %v1292_v57 }
 0x2aa   :  { %v444_v18 = vpop.xlane.xlu0 %443 }
 0x2ab   :  { %1829 = vpow2.f32 %v1321_v28 }
 0x2ae   :  { %v665_v53 = vpop.xlane.xlu0 %664 }
 0x2b2   :  { %v966_v57 = vpop.xlane.xlu0 %965 }
 0x2b5   :  { %v2739_v43 = vpop.eup %1829 }
 0x2b6   :  { %554 = vadd.xlane.f32.xlu1 %v553_v47  ;;  %3740 = vst [vmem:[#allocation31_spill] sm:$0xff] %v2739_v43  ;;  %v496_v47 = vmul.f32 1.442695, %v468_v16  ;;  %v2750_v17 = vpop.xlane.xlu0 %437 }
 0x2b8   :  { %1831 = vpow2.f32 %v496_v47  ;;  %v695_v47 = vsub.f32 %v2322_v46, %v665_v53 }
 0x2ba   :  { %v659_v41 = vpop.xlane.xlu0 %658 }
 0x2bc   :  { %777 = vrot.lane.b32.xlu0 %v2716_v26, %s2059_s1  ;;  %v996_v26 = vsub.f32 %v2322_v46, %v966_v57 }
 0x2be   :  { %v1030_v36 = vmul.f32 1.442695, %v996_v26  ;;  %v960_v19 = vpop.xlane.xlu0 %959 }
 0x2c0   :  { %1078 = vrot.lane.b32.xlu0 %v2721_v44, %s2060_s5  ;;  %v498_v44 = vmul.f32 1.442695, %v469_v62 }
 0x2c2   :  { %v2744_v28 = vpop.eup %1831  ;;  %1833 = vpow2.f32 %v498_v44 }
 0x2c3   :  { %3741 = vst [vmem:[#allocation32_spill] sm:$0xff] %v2744_v28  ;;  %v544_v32 = vsel %vm399_vm2, %v2744_v28, 0.0  ;;  %v1331_v28 = vmul.f32 1.442695, %v1297_v8 }
 0x2c4   :  { %1379 = vrot.lane.b32.xlu0 %v2725_v58, %s2061_s13  ;;  %v2746_v58 = vpop.xlane.xlu1 %1260 }
 0x2c7   :  { %779 = vrot.lane.b32.xlu1 %v2729_v21, %s2059_s1 }
 0x2c8   :  { %v447_v16 = vpop.xlane.xlu1 %446 }
 0x2cb   :  { %1080 = vrot.lane.b32.xlu1 %v2733_v39, %s2060_s5 }
 0x2cc   :  { %v668_v2 = vpop.xlane.xlu1 %667  ;;  %v2755_v62 = vpop.eup %1833 }
 0x2cd   :  { %3742 = vst [vmem:[#allocation33_spill] sm:$0xff] %v2755_v62  ;;  %v547_v44 = vsel %vm399_vm2, %v2755_v62, 0.0 }
 0x2cf   :  { %1381 = vrot.lane.b32.xlu1 %v2739_v43, %s2061_s13  ;;  %v729_v43 = vmul.f32 1.442695, %v695_v47  ;;  %v1270_v47 = vpop.xlane.xlu0 %1269 }
 0x2d0   :  { %v969_v33 = vpop.xlane.xlu1 %968 }
 0x2d1   :  { %1835 = vpow2.f32 %v729_v43  ;;  %v997_v57 = vsub.f32 %v2332_v54, %v969_v33  ;;  %v1298_v43 = vsub.f32 %v2332_v54, %v1270_v47 }
 0x2d2   :  { %1837 = vpow2.f32 %v1030_v36 }
 0x2d3   :  { %1839 = vpow2.f32 %v1331_v28  ;;  %v1032_v26 = vmul.f32 1.442695, %v997_v57  ;;  %v1333_v36 = vmul.f32 1.442695, %v1298_v43  ;;  %v475_v57 = vsub.f32 %v2332_v54, %v447_v16 }
 0x2d5   :  { %v510_v43 = vmul.f32 1.442695, %v475_v57 }
 0x2db   :  { %v2761_v15 = vpop.eup %1835 }
 0x2dc   :  { %3743 = vst [vmem:[#allocation34_spill] sm:$0xff] %v2761_v15  ;;  %v2766_v8 = vpop.eup %1837 }
 0x2dd   :  { %3744 = vst [vmem:[#allocation35_spill] sm:$0xff] %v2766_v8 }
 0x2e3   :  { %545 = vadd.xlane.f32.xlu0 %v544_v32  ;;  %v696_v32 = vsub.f32 %v2332_v54, %v668_v2  ;;  %v2770_v2 = vpop.eup %1839 }
 0x2e4   :  { %3745 = vst [vmem:[#allocation36_spill] sm:$0xff] %v2770_v2 }
 0x2e5   :  { %v731_v53 = vmul.f32 1.442695, %v696_v32  ;;  %v474_v32 = vsub.f32 %v2322_v46, %v444_v18  ;;  %v693_v46 = vsub.f32 %v2325_v48, %v659_v41 }
 0x2e7   :  { %1841 = vpow2.f32 %v731_v53  ;;  %v508_v53 = vmul.f32 1.442695, %v474_v32  ;;  %v725_v18 = vmul.f32 1.442695, %v693_v46  ;;  %v1295_v32 = vsub.f32 %v2325_v48, %v2746_v58  ;;  %v1264_v46 = vpop.xlane.xlu0 %1263 }
 0x2e8   :  { %1843 = vpow2.f32 %v1032_v26  ;;  %v441_v26 = vpop.xlane.xlu1 %440 }
 0x2e9   :  { %1845 = vpow2.f32 %v1333_v36  ;;  %v1327_v57 = vmul.f32 1.442695, %v1295_v32 }
 0x2ea   :  { %1847 = vpow2.f32 %v508_v53 }
 0x2eb   :  { %1849 = vpow2.f32 %v510_v43 }
 0x2ec   :  { %1851 = vpow2.f32 %v725_v18 }
 0x2f1   :  { %v2774_v33 = vpop.eup %1841 }
 0x2f2   :  { %3746 = vst [vmem:[#allocation37_spill] sm:$0xff] %v2774_v33  ;;  %v2778_v28 = vpop.eup %1843 }
 0x2f3   :  { %548 = vadd.xlane.f32.xlu1 %v547_v44  ;;  %3747 = vst [vmem:[#allocation38_spill] sm:$0xff] %v2778_v28  ;;  %v2783_v44 = vpop.eup %1845 }
 0x2f4   :  { %3748 = vst [vmem:[#allocation39_spill] sm:$0xff] %v2783_v44  ;;  %v2788_v47 = vpop.eup %1847 }
 0x2f5   :  { %3749 = vst [vmem:[#allocation40_spill] sm:$0xff] %v2788_v47  ;;  %v562_v36 = vsel %vm399_vm2, %v2788_v47, 0.0  ;;  %v2796_v16 = vpop.eup %1849 }
 0x2f6   :  { %3750 = vst [vmem:[#allocation41_spill] sm:$0xff] %v2796_v16  ;;  %v565_v43 = vsel %vm399_vm2, %v2796_v16, 0.0  ;;  %v2802_v47 = vpop.eup %1851 }
 0x2f7   :  { %3751 = vst [vmem:[#allocation42_spill] sm:$0xff] %v2802_v47 }
 0x2f9   :  { %789 = vrot.lane.b32.xlu0 %v2761_v15, %s2059_s1 }
 0x2fd   :  { %1090 = vrot.lane.b32.xlu0 %v2766_v8, %s2060_s5  ;;  %v994_v8 = vsub.f32 %v2325_v48, %v960_v19 }
 0x2ff   :  { %v1026_v54 = vmul.f32 1.442695, %v994_v8 }
 0x301   :  { %1391 = vrot.lane.b32.xlu0 %v2770_v2, %s2061_s13  ;;  %v662_v2 = vpop.xlane.xlu1 %661  ;;  %1853 = vpow2.f32 %v1026_v54 }
 0x302   :  { %v694_v53 = vsub.f32 %v2335_v56, %v662_v2  ;;  %1855 = vpow2.f32 %v1327_v57  ;;  %v1296_v2 = vsub.f32 %v2335_v56, %v1264_v46 }
 0x304   :  { %791 = vrot.lane.b32.xlu1 %v2774_v33, %s2059_s1  ;;  %v727_v41 = vmul.f32 1.442695, %v694_v53  ;;  %v1329_v32 = vmul.f32 1.442695, %v1296_v2 }
 0x306   :  { %1857 = vpow2.f32 %v727_v41  ;;  %v472_v41 = vsub.f32 %v2325_v48, %v2750_v17 }
 0x308   :  { %1092 = vrot.lane.b32.xlu1 %v2778_v28, %s2060_s5  ;;  %v504_v2 = vmul.f32 1.442695, %v472_v41 }
 0x30b   :  { %v2809_v18 = vpop.eup %1853 }
 0x30c   :  { %1393 = vrot.lane.b32.xlu1 %v2783_v44, %s2061_s13  ;;  %v963_v44 = vpop.xlane.xlu1 %962  ;;  %3752 = vst [vmem:[#allocation43_spill] sm:$0xff] %v2809_v18  ;;  %v2815_v54 = vpop.eup %1855 }
 0x30d   :  { %v995_v19 = vsub.f32 %v2335_v56, %v963_v44  ;;  %3753 = vst [vmem:[#allocation44_spill] sm:$0xff] %v2815_v54 }
 0x30f   :  { %v1028_v8 = vmul.f32 1.442695, %v995_v19 }
 0x310   :  { %v2819_v53 = vpop.eup %1857 }
 0x311   :  { %1859 = vpow2.f32 %v1028_v8  ;;  %3754 = vst [vmem:[#allocation45_spill] sm:$0xff] %v2819_v53  ;;  %v2831_v8 = vpop.xlane.xlu0 %455 }
 0x312   :  { %1861 = vpow2.f32 %v1329_v32 }
 0x313   :  { %1863 = vpow2.f32 %v504_v2 }
 0x320   :  { %563 = vadd.xlane.f32.xlu0 %v562_v36  ;;  %v1279_v36 = vpop.xlane.xlu1 %1278 }
 0x324   :  { %v2804_v58 = vpop.xlane.xlu1 %1272 }
 0x328   :  { %v2813_v44 = vpop.xlane.xlu1 %458 }
 0x32c   :  { %v680_v57 = vpop.xlane.xlu1 %679 }
 0x330   :  { %566 = vadd.xlane.f32.xlu1 %v565_v43  ;;  %v2823_v43 = vpop.eup %1859  ;;  %v981_v19 = vpop.xlane.xlu1 %980 }
 0x331   :  { %3755 = vst [vmem:[#allocation46_spill] sm:$0xff] %v2823_v43  ;;  %v2829_v46 = vpop.eup %1861  ;;  %v1001_v21 = vsub.f32 %v2358_v6, %v981_v19 }
 0x332   :  { %3756 = vst [vmem:[#allocation47_spill] sm:$0xff] %v2829_v46 }
 0x334   :  { %v2835_v32 = vpop.xlane.xlu1 %452 }
 0x336   :  { %785 = vrot.lane.b32.xlu0 %v2802_v47, %s2059_s1 }
 0x33a   :  { %1086 = vrot.lane.b32.xlu0 %v2809_v18, %s2060_s5  ;;  %v2840_v18 = vpop.eup %1863 }
 0x33b   :  { %3757 = vst [vmem:[#allocation48_spill] sm:$0xff] %v2840_v18 }
 0x33e   :  { %1387 = vrot.lane.b32.xlu0 %v2815_v54, %s2061_s13  ;;  %v2837_v54 = vpop.xlane.xlu1 %673 }
 0x341   :  { %787 = vrot.lane.b32.xlu1 %v2819_v53, %s2059_s1  ;;  %v677_v53 = vpop.xlane.xlu0 %676 }
 0x342   :  { %v2842_v48 = vpop.xlane.xlu1 %974  ;;  %v699_v2 = vsub.f32 %v2345_v61, %v677_v53 }
 0x344   :  { %v737_v28 = vmul.f32 1.442695, %v699_v2 }
 0x345   :  { %1088 = vrot.lane.b32.xlu1 %v2823_v43, %s2060_s5  ;;  %v978_v15 = vpop.xlane.xlu0 %977  ;;  %v473_v43 = vsub.f32 %v2335_v56, %v441_v26 }
 0x346   :  { %v2848_v41 = vpop.permute.xlu1 %765  ;;  %v1000_v56 = vsub.f32 %v2345_v61, %v978_v15 }
 0x347   :  { %v506_v17 = vmul.f32 1.442695, %v473_v43  ;;  %v1301_v43 = vsub.f32 %v2345_v61, %v1279_v36  ;;  %v827_v13 = vsel %vm399_vm2, %v2848_v41, 0.0 }
 0x348   :  { %v1038_v16 = vmul.f32 1.442695, %v1000_v56  ;;  %v1040_v56 = vmul.f32 1.442695, %v1001_v21 }
 0x349   :  { %1389 = vrot.lane.b32.xlu1 %v2829_v46, %s2061_s13  ;;  %v2844_v47 = vpop.xlane.xlu0 %449  ;;  %v556_v46 = vsel %vm399_vm2, %v2840_v18, 0.0  ;;  %1865 = vpow2.f32 %v506_v17  ;;  %v1339_v53 = vmul.f32 1.442695, %v1301_v43 }
 0x34a   :  { %v2854_v26 = vpop.permute.xlu1 %1066  ;;  %1867 = vpow2.f32 %v737_v28 }
 0x34b   :  { %1869 = vpow2.f32 %v1038_v16 }
 0x34c   :  { %1871 = vpow2.f32 %v1339_v53 }
 0x34d   :  { %v2851_v31 = vpop.xlane.xlu0 %670 }
 0x34e   :  { %v2862_v17 = vpop.permute.xlu1 %767 }
 0x351   :  { %v2856_v33 = vpop.xlane.xlu0 %971 }
 0x352   :  { %v2867_v36 = vpop.permute.xlu1 %1068 }
 0x353   :  { %v2859_v18 = vpop.eup %1865 }
 0x354   :  { %3758 = vst [vmem:[#allocation49_spill] sm:$0xff] %v2859_v18  ;;  %v559_v2 = vsel %vm399_vm2, %v2859_v18, 0.0  ;;  %v2869_v28 = vpop.eup %1867 }
 0x355   :  { %v1282_v15 = vpop.xlane.xlu0 %1281  ;;  %3759 = vst [vmem:[#allocation50_spill] sm:$0xff] %v2869_v28  ;;  %v2876_v16 = vpop.eup %1869 }
 0x356   :  { %3760 = vst [vmem:[#allocation51_spill] sm:$0xff] %v2876_v16 }
 0x359   :  { %v2872_v62 = vpop.xlane.xlu0 %1275 }
 0x35d   :  { %557 = vadd.xlane.f32.xlu0 %v556_v46  ;;  %v700_v46 = vsub.f32 %v2358_v6, %v680_v57  ;;  %v1302_v57 = vsub.f32 %v2358_v6, %v1282_v15  ;;  %v2882_v19 = vpop.permute.xlu0 %1367  ;;  %v1737_v15 = vld [vmem:[%s3643_s2] sm:$0xff]  }
 0x35e   :  { %1684 = vmatprep.subr.bf16.mxu0 %v1737_v15 }
 0x35f   :  { %v739_v39 = vmul.f32 1.442695, %v700_v46  ;;  %v1341_v43 = vmul.f32 1.442695, %v1302_v57  ;;  %v2878_v46 = vpop.permute.xlu1 %1369  ;;  %1685 = vmatpush3.bf16.msra.mxu0 %v1737_v15 }
 0x361   :  { %1873 = vpow2.f32 %v739_v39  ;;  %v2884_v39 = vpop.eup %1871 }
 0x362   :  { %1875 = vpow2.f32 %v1040_v56  ;;  %3761 = vst [vmem:[#allocation52_spill] sm:$0xff] %v2884_v39 }
 0x363   :  { %1877 = vpow2.f32 %v1341_v43  ;;  %v2886_v21 = vpop.xlane.xlu1 %530  ;;  %v1738_v43 = vld [vmem:[%s3643_s2 + $0x8] sm:$0xff]  }
 0x364   :  { %1686 = vmatprep.subr.bf16.mxu0 %v1738_v43 }
 0x365   :  { %1687 = vmatpush3.bf16.msra.mxu0 %v1738_v43 }
 0x367   :  { %v2901_v57 = vpop.permute.xlu1 %763 }
 0x368   :  { %1689 = vmatmul.mubr.msk.bf16.vlgmr.msra.gmra.mrb[0].mxu0 %vm119_vm0, %v2150_v23 }
 0x369   :  { %1692 = vmatprep.mubr.msk.bf16.mxu0 %vm119_vm0, %v2162_v27  ;;  %v479_v27 = vsub.f32 %v2358_v6, %v2813_v44  ;;  %v697_v6 = vsub.f32 %v2348_v0, %v2851_v31  ;;  %v1299_v31 = vsub.f32 %v2348_v0, %v2804_v58 }
 0x36b   :  { %v2890_v53 = vpop.eup %1873  ;;  %v2916_v15 = vpop.permute.xlu1 %1064  ;;  %v518_v43 = vmul.f32 1.442695, %v479_v27 }
 0x36c   :  { %3762 = vst [vmem:[#allocation53_spill] sm:$0xff] %v2890_v53  ;;  %v2899_v56 = vpop.eup %1875 }
 0x36d   :  { %560 = vadd.xlane.f32.xlu1 %v559_v2  ;;  %v2892_v2 = vpop.xlane.xlu0 %527  ;;  %3763 = vst [vmem:[#allocation54_spill] sm:$0xff] %v2899_v56 }
 0x370   :  { %1693 = vmatmul.mubr.msk.bf16.gmra.mrb[4].mxu0 %vm119_vm0, %v2178_v35 }
 0x371   :  { %1696 = vmatprep.mubr.msk.bf16.mxu0 %vm119_vm0, %v2186_v38 }
 0x373   :  { %797 = vrot.lane.b32.xlu0 %v2869_v28, %s2059_s1  ;;  %v2924_v28 = vpop.permute.xlu1 %1365 }
 0x377   :  { %1098 = vrot.lane.b32.xlu0 %v2876_v16, %s2060_s5  ;;  %v478_v16 = vsub.f32 %v2345_v61, %v2831_v8  ;;  %v2932_v8 = vpop.xlane.xlu1 %524 }
 0x378   :  { %3765 = vst [vmem:[#allocation56_spill] sm:$0xff] %v2932_v8  ;;  %1697 = vmatmul.mubr.msk.bf16.gmra.mrb[8].mxu0 %vm119_vm0, %v2210_v49  ;;  %v733_v49 = vmul.f32 1.442695, %v697_v6 }
 0x379   :  { %v516_v18 = vmul.f32 1.442695, %v478_v16  ;;  %1700 = vmatprep.mubr.msk.bf16.mxu0 %vm119_vm0, %v2218_v52  ;;  %v998_v52 = vsub.f32 %v2348_v0, %v2856_v33 }
 0x37b   :  { %1399 = vrot.lane.b32.xlu0 %v2884_v39, %s2061_s13  ;;  %v2908_v39 = vpop.permute.xlu0 %761  ;;  %1879 = vpow2.f32 %v516_v18  ;;  %v2940_v18 = vpop.permute.xlu1 %1074 }
 0x37c   :  { %1881 = vpow2.f32 %v518_v43 }
 0x37d   :  { %1883 = vpow2.f32 %v733_v49  ;;  %v999_v49 = vsub.f32 %v2361_v11, %v2842_v48 }
 0x37e   :  { %799 = vrot.lane.b32.xlu1 %v2890_v53, %s2059_s1  ;;  %v2912_v53 = vpop.eup %1877 }
 0x37f   :  { %3764 = vst [vmem:[#allocation55_spill] sm:$0xff] %v2912_v53  ;;  %v2952_v44 = vpop.permute.xlu1 %775 }
 0x380   :  { %1701 = vmatmul.mubr.msk.bf16.gmra.mrb[12].mxu0 %vm119_vm0, %v2242_v63  ;;  %v698_v63 = vsub.f32 %v2361_v11, %v2837_v54 }
 0x381   :  { %1704 = vmatprep.mubr.msk.bf16.mxu0 %vm119_vm0, %v2247_v1  ;;  %v1335_v1 = vmul.f32 1.442695, %v1299_v31  ;;  %v1036_v31 = vmul.f32 1.442695, %v999_v49 }
 0x382   :  { %1100 = vrot.lane.b32.xlu1 %v2899_v56, %s2060_s5  ;;  %v2922_v56 = vpop.permute.xlu0 %1062  ;;  %v735_v58 = vmul.f32 1.442695, %v698_v63 }
 0x383   :  { %v2962_v27 = vpop.permute.xlu1 %1076 }
 0x385   :  { %v2938_v16 = vpop.eup %1879 }
 0x386   :  { %1401 = vrot.lane.b32.xlu1 %v2912_v53, %s2061_s13  ;;  %v2926_v61 = vpop.permute.xlu0 %1363  ;;  %3766 = vst [vmem:[#allocation57_spill] sm:$0xff] %v2938_v16  ;;  %v574_v38 = vsel %vm399_vm2, %v2938_v16, 0.0  ;;  %v2968_v16 = vpop.eup %1881 }
 0x387   :  { %3767 = vst [vmem:[#allocation58_spill] sm:$0xff] %v2968_v16  ;;  %v2974_v33 = vpop.permute.xlu1 %1377  ;;  %v577_v8 = vsel %vm399_vm2, %v2968_v16, 0.0 }
 0x388   :  { %1705 = vmatmul.mubr.msk.bf16.gmra.mrb[16].mxu0 %vm119_vm0, %v2262_v7  ;;  %v2984_v7 = vpop.eup %1883 }
 0x389   :  { %3768 = vst [vmem:[#allocation59_spill] sm:$0xff] %v2984_v7 }
 0x38a   :  { %v2934_v23 = vpop.xlane.xlu0 %521 }
 0x38e   :  { %v2946_v35 = vpop.permute.xlu0 %773 }
 0x392   :  { %v2954_v53 = vpop.permute.xlu0 %1375 }
 0x396   :  { %v2964_v43 = vpop.xlane.xlu0 %539 }
 0x39a   :  { %575 = vadd.xlane.f32.xlu0 %v574_v38  ;;  %v1034_v38 = vmul.f32 1.442695, %v998_v52  ;;  %v2976_v6 = vpop.permute.xlu0 %769  ;;  %v2982_v52 = vpop.xlane.xlu1 %542 }
 0x39c   :  { %1885 = vpow2.f32 %v1034_v38  ;;  %v1300_v38 = vsub.f32 %v2361_v11, %v2872_v62 }
 0x39d   :  { %1887 = vpow2.f32 %v1335_v1 }
 0x39e   :  { %v2986_v54 = vpop.permute.xlu0 %1070  ;;  %1889 = vpow2.f32 %v735_v58  ;;  %v2994_v63 = vpop.permute.xlu1 %771  ;;  %v1337_v48 = vmul.f32 1.442695, %v1300_v38 }
 0x39f   :  { %1891 = vpow2.f32 %v1036_v31 }
 0x3a0   :  { %1893 = vpow2.f32 %v1337_v48  ;;  %v476_v48 = vsub.f32 %v2348_v0, %v2844_v47  ;;  %v477_v0 = vsub.f32 %v2361_v11, %v2835_v32  ;;  %v1128_v11 = vsel %vm399_vm2, %v2854_v26, 0.0 }
 0x3a1   :  { %v824_v26 = vsel %vm399_vm2, %v2901_v57, 0.0  ;;  %v842_v57 = vsel %vm399_vm2, %v2952_v44, 0.0  ;;  %v833_v44 = vsel %vm399_vm2, %v2976_v6, 0.0 }
 0x3a2   :  { %v2998_v1 = vpop.permute.xlu0 %1371  ;;  %v3004_v62 = vpop.permute.xlu1 %1072  ;;  %v514_v24 = vmul.f32 1.442695, %v477_v0 }
 0x3a6   :  { %v3006_v58 = vpop.xlane.xlu0 %533  ;;  %v3014_v38 = vpop.permute.xlu1 %1373 }
 0x3a7   :  { %3771 = vst [vmem:[#allocation62_spill] sm:$0xff] %v3006_v58 }
 0x3aa   :  { %578 = vadd.xlane.f32.xlu1 %v577_v8  ;;  %v2992_v8 = vpop.eup %1885 }
 0x3ab   :  { %3769 = vst [vmem:[#allocation60_spill] sm:$0xff] %v2992_v8  ;;  %v3000_v16 = vpop.eup %1887 }
 0x3ac   :  { %3770 = vst [vmem:[#allocation61_spill] sm:$0xff] %v3000_v16  ;;  %v3008_v49 = vpop.eup %1889 }
 0x3ad   :  { %3772 = vst [vmem:[#allocation63_spill] sm:$0xff] %v3008_v49  ;;  %v3012_v31 = vpop.eup %1891 }
 0x3ae   :  { %3773 = vst [vmem:[#allocation64_spill] sm:$0xff] %v3012_v31 }
 0x3b0   :  { %793 = vrot.lane.b32.xlu0 %v2984_v7, %s2059_s1  ;;  %v3024_v7 = vpop.xlane.xlu1 %536 }
 0x3b4   :  { %1094 = vrot.lane.b32.xlu0 %v2992_v8, %s2060_s5  ;;  %v3016_v8 = vpop.permute.xlu0 %781  ;;  %v3030_v34 = vpop.permute.xlu1 %783 }
 0x3b5   :  { %v851_v6 = vsel %vm399_vm2, %v3016_v8, 0.0 }
 0x3b8   :  { %1395 = vrot.lane.b32.xlu0 %v3000_v16, %s2061_s13  ;;  %v3022_v16 = vpop.eup %1893  ;;  %v3028_v58 = vpop.permute.xlu0 %1082 }
 0x3b9   :  { %3774 = vst [vmem:[#allocation65_spill] sm:$0xff] %v3022_v16  ;;  %v3034_v25 = vpop.permute.xlu1 %1084 }
 0x3bb   :  { %795 = vrot.lane.b32.xlu1 %v3008_v49, %s2059_s1  ;;  %v512_v49 = vmul.f32 1.442695, %v476_v48 }
 0x3bc   :  { %v3032_v45 = vpop.permute.xlu0 %1383 }
 0x3bd   :  { %1895 = vpow2.f32 %v512_v49  ;;  %v3042_v55 = vpop.permute.xlu1 %1385 }
 0x3be   :  { %1897 = vpow2.f32 %v514_v24 }
 0x3bf   :  { %1096 = vrot.lane.b32.xlu1 %v3012_v31, %s2060_s5 }
 0x3c0   :  { %v3036_v31 = vpop.xlane.xlu0 %551 }
 0x3c3   :  { %1397 = vrot.lane.b32.xlu1 %v3022_v16, %s2061_s13  ;;  %v3048_v16 = vpop.xlane.xlu1 %554 }
 0x3c4   :  { %v3044_v48 = vpop.permute.xlu0 %777 }
 0x3c7   :  { %v3040_v47 = vpop.eup %1895  ;;  %v780_v32 = vpop.permute.xlu1 %779 }
 0x3c8   :  { %3775 = vst [vmem:[#allocation66_spill] sm:$0xff] %v3040_v47  ;;  %v568_v49 = vsel %vm399_vm2, %v3040_v47, 0.0  ;;  %v3052_v3 = vpop.permute.xlu0 %1078  ;;  %v821_v47 = vsel %vm399_vm2, %v2908_v39, 0.0  ;;  %v830_v39 = vsel %vm399_vm2, %v2862_v17, 0.0  ;;  %v839_v17 = vsel %vm399_vm2, %v2946_v35, 0.0 }
 0x3cb   :  { %v1081_v24 = vpop.permute.xlu1 %1080 }
 0x3cc   :  { %v3056_v0 = vpop.permute.xlu0 %1379 }
 0x3d0   :  { %v3062_v50 = vpop.xlane.xlu0 %545 }
 0x3d1   :  { %3777 = vst [vmem:[#allocation68_spill] sm:$0xff] %v3062_v50  ;;  %v1125_v50 = vsel %vm399_vm2, %v2916_v15, 0.0  ;;  %v1143_v15 = vsel %vm399_vm2, %v2962_v27, 0.0  ;;  %v1137_v27 = vsel %vm399_vm2, %v3004_v62, 0.0  ;;  %v1155_v62 = vsel %vm399_vm2, %v3034_v25, 0.0 }
 0x3d2   :  { %v1146_v25 = vsel %vm399_vm2, %v3052_v3, 0.0 }
 0x3d7   :  { %569 = vadd.xlane.f32.xlu0 %v568_v49  ;;  %v3060_v49 = vpop.eup %1897 }
 0x3d8   :  { %3776 = vst [vmem:[#allocation67_spill] sm:$0xff] %v3060_v49  ;;  %v571_v41 = vsel %vm399_vm2, %v3060_v49, 0.0  ;;  %v1131_v49 = vsel %vm399_vm2, %v2867_v36, 0.0  ;;  %v1140_v36 = vsel %vm399_vm2, %v2940_v18, 0.0  ;;  %v1134_v18 = vsel %vm399_vm2, %v2986_v54, 0.0 }
 0x3d9   :  { %v1152_v54 = vsel %vm399_vm2, %v3028_v58, 0.0 }
 0x3db   :  { %828 = vadd.xlane.f32.xlu0 %v827_v13  ;;  %v1122_v13 = vsel %vm399_vm2, %v2922_v56, 0.0 }
 0x3df   :  { %1129 = vadd.xlane.f32.xlu0 %v1128_v11  ;;  %v3072_v11 = vpop.permute.xlu1 %1381 }
 0x3e3   :  { %822 = vadd.xlane.f32.xlu0 %v821_v47  ;;  %v790_v47 = vpop.permute.xlu0 %789  ;;  %v3078_v56 = vpop.xlane.xlu1 %548 }
 0x3e7   :  { %572 = vadd.xlane.f32.xlu1 %v571_v41  ;;  %1123 = vadd.xlane.f32.xlu0 %v1122_v13  ;;  %v1091_v41 = vpop.permute.xlu0 %1090  ;;  %v792_v13 = vpop.permute.xlu1 %791 }
 0x3eb   :  { %825 = vadd.xlane.f32.xlu1 %v824_v26  ;;  %831 = vadd.xlane.f32.xlu0 %v830_v39  ;;  %v3088_v26 = vpop.permute.xlu0 %1391  ;;  %v1093_v35 = vpop.permute.xlu1 %1092 }
 0x3ef   :  { %1126 = vadd.xlane.f32.xlu1 %v1125_v50  ;;  %1132 = vadd.xlane.f32.xlu0 %v1131_v49  ;;  %v836_v50 = vsel %vm399_vm2, %v2994_v63, 0.0  ;;  %v3094_v49 = vpop.xlane.xlu0 %563  ;;  %v3100_v39 = vpop.permute.xlu1 %1393  ;;  %v854_v63 = vsel %vm399_vm2, %v3030_v34, 0.0  ;;  %v845_v34 = vsel %vm399_vm2, %v3044_v48, 0.0  ;;  %v1164_v48 = vsel %vm399_vm2, %v1091_v41, 0.0 }
 0x3f3   :  { %843 = vadd.xlane.f32.xlu1 %v842_v57  ;;  %840 = vadd.xlane.f32.xlu0 %v839_v17  ;;  %v786_v57 = vpop.permute.xlu0 %785  ;;  %v3106_v17 = vpop.xlane.xlu1 %566 }
 0x3f4   :  { %v857_v3 = vsel %vm399_vm2, %v786_v57, 0.0 }
 0x3f7   :  { %1144 = vadd.xlane.f32.xlu1 %v1143_v15  ;;  %1141 = vadd.xlane.f32.xlu0 %v1140_v36  ;;  %v1087_v15 = vpop.permute.xlu0 %1086  ;;  %v848_v36 = vsel %vm399_vm2, %v780_v32, 0.0  ;;  %v863_v32 = vsel %vm399_vm2, %v790_v47, 0.0 }
 0x3fb   :  { %837 = vadd.xlane.f32.xlu1 %v836_v50  ;;  %834 = vadd.xlane.f32.xlu0 %v833_v44  ;;  %v788_v50 = vpop.permute.xlu1 %787  ;;  %v3115_v8 = vpop.permute.xlu0 %1387  ;;  %v1149_v44 = vsel %vm399_vm2, %v1081_v24, 0.0 }
 0x3ff   :  { %1138 = vadd.xlane.f32.xlu1 %v1137_v27  ;;  %1135 = vadd.xlane.f32.xlu0 %v1134_v18  ;;  %v1089_v58 = vpop.permute.xlu1 %1088  ;;  %v3120_v27 = vpop.xlane.xlu0 %557  ;;  %v866_v18 = vsel %vm399_vm2, %v792_v13, 0.0  ;;  %v1158_v13 = vsel %vm399_vm2, %v1087_v15, 0.0 }
 0x400   :  { %v1161_v41 = vsel %vm399_vm2, %v1089_v58, 0.0 }
 0x403   :  { %855 = vadd.xlane.f32.xlu1 %v854_v63  ;;  %852 = vadd.xlane.f32.xlu0 %v851_v6  ;;  %v1167_v63 = vsel %vm399_vm2, %v1093_v35, 0.0  ;;  %v3126_v6 = vpop.permute.xlu1 %1389  ;;  %v798_v24 = vpop.permute.xlu0 %797 }
 0x407   :  { %1156 = vadd.xlane.f32.xlu1 %v1155_v62  ;;  %1153 = vadd.xlane.f32.xlu0 %v1152_v54  ;;  %v860_v62 = vsel %vm399_vm2, %v788_v50, 0.0  ;;  %v3130_v54 = vpop.xlane.xlu1 %560  ;;  %v1099_v47 = vpop.permute.xlu0 %1098 }
 0x408   :  { %v1176_v50 = vsel %vm399_vm2, %v1099_v47, 0.0 }
 0x40b   :  { %849 = vadd.xlane.f32.xlu1 %v848_v36  ;;  %846 = vadd.xlane.f32.xlu0 %v845_v34  ;;  %v800_v35 = vpop.permute.xlu1 %799  ;;  %v875_v36 = vsel %vm399_vm2, %v798_v24, 0.0  ;;  %v1426_v34 = vsel %vm399_vm2, %v2924_v28, 0.0  ;;  %v1400_v57 = vpop.permute.xlu0 %1399  ;;  %v1423_v24 = vsel %vm399_vm2, %v2926_v61, 0.0  ;;  %v1441_v61 = vsel %vm399_vm2, %v2954_v53, 0.0 }
 0x40c   :  { %v1459_v53 = vsel %vm399_vm2, %v3115_v8, 0.0  ;;  %v1477_v8 = vsel %vm399_vm2, %v1400_v57, 0.0 }
 0x40f   :  { %1150 = vadd.xlane.f32.xlu1 %v1149_v44  ;;  %1147 = vadd.xlane.f32.xlu0 %v1146_v25  ;;  %v878_v44 = vsel %vm399_vm2, %v800_v35, 0.0  ;;  %v1101_v25 = vpop.permute.xlu1 %1100 }
 0x410   :  { %v1179_v58 = vsel %vm399_vm2, %v1101_v25, 0.0  ;;  %v1456_v25 = vsel %vm399_vm2, %v3042_v55, 0.0  ;;  %v3185_v55 = vld [vmem:[%s3644_s3] ss:$0 sm:$0xff] }
 0x413   :  { %867 = vadd.xlane.f32.xlu1 %v866_v18  ;;  %864 = vadd.xlane.f32.xlu0 %v863_v32 }
 0x417   :  { %1168 = vadd.xlane.f32.xlu1 %v1167_v63  ;;  %1165 = vadd.xlane.f32.xlu0 %v1164_v48  ;;  %v3144_v63 = vpop.permute.xlu1 %1401 }
 0x41b   :  { %861 = vadd.xlane.f32.xlu1 %v860_v62  ;;  %858 = vadd.xlane.f32.xlu0 %v857_v3  ;;  %v1429_v62 = vsel %vm399_vm2, %v2882_v19, 0.0  ;;  %v1432_v19 = vsel %vm399_vm2, %v2878_v46, 0.0  ;;  %v1450_v46 = vsel %vm399_vm2, %v3072_v11, 0.0 }
 0x41f   :  { %1162 = vadd.xlane.f32.xlu1 %v1161_v41  ;;  %1159 = vadd.xlane.f32.xlu0 %v1158_v13  ;;  %v1435_v41 = vsel %vm399_vm2, %v2998_v1, 0.0  ;;  %v1438_v1 = vsel %vm399_vm2, %v3014_v38, 0.0 }
 0x423   :  { %1427 = vadd.xlane.f32.xlu1 %v1426_v34  ;;  %876 = vadd.xlane.f32.xlu0 %v875_v36  ;;  %v1447_v34 = vsel %vm399_vm2, %v3056_v0, 0.0  ;;  %v1465_v0 = vsel %vm399_vm2, %v3088_v26, 0.0  ;;  %v1468_v26 = vsel %vm399_vm2, %v3100_v39, 0.0 }
 0x427   :  { %879 = vadd.xlane.f32.xlu1 %v878_v44  ;;  %1177 = vadd.xlane.f32.xlu0 %v1176_v50  ;;  %v3139_v15 = vpop.xlane.xlu0 %575  ;;  %v1453_v50 = vsel %vm399_vm2, %v3032_v45, 0.0  ;;  %v1444_v44 = vsel %vm399_vm2, %v2974_v33, 0.0  ;;  %v1462_v33 = vsel %vm399_vm2, %v3126_v6, 0.0 }
 0x42b   :  { %1180 = vadd.xlane.f32.xlu1 %v1179_v58  ;;  %v794_v32 = vpop.permute.xlu0 %793 }
 0x42c   :  { %v869_v18 = vsel %vm399_vm2, %v794_v32, 0.0 }
 0x42d   :  { %870 = vadd.xlane.f32.xlu0 %v869_v18 }
 0x42f   :  { %v1095_v28 = vpop.permute.xlu0 %1094 }
 0x430   :  { %v1170_v48 = vsel %vm399_vm2, %v1095_v28, 0.0 }
 0x431   :  { %1171 = vadd.xlane.f32.xlu0 %v1170_v48 }
 0x433   :  { %v1396_v38 = vpop.permute.xlu0 %1395 }
 0x434   :  { %v1471_v45 = vsel %vm399_vm2, %v1396_v38, 0.0 }
 0x435   :  { %1424 = vadd.xlane.f32.xlu0 %v1423_v24 }
 0x437   :  { %v3148_v3 = vpop.xlane.xlu1 %578 }
 0x439   :  { %1430 = vadd.xlane.f32.xlu0 %v1429_v62 }
 0x43b   :  { %v796_v47 = vpop.permute.xlu1 %795  ;;  %v1690_v11 = vpop.f32.mrb[0].mxu0 }
 0x43c   :  { %v872_v13 = vsel %vm399_vm2, %v796_v47, 0.0  ;;  %v184_v58 = vpop.f32.mrb[1].mxu0  ;;  %v193_v6 = vadd.f32 %v1690_v11, %v3185_v55 }
 0x43d   :  { %873 = vadd.xlane.f32.xlu1 %v872_v13  ;;  %1436 = vadd.xlane.f32.xlu0 %v1435_v41  ;;  %v1691_v32 = vpop.f32.mrb[2].mxu0  ;;  %v185_v57 = vadd.f32 %v3185_v55, %v184_v58  ;;  %v1480_v13 = vsel %vm399_vm2, %v3144_v63, 0.0 }
 0x43e   :  { %v187_v28 = vpop.f32.mrb[3].mxu0  ;;  %v196_v48 = vadd.f32 %v1691_v32, %v3185_v55  ;;  %1608 = vst.msk [vmem:[%s3645_s6 + $0x10] sm:$0xff] %vm119_vm0, %v193_v6 }
 0x43f   :  { %v1097_v35 = vpop.permute.xlu1 %1096  ;;  %v188_v24 = vadd.f32 %v3185_v55, %v187_v28  ;;  %1606 = vst.msk [vmem:[%s3645_s6] sm:$0xff] %vm119_vm0, %v185_v57 }
 0x440   :  { %v1173_v36 = vsel %vm399_vm2, %v1097_v35, 0.0  ;;  %1609 = vst.msk [vmem:[%s3645_s6 + $0x18] sm:$0xff] %vm119_vm0, %v196_v48 }
 0x441   :  { %1174 = vadd.xlane.f32.xlu1 %v1173_v36  ;;  %1442 = vadd.xlane.f32.xlu0 %v1441_v61  ;;  %1607 = vst.msk [vmem:[%s3645_s6 + $0x8] sm:$0xff] %vm119_vm0, %v188_v24 }
 0x443   :  { %v1398_v18 = vpop.permute.xlu1 %1397  ;;  %v1694_v39 = vpop.f32.mrb[4].mxu0 }
 0x444   :  { %v1474_v62 = vsel %vm399_vm2, %v1398_v18, 0.0  ;;  %v200_v47 = vpop.f32.mrb[5].mxu0  ;;  %v209_v61 = vadd.f32 %v1694_v39, %v3185_v55 }
 0x445   :  { %1433 = vadd.xlane.f32.xlu1 %v1432_v19  ;;  %1448 = vadd.xlane.f32.xlu0 %v1447_v34  ;;  %v1695_v35 = vpop.f32.mrb[6].mxu0  ;;  %v201_v19 = vadd.f32 %v3185_v55, %v200_v47 }
 0x446   :  { %v203_v36 = vpop.f32.mrb[7].mxu0  ;;  %v212_v34 = vadd.f32 %v1695_v35, %v3185_v55  ;;  %1612 = vst.msk [vmem:[%s3645_s6 + $0x30] sm:$0xff] %vm119_vm0, %v209_v61 }
 0x447   :  { %1610 = vst.msk [vmem:[%s3645_s6 + $0x20] sm:$0xff] %vm119_vm0, %v201_v19 }
 0x448   :  { %1613 = vst.msk [vmem:[%s3645_s6 + $0x38] sm:$0xff] %vm119_vm0, %v212_v34 }
 0x449   :  { %1439 = vadd.xlane.f32.xlu1 %v1438_v1  ;;  %1454 = vadd.xlane.f32.xlu0 %v1453_v50  ;;  %v204_v1 = vadd.f32 %v3185_v55, %v203_v36 }
 0x44b   :  { %1611 = vst.msk [vmem:[%s3645_s6 + $0x28] sm:$0xff] %vm119_vm0, %v204_v1  ;;  %v1698_v63 = vpop.f32.mrb[8].mxu0 }
 0x44c   :  { %v225_v38 = vadd.f32 %v1698_v63, %v3185_v55 }
 0x44d   :  { %1445 = vadd.xlane.f32.xlu1 %v1444_v44  ;;  %1460 = vadd.xlane.f32.xlu0 %v1459_v53  ;;  %v216_v53 = vpop.f32.mrb[9].mxu0 }
 0x44e   :  { %1616 = vst.msk [vmem:[%s3645_s6 + $0x50] sm:$0xff] %vm119_vm0, %v225_v38 }
 0x451   :  { %1451 = vadd.xlane.f32.xlu1 %v1450_v46  ;;  %1466 = vadd.xlane.f32.xlu0 %v1465_v0  ;;  %v1699_v46 = vpop.f32.mrb[10].mxu0 }
 0x452   :  { %v219_v0 = vpop.f32.mrb[11].mxu0 }
 0x455   :  { %1457 = vadd.xlane.f32.xlu1 %v1456_v25  ;;  %1472 = vadd.xlane.f32.xlu0 %v1471_v45  ;;  %v217_v45 = vadd.f32 %v3185_v55, %v216_v53  ;;  %v228_v25 = vadd.f32 %v1699_v46, %v3185_v55 }
 0x457   :  { %1614 = vst.msk [vmem:[%s3645_s6 + $0x40] sm:$0xff] %vm119_vm0, %v217_v45  ;;  %1617 = vst.msk [vmem:[%s3645_s6 + $0x58] sm:$0xff] %vm119_vm0, %v228_v25 }
 0x459   :  { %1463 = vadd.xlane.f32.xlu1 %v1462_v33  ;;  %1478 = vadd.xlane.f32.xlu0 %v1477_v8  ;;  %v220_v33 = vadd.f32 %v3185_v55, %v219_v0 }
 0x45b   :  { %1615 = vst.msk [vmem:[%s3645_s6 + $0x48] sm:$0xff] %vm119_vm0, %v220_v33 }
 0x45d   :  { %1469 = vadd.xlane.f32.xlu1 %v1468_v26 }
 0x461   :  { %1475 = vadd.xlane.f32.xlu1 %v1474_v62 }
 0x464   :  { %v3210_v41 = vpop.xlane.xlu0 %569 }
 0x465   :  { %1481 = vadd.xlane.f32.xlu1 %v1480_v13 }
 0x468   :  { %v829_v50 = vpop.xlane.xlu0 %828 }
 0x469   :  { %1899 = vrcp.f32 %v829_v50 }
 0x46a   :  { %1901 = vrcp.f32 %v2892_v2  ;;  %v1702_v2 = vpop.f32.mrb[12].mxu0 }
 0x46b   :  { %v232_v58 = vpop.f32.mrb[13].mxu0  ;;  %v241_v57 = vadd.f32 %v1702_v2, %v3185_v55 }
 0x46c   :  { %v1130_v44 = vpop.xlane.xlu0 %1129  ;;  %v1703_v6 = vpop.f32.mrb[14].mxu0  ;;  %v233_v48 = vadd.f32 %v3185_v55, %v232_v58 }
 0x46d   :  { %1903 = vrcp.f32 %v1130_v44  ;;  %v235_v24 = vpop.f32.mrb[15].mxu0  ;;  %1620 = vst.msk [vmem:[%s3645_s6 + $0x70] sm:$0xff] %vm119_vm0, %v241_v57 }
 0x46e   :  { %v236_v47 = vadd.f32 %v3185_v55, %v235_v24  ;;  %1618 = vst.msk [vmem:[%s3645_s6 + $0x60] sm:$0xff] %vm119_vm0, %v233_v48  ;;  %v1706_v36 = vpop.f32.mrb[16].mxu0 }
 0x46f   :  { %v248_v19 = vpop.f32.mrb[17].mxu0  ;;  %v257_v44 = vadd.f32 %v1706_v36, %v3185_v55 }
 0x470   :  { %v823_v8 = vpop.xlane.xlu0 %822  ;;  %1619 = vst.msk [vmem:[%s3645_s6 + $0x68] sm:$0xff] %vm119_vm0, %v236_v47  ;;  %v1707_v63 = vpop.f32.mrb[18].mxu0  ;;  %v249_v46 = vadd.f32 %v3185_v55, %v248_v19 }
 0x471   :  { %1905 = vrcp.f32 %v823_v8  ;;  %v251_v0 = vpop.f32.mrb[19].mxu0  ;;  %v260_v38 = vadd.f32 %v1707_v63, %v3185_v55  ;;  %1624 = vst.msk [vmem:[%s3645_s6 + $0x90] sm:$0xff] %vm119_vm0, %v257_v44  ;;  %v3778_v44 = vld [vmem:[#allocation17_spill] sm:$0xff] }
 0x472   :  { %1907 = vrcp.f32 %v2934_v23  ;;  %v244_v23 = vadd.f32 %v1703_v6, %v3185_v55  ;;  %v252_v45 = vadd.f32 %v3185_v55, %v251_v0  ;;  %1622 = vst.msk [vmem:[%s3645_s6 + $0x80] sm:$0xff] %vm119_vm0, %v249_v46  ;;  %v3779_v0 = vld [vmem:[#allocation14_spill] sm:$0xff] }
 0x473   :  { %v1900_v11 = vpop.eup %1899  ;;  %1625 = vst.msk [vmem:[%s3645_s6 + $0x98] sm:$0xff] %vm119_vm0, %v260_v38 }
 0x474   :  { %v1902_v26 = vpop.eup %1901  ;;  %v3254_v32 = vpop.xlane.xlu1 %572  ;;  %v903_v28 = vmul.f32 %v1900_v11, %v2504_v30  ;;  %1621 = vst.msk [vmem:[%s3645_s6 + $0x78] sm:$0xff] %vm119_vm0, %v244_v23  ;;  %1623 = vst.msk [vmem:[%s3645_s6 + $0x88] sm:$0xff] %vm119_vm0, %v252_v45 }
 0x475   :  { %v1124_v18 = vpop.xlane.xlu0 %1123  ;;  %v602_v39 = vmul.f32 %v1902_v26, %v2530_v60 }
 0x476   :  { %1909 = vrcp.f32 %v1124_v18 }
 0x477   :  { %v1904_v62 = vpop.eup %1903  ;;  %v1525_v60 = vsel %vm399_vm2, %v602_v39, %v903_v28 }
 0x478   :  { %v1204_v13 = vmul.f32 %v1904_v62, %v2508_v37  ;;  %v3263_v35 = vpop.xlane.xlu1 %825 }
 0x479   :  { %v832_v30 = vpop.xlane.xlu0 %831 }
 0x47a   :  { %v3283_v37 = vsel %vm1543_vm5, %v1525_v60, %v1204_v13  ;;  %1911 = vrcp.f32 %v832_v30 }
 0x47b   :  { %v1906_v61 = vpop.eup %1905  ;;  %1913 = vrcp.f32 %v2886_v21 }
 0x47c   :  { %v3286_v34 = vpop.xlane.xlu1 %1126  ;;  %v1908_v50 = vpop.eup %1907  ;;  %v901_v53 = vmul.f32 %v1906_v61, %v2545_v29 }
 0x47d   :  { %v1133_v1 = vpop.xlane.xlu0 %1132  ;;  %v600_v21 = vmul.f32 %v1908_v50, %v2574_v14 }
 0x47e   :  { %1915 = vrcp.f32 %v1133_v1 }
 0x47f   :  { %1917 = vrcp.f32 %v2982_v52  ;;  %v1523_v14 = vsel %vm399_vm2, %v600_v21, %v901_v53 }
 0x480   :  { %v1910_v25 = vpop.eup %1909  ;;  %v844_v33 = vpop.xlane.xlu1 %843 }
 0x481   :  { %v841_v8 = vpop.xlane.xlu0 %840  ;;  %v1202_v29 = vmul.f32 %v1910_v25, %v2551_v51  ;;  %1919 = vrcp.f32 %v844_v33 }
 0x482   :  { %1921 = vrcp.f32 %v841_v8 }
 0x483   :  { %1923 = vrcp.f32 %v2964_v43  ;;  %v3315_v52 = vsel %vm1543_vm5, %v1523_v14, %v1202_v29  ;;  %v3780_v29 = vld [vmem:[#allocation25_spill] sm:$0xff] }
 0x484   :  { %v1912_v51 = vpop.eup %1911  ;;  %v1145_v55 = vpop.xlane.xlu1 %1144 }
 0x485   :  { %v1142_v2 = vpop.xlane.xlu0 %1141  ;;  %v1914_v11 = vpop.eup %1913  ;;  %1925 = vrcp.f32 %v1145_v55  ;;  %v904_v58 = vmul.f32 %v1912_v51, %v2512_v40  ;;  %v3781_v51 = vld [vmem:[#allocation21_spill] sm:$0xff] }
 0x486   :  { %1927 = vrcp.f32 %v1142_v2  ;;  %v603_v18 = vmul.f32 %v1914_v11, %v2535_v9 }
 0x488   :  { %v1916_v26 = vpop.eup %1915  ;;  %v838_v28 = vpop.xlane.xlu1 %837  ;;  %v1526_v48 = vsel %vm399_vm2, %v603_v18, %v904_v58 }
 0x489   :  { %v3319_v6 = vpop.xlane.xlu0 %834  ;;  %v1205_v57 = vmul.f32 %v1916_v26, %v2516_v42  ;;  %1929 = vrcp.f32 %v838_v28  ;;  %v1918_v43 = vpop.eup %1917  ;;  %v3782_v26 = vld [vmem:[#allocation18_spill] sm:$0xff] }
 0x48a   :  { %1931 = vrcp.f32 %v3024_v7  ;;  %v607_v30 = vmul.f32 %v1918_v43, %v2624_v59  ;;  %v3783_v43 = vld [vmem:[#allocation24_spill] sm:$0xff] }
 0x48b   :  { %v1920_v24 = vpop.eup %1919  ;;  %v3325_v62 = vsel %vm1543_vm5, %v1526_v48, %v1205_v57 }
 0x48c   :  { %v1922_v40 = vpop.eup %1921  ;;  %v1139_v39 = vpop.xlane.xlu1 %1138  ;;  %v908_v47 = vmul.f32 %v1920_v24, %v2602_v12  ;;  %v3784_v24 = vld [vmem:[#allocation22_spill] sm:$0xff] }
 0x48d   :  { %v3327_v23 = vpop.xlane.xlu0 %1135  ;;  %v1924_v9 = vpop.eup %1923  ;;  %1933 = vrcp.f32 %v1139_v39  ;;  %v907_v42 = vmul.f32 %v1922_v40, %v2590_v10 }
 0x48e   :  { %1935 = vrcp.f32 %v3048_v16  ;;  %v606_v60 = vmul.f32 %v1924_v9, %v2616_v22  ;;  %v1530_v1 = vsel %vm399_vm2, %v607_v30, %v908_v47 }
 0x48f   :  { %v1926_v13 = vpop.eup %1925 }
 0x490   :  { %v1928_v7 = vpop.eup %1927  ;;  %v1209_v36 = vmul.f32 %v1926_v13, %v2606_v20  ;;  %v856_v61 = vpop.xlane.xlu1 %855  ;;  %v1529_v12 = vsel %vm399_vm2, %v606_v60, %v907_v42  ;;  %v3785_v42 = vld [vmem:[#allocation19_spill] sm:$0xff] }
 0x491   :  { %v853_v19 = vpop.xlane.xlu0 %852  ;;  %v1208_v50 = vmul.f32 %v1928_v7, %v2594_v5  ;;  %1937 = vrcp.f32 %v856_v61 }
 0x492   :  { %v3339_v10 = vsel %vm1543_vm5, %v1530_v1, %v1209_v36  ;;  %1939 = vrcp.f32 %v853_v19  ;;  %v3786_v36 = vld [vmem:[#allocation33_spill] sm:$0xff] }
 0x493   :  { %v1930_v59 = vpop.eup %1929  ;;  %1941 = vrcp.f32 %v3036_v31  ;;  %v3343_v22 = vsel %vm1543_vm5, %v1529_v12, %v1208_v50  ;;  %v3787_v19 = vld [vmem:[#allocation29_spill] sm:$0xff] }
 0x494   :  { %v1932_v20 = vpop.eup %1931  ;;  %v1157_v16 = vpop.xlane.xlu1 %1156  ;;  %v906_v53 = vmul.f32 %v1930_v59, %v2643_v4 }
 0x495   :  { %v1154_v63 = vpop.xlane.xlu0 %1153  ;;  %1943 = vrcp.f32 %v1157_v16  ;;  %v605_v46 = vmul.f32 %v1932_v20, %v3778_v44  ;;  %v3788_v16 = vld [vmem:[#allocation30_spill] sm:$0xff] }
 0x496   :  { %1945 = vrcp.f32 %v1154_v63 }
 0x497   :  { %v1934_v5 = vpop.eup %1933  ;;  %1947 = vrcp.f32 %v3078_v56  ;;  %v1528_v21 = vsel %vm399_vm2, %v605_v46, %v906_v53 }
 0x498   :  { %v1207_v38 = vmul.f32 %v1934_v5, %v3779_v0  ;;  %v850_v45 = vpop.xlane.xlu1 %849  ;;  %v1936_v31 = vpop.eup %1935 }
 0x499   :  { %v3349_v25 = vpop.xlane.xlu0 %846  ;;  %1949 = vrcp.f32 %v850_v45  ;;  %v611_v14 = vmul.f32 %v1936_v31, %v3780_v29  ;;  %v3790_v31 = vld [vmem:[#allocation37_spill] sm:$0xff]  ;;  %v3791_v29 = vld [vmem:[#allocation56_spill] sm:$0xff] }
 0x49a   :  { %v3353_v33 = vsel %vm1543_vm5, %v1528_v21, %v1207_v38  ;;  %v3789_v38 = vld [vmem:[#allocation41_spill] sm:$0xff] }
 0x49b   :  { %v1938_v4 = vpop.eup %1937 }
 0x49c   :  { %v1940_v8 = vpop.eup %1939  ;;  %v912_v55 = vmul.f32 %v1938_v4, %v3781_v51  ;;  %v1151_v2 = vpop.xlane.xlu1 %1150 }
 0x49d   :  { %v3357_v56 = vpop.xlane.xlu0 %1147  ;;  %v1942_v11 = vpop.eup %1941  ;;  %1951 = vrcp.f32 %v1151_v2  ;;  %v911_v18 = vmul.f32 %v1940_v8, %v3782_v26 }
 0x49e   :  { %v1534_v58 = vsel %vm399_vm2, %v611_v14, %v912_v55  ;;  %1953 = vrcp.f32 %v3106_v17  ;;  %v610_v48 = vmul.f32 %v1942_v11, %v3783_v43  ;;  %v3792_v55 = vld [vmem:[#allocation38_spill] sm:$0xff] }
 0x49f   :  { %v1944_v28 = vpop.eup %1943 }
 0x4a0   :  { %v1946_v57 = vpop.eup %1945  ;;  %v1213_v40 = vmul.f32 %v1944_v28, %v3784_v24  ;;  %v868_v39 = vpop.xlane.xlu1 %867  ;;  %v1533_v30 = vsel %vm399_vm2, %v610_v48, %v911_v18  ;;  %v3794_v48 = vld [vmem:[#allocation5_spill] sm:$0xff] }
 0x4a1   :  { %v3364_v9 = vpop.xlane.xlu0 %864  ;;  %v1948_v47 = vpop.eup %1947  ;;  %v1212_v13 = vmul.f32 %v1946_v57, %v3785_v42  ;;  %1955 = vrcp.f32 %v868_v39  ;;  %v3793_v57 = vld [vmem:[#allocation4_spill] sm:$0xff] }
 0x4a2   :  { %v3369_v7 = vsel %vm1543_vm5, %v1534_v58, %v1213_v40  ;;  %v609_v61 = vmul.f32 %v1948_v47, %v3786_v36  ;;  %v3795_v40 = vld [vmem:[#allocation8_spill] sm:$0xff] }
 0x4a3   :  { %v1950_v60 = vpop.eup %1949  ;;  %v3372_v17 = vsel %vm1543_vm5, %v1533_v30, %v1212_v13  ;;  %v3796_v30 = vld [vmem:[#allocation7_spill] sm:$0xff] }
 0x4a4   :  { %v910_v1 = vmul.f32 %v1950_v60, %v3787_v19  ;;  %v1169_v50 = vpop.xlane.xlu1 %1168 }
 0x4a5   :  { %v3376_v12 = vpop.xlane.xlu0 %1165  ;;  %1957 = vrcp.f32 %v1169_v50  ;;  %v3797_v50 = vld [vmem:[#allocation62_spill] sm:$0xff] }
 0x4a6   :  { %v1532_v59 = vsel %vm399_vm2, %v609_v61, %v910_v1  ;;  %1959 = vrcp.f32 %v3263_v35 }
 0x4a7   :  { %v1952_v20 = vpop.eup %1951  ;;  %1961 = vrcp.f32 %v3286_v34 }
 0x4a8   :  { %v1211_v63 = vmul.f32 %v1952_v20, %v3788_v16  ;;  %v3380_v53 = vpop.xlane.xlu1 %861  ;;  %v1954_v44 = vpop.eup %1953  ;;  %1963 = vrcp.f32 %v3791_v29  ;;  %v3798_v20 = vld [vmem:[#allocation68_spill] sm:$0xff] }
 0x4a9   :  { %v3382_v5 = vpop.xlane.xlu0 %858  ;;  %v615_v45 = vmul.f32 %v1954_v44, %v3789_v38 }
 0x4aa   :  { %v3385_v46 = vsel %vm1543_vm5, %v1532_v59, %v1211_v63 }
 0x4ab   :  { %v1956_v0 = vpop.eup %1955 }
 0x4ac   :  { %v916_v21 = vmul.f32 %v1956_v0, %v3790_v31  ;;  %v3391_v4 = vpop.xlane.xlu1 %1162 }
 0x4ad   :  { %v3393_v8 = vpop.xlane.xlu0 %1159 }
 0x4ae   :  { %v1538_v14 = vsel %vm399_vm2, %v615_v45, %v916_v21  ;;  %v3799_v45 = vld [vmem:[#allocation6_spill] sm:$0xff] }
 0x4af   :  { %v1958_v51 = vpop.eup %1957 }
 0x4b0   :  { %v1217_v2 = vmul.f32 %v1958_v51, %v3792_v55  ;;  %v1428_v11 = vpop.xlane.xlu1 %1427  ;;  %v1960_v34 = vpop.eup %1959 }
 0x4b1   :  { %v3398_v58 = vpop.xlane.xlu0 %876  ;;  %1965 = vrcp.f32 %v1428_v11  ;;  %v1962_v26 = vpop.eup %1961  ;;  %v902_v43 = vmul.f32 %v1960_v34, %v3793_v57 }
 0x4b2   :  { %v3401_v35 = vsel %vm1543_vm5, %v1538_v14, %v1217_v2  ;;  %v1964_v28 = vpop.eup %1963  ;;  %v1203_v24 = vmul.f32 %v1962_v26, %v3794_v48  ;;  %1967 = vrcp.f32 %v3797_v50 }
 0x4b3   :  { %v601_v39 = vmul.f32 %v1964_v28, %v3795_v40 }
 0x4b4   :  { %v3420_v1 = vpop.xlane.xlu1 %879 }
 0x4b5   :  { %v3403_v18 = vpop.xlane.xlu0 %1177  ;;  %v1524_v13 = vsel %vm399_vm2, %v601_v39, %v902_v43  ;;  %v3804_v39 = vld [vmem:[#allocation13_spill] sm:$0xff] }
 0x4b6   :  { %v1545_v36 = vsel %vm1543_vm5, %v1524_v13, %v1203_v24 }
 0x4b8   :  { %v3426_v16 = vpop.xlane.xlu1 %1180 }
 0x4ba   :  { %v3408_v47 = vpop.xlane.xlu0 %870 }
 0x4bb   :  { %v1966_v42 = vpop.eup %1965 }
 0x4bc   :  { %v1504_v60 = vmul.f32 %v1966_v42, %v3796_v30  ;;  %v1968_v38 = vpop.eup %1967 }
 0x4be   :  { %v1566_v61 = vsel %vm1564_vm6, %v1545_v36, %v1504_v60  ;;  %v3414_v19 = vpop.xlane.xlu0 %1171 }
 0x4bf   :  { %1587 = vst.msk [vmem:[%s3646_s7 + $0x8] sm:$0xff] %vm1585_vm7, %v1566_v61 }
 0x4c2   :  { %v1425_v59 = vpop.xlane.xlu0 %1424 }
 0x4c3   :  { %1969 = vrcp.f32 %v1425_v59  ;;  %v3805_v59 = vld [vmem:[#allocation26_spill] sm:$0xff] }
 0x4c4   :  { %1971 = vrcp.f32 %v3798_v20 }
 0x4c5   :  { %1973 = vrcp.f32 %v3319_v6 }
 0x4c6   :  { %1975 = vrcp.f32 %v3327_v23  ;;  %v1431_v63 = vpop.xlane.xlu0 %1430 }
 0x4c7   :  { %1977 = vrcp.f32 %v1431_v63  ;;  %v3806_v63 = vld [vmem:[#allocation9_spill] sm:$0xff] }
 0x4c8   :  { %1979 = vrcp.f32 %v3094_v49 }
 0x4c9   :  { %1981 = vrcp.f32 %v3120_v27 }
 0x4ca   :  { %1983 = vrcp.f32 %v3130_v54  ;;  %v3431_v44 = vpop.xlane.xlu1 %873  ;;  %v1437_v0 = vpop.xlane.xlu0 %1436 }
 0x4cb   :  { %1985 = vrcp.f32 %v3139_v15 }
 0x4cc   :  { %1987 = vrcp.f32 %v1437_v0 }
 0x4cd   :  { %v1970_v6 = vpop.eup %1969  ;;  %1989 = vrcp.f32 %v3210_v41 }
 0x4ce   :  { %v1972_v23 = vpop.eup %1971  ;;  %1991 = vrcp.f32 %v3349_v25  ;;  %v1503_v31 = vmul.f32 %v1970_v6, %v3799_v45  ;;  %v3437_v49 = vpop.xlane.xlu1 %1174  ;;  %v3800_v25 = vld [vmem:[#allocation2_spill] sm:$0xff] }
 0x4cf   :  { %v1443_v27 = vpop.xlane.xlu0 %1442  ;;  %v1974_v21 = vpop.eup %1973  ;;  %1993 = vrcp.f32 %v3357_v56 }
 0x4d0   :  { %v1976_v54 = vpop.eup %1975  ;;  %v1565_v15 = vsel %vm1564_vm6, %v3315_v52, %v1503_v31  ;;  %1995 = vrcp.f32 %v1443_v27  ;;  %v3801_v52 = vld [vmem:[#allocation11_spill] sm:$0xff]  ;;  %v3808_v31 = vld [vmem:[#allocation32_spill] sm:$0xff] }
 0x4d1   :  { %v1978_v29 = vpop.eup %1977  ;;  %1997 = vrcp.f32 %v3364_v9  ;;  %1586 = vst.msk [vmem:[%s3646_s7] sm:$0xff] %vm1585_vm7, %v1565_v15  ;;  %v905_v2 = vmul.f32 %v1974_v21, %v3801_v52  ;;  %v3802_v9 = vld [vmem:[#allocation12_spill] sm:$0xff] }
 0x4d2   :  { %v3447_v41 = vpop.eup %1979  ;;  %1999 = vrcp.f32 %v3376_v12  ;;  %v1505_v14 = vmul.f32 %v1978_v29, %v3800_v25  ;;  %v1434_v56 = vpop.xlane.xlu1 %1433  ;;  %v1206_v34 = vmul.f32 %v1976_v54, %v3802_v9  ;;  %v3803_v12 = vld [vmem:[#allocation16_spill] sm:$0xff]  ;;  %v3809_v54 = vld [vmem:[#allocation3_spill] sm:$0xff] }
 0x4d3   :  { %v1449_v51 = vpop.xlane.xlu0 %1448  ;;  %v3451_v55 = vpop.eup %1981  ;;  %2001 = vrcp.f32 %v1434_v56  ;;  %v604_v57 = vmul.f32 %v1968_v38, %v3803_v12  ;;  %v3810_v56 = vld [vmem:[#allocation28_spill] sm:$0xff] }
 0x4d4   :  { %v3454_v11 = vpop.eup %1983  ;;  %v1567_v26 = vsel %vm1564_vm6, %v3283_v37, %v1505_v14  ;;  %2003 = vrcp.f32 %v1449_v51 }
 0x4d5   :  { %v3459_v28 = vpop.eup %1985  ;;  %2005 = vrcp.f32 %v3382_v5  ;;  %1588 = vst.msk [vmem:[%s3646_s7 + $0x10] sm:$0xff] %vm1585_vm7, %v1567_v26  ;;  %v1527_v37 = vsel %vm399_vm2, %v604_v57, %v905_v2  ;;  %v3812_v57 = vld [vmem:[#allocation42_spill] sm:$0xff] }
 0x4d6   :  { %v1988_v43 = vpop.eup %1987  ;;  %2007 = vrcp.f32 %v3393_v8  ;;  %v1440_v48 = vpop.xlane.xlu1 %1439  ;;  %v1548_v5 = vsel %vm1543_vm5, %v1527_v37, %v1206_v34 }
 0x4d7   :  { %v1455_v24 = vpop.xlane.xlu0 %1454  ;;  %v3468_v40 = vpop.eup %1989  ;;  %v1507_v42 = vmul.f32 %v1988_v43, %v3804_v39  ;;  %2009 = vrcp.f32 %v1440_v48  ;;  %v3813_v48 = vld [vmem:[#allocation20_spill] sm:$0xff]  ;;  %v3814_v39 = vld [vmem:[#allocation43_spill] sm:$0xff] }
 0x4d8   :  { %v1992_v13 = vpop.eup %1991  ;;  %2011 = vrcp.f32 %v1455_v24 }
 0x4d9   :  { %v1994_v30 = vpop.eup %1993  ;;  %2013 = vrcp.f32 %v3380_v53  ;;  %v1569_v60 = vsel %vm1564_vm6, %v1548_v5, %v1507_v42  ;;  %v909_v20 = vmul.f32 %v1992_v13, %v3805_v59  ;;  %v3807_v53 = vld [vmem:[#allocation27_spill] sm:$0xff]  ;;  %v3815_v5 = vld [vmem:[#allocation48_spill] sm:$0xff] }
 0x4da   :  { %v1996_v36 = vpop.eup %1995  ;;  %2015 = vrcp.f32 %v3391_v4  ;;  %1590 = vst.msk [vmem:[%s3646_s7 + $0x20] sm:$0xff] %vm1585_vm7, %v1569_v60  ;;  %v1446_v8 = vpop.xlane.xlu1 %1445  ;;  %v1210_v6 = vmul.f32 %v1994_v30, %v3807_v53  ;;  %v608_v4 = vmul.f32 %v1972_v23, %v3808_v31  ;;  %v612_v30 = vmul.f32 %v3451_v55, %v3815_v5  ;;  %v3818_v53 = vld [vmem:[#allocation44_spill] sm:$0xff] }
 0x4db   :  { %v1461_v61 = vpop.xlane.xlu0 %1460  ;;  %v1998_v50 = vpop.eup %1997  ;;  %v1509_v0 = vmul.f32 %v1996_v36, %v3806_v63  ;;  %2017 = vrcp.f32 %v1446_v8 }
 0x4dc   :  { %v2000_v38 = vpop.eup %1999  ;;  %2019 = vrcp.f32 %v1461_v61  ;;  %v1531_v23 = vsel %vm399_vm2, %v608_v4, %v909_v20  ;;  %v3817_v20 = vld [vmem:[#allocation34_spill] sm:$0xff] }
 0x4dd   :  { %v2002_v45 = vpop.eup %2001  ;;  %2021 = vrcp.f32 %v3408_v47  ;;  %v1571_v27 = vsel %vm1564_vm6, %v3343_v22, %v1509_v0  ;;  %v1552_v22 = vsel %vm1543_vm5, %v1531_v23, %v1210_v6  ;;  %v915_v63 = vmul.f32 %v1998_v50, %v3817_v20  ;;  %v3823_v23 = vld [vmem:[#allocation36_spill] sm:$0xff] }
 0x4de   :  { %v2004_v21 = vpop.eup %2003  ;;  %2023 = vrcp.f32 %v3414_v19  ;;  %1592 = vst.msk [vmem:[%s3646_s7 + $0x30] sm:$0xff] %vm1585_vm7, %v1571_v27  ;;  %v1506_v15 = vmul.f32 %v2002_v45, %v3809_v54  ;;  %v1452_v29 = vpop.xlane.xlu1 %1451  ;;  %v3819_v45 = vld [vmem:[#allocation35_spill] sm:$0xff] }
 0x4df   :  { %v1467_v25 = vpop.xlane.xlu0 %1466  ;;  %v2006_v14 = vpop.eup %2005  ;;  %v1511_v47 = vmul.f32 %v2004_v21, %v3810_v56  ;;  %2025 = vrcp.f32 %v1452_v29  ;;  %v3820_v21 = vld [vmem:[#allocation40_spill] sm:$0xff] }
 0x4e0   :  { %v2008_v51 = vpop.eup %2007  ;;  %v1568_v19 = vsel %vm1564_vm6, %v3325_v62, %v1506_v15  ;;  %2027 = vrcp.f32 %v1467_v25  ;;  %v3811_v62 = vld [vmem:[#allocation15_spill] sm:$0xff]  ;;  %v913_v43 = vmul.f32 %v2006_v14, %v3812_v57  ;;  %v614_v54 = vmul.f32 %v3447_v41, %v3820_v21 }
 0x4e1   :  { %v2010_v52 = vpop.eup %2009  ;;  %2029 = vrcp.f32 %v3398_v58  ;;  %1589 = vst.msk [vmem:[%s3646_s7 + $0x18] sm:$0xff] %vm1585_vm7, %v1568_v19  ;;  %v1573_v2 = vsel %vm1564_vm6, %v1552_v22, %v1511_v47  ;;  %v1214_v42 = vmul.f32 %v2008_v51, %v3814_v39  ;;  %v3822_v25 = vld [vmem:[#allocation59_spill] sm:$0xff]  ;;  %v3824_v51 = vld [vmem:[#allocation60_spill] sm:$0xff]  ;;  %v3830_v39 = vld [vmem:[#allocation61_spill] sm:$0xff] }
 0x4e2   :  { %v2012_v9 = vpop.eup %2011  ;;  %2031 = vrcp.f32 %v3403_v18  ;;  %1594 = vst.msk [vmem:[%s3646_s7 + $0x40] sm:$0xff] %vm1585_vm7, %v1573_v2  ;;  %v1508_v34 = vmul.f32 %v2010_v52, %v3811_v62  ;;  %v1458_v26 = vpop.xlane.xlu1 %1457  ;;  %v1535_v0 = vsel %vm399_vm2, %v612_v30, %v913_v43  ;;  %v3825_v2 = vld [vmem:[#allocation66_spill] sm:$0xff] }
 0x4e3   :  { %v1473_v12 = vpop.xlane.xlu0 %1472  ;;  %v2014_v58 = vpop.eup %2013  ;;  %v1513_v24 = vmul.f32 %v2012_v9, %v3813_v48  ;;  %2033 = vrcp.f32 %v1458_v26  ;;  %v1556_v31 = vsel %vm1543_vm5, %v1535_v0, %v1214_v42  ;;  %v616_v9 = vmul.f32 %v3468_v40, %v3825_v2  ;;  %v3829_v43 = vld [vmem:[#allocation50_spill] sm:$0xff]  ;;  %v3835_v0 = vld [vmem:[#allocation52_spill] sm:$0xff] }
 0x4e4   :  { %v2016_v37 = vpop.eup %2015  ;;  %v1570_v18 = vsel %vm1564_vm6, %v3353_v33, %v1508_v34  ;;  %2035 = vrcp.f32 %v1473_v12  ;;  %v3816_v33 = vld [vmem:[#allocation10_spill] sm:$0xff]  ;;  %v3826_v34 = vld [vmem:[#allocation45_spill] sm:$0xff] }
 0x4e5   :  { %v2018_v13 = vpop.eup %2017  ;;  %1591 = vst.msk [vmem:[%s3646_s7 + $0x28] sm:$0xff] %vm1585_vm7, %v1570_v18  ;;  %v1575_v60 = vsel %vm1564_vm6, %v3372_v17, %v1513_v24  ;;  %2037 = vrcp.f32 %v3254_v32  ;;  %v1216_v32 = vmul.f32 %v2000_v38, %v3819_v45  ;;  %v914_v26 = vmul.f32 %v2014_v58, %v3826_v34  ;;  %v3827_v12 = vld [vmem:[#allocation46_spill] sm:$0xff]  ;;  %v3831_v18 = vld [vmem:[#allocation49_spill] sm:$0xff]  ;;  %v3844_v34 = vld [vmem:[#allocation55_spill] sm:$0xff] }
 0x4e6   :  { %v2020_v36 = vpop.eup %2019  ;;  %1596 = vst.msk [vmem:[%s3646_s7 + $0x50] sm:$0xff] %vm1585_vm7, %v1575_v60  ;;  %v1510_v8 = vmul.f32 %v2018_v13, %v3816_v33  ;;  %v1464_v61 = vpop.xlane.xlu1 %1463  ;;  %v1215_v57 = vmul.f32 %v2016_v37, %v3827_v12  ;;  %v613_v37 = vmul.f32 %v3454_v11, %v3831_v18  ;;  %v3843_v2 = vld [vmem:[#allocation58_spill] sm:$0xff] }
 0x4e7   :  { %v1479_v55 = vpop.xlane.xlu0 %1478  ;;  %v2022_v59 = vpop.eup %2021  ;;  %v1515_v6 = vmul.f32 %v2020_v36, %v3818_v53  ;;  %2039 = vrcp.f32 %v1464_v61  ;;  %v3833_v36 = vld [vmem:[#allocation57_spill] sm:$0xff] }
 0x4e8   :  { %v2024_v17 = vpop.eup %2023  ;;  %v1572_v4 = vsel %vm1564_vm6, %v3339_v10, %v1510_v8  ;;  %2041 = vrcp.f32 %v1479_v55  ;;  %v3821_v10 = vld [vmem:[#allocation31_spill] sm:$0xff]  ;;  %v917_v14 = vmul.f32 %v2022_v59, %v3822_v25  ;;  %v618_v33 = vmul.f32 %v3459_v28, %v3833_v36 }
 0x4e9   :  { %v2026_v27 = vpop.eup %2025  ;;  %2043 = vrcp.f32 %v3431_v44  ;;  %1593 = vst.msk [vmem:[%s3646_s7 + $0x38] sm:$0xff] %vm1585_vm7, %v1572_v4  ;;  %v1577_v50 = vsel %vm1564_vm6, %v1556_v31, %v1515_v6  ;;  %v1537_v44 = vsel %vm399_vm2, %v614_v54, %v915_v63  ;;  %v1218_v22 = vmul.f32 %v2024_v17, %v3824_v51  ;;  %v3837_v54 = vld [vmem:[#allocation39_spill] sm:$0xff] }
 0x4ea   :  { %v2028_v38 = vpop.eup %2027  ;;  %2045 = vrcp.f32 %v3437_v49  ;;  %1598 = vst.msk [vmem:[%s3646_s7 + $0x60] sm:$0xff] %vm1585_vm7, %v1577_v50  ;;  %v1512_v15 = vmul.f32 %v2026_v27, %v3821_v10  ;;  %v1470_v41 = vpop.xlane.xlu1 %1469  ;;  %v1558_v49 = vsel %vm1543_vm5, %v1537_v44, %v1216_v32  ;;  %v1539_v24 = vsel %vm399_vm2, %v616_v9, %v917_v14  ;;  %v3836_v27 = vld [vmem:[#allocation63_spill] sm:$0xff]  ;;  %v3838_v10 = vld [vmem:[#allocation64_spill] sm:$0xff] }
 0x4eb   :  { %v2030_v29 = vpop.eup %2029  ;;  %v1517_v56 = vmul.f32 %v2028_v38, %v3823_v23  ;;  %2047 = vrcp.f32 %v1470_v41  ;;  %v1560_v5 = vsel %vm1543_vm5, %v1539_v24, %v1218_v22  ;;  %v1536_v11 = vsel %vm399_vm2, %v613_v37, %v914_v26  ;;  %v3840_v23 = vld [vmem:[#allocation53_spill] sm:$0xff]  ;;  %v3842_v22 = vld [vmem:[#allocation54_spill] sm:$0xff] }
 0x4ec   :  { %v2032_v47 = vpop.eup %2031  ;;  %2049 = vrcp.f32 %v3148_v3  ;;  %v1574_v19 = vsel %vm1564_vm6, %v3385_v46, %v1512_v15  ;;  %v3828_v46 = vld [vmem:[#allocation23_spill] sm:$0xff]  ;;  %v919_v48 = vmul.f32 %v2030_v29, %v3829_v43  ;;  %v1557_v28 = vsel %vm1543_vm5, %v1536_v11, %v1215_v57 }
 0x4ed   :  { %v2034_v52 = vpop.eup %2033  ;;  %2051 = vrcp.f32 %v3420_v1  ;;  %1595 = vst.msk [vmem:[%s3646_s7 + $0x48] sm:$0xff] %vm1585_vm7, %v1574_v19  ;;  %v1579_v3 = vsel %vm1564_vm6, %v1558_v49, %v1517_v56  ;;  %v3839_v29 = vld [vmem:[#allocation67_spill] sm:$0xff]  ;;  %v3841_v49 = vld [vmem:[#allocation65_spill] sm:$0xff] }
 0x4ee   :  { %v2036_v62 = vpop.eup %2035  ;;  %2053 = vrcp.f32 %v3426_v16  ;;  %1600 = vst.msk [vmem:[%s3646_s7 + $0x70] sm:$0xff] %vm1585_vm7, %v1579_v3  ;;  %v1514_v1 = vmul.f32 %v2034_v52, %v3828_v46  ;;  %v1476_v40 = vpop.xlane.xlu1 %1475  ;;  %v3832_v16 = vld [vmem:[#allocation51_spill] sm:$0xff]  ;;  %v1541_v63 = vsel %vm399_vm2, %v618_v33, %v919_v48 }
 0x4ef   :  { %v1519_v42 = vmul.f32 %v2036_v62, %v3830_v39  ;;  %2055 = vrcp.f32 %v1476_v40  ;;  %v2038_v58 = vpop.eup %2037  ;;  %v1220_v13 = vmul.f32 %v2032_v47, %v3832_v16 }
 0x4f0   :  { %v1576_v30 = vsel %vm1564_vm6, %v3369_v7, %v1514_v1  ;;  %v3834_v7 = vld [vmem:[#allocation47_spill] sm:$0xff]  ;;  %v617_v44 = vmul.f32 %v2038_v58, %v3839_v29 }
 0x4f1   :  { %v2040_v60 = vpop.eup %2039  ;;  %1597 = vst.msk [vmem:[%s3646_s7 + $0x58] sm:$0xff] %vm1585_vm7, %v1576_v30  ;;  %v1581_v8 = vsel %vm1564_vm6, %v1560_v5, %v1519_v42  ;;  %v1562_v17 = vsel %vm1543_vm5, %v1541_v63, %v1220_v13 }
 0x4f2   :  { %v2042_v61 = vpop.eup %2041  ;;  %1602 = vst.msk [vmem:[%s3646_s7 + $0x80] sm:$0xff] %vm1585_vm7, %v1581_v8  ;;  %v1516_v55 = vmul.f32 %v2040_v60, %v3834_v7  ;;  %v1482_v59 = vpop.xlane.xlu1 %1481 }
 0x4f3   :  { %v2044_v20 = vpop.eup %2043  ;;  %v1521_v53 = vmul.f32 %v2042_v61, %v3835_v0  ;;  %2057 = vrcp.f32 %v1482_v59 }
 0x4f4   :  { %v2046_v6 = vpop.eup %2045  ;;  %v1578_v45 = vsel %vm1564_vm6, %v1557_v28, %v1516_v55  ;;  %v918_v21 = vmul.f32 %v2044_v20, %v3836_v27 }
 0x4f5   :  { %v2048_v32 = vpop.eup %2047  ;;  %1599 = vst.msk [vmem:[%s3646_s7 + $0x68] sm:$0xff] %vm1585_vm7, %v1578_v45  ;;  %v1583_v31 = vsel %vm1564_vm6, %v1562_v17, %v1521_v53  ;;  %v1219_v15 = vmul.f32 %v2046_v6, %v3838_v10 }
 0x4f6   :  { %v2050_v4 = vpop.eup %2049  ;;  %1604 = vst.msk [vmem:[%s3646_s7 + $0x90] sm:$0xff] %vm1585_vm7, %v1583_v31  ;;  %v1518_v50 = vmul.f32 %v2048_v32, %v3837_v54  ;;  %v1540_v47 = vsel %vm399_vm2, %v617_v44, %v918_v21 }
 0x4f7   :  { %v2052_v38 = vpop.eup %2051  ;;  %v1561_v52 = vsel %vm1543_vm5, %v1540_v47, %v1219_v15  ;;  %v619_v9 = vmul.f32 %v2050_v4, %v3843_v2 }
 0x4f8   :  { %v2054_v41 = vpop.eup %2053  ;;  %v1580_v25 = vsel %vm1564_vm6, %v3401_v35, %v1518_v50  ;;  %v920_v56 = vmul.f32 %v2052_v38, %v3840_v23 }
 0x4f9   :  { %v2056_v14 = vpop.eup %2055  ;;  %1601 = vst.msk [vmem:[%s3646_s7 + $0x78] sm:$0xff] %vm1585_vm7, %v1580_v25  ;;  %v1221_v19 = vmul.f32 %v2054_v41, %v3842_v22 }
 0x4fa   :  { %v1520_v51 = vmul.f32 %v2056_v14, %v3841_v49  ;;  %v1542_v62 = vsel %vm399_vm2, %v619_v9, %v920_v56 }
 0x4fb   :  { %v1563_v12 = vsel %vm1543_vm5, %v1542_v62, %v1221_v19 }
 0x4fc   :  { %v1582_v35 = vsel %vm1564_vm6, %v1561_v52, %v1520_v51 }
 0x4fd   :  { %v2058_v3 = vpop.eup %2057  ;;  %1603 = vst.msk [vmem:[%s3646_s7 + $0x88] sm:$0xff] %vm1585_vm7, %v1582_v35 }
 0x4fe   :  { %v1522_v26 = vmul.f32 %v2058_v3, %v3844_v34 }
 0x500   :  { %v1584_v57 = vsel %vm1564_vm6, %v1563_v12, %v1522_v26 }
 0x501   :  { %1605 = vst.msk [vmem:[%s3646_s7 + $0x98] sm:$0xff] %vm1585_vm7, %v1584_v57 }

// kernel: _lambda_.26
= control target key start
LH: loop header
LB: loop body
LE: loop exit
PB: predicated region body
PF: predicated region fallthrough
CT: control target
= control target key end

     0   :  { %vm68_vm0 = vcmask 261120   ;;  %s470_s1 = inlined_call_operand.vmem [shape: bf16[32,32], index: 1, kind: input, shape index: {}]   ;;  %s471_s0 = inlined_call_operand.vmem [shape: f32[160,32], index: 0, kind: input, shape index: {}]   ;;  %s472_s2 = inlined_call_operand.vmem [shape: f32[1,32], index: 2, kind: input, shape index: {}]   ;;  %s473_s3 = inlined_call_operand.vmem [shape: f32[160,32], index: 3, kind: output, shape index: {}]  }
   0x1   :  { %v289_v0 = vld [vmem:[%s470_s1] sm:$0xff]   ;;  %v290_v1 = vld [vmem:[%s470_s1 + $0x8] sm:$0xff]   ;;  %v17_v4 = vld [vmem:[%s471_s0 + $0x10] sm:$0xff] }
   0x2   :  { %261 = vmatprep.subr.bf16.mxu0 %v289_v0  ;;  %285 = vmatprep.subr.bf16.mxu1 %v289_v0  ;;  %v15_v2 = vld [vmem:[%s471_s0] sm:$0xff]  ;;  %v16_v3 = vld [vmem:[%s471_s0 + $0x8] sm:$0xff]  ;;  %v18_v6 = vld [vmem:[%s471_s0 + $0x18] sm:$0xff] }
   0x3   :  { %262 = vmatpush3.bf16.msra.mxu0 %v289_v0  ;;  %287 = vmatpush3.bf16.msra.mxu1 %v289_v0  ;;  %v35_v5 = vpack.c.bf16 %v16_v3, %v15_v2  ;;  %v27_v7 = vld [vmem:[%s471_s0 + $0x60] sm:$0xff]  ;;  %v28_v8 = vld [vmem:[%s471_s0 + $0x68] sm:$0xff]  ;;  %v29_v10 = vld [vmem:[%s471_s0 + $0x70] sm:$0xff]  ;;  %v36_v14 = vpack.c.bf16 %v18_v6, %v17_v4 }
   0x4   :  { %263 = vmatprep.subr.bf16.mxu0 %v290_v1  ;;  %286 = vmatprep.subr.bf16.mxu1 %v290_v1  ;;  %v41_v9 = vpack.c.bf16 %v28_v8, %v27_v7  ;;  %v30_v11 = vld [vmem:[%s471_s0 + $0x78] sm:$0xff]  ;;  %v19_v12 = vld [vmem:[%s471_s0 + $0x20] sm:$0xff]  ;;  %v20_v13 = vld [vmem:[%s471_s0 + $0x28] sm:$0xff] }
   0x5   :  { %265 = vmatprep.mubr.msk.bf16.mxu0 %vm68_vm0, %v35_v5  ;;  %v42_v15 = vpack.c.bf16 %v30_v11, %v29_v10  ;;  %v31_v16 = vld [vmem:[%s471_s0 + $0x80] sm:$0xff]  ;;  %v32_v17 = vld [vmem:[%s471_s0 + $0x88] sm:$0xff]  ;;  %v37_v18 = vpack.c.bf16 %v20_v13, %v19_v12  ;;  %v21_v20 = vld [vmem:[%s471_s0 + $0x30] sm:$0xff] }
   0x6   :  { %277 = vmatprep.mubr.msk.bf16.mxu1 %vm68_vm0, %v41_v9  ;;  %v43_v19 = vpack.c.bf16 %v32_v17, %v31_v16  ;;  %v22_v21 = vld [vmem:[%s471_s0 + $0x38] sm:$0xff]  ;;  %v33_v22 = vld [vmem:[%s471_s0 + $0x90] sm:$0xff]  ;;  %v23_v24 = vld [vmem:[%s471_s0 + $0x40] sm:$0xff] }
   0x7   :  { %264 = vmatpush3.bf16.msra.mxu0 %v290_v1  ;;  %288 = vmatpush3.bf16.msra.mxu1 %v290_v1  ;;  %v34_v23 = vld [vmem:[%s471_s0 + $0x98] sm:$0xff]  ;;  %v24_v25 = vld [vmem:[%s471_s0 + $0x48] sm:$0xff]  ;;  %v38_v26 = vpack.c.bf16 %v22_v21, %v21_v20  ;;  %v25_v29 = vld [vmem:[%s471_s0 + $0x50] sm:$0xff] }
   0x8   :  { %v44_v27 = vpack.c.bf16 %v34_v23, %v33_v22  ;;  %v39_v28 = vpack.c.bf16 %v24_v25, %v23_v24  ;;  %v26_v30 = vld [vmem:[%s471_s0 + $0x58] sm:$0xff]  ;;  %v236_v32 = vld [vmem:[%s472_s2] ss:$0 sm:$0xff] }
   0x9   :  { %v40_v31 = vpack.c.bf16 %v26_v30, %v25_v29 }
   0xa   :  { %266 = vmatmul.mubr.msk.bf16.vlgmr.msra.gmra.mrb[0].mxu0 %vm68_vm0, %v36_v14  ;;  %278 = vmatmul.mubr.msk.bf16.vlgmr.msra.gmra.mrb[0].mxu1 %vm68_vm0, %v42_v15 }
   0xb   :  { %269 = vmatprep.mubr.msk.bf16.mxu0 %vm68_vm0, %v37_v18  ;;  %281 = vmatprep.mubr.msk.bf16.mxu1 %vm68_vm0, %v43_v19 }
  0x12   :  { %270 = vmatmul.mubr.msk.bf16.gmra.mrb[4].mxu0 %vm68_vm0, %v38_v26  ;;  %282 = vmatmul.mubr.msk.bf16.gmra.mrb[4].mxu1 %vm68_vm0, %v44_v27 }
  0x13   :  { %273 = vmatprep.mubr.msk.bf16.mxu0 %vm68_vm0, %v39_v28 }
  0x1a   :  { %274 = vmatmul.mubr.msk.bf16.gmra.mrb[8].mxu0 %vm68_vm0, %v40_v31 }
  0xdd   :  { %v267_v33 = vpop.f32.mrb[0].mxu0  ;;  %v279_v34 = vpop.f32.mrb[0].mxu1 }
  0xde   :  { %v142_v35 = vadd.f32 %v267_v33, %v236_v32  ;;  %v133_v36 = vpop.f32.mrb[1].mxu0  ;;  %v190_v37 = vadd.f32 %v279_v34, %v236_v32  ;;  %v181_v38 = vpop.f32.mrb[1].mxu1 }
  0xdf   :  { %v134_v39 = vadd.f32 %v236_v32, %v133_v36  ;;  %v268_v40 = vpop.f32.mrb[2].mxu0  ;;  %v182_v41 = vadd.f32 %v236_v32, %v181_v38  ;;  %v280_v42 = vpop.f32.mrb[2].mxu1 }
  0xe0   :  { %214 = vst.msk [vmem:[%s473_s3 + $0x10] sm:$0xff] %vm68_vm0, %v142_v35  ;;  %v145_v43 = vadd.f32 %v268_v40, %v236_v32  ;;  %v136_v44 = vpop.f32.mrb[3].mxu0  ;;  %226 = vst.msk [vmem:[%s473_s3 + $0x70] sm:$0xff] %vm68_vm0, %v190_v37  ;;  %v193_v45 = vadd.f32 %v280_v42, %v236_v32  ;;  %v184_v46 = vpop.f32.mrb[3].mxu1 }
  0xe1   :  { %212 = vst.msk [vmem:[%s473_s3] sm:$0xff] %vm68_vm0, %v134_v39  ;;  %v137_v47 = vadd.f32 %v236_v32, %v136_v44  ;;  %224 = vst.msk [vmem:[%s473_s3 + $0x60] sm:$0xff] %vm68_vm0, %v182_v41  ;;  %v185_v48 = vadd.f32 %v236_v32, %v184_v46 }
  0xe2   :  { %215 = vst.msk [vmem:[%s473_s3 + $0x18] sm:$0xff] %vm68_vm0, %v145_v43  ;;  %227 = vst.msk [vmem:[%s473_s3 + $0x78] sm:$0xff] %vm68_vm0, %v193_v45 }
  0xe3   :  { %213 = vst.msk [vmem:[%s473_s3 + $0x8] sm:$0xff] %vm68_vm0, %v137_v47  ;;  %225 = vst.msk [vmem:[%s473_s3 + $0x68] sm:$0xff] %vm68_vm0, %v185_v48 }
  0xe5   :  { %v271_v49 = vpop.f32.mrb[4].mxu0  ;;  %v283_v50 = vpop.f32.mrb[4].mxu1 }
  0xe6   :  { %v158_v51 = vadd.f32 %v271_v49, %v236_v32  ;;  %v149_v52 = vpop.f32.mrb[5].mxu0  ;;  %v206_v53 = vadd.f32 %v283_v50, %v236_v32  ;;  %v197_v54 = vpop.f32.mrb[5].mxu1 }
  0xe7   :  { %v150_v55 = vadd.f32 %v236_v32, %v149_v52  ;;  %v272_v56 = vpop.f32.mrb[6].mxu0  ;;  %v198_v57 = vadd.f32 %v236_v32, %v197_v54  ;;  %v284_v58 = vpop.f32.mrb[6].mxu1 }
  0xe8   :  { %218 = vst.msk [vmem:[%s473_s3 + $0x30] sm:$0xff] %vm68_vm0, %v158_v51  ;;  %v161_v59 = vadd.f32 %v272_v56, %v236_v32  ;;  %v152_v60 = vpop.f32.mrb[7].mxu0  ;;  %230 = vst.msk [vmem:[%s473_s3 + $0x90] sm:$0xff] %vm68_vm0, %v206_v53  ;;  %v209_v61 = vadd.f32 %v284_v58, %v236_v32  ;;  %v200_v62 = vpop.f32.mrb[7].mxu1 }
  0xe9   :  { %216 = vst.msk [vmem:[%s473_s3 + $0x20] sm:$0xff] %vm68_vm0, %v150_v55  ;;  %v153_v63 = vadd.f32 %v236_v32, %v152_v60  ;;  %228 = vst.msk [vmem:[%s473_s3 + $0x80] sm:$0xff] %vm68_vm0, %v198_v57  ;;  %v201_v0 = vadd.f32 %v236_v32, %v200_v62 }
  0xea   :  { %219 = vst.msk [vmem:[%s473_s3 + $0x38] sm:$0xff] %vm68_vm0, %v161_v59  ;;  %231 = vst.msk [vmem:[%s473_s3 + $0x98] sm:$0xff] %vm68_vm0, %v209_v61 }
  0xeb   :  { %217 = vst.msk [vmem:[%s473_s3 + $0x28] sm:$0xff] %vm68_vm0, %v153_v63  ;;  %229 = vst.msk [vmem:[%s473_s3 + $0x88] sm:$0xff] %vm68_vm0, %v201_v0 }
  0xed   :  { %v275_v1 = vpop.f32.mrb[8].mxu0 }
  0xee   :  { %v174_v2 = vadd.f32 %v275_v1, %v236_v32  ;;  %v165_v3 = vpop.f32.mrb[9].mxu0 }
  0xef   :  { %v166_v4 = vadd.f32 %v236_v32, %v165_v3  ;;  %v276_v5 = vpop.f32.mrb[10].mxu0 }
  0xf0   :  { %222 = vst.msk [vmem:[%s473_s3 + $0x50] sm:$0xff] %vm68_vm0, %v174_v2  ;;  %v177_v6 = vadd.f32 %v276_v5, %v236_v32  ;;  %v168_v7 = vpop.f32.mrb[11].mxu0 }
  0xf1   :  { %220 = vst.msk [vmem:[%s473_s3 + $0x40] sm:$0xff] %vm68_vm0, %v166_v4  ;;  %v169_v8 = vadd.f32 %v236_v32, %v168_v7 }
  0xf2   :  { %223 = vst.msk [vmem:[%s473_s3 + $0x58] sm:$0xff] %vm68_vm0, %v177_v6 }
  0xf3   :  { %221 = vst.msk [vmem:[%s473_s3 + $0x48] sm:$0xff] %vm68_vm0, %v169_v8 }

// kernel: _lambda_.27
= control target key start
LH: loop header
LB: loop body
LE: loop exit
PB: predicated region body
PF: predicated region fallthrough
CT: control target
= control target key end

     0   :  { %vm77_vm0 = vcmask 261120   ;;  %s954_s0 = inlined_call_operand.vmem [shape: f32[160,32], index: 0, kind: input, shape index: {}]   ;;  %s955_s1 = inlined_call_operand.vmem [shape: f32[160,32], index: 1, kind: input, shape index: {}]   ;;  %s956_s2 = inlined_call_operand.vmem [shape: f32[1,32], index: 2, kind: input, shape index: {}]   ;;  %s957_s3 = inlined_call_operand.vmem [shape: f32[1,32], index: 3, kind: input, shape index: {}]   ;;  %s958_s4 = inlined_call_operand.vmem [shape: f32[160,32], index: 4, kind: output, shape index: {}]  }
   0x1   :  { %v17_v0 = vld [vmem:[%s954_s0] sm:$0xff]  ;;  %v19_v2 = vld [vmem:[%s954_s0 + $0x10] sm:$0xff]  ;;  %v18_v5 = vld [vmem:[%s954_s0 + $0x8] sm:$0xff] }
   0x2   :  { %v37_v1 = vld [vmem:[%s955_s1] sm:$0xff]  ;;  %v39_v4 = vld [vmem:[%s955_s1 + $0x10] sm:$0xff]  ;;  %v38_v6 = vld [vmem:[%s955_s1 + $0x8] sm:$0xff] }
   0x3   :  { %v493_v3 = vadd.f32 %v37_v1, %v17_v0  ;;  %v504_v7 = vadd.f32 %v39_v4, %v19_v2  ;;  %v506_v8 = vadd.f32 %v38_v6, %v18_v5  ;;  %v20_v9 = vld [vmem:[%s954_s0 + $0x18] sm:$0xff]  ;;  %v21_v11 = vld [vmem:[%s954_s0 + $0x20] sm:$0xff]  ;;  %v22_v15 = vld [vmem:[%s954_s0 + $0x28] sm:$0xff] }
   0x4   :  { %v40_v10 = vld [vmem:[%s955_s1 + $0x18] sm:$0xff]  ;;  %v41_v14 = vld [vmem:[%s955_s1 + $0x20] sm:$0xff]  ;;  %v42_v16 = vld [vmem:[%s955_s1 + $0x28] sm:$0xff] }
   0x5   :  { %v78_v12 = vsel %vm77_vm0, %v493_v3, 0.0  ;;  %v519_v13 = vadd.f32 %v40_v10, %v20_v9  ;;  %v84_v17 = vsel %vm77_vm0, %v504_v7, 0.0  ;;  %v81_v18 = vsel %vm77_vm0, %v506_v8, 0.0  ;;  %v23_v22 = vld [vmem:[%s954_s0 + $0x30] sm:$0xff]  ;;  %v24_v24 = vld [vmem:[%s954_s0 + $0x38] sm:$0xff]  ;;  %v25_v30 = vld [vmem:[%s954_s0 + $0x40] sm:$0xff] }
   0x6   :  { %79 = vadd.xlane.f32.xlu0 %v78_v12  ;;  %85 = vadd.xlane.f32.xlu1 %v84_v17  ;;  %v534_v19 = vadd.f32 %v41_v14, %v21_v11  ;;  %v538_v21 = vadd.f32 %v42_v16, %v22_v15  ;;  %v43_v23 = vld [vmem:[%s955_s1 + $0x30] sm:$0xff]  ;;  %v44_v25 = vld [vmem:[%s955_s1 + $0x38] sm:$0xff]  ;;  %v45_v31 = vld [vmem:[%s955_s1 + $0x40] sm:$0xff] }
   0x7   :  { %v87_v20 = vsel %vm77_vm0, %v519_v13, 0.0  ;;  %v554_v27 = vadd.f32 %v43_v23, %v23_v22  ;;  %v558_v29 = vadd.f32 %v44_v25, %v24_v24  ;;  %v26_v32 = vld [vmem:[%s954_s0 + $0x48] sm:$0xff]  ;;  %v574_v35 = vadd.f32 %v45_v31, %v25_v30  ;;  %v27_v38 = vld [vmem:[%s954_s0 + $0x50] sm:$0xff]  ;;  %v28_v40 = vld [vmem:[%s954_s0 + $0x58] sm:$0xff] }
   0x8   :  { %v90_v26 = vsel %vm77_vm0, %v534_v19, 0.0  ;;  %v93_v28 = vsel %vm77_vm0, %v538_v21, 0.0  ;;  %v46_v33 = vld [vmem:[%s955_s1 + $0x48] sm:$0xff]  ;;  %v47_v39 = vld [vmem:[%s955_s1 + $0x50] sm:$0xff]  ;;  %v48_v41 = vld [vmem:[%s955_s1 + $0x58] sm:$0xff] }
   0x9   :  { %v96_v34 = vsel %vm77_vm0, %v554_v27, 0.0  ;;  %v99_v36 = vsel %vm77_vm0, %v558_v29, 0.0  ;;  %v578_v37 = vadd.f32 %v46_v33, %v26_v32  ;;  %v102_v42 = vsel %vm77_vm0, %v574_v35, 0.0  ;;  %v29_v46 = vld [vmem:[%s954_s0 + $0x60] sm:$0xff]  ;;  %v30_v48 = vld [vmem:[%s954_s0 + $0x68] sm:$0xff]  ;;  %v31_v54 = vld [vmem:[%s954_s0 + $0x70] sm:$0xff] }
   0xa   :  { %82 = vadd.xlane.f32.xlu0 %v81_v18  ;;  %88 = vadd.xlane.f32.xlu1 %v87_v20  ;;  %v594_v43 = vadd.f32 %v47_v39, %v27_v38  ;;  %v598_v45 = vadd.f32 %v48_v41, %v28_v40  ;;  %v49_v47 = vld [vmem:[%s955_s1 + $0x60] sm:$0xff]  ;;  %v50_v49 = vld [vmem:[%s955_s1 + $0x68] sm:$0xff]  ;;  %v51_v55 = vld [vmem:[%s955_s1 + $0x70] sm:$0xff] }
   0xb   :  { %v105_v44 = vsel %vm77_vm0, %v578_v37, 0.0  ;;  %v614_v51 = vadd.f32 %v49_v47, %v29_v46  ;;  %v618_v53 = vadd.f32 %v50_v49, %v30_v48  ;;  %v32_v56 = vld [vmem:[%s954_s0 + $0x78] sm:$0xff]  ;;  %v634_v59 = vadd.f32 %v51_v55, %v31_v54  ;;  %v33_v62 = vld [vmem:[%s954_s0 + $0x80] sm:$0xff]  ;;  %v34_v0 = vld [vmem:[%s954_s0 + $0x88] sm:$0xff] }
   0xc   :  { %v108_v50 = vsel %vm77_vm0, %v594_v43, 0.0  ;;  %v111_v52 = vsel %vm77_vm0, %v598_v45, 0.0  ;;  %v52_v57 = vld [vmem:[%s955_s1 + $0x78] sm:$0xff]  ;;  %v53_v63 = vld [vmem:[%s955_s1 + $0x80] sm:$0xff]  ;;  %v54_v1 = vld [vmem:[%s955_s1 + $0x88] sm:$0xff] }
   0xd   :  { %v114_v58 = vsel %vm77_vm0, %v614_v51, 0.0  ;;  %v117_v60 = vsel %vm77_vm0, %v618_v53, 0.0  ;;  %v638_v61 = vadd.f32 %v52_v57, %v32_v56  ;;  %v120_v2 = vsel %vm77_vm0, %v634_v59, 0.0  ;;  %v35_v9 = vld [vmem:[%s954_s0 + $0x90] sm:$0xff]  ;;  %v36_v11 = vld [vmem:[%s954_s0 + $0x98] sm:$0xff] }
   0xe   :  { %91 = vadd.xlane.f32.xlu0 %v90_v26  ;;  %94 = vadd.xlane.f32.xlu1 %v93_v28  ;;  %v654_v4 = vadd.f32 %v53_v63, %v33_v62  ;;  %v658_v6 = vadd.f32 %v54_v1, %v34_v0  ;;  %v55_v10 = vld [vmem:[%s955_s1 + $0x90] sm:$0xff]  ;;  %v56_v12 = vld [vmem:[%s955_s1 + $0x98] sm:$0xff] }
   0xf   :  { %v123_v5 = vsel %vm77_vm0, %v638_v61, 0.0  ;;  %v674_v15 = vadd.f32 %v55_v10, %v35_v9  ;;  %v678_v17 = vadd.f32 %v56_v12, %v36_v11 }
  0x10   :  { %v126_v14 = vsel %vm77_vm0, %v654_v4, 0.0  ;;  %v129_v16 = vsel %vm77_vm0, %v658_v6, 0.0 }
  0x11   :  { %v132_v18 = vsel %vm77_vm0, %v674_v15, 0.0  ;;  %v135_v20 = vsel %vm77_vm0, %v678_v17, 0.0 }
  0x12   :  { %97 = vadd.xlane.f32.xlu0 %v96_v34  ;;  %100 = vadd.xlane.f32.xlu1 %v99_v36 }
  0x16   :  { %103 = vadd.xlane.f32.xlu0 %v102_v42  ;;  %106 = vadd.xlane.f32.xlu1 %v105_v44 }
  0x1a   :  { %109 = vadd.xlane.f32.xlu0 %v108_v50  ;;  %112 = vadd.xlane.f32.xlu1 %v111_v52 }
  0x1e   :  { %115 = vadd.xlane.f32.xlu0 %v114_v58  ;;  %118 = vadd.xlane.f32.xlu1 %v117_v60 }
  0x22   :  { %121 = vadd.xlane.f32.xlu0 %v120_v2  ;;  %124 = vadd.xlane.f32.xlu1 %v123_v5 }
  0x26   :  { %127 = vadd.xlane.f32.xlu0 %v126_v14  ;;  %130 = vadd.xlane.f32.xlu1 %v129_v16 }
  0x2a   :  { %133 = vadd.xlane.f32.xlu0 %v132_v18  ;;  %136 = vadd.xlane.f32.xlu1 %v135_v20 }
  0x93   :  { %v80_v22 = vpop.xlane.xlu0 %79  ;;  %v86_v24 = vpop.xlane.xlu1 %85 }
  0x94   :  { %v139_v23 = vmul.f32 0.03125, %v80_v22  ;;  %v141_v25 = vmul.f32 0.03125, %v86_v24 }
  0x96   :  { %v685_v26 = vsub.f32 %v493_v3, %v139_v23  ;;  %v688_v28 = vsub.f32 %v504_v7, %v141_v25 }
  0x97   :  { %v83_v30 = vpop.xlane.xlu0 %82  ;;  %v89_v32 = vpop.xlane.xlu1 %88 }
  0x98   :  { %v140_v31 = vmul.f32 0.03125, %v83_v30  ;;  %v179_v33 = vmul.f32 %v685_v26, %v685_v26  ;;  %v142_v34 = vmul.f32 0.03125, %v89_v32  ;;  %v181_v36 = vmul.f32 %v688_v28, %v688_v28 }
  0x9a   :  { %v695_v38 = vsub.f32 %v506_v8, %v140_v31  ;;  %v199_v39 = vsel %vm77_vm0, %v179_v33, 0.0  ;;  %v699_v3 = vsub.f32 %v519_v13, %v142_v34  ;;  %v205_v42 = vsel %vm77_vm0, %v181_v36, 0.0 }
  0x9b   :  { %200 = vadd.xlane.f32.xlu0 %v199_v39  ;;  %v92_v7 = vpop.xlane.xlu0 %91  ;;  %v95_v41 = vpop.xlane.xlu1 %94 }
  0x9c   :  { %v143_v40 = vmul.f32 0.03125, %v92_v7  ;;  %v180_v44 = vmul.f32 %v695_v38, %v695_v38  ;;  %v144_v46 = vmul.f32 0.03125, %v95_v41  ;;  %v182_v47 = vmul.f32 %v699_v3, %v699_v3 }
  0x9e   :  { %v707_v8 = vsub.f32 %v534_v19, %v143_v40  ;;  %v202_v48 = vsel %vm77_vm0, %v180_v44, 0.0  ;;  %v711_v13 = vsub.f32 %v538_v21, %v144_v46  ;;  %v208_v54 = vsel %vm77_vm0, %v182_v47, 0.0 }
  0x9f   :  { %206 = vadd.xlane.f32.xlu0 %v205_v42  ;;  %203 = vadd.xlane.f32.xlu1 %v202_v48  ;;  %v98_v49 = vpop.xlane.xlu0 %97  ;;  %v101_v52 = vpop.xlane.xlu1 %100 }
  0xa0   :  { %v145_v50 = vmul.f32 0.03125, %v98_v49  ;;  %v183_v55 = vmul.f32 %v707_v8, %v707_v8  ;;  %v146_v56 = vmul.f32 0.03125, %v101_v52  ;;  %v184_v19 = vmul.f32 %v711_v13, %v711_v13 }
  0xa2   :  { %v719_v57 = vsub.f32 %v554_v27, %v145_v50  ;;  %v211_v21 = vsel %vm77_vm0, %v183_v55, 0.0  ;;  %v723_v58 = vsub.f32 %v558_v29, %v146_v56  ;;  %v214_v0 = vsel %vm77_vm0, %v184_v19, 0.0 }
  0xa3   :  { %209 = vadd.xlane.f32.xlu1 %v208_v54  ;;  %212 = vadd.xlane.f32.xlu0 %v211_v21  ;;  %v104_v60 = vpop.xlane.xlu0 %103  ;;  %v107_v63 = vpop.xlane.xlu1 %106 }
  0xa4   :  { %v147_v62 = vmul.f32 0.03125, %v104_v60  ;;  %v185_v1 = vmul.f32 %v719_v57, %v719_v57  ;;  %v148_v2 = vmul.f32 0.03125, %v107_v63  ;;  %v186_v27 = vmul.f32 %v723_v58, %v723_v58 }
  0xa6   :  { %v731_v5 = vsub.f32 %v574_v35, %v147_v62  ;;  %v217_v29 = vsel %vm77_vm0, %v185_v1, 0.0  ;;  %v735_v9 = vsub.f32 %v578_v37, %v148_v2  ;;  %v220_v14 = vsel %vm77_vm0, %v186_v27, 0.0 }
  0xa7   :  { %215 = vadd.xlane.f32.xlu1 %v214_v0  ;;  %218 = vadd.xlane.f32.xlu0 %v217_v29  ;;  %v110_v10 = vpop.xlane.xlu0 %109  ;;  %v113_v12 = vpop.xlane.xlu1 %112 }
  0xa8   :  { %v149_v11 = vmul.f32 0.03125, %v110_v10  ;;  %v187_v16 = vmul.f32 %v731_v5, %v731_v5  ;;  %v150_v18 = vmul.f32 0.03125, %v113_v12  ;;  %v188_v35 = vmul.f32 %v735_v9, %v735_v9 }
  0xaa   :  { %v743_v20 = vsub.f32 %v594_v43, %v149_v11  ;;  %v223_v37 = vsel %vm77_vm0, %v187_v16, 0.0  ;;  %v747_v22 = vsub.f32 %v598_v45, %v150_v18  ;;  %v226_v30 = vsel %vm77_vm0, %v188_v35, 0.0 }
  0xab   :  { %221 = vadd.xlane.f32.xlu1 %v220_v14  ;;  %224 = vadd.xlane.f32.xlu0 %v223_v37  ;;  %v116_v23 = vpop.xlane.xlu0 %115  ;;  %v119_v25 = vpop.xlane.xlu1 %118 }
  0xac   :  { %v151_v24 = vmul.f32 0.03125, %v116_v23  ;;  %v189_v31 = vmul.f32 %v743_v20, %v743_v20  ;;  %v152_v32 = vmul.f32 0.03125, %v119_v25  ;;  %v190_v43 = vmul.f32 %v747_v22, %v747_v22 }
  0xae   :  { %v755_v33 = vsub.f32 %v614_v51, %v151_v24  ;;  %v229_v45 = vsel %vm77_vm0, %v189_v31, 0.0  ;;  %v759_v34 = vsub.f32 %v618_v53, %v152_v32  ;;  %v232_v40 = vsel %vm77_vm0, %v190_v43, 0.0 }
  0xaf   :  { %227 = vadd.xlane.f32.xlu1 %v226_v30  ;;  %230 = vadd.xlane.f32.xlu0 %v229_v45  ;;  %v122_v36 = vpop.xlane.xlu0 %121  ;;  %v125_v7 = vpop.xlane.xlu1 %124 }
  0xb0   :  { %v153_v39 = vmul.f32 0.03125, %v122_v36  ;;  %v191_v41 = vmul.f32 %v755_v33, %v755_v33  ;;  %v154_v42 = vmul.f32 0.03125, %v125_v7  ;;  %v192_v51 = vmul.f32 %v759_v34, %v759_v34 }
  0xb2   :  { %v767_v44 = vsub.f32 %v634_v59, %v153_v39  ;;  %v235_v53 = vsel %vm77_vm0, %v191_v41, 0.0  ;;  %v771_v46 = vsub.f32 %v638_v61, %v154_v42  ;;  %v238_v50 = vsel %vm77_vm0, %v192_v51, 0.0  ;;  %v807_v42 = vld [vmem:[%s956_s2] ss:$0 sm:$0xff] }
  0xb3   :  { %233 = vadd.xlane.f32.xlu1 %v232_v40  ;;  %236 = vadd.xlane.f32.xlu0 %v235_v53  ;;  %v128_v47 = vpop.xlane.xlu0 %127  ;;  %v131_v49 = vpop.xlane.xlu1 %130 }
  0xb4   :  { %v155_v48 = vmul.f32 0.03125, %v128_v47  ;;  %v193_v52 = vmul.f32 %v767_v44, %v767_v44  ;;  %v156_v54 = vmul.f32 0.03125, %v131_v49  ;;  %v194_v59 = vmul.f32 %v771_v46, %v771_v46 }
  0xb6   :  { %v779_v55 = vsub.f32 %v654_v4, %v155_v48  ;;  %v241_v61 = vsel %vm77_vm0, %v193_v52, 0.0  ;;  %v783_v56 = vsub.f32 %v658_v6, %v156_v54  ;;  %v244_v62 = vsel %vm77_vm0, %v194_v59, 0.0 }
  0xb7   :  { %239 = vadd.xlane.f32.xlu1 %v238_v50  ;;  %242 = vadd.xlane.f32.xlu0 %v241_v61  ;;  %v134_v19 = vpop.xlane.xlu0 %133  ;;  %v137_v60 = vpop.xlane.xlu1 %136  ;;  %v813_v50 = vld [vmem:[%s957_s3] ss:$0 sm:$0xff] }
  0xb8   :  { %v157_v21 = vmul.f32 0.03125, %v134_v19  ;;  %v195_v63 = vmul.f32 %v779_v55, %v779_v55  ;;  %v158_v0 = vmul.f32 0.03125, %v137_v60  ;;  %v196_v4 = vmul.f32 %v783_v56, %v783_v56 }
  0xba   :  { %v791_v1 = vsub.f32 %v674_v15, %v157_v21  ;;  %v247_v6 = vsel %vm77_vm0, %v195_v63, 0.0  ;;  %v795_v2 = vsub.f32 %v678_v17, %v158_v0  ;;  %v250_v27 = vsel %vm77_vm0, %v196_v4, 0.0 }
  0xbb   :  { %245 = vadd.xlane.f32.xlu1 %v244_v62  ;;  %248 = vadd.xlane.f32.xlu0 %v247_v6 }
  0xbc   :  { %v197_v29 = vmul.f32 %v791_v1, %v791_v1  ;;  %v198_v10 = vmul.f32 %v795_v2, %v795_v2 }
  0xbe   :  { %v253_v11 = vsel %vm77_vm0, %v197_v29, 0.0  ;;  %v256_v15 = vsel %vm77_vm0, %v198_v10, 0.0 }
  0xbf   :  { %251 = vadd.xlane.f32.xlu1 %v250_v27  ;;  %254 = vadd.xlane.f32.xlu0 %v253_v11 }
  0xc3   :  { %257 = vadd.xlane.f32.xlu1 %v256_v15 }
 0x128   :  { %v201_v12 = vpop.xlane.xlu0 %200 }
 0x129   :  { %v259_v17 = vmul.f32 0.03125, %v201_v12 }
 0x12b   :  { %v279_v14 = vadd.f32 1e-05, %v259_v17 }
 0x12c   :  { %v204_v16 = vpop.xlane.xlu1 %203  ;;  %v207_v18 = vpop.xlane.xlu0 %206 }
 0x12d   :  { %419 = vrsqrt.f32 %v279_v14  ;;  %v260_v35 = vmul.f32 0.03125, %v204_v16  ;;  %v261_v37 = vmul.f32 0.03125, %v207_v18 }
 0x12f   :  { %v280_v23 = vadd.f32 1e-05, %v260_v35  ;;  %v281_v24 = vadd.f32 1e-05, %v261_v37 }
 0x130   :  { %v210_v25 = vpop.xlane.xlu1 %209  ;;  %v213_v30 = vpop.xlane.xlu0 %212 }
 0x131   :  { %421 = vrsqrt.f32 %v280_v23  ;;  %v262_v31 = vmul.f32 0.03125, %v210_v25  ;;  %v263_v32 = vmul.f32 0.03125, %v213_v30 }
 0x132   :  { %423 = vrsqrt.f32 %v281_v24 }
 0x133   :  { %v282_v43 = vadd.f32 1e-05, %v262_v31  ;;  %v283_v45 = vadd.f32 1e-05, %v263_v32 }
 0x134   :  { %v216_v36 = vpop.xlane.xlu1 %215  ;;  %v219_v39 = vpop.xlane.xlu0 %218 }
 0x135   :  { %425 = vrsqrt.f32 %v282_v43  ;;  %v264_v7 = vmul.f32 0.03125, %v216_v36  ;;  %v265_v40 = vmul.f32 0.03125, %v219_v39 }
 0x136   :  { %427 = vrsqrt.f32 %v283_v45 }
 0x137   :  { %v420_v41 = vpop.eup %419  ;;  %v284_v51 = vadd.f32 1e-05, %v264_v7  ;;  %v285_v53 = vadd.f32 1e-05, %v265_v40 }
 0x138   :  { %v319_v47 = vmul.f32 %v420_v41, %v685_v26  ;;  %v222_v48 = vpop.xlane.xlu1 %221  ;;  %v225_v49 = vpop.xlane.xlu0 %224 }
 0x139   :  { %429 = vrsqrt.f32 %v284_v51  ;;  %v266_v52 = vmul.f32 0.03125, %v222_v48  ;;  %v267_v54 = vmul.f32 0.03125, %v225_v49 }
 0x13a   :  { %v346_v59 = vmul.f32 %v807_v42, %v319_v47  ;;  %431 = vrsqrt.f32 %v285_v53 }
 0x13b   :  { %v422_v61 = vpop.eup %421  ;;  %v286_v19 = vadd.f32 1e-05, %v266_v52  ;;  %v287_v21 = vadd.f32 1e-05, %v267_v54 }
 0x13c   :  { %v424_v60 = vpop.eup %423  ;;  %v373_v62 = vadd.f32 %v813_v50, %v346_v59  ;;  %v320_v26 = vmul.f32 %v422_v61, %v695_v38  ;;  %v228_v63 = vpop.xlane.xlu1 %227 }
 0x13d   :  { %v231_v0 = vpop.xlane.xlu0 %230  ;;  %v321_v4 = vmul.f32 %v424_v60, %v688_v28  ;;  %433 = vrsqrt.f32 %v286_v19  ;;  %v268_v6 = vmul.f32 0.03125, %v228_v63 }
 0x13e   :  { %v269_v27 = vmul.f32 0.03125, %v231_v0  ;;  %393 = vst.msk [vmem:[%s958_s4] sm:$0xff] %vm77_vm0, %v373_v62  ;;  %v347_v29 = vmul.f32 %v807_v42, %v320_v26  ;;  %435 = vrsqrt.f32 %v287_v21 }
 0x13f   :  { %v426_v10 = vpop.eup %425  ;;  %v348_v11 = vmul.f32 %v807_v42, %v321_v4  ;;  %v288_v15 = vadd.f32 1e-05, %v268_v6 }
 0x140   :  { %v289_v38 = vadd.f32 1e-05, %v269_v27  ;;  %v428_v12 = vpop.eup %427  ;;  %v374_v17 = vadd.f32 %v813_v50, %v347_v29  ;;  %v322_v28 = vmul.f32 %v426_v10, %v699_v3  ;;  %v234_v14 = vpop.xlane.xlu1 %233 }
 0x141   :  { %v237_v16 = vpop.xlane.xlu0 %236  ;;  %v375_v18 = vadd.f32 %v813_v50, %v348_v11  ;;  %v323_v35 = vmul.f32 %v428_v12, %v707_v8  ;;  %437 = vrsqrt.f32 %v288_v15  ;;  %v270_v37 = vmul.f32 0.03125, %v234_v14 }
 0x142   :  { %394 = vst.msk [vmem:[%s958_s4 + $0x8] sm:$0xff] %vm77_vm0, %v374_v17  ;;  %v349_v23 = vmul.f32 %v807_v42, %v322_v28  ;;  %439 = vrsqrt.f32 %v289_v38  ;;  %v271_v24 = vmul.f32 0.03125, %v237_v16 }
 0x143   :  { %v430_v25 = vpop.eup %429  ;;  %395 = vst.msk [vmem:[%s958_s4 + $0x10] sm:$0xff] %vm77_vm0, %v375_v18  ;;  %v350_v3 = vmul.f32 %v807_v42, %v323_v35  ;;  %v290_v8 = vadd.f32 1e-05, %v270_v37 }
 0x144   :  { %v432_v30 = vpop.eup %431  ;;  %v376_v31 = vadd.f32 %v813_v50, %v349_v23  ;;  %v324_v32 = vmul.f32 %v430_v25, %v711_v13  ;;  %v291_v43 = vadd.f32 1e-05, %v271_v24  ;;  %v240_v45 = vpop.xlane.xlu1 %239 }
 0x145   :  { %v243_v36 = vpop.xlane.xlu0 %242  ;;  %v377_v39 = vadd.f32 %v813_v50, %v350_v3  ;;  %v325_v7 = vmul.f32 %v432_v30, %v719_v57  ;;  %441 = vrsqrt.f32 %v290_v8  ;;  %v272_v40 = vmul.f32 0.03125, %v240_v45 }
 0x146   :  { %396 = vst.msk [vmem:[%s958_s4 + $0x18] sm:$0xff] %vm77_vm0, %v376_v31  ;;  %v351_v41 = vmul.f32 %v807_v42, %v324_v32  ;;  %443 = vrsqrt.f32 %v291_v43  ;;  %v273_v51 = vmul.f32 0.03125, %v243_v36 }
 0x147   :  { %v434_v53 = vpop.eup %433  ;;  %397 = vst.msk [vmem:[%s958_s4 + $0x20] sm:$0xff] %vm77_vm0, %v377_v39  ;;  %v352_v13 = vmul.f32 %v807_v42, %v325_v7  ;;  %v292_v57 = vadd.f32 1e-05, %v272_v40 }
 0x148   :  { %v436_v47 = vpop.eup %435  ;;  %v378_v48 = vadd.f32 %v813_v50, %v351_v41  ;;  %v326_v49 = vmul.f32 %v434_v53, %v723_v58  ;;  %v293_v52 = vadd.f32 1e-05, %v273_v51  ;;  %v246_v54 = vpop.xlane.xlu1 %245 }
 0x149   :  { %v249_v59 = vpop.xlane.xlu0 %248  ;;  %v379_v61 = vadd.f32 %v813_v50, %v352_v13  ;;  %v327_v19 = vmul.f32 %v436_v47, %v731_v5  ;;  %445 = vrsqrt.f32 %v292_v57  ;;  %v274_v21 = vmul.f32 0.03125, %v246_v54 }
 0x14a   :  { %398 = vst.msk [vmem:[%s958_s4 + $0x28] sm:$0xff] %vm77_vm0, %v378_v48  ;;  %v353_v60 = vmul.f32 %v807_v42, %v326_v49  ;;  %447 = vrsqrt.f32 %v293_v52  ;;  %v275_v62 = vmul.f32 0.03125, %v249_v59 }
 0x14b   :  { %v438_v26 = vpop.eup %437  ;;  %399 = vst.msk [vmem:[%s958_s4 + $0x30] sm:$0xff] %vm77_vm0, %v379_v61  ;;  %v354_v58 = vmul.f32 %v807_v42, %v327_v19  ;;  %v294_v5 = vadd.f32 1e-05, %v274_v21 }
 0x14c   :  { %v440_v63 = vpop.eup %439  ;;  %v380_v0 = vadd.f32 %v813_v50, %v353_v60  ;;  %v328_v4 = vmul.f32 %v438_v26, %v735_v9  ;;  %v295_v6 = vadd.f32 1e-05, %v275_v62  ;;  %v252_v27 = vpop.xlane.xlu1 %251 }
 0x14d   :  { %v255_v29 = vpop.xlane.xlu0 %254  ;;  %v381_v10 = vadd.f32 %v813_v50, %v354_v58  ;;  %v329_v11 = vmul.f32 %v440_v63, %v743_v20  ;;  %449 = vrsqrt.f32 %v294_v5  ;;  %v276_v15 = vmul.f32 0.03125, %v252_v27 }
 0x14e   :  { %400 = vst.msk [vmem:[%s958_s4 + $0x38] sm:$0xff] %vm77_vm0, %v380_v0  ;;  %v355_v38 = vmul.f32 %v807_v42, %v328_v4  ;;  %451 = vrsqrt.f32 %v295_v6  ;;  %v277_v12 = vmul.f32 0.03125, %v255_v29 }
 0x14f   :  { %v442_v17 = vpop.eup %441  ;;  %401 = vst.msk [vmem:[%s958_s4 + $0x40] sm:$0xff] %vm77_vm0, %v381_v10  ;;  %v356_v9 = vmul.f32 %v807_v42, %v329_v11  ;;  %v296_v20 = vadd.f32 1e-05, %v276_v15 }
 0x150   :  { %v444_v28 = vpop.eup %443  ;;  %v382_v14 = vadd.f32 %v813_v50, %v355_v38  ;;  %v330_v16 = vmul.f32 %v442_v17, %v747_v22  ;;  %v297_v18 = vadd.f32 1e-05, %v277_v12  ;;  %v258_v35 = vpop.xlane.xlu1 %257 }
 0x151   :  { %v383_v37 = vadd.f32 %v813_v50, %v356_v9  ;;  %v331_v23 = vmul.f32 %v444_v28, %v755_v33  ;;  %453 = vrsqrt.f32 %v296_v20  ;;  %v278_v24 = vmul.f32 0.03125, %v258_v35 }
 0x152   :  { %402 = vst.msk [vmem:[%s958_s4 + $0x48] sm:$0xff] %vm77_vm0, %v382_v14  ;;  %v357_v25 = vmul.f32 %v807_v42, %v330_v16  ;;  %455 = vrsqrt.f32 %v297_v18 }
 0x153   :  { %v446_v3 = vpop.eup %445  ;;  %403 = vst.msk [vmem:[%s958_s4 + $0x50] sm:$0xff] %vm77_vm0, %v383_v37  ;;  %v358_v22 = vmul.f32 %v807_v42, %v331_v23  ;;  %v298_v8 = vadd.f32 1e-05, %v278_v24 }
 0x154   :  { %v448_v33 = vpop.eup %447  ;;  %v384_v30 = vadd.f32 %v813_v50, %v357_v25  ;;  %v332_v31 = vmul.f32 %v446_v3, %v759_v34 }
 0x155   :  { %v385_v32 = vadd.f32 %v813_v50, %v358_v22  ;;  %v333_v43 = vmul.f32 %v448_v33, %v767_v44  ;;  %457 = vrsqrt.f32 %v298_v8 }
 0x156   :  { %404 = vst.msk [vmem:[%s958_s4 + $0x58] sm:$0xff] %vm77_vm0, %v384_v30  ;;  %v359_v45 = vmul.f32 %v807_v42, %v332_v31 }
 0x157   :  { %v450_v36 = vpop.eup %449  ;;  %405 = vst.msk [vmem:[%s958_s4 + $0x60] sm:$0xff] %vm77_vm0, %v385_v32  ;;  %v360_v34 = vmul.f32 %v807_v42, %v333_v43 }
 0x158   :  { %v452_v39 = vpop.eup %451  ;;  %v386_v7 = vadd.f32 %v813_v50, %v359_v45  ;;  %v334_v44 = vmul.f32 %v450_v36, %v771_v46 }
 0x159   :  { %v387_v40 = vadd.f32 %v813_v50, %v360_v34  ;;  %v335_v41 = vmul.f32 %v452_v39, %v779_v55 }
 0x15a   :  { %406 = vst.msk [vmem:[%s958_s4 + $0x68] sm:$0xff] %vm77_vm0, %v386_v7  ;;  %v361_v51 = vmul.f32 %v807_v42, %v334_v44 }
 0x15b   :  { %v454_v53 = vpop.eup %453  ;;  %407 = vst.msk [vmem:[%s958_s4 + $0x70] sm:$0xff] %vm77_vm0, %v387_v40  ;;  %v362_v13 = vmul.f32 %v807_v42, %v335_v41 }
 0x15c   :  { %v456_v46 = vpop.eup %455  ;;  %v388_v57 = vadd.f32 %v813_v50, %v361_v51  ;;  %v336_v55 = vmul.f32 %v454_v53, %v783_v56 }
 0x15d   :  { %v389_v47 = vadd.f32 %v813_v50, %v362_v13  ;;  %v337_v48 = vmul.f32 %v456_v46, %v791_v1 }
 0x15e   :  { %408 = vst.msk [vmem:[%s958_s4 + $0x78] sm:$0xff] %vm77_vm0, %v388_v57  ;;  %v363_v49 = vmul.f32 %v807_v42, %v336_v55 }
 0x15f   :  { %v458_v52 = vpop.eup %457  ;;  %409 = vst.msk [vmem:[%s958_s4 + $0x80] sm:$0xff] %vm77_vm0, %v389_v47  ;;  %v364_v54 = vmul.f32 %v807_v42, %v337_v48 }
 0x160   :  { %v390_v56 = vadd.f32 %v813_v50, %v363_v49  ;;  %v338_v59 = vmul.f32 %v458_v52, %v795_v2 }
 0x161   :  { %v391_v1 = vadd.f32 %v813_v50, %v364_v54 }
 0x162   :  { %410 = vst.msk [vmem:[%s958_s4 + $0x88] sm:$0xff] %vm77_vm0, %v390_v56  ;;  %v365_v61 = vmul.f32 %v807_v42, %v338_v59 }
 0x163   :  { %411 = vst.msk [vmem:[%s958_s4 + $0x90] sm:$0xff] %vm77_vm0, %v391_v1 }
 0x164   :  { %v392_v19 = vadd.f32 %v813_v50, %v365_v61 }
 0x166   :  { %412 = vst.msk [vmem:[%s958_s4 + $0x98] sm:$0xff] %vm77_vm0, %v392_v19 }

// kernel: _lambda_.28
= control target key start
LH: loop header
LB: loop body
LE: loop exit
PB: predicated region body
PF: predicated region fallthrough
CT: control target
= control target key end

     0   :  { %vm80_vm0 = vcmask 261120   ;;  %vm293_vm1 = vcmask 523264   ;;  %s1568_s1 = inlined_call_operand.vmem [shape: bf16[32,64], index: 1, kind: input, shape index: {}]   ;;  %s1569_s0 = inlined_call_operand.vmem [shape: f32[160,32], index: 0, kind: input, shape index: {}]   ;;  %s1570_s3 = inlined_call_operand.vmem [shape: bf16[64,32], index: 3, kind: input, shape index: {}]   ;;  %s1571_s2 = inlined_call_operand.vmem [shape: f32[1,64], index: 2, kind: input, shape index: {}]   ;;  %s1572_s4 = inlined_call_operand.vmem [shape: f32[1,32], index: 4, kind: input, shape index: {}]   ;;  %s1573_s5 = inlined_call_operand.vmem [shape: f32[1,32], index: 5, kind: input, shape index: {}]   ;;  %s1574_s6 = inlined_call_operand.vmem [shape: f32[1,32], index: 6, kind: input, shape index: {}]   ;;  %s1575_s7 = inlined_call_operand.vmem [shape: f32[160,32], index: 7, kind: output, shape index: {}]  }
   0x1   :  { %v904_v0 = vld [vmem:[%s1568_s1] sm:$0xff]   ;;  %v905_v1 = vld [vmem:[%s1568_s1 + $0x8] sm:$0xff]   ;;  %v1011_v5 = vld [vmem:[%s1569_s0 + $0x10] sm:$0xff] }
   0x2   :  { %852 = vmatprep.subr.bf16.mxu0 %v904_v0  ;;  %v999_v2 = vld [vmem:[%s1569_s0] sm:$0xff]  ;;  %v1004_v3 = vld [vmem:[%s1569_s0 + $0x8] sm:$0xff]  ;;  %v1016_v6 = vld [vmem:[%s1569_s0 + $0x18] sm:$0xff] }
   0x3   :  { %853 = vmatpush3.bf16.msra.mxu0 %v904_v0  ;;  %v47_v4 = vpack.c.bf16 %v1004_v3, %v999_v2  ;;  %v1021_v7 = vld [vmem:[%s1569_s0 + $0x20] sm:$0xff]  ;;  %v1026_v8 = vld [vmem:[%s1569_s0 + $0x28] sm:$0xff]  ;;  %v48_v9 = vpack.c.bf16 %v1016_v6, %v1011_v5  ;;  %v1036_v11 = vld [vmem:[%s1569_s0 + $0x30] sm:$0xff] }
   0x4   :  { %854 = vmatprep.subr.bf16.mxu0 %v905_v1  ;;  %v49_v10 = vpack.c.bf16 %v1026_v8, %v1021_v7  ;;  %v1041_v12 = vld [vmem:[%s1569_s0 + $0x38] sm:$0xff]  ;;  %v906_v13 = vld [vmem:[%s1570_s3] sm:$0xff]   ;;  %v907_v14 = vld [vmem:[%s1570_s3 + $0x8] sm:$0xff]  }
   0x5   :  { %856 = vmatprep.mubr.msk.bf16.mxu0 %vm80_vm0, %v47_v4  ;;  %876 = vmatprep.subr.bf16.mxu1 %v906_v13  ;;  %v1054_v15 = vld [vmem:[%s1569_s0 + $0x40] sm:$0xff]  ;;  %v1059_v16 = vld [vmem:[%s1569_s0 + $0x48] sm:$0xff]  ;;  %v50_v17 = vpack.c.bf16 %v1041_v12, %v1036_v11  ;;  %v1070_v19 = vld [vmem:[%s1569_s0 + $0x50] sm:$0xff] }
   0x6   :  { %877 = vmatpush3.bf16.msra.mxu1 %v906_v13  ;;  %v51_v18 = vpack.c.bf16 %v1059_v16, %v1054_v15  ;;  %v1075_v20 = vld [vmem:[%s1569_s0 + $0x58] sm:$0xff]  ;;  %v1080_v21 = vld [vmem:[%s1569_s0 + $0x60] sm:$0xff]  ;;  %v1085_v22 = vld [vmem:[%s1569_s0 + $0x68] sm:$0xff] }
   0x7   :  { %855 = vmatpush3.bf16.msra.mxu0 %v905_v1  ;;  %878 = vmatprep.subr.bf16.mxu1 %v907_v14  ;;  %v52_v23 = vpack.c.bf16 %v1075_v20, %v1070_v19  ;;  %v53_v24 = vpack.c.bf16 %v1085_v22, %v1080_v21  ;;  %v1096_v25 = vld [vmem:[%s1569_s0 + $0x70] sm:$0xff]  ;;  %v1101_v26 = vld [vmem:[%s1569_s0 + $0x78] sm:$0xff]  ;;  %v1106_v27 = vld [vmem:[%s1569_s0 + $0x80] sm:$0xff] }
   0x8   :  { %v1111_v28 = vld [vmem:[%s1569_s0 + $0x88] sm:$0xff]  ;;  %v54_v29 = vpack.c.bf16 %v1101_v26, %v1096_v25  ;;  %v1122_v31 = vld [vmem:[%s1569_s0 + $0x90] sm:$0xff]  ;;  %v1127_v32 = vld [vmem:[%s1569_s0 + $0x98] sm:$0xff] }
   0x9   :  { %v55_v30 = vpack.c.bf16 %v1111_v28, %v1106_v27  ;;  %v56_v33 = vpack.c.bf16 %v1127_v32, %v1122_v31  ;;  %v908_v34 = vld [vmem:[%s1570_s3 + $0x10] sm:$0xff]   ;;  %v909_v35 = vld [vmem:[%s1570_s3 + $0x18] sm:$0xff]   ;;  %v1141_v36 = vld [vmem:[%s1571_s2] ss:$0 sm:$0xff] }
   0xa   :  { %857 = vmatmul.mubr.msk.bf16.vlgmr.msra.gmra.mrb[0].mxu0 %vm80_vm0, %v48_v9  ;;  %879 = vmatpush3.bf16.msra.mxu1 %v907_v14 }
   0xb   :  { %860 = vmatprep.mubr.msk.bf16.mxu0 %vm80_vm0, %v49_v10  ;;  %880 = vmatprep.subr.bf16.mxu1 %v908_v34 }
   0xe   :  { %881 = vmatpush3.bf16.msra.mxu1 %v908_v34 }
   0xf   :  { %882 = vmatprep.subr.bf16.mxu1 %v909_v35 }
  0x12   :  { %861 = vmatmul.mubr.msk.bf16.gmra.mrb[4].mxu0 %vm80_vm0, %v50_v17  ;;  %883 = vmatpush3.bf16.msra.mxu1 %v909_v35 }
  0x13   :  { %864 = vmatprep.mubr.msk.bf16.mxu0 %vm80_vm0, %v51_v18 }
  0x1a   :  { %865 = vmatmul.mubr.msk.bf16.gmra.mrb[8].mxu0 %vm80_vm0, %v52_v23 }
  0x1b   :  { %868 = vmatprep.mubr.msk.bf16.mxu0 %vm80_vm0, %v53_v24 }
  0x22   :  { %869 = vmatmul.mubr.msk.bf16.gmra.mrb[12].mxu0 %vm80_vm0, %v54_v29 }
  0x23   :  { %872 = vmatprep.mubr.msk.bf16.mxu0 %vm80_vm0, %v55_v30 }
  0x2a   :  { %873 = vmatmul.mubr.msk.bf16.gmra.mrb[16].mxu0 %vm80_vm0, %v56_v33 }
  0xdd   :  { %v858_v37 = vpop.f32.mrb[0].mxu0 }
  0xde   :  { %v154_v38 = vadd.f32 %v858_v37, %v1141_v36  ;;  %v145_v39 = vpop.f32.mrb[1].mxu0 }
  0xdf   :  { %v146_v40 = vadd.f32 %v1141_v36, %v145_v39  ;;  %v859_v41 = vpop.f32.mrb[2].mxu0 }
  0xe0   :  { %v157_v42 = vadd.f32 %v859_v41, %v1141_v36  ;;  %v148_v43 = vpop.f32.mrb[3].mxu0  ;;  %v226_v45 = vmax.f32 %v154_v38, 0.0 }
  0xe1   :  { %v149_v44 = vadd.f32 %v1141_v36, %v148_v43  ;;  %v224_v47 = vmax.f32 %v146_v40, 0.0 }
  0xe2   :  { %v227_v46 = vmax.f32 %v157_v42, 0.0 }
  0xe3   :  { %v225_v48 = vmax.f32 %v149_v44, 0.0 }
  0xe4   :  { %v245_v49 = vpack.c.bf16 %v227_v46, %v226_v45 }
  0xe5   :  { %v862_v50 = vpop.f32.mrb[4].mxu0  ;;  %v244_v51 = vpack.c.bf16 %v225_v48, %v224_v47 }
  0xe6   :  { %v170_v52 = vadd.f32 %v862_v50, %v1141_v36  ;;  %v161_v53 = vpop.f32.mrb[5].mxu0 }
  0xe7   :  { %v162_v54 = vadd.f32 %v1141_v36, %v161_v53  ;;  %v863_v55 = vpop.f32.mrb[6].mxu0  ;;  %884 = vmatprep.mubr.msk.bf16.mxu1 %vm293_vm1, %v244_v51 }
  0xe8   :  { %v230_v56 = vmax.f32 %v170_v52, 0.0  ;;  %v173_v57 = vadd.f32 %v863_v55, %v1141_v36  ;;  %v164_v58 = vpop.f32.mrb[7].mxu0  ;;  %885 = vmatmul.mubr.msk.bf16.vlgmr.msra.gmra.mrb[0].mxu1 %vm293_vm1, %v245_v49 }
  0xe9   :  { %v165_v59 = vadd.f32 %v1141_v36, %v164_v58  ;;  %v228_v61 = vmax.f32 %v162_v54, 0.0 }
  0xea   :  { %v231_v60 = vmax.f32 %v173_v57, 0.0 }
  0xeb   :  { %v229_v62 = vmax.f32 %v165_v59, 0.0 }
  0xec   :  { %v247_v63 = vpack.c.bf16 %v231_v60, %v230_v56 }
  0xed   :  { %v246_v0 = vpack.c.bf16 %v229_v62, %v228_v61  ;;  %v866_v1 = vpop.f32.mrb[8].mxu0 }
  0xee   :  { %v186_v4 = vadd.f32 %v866_v1, %v1141_v36  ;;  %v177_v9 = vpop.f32.mrb[9].mxu0 }
  0xef   :  { %v178_v10 = vadd.f32 %v1141_v36, %v177_v9  ;;  %v867_v13 = vpop.f32.mrb[10].mxu0  ;;  %888 = vmatprep.mubr.msk.bf16.mxu1 %vm293_vm1, %v246_v0  ;;  %v1176_v0 = vld [vmem:[%s1572_s4] ss:$0 sm:$0xff] }
  0xf0   :  { %v234_v14 = vmax.f32 %v186_v4, 0.0  ;;  %v189_v17 = vadd.f32 %v867_v13, %v1141_v36  ;;  %v180_v18 = vpop.f32.mrb[11].mxu0  ;;  %889 = vmatmul.mubr.msk.bf16.gmra.mrb[4].mxu1 %vm293_vm1, %v247_v63 }
  0xf1   :  { %v181_v23 = vadd.f32 %v1141_v36, %v180_v18  ;;  %v232_v29 = vmax.f32 %v178_v10, 0.0 }
  0xf2   :  { %v235_v24 = vmax.f32 %v189_v17, 0.0 }
  0xf3   :  { %v233_v30 = vmax.f32 %v181_v23, 0.0 }
  0xf4   :  { %v249_v33 = vpack.c.bf16 %v235_v24, %v234_v14 }
  0xf5   :  { %v248_v34 = vpack.c.bf16 %v233_v30, %v232_v29  ;;  %v870_v35 = vpop.f32.mrb[12].mxu0 }
  0xf6   :  { %v202_v37 = vadd.f32 %v870_v35, %v1141_v36  ;;  %v193_v38 = vpop.f32.mrb[13].mxu0 }
  0xf7   :  { %v194_v39 = vadd.f32 %v1141_v36, %v193_v38  ;;  %v871_v40 = vpop.f32.mrb[14].mxu0  ;;  %892 = vmatprep.mubr.msk.bf16.mxu1 %vm293_vm1, %v248_v34 }
  0xf8   :  { %v238_v41 = vmax.f32 %v202_v37, 0.0  ;;  %v205_v42 = vadd.f32 %v871_v40, %v1141_v36  ;;  %v196_v43 = vpop.f32.mrb[15].mxu0  ;;  %893 = vmatmul.mubr.msk.bf16.gmra.mrb[8].mxu1 %vm293_vm1, %v249_v33 }
  0xf9   :  { %v197_v44 = vadd.f32 %v1141_v36, %v196_v43  ;;  %v236_v46 = vmax.f32 %v194_v39, 0.0 }
  0xfa   :  { %v239_v45 = vmax.f32 %v205_v42, 0.0 }
  0xfb   :  { %v237_v47 = vmax.f32 %v197_v44, 0.0 }
  0xfc   :  { %v251_v48 = vpack.c.bf16 %v239_v45, %v238_v41 }
  0xfd   :  { %v250_v49 = vpack.c.bf16 %v237_v47, %v236_v46  ;;  %v874_v50 = vpop.f32.mrb[16].mxu0 }
  0xfe   :  { %v218_v51 = vadd.f32 %v874_v50, %v1141_v36  ;;  %v209_v52 = vpop.f32.mrb[17].mxu0 }
  0xff   :  { %v210_v53 = vadd.f32 %v1141_v36, %v209_v52  ;;  %v875_v54 = vpop.f32.mrb[18].mxu0  ;;  %896 = vmatprep.mubr.msk.bf16.mxu1 %vm293_vm1, %v250_v49 }
 0x100   :  { %v242_v55 = vmax.f32 %v218_v51, 0.0  ;;  %v221_v56 = vadd.f32 %v875_v54, %v1141_v36  ;;  %v212_v57 = vpop.f32.mrb[19].mxu0  ;;  %897 = vmatmul.mubr.msk.bf16.gmra.mrb[12].mxu1 %vm293_vm1, %v251_v48 }
 0x101   :  { %v213_v58 = vadd.f32 %v1141_v36, %v212_v57  ;;  %v240_v60 = vmax.f32 %v210_v53, 0.0 }
 0x102   :  { %v243_v59 = vmax.f32 %v221_v56, 0.0 }
 0x103   :  { %v241_v61 = vmax.f32 %v213_v58, 0.0 }
 0x104   :  { %v253_v62 = vpack.c.bf16 %v243_v59, %v242_v55 }
 0x105   :  { %v252_v63 = vpack.c.bf16 %v241_v61, %v240_v60 }
 0x107   :  { %900 = vmatprep.mubr.msk.bf16.mxu1 %vm293_vm1, %v252_v63 }
 0x108   :  { %901 = vmatmul.mubr.msk.bf16.gmra.mrb[16].mxu1 %vm293_vm1, %v253_v62 }
 0x1bb   :  { %v886_v1 = vpop.f32.mrb[0].mxu1 }
 0x1bc   :  { %v367_v4 = vadd.f32 %v886_v1, %v1176_v0  ;;  %v358_v9 = vpop.f32.mrb[1].mxu1 }
 0x1bd   :  { %v359_v36 = vadd.f32 %v1176_v0, %v358_v9  ;;  %v887_v10 = vpop.f32.mrb[2].mxu1 }
 0x1be   :  { %v370_v13 = vadd.f32 %v887_v10, %v1176_v0  ;;  %v361_v14 = vpop.f32.mrb[3].mxu1  ;;  %v1182_v17 = vadd.f32 %v367_v4, %v1011_v5 }
 0x1bf   :  { %v362_v18 = vadd.f32 %v1176_v0, %v361_v14  ;;  %v1186_v23 = vadd.f32 %v359_v36, %v999_v2 }
 0x1c0   :  { %v463_v24 = vsel %vm80_vm0, %v1182_v17, 0.0  ;;  %v1191_v29 = vadd.f32 %v370_v13, %v1016_v6 }
 0x1c1   :  { %464 = vadd.xlane.f32.xlu1 %v463_v24  ;;  %v457_v30 = vsel %vm80_vm0, %v1186_v23, 0.0  ;;  %v1196_v33 = vadd.f32 %v362_v18, %v1004_v3 }
 0x1c2   :  { %458 = vadd.xlane.f32.xlu0 %v457_v30  ;;  %v466_v2 = vsel %vm80_vm0, %v1191_v29, 0.0 }
 0x1c3   :  { %v890_v5 = vpop.f32.mrb[4].mxu1  ;;  %v460_v38 = vsel %vm80_vm0, %v1196_v33, 0.0 }
 0x1c4   :  { %v383_v34 = vadd.f32 %v890_v5, %v1176_v0  ;;  %v374_v35 = vpop.f32.mrb[5].mxu1 }
 0x1c5   :  { %v375_v37 = vadd.f32 %v1176_v0, %v374_v35  ;;  %467 = vadd.xlane.f32.xlu1 %v466_v2  ;;  %v891_v6 = vpop.f32.mrb[6].mxu1 }
 0x1c6   :  { %v386_v39 = vadd.f32 %v891_v6, %v1176_v0  ;;  %v377_v40 = vpop.f32.mrb[7].mxu1  ;;  %461 = vadd.xlane.f32.xlu0 %v460_v38  ;;  %v1206_v3 = vadd.f32 %v383_v34, %v1036_v11 }
 0x1c7   :  { %v378_v41 = vadd.f32 %v1176_v0, %v377_v40  ;;  %v1215_v44 = vadd.f32 %v375_v37, %v1021_v7 }
 0x1c8   :  { %v475_v42 = vsel %vm80_vm0, %v1206_v3, 0.0  ;;  %v1212_v43 = vadd.f32 %v386_v39, %v1041_v12 }
 0x1c9   :  { %v1220_v46 = vadd.f32 %v378_v41, %v1026_v8  ;;  %v469_v12 = vsel %vm80_vm0, %v1215_v44, 0.0 }
 0x1ca   :  { %476 = vadd.xlane.f32.xlu0 %v475_v42  ;;  %v478_v45 = vsel %vm80_vm0, %v1212_v43, 0.0 }
 0x1cb   :  { %479 = vadd.xlane.f32.xlu1 %v478_v45  ;;  %v894_v11 = vpop.f32.mrb[8].mxu1  ;;  %v472_v52 = vsel %vm80_vm0, %v1220_v46, 0.0 }
 0x1cc   :  { %v399_v47 = vadd.f32 %v894_v11, %v1176_v0  ;;  %v390_v48 = vpop.f32.mrb[9].mxu1 }
 0x1cd   :  { %v391_v49 = vadd.f32 %v1176_v0, %v390_v48  ;;  %v895_v50 = vpop.f32.mrb[10].mxu1 }
 0x1ce   :  { %v402_v7 = vadd.f32 %v895_v50, %v1176_v0  ;;  %v393_v51 = vpop.f32.mrb[11].mxu1  ;;  %470 = vadd.xlane.f32.xlu0 %v469_v12  ;;  %v1230_v8 = vadd.f32 %v399_v47, %v1070_v19 }
 0x1cf   :  { %v394_v53 = vadd.f32 %v1176_v0, %v393_v51  ;;  %473 = vadd.xlane.f32.xlu1 %v472_v52  ;;  %v1239_v56 = vadd.f32 %v391_v49, %v1054_v15 }
 0x1d0   :  { %v487_v54 = vsel %vm80_vm0, %v1230_v8, 0.0  ;;  %v1236_v55 = vadd.f32 %v402_v7, %v1075_v20 }
 0x1d1   :  { %v1244_v58 = vadd.f32 %v394_v53, %v1059_v16  ;;  %v481_v20 = vsel %vm80_vm0, %v1239_v56, 0.0 }
 0x1d2   :  { %488 = vadd.xlane.f32.xlu0 %v487_v54  ;;  %v490_v57 = vsel %vm80_vm0, %v1236_v55, 0.0 }
 0x1d3   :  { %v898_v19 = vpop.f32.mrb[12].mxu1  ;;  %491 = vadd.xlane.f32.xlu1 %v490_v57  ;;  %v484_v1 = vsel %vm80_vm0, %v1244_v58, 0.0 }
 0x1d4   :  { %v415_v59 = vadd.f32 %v898_v19, %v1176_v0  ;;  %v406_v60 = vpop.f32.mrb[13].mxu1 }
 0x1d5   :  { %v407_v61 = vadd.f32 %v1176_v0, %v406_v60  ;;  %v899_v62 = vpop.f32.mrb[14].mxu1 }
 0x1d6   :  { %v418_v15 = vadd.f32 %v899_v62, %v1176_v0  ;;  %v409_v63 = vpop.f32.mrb[15].mxu1  ;;  %482 = vadd.xlane.f32.xlu0 %v481_v20  ;;  %v1254_v16 = vadd.f32 %v415_v59, %v1096_v25 }
 0x1d7   :  { %v410_v4 = vadd.f32 %v1176_v0, %v409_v63  ;;  %485 = vadd.xlane.f32.xlu1 %v484_v1  ;;  %v1263_v10 = vadd.f32 %v407_v61, %v1080_v21 }
 0x1d8   :  { %v499_v9 = vsel %vm80_vm0, %v1254_v16, 0.0  ;;  %v1260_v36 = vadd.f32 %v418_v15, %v1101_v26 }
 0x1d9   :  { %v1268_v14 = vadd.f32 %v410_v4, %v1085_v22  ;;  %v493_v26 = vsel %vm80_vm0, %v1263_v10, 0.0 }
 0x1da   :  { %500 = vadd.xlane.f32.xlu0 %v499_v9  ;;  %v502_v13 = vsel %vm80_vm0, %v1260_v36, 0.0 }
 0x1db   :  { %v902_v25 = vpop.f32.mrb[16].mxu1  ;;  %503 = vadd.xlane.f32.xlu1 %v502_v13  ;;  %v496_v34 = vsel %vm80_vm0, %v1268_v14, 0.0 }
 0x1dc   :  { %v422_v18 = vpop.f32.mrb[17].mxu1  ;;  %v431_v24 = vadd.f32 %v902_v25, %v1176_v0 }
 0x1dd   :  { %v423_v30 = vadd.f32 %v1176_v0, %v422_v18  ;;  %v903_v5 = vpop.f32.mrb[18].mxu1 }
 0x1de   :  { %v425_v21 = vpop.f32.mrb[19].mxu1  ;;  %494 = vadd.xlane.f32.xlu0 %v493_v26  ;;  %v434_v35 = vadd.f32 %v903_v5, %v1176_v0  ;;  %v1287_v38 = vadd.f32 %v431_v24, %v1122_v31 }
 0x1df   :  { %v426_v22 = vadd.f32 %v1176_v0, %v425_v21  ;;  %497 = vadd.xlane.f32.xlu1 %v496_v34  ;;  %v1279_v2 = vadd.f32 %v423_v30, %v1106_v27 }
 0x1e0   :  { %v1292_v40 = vadd.f32 %v434_v35, %v1127_v32  ;;  %v511_v27 = vsel %vm80_vm0, %v1287_v38, 0.0 }
 0x1e1   :  { %v505_v37 = vsel %vm80_vm0, %v1279_v2, 0.0  ;;  %v1284_v6 = vadd.f32 %v426_v22, %v1111_v28 }
 0x1e2   :  { %506 = vadd.xlane.f32.xlu0 %v505_v37  ;;  %v514_v0 = vsel %vm80_vm0, %v1292_v40, 0.0 }
 0x1e3   :  { %v508_v39 = vsel %vm80_vm0, %v1284_v6, 0.0 }
 0x1e4   :  { %509 = vadd.xlane.f32.xlu1 %v508_v39 }
 0x1e6   :  { %512 = vadd.xlane.f32.xlu0 %v511_v27 }
 0x1e8   :  { %515 = vadd.xlane.f32.xlu1 %v514_v0 }
 0x24e   :  { %v465_v28 = vpop.xlane.xlu1 %464 }
 0x24f   :  { %v520_v41 = vmul.f32 0.03125, %v465_v28  ;;  %v459_v31 = vpop.xlane.xlu0 %458 }
 0x250   :  { %v518_v42 = vmul.f32 0.03125, %v459_v31 }
 0x251   :  { %v1299_v45 = vsub.f32 %v1182_v17, %v520_v41 }
 0x252   :  { %v1302_v11 = vsub.f32 %v1186_v23, %v518_v42  ;;  %v468_v32 = vpop.xlane.xlu1 %467 }
 0x253   :  { %v521_v47 = vmul.f32 0.03125, %v468_v32  ;;  %v462_v48 = vpop.xlane.xlu0 %461  ;;  %v560_v49 = vmul.f32 %v1299_v45, %v1299_v45 }
 0x254   :  { %v519_v50 = vmul.f32 0.03125, %v462_v48  ;;  %v558_v51 = vmul.f32 %v1302_v11, %v1302_v11 }
 0x255   :  { %v1307_v12 = vsub.f32 %v1191_v29, %v521_v47  ;;  %v584_v7 = vsel %vm80_vm0, %v560_v49, 0.0 }
 0x256   :  { %v1313_v17 = vsub.f32 %v1196_v33, %v519_v50  ;;  %585 = vadd.xlane.f32.xlu0 %v584_v7  ;;  %v578_v29 = vsel %vm80_vm0, %v558_v51, 0.0 }
 0x257   :  { %v477_v23 = vpop.xlane.xlu0 %476  ;;  %v561_v52 = vmul.f32 %v1307_v12, %v1307_v12 }
 0x258   :  { %v524_v53 = vmul.f32 0.03125, %v477_v23  ;;  %v480_v54 = vpop.xlane.xlu1 %479  ;;  %v559_v59 = vmul.f32 %v1313_v17, %v1313_v17 }
 0x259   :  { %v525_v57 = vmul.f32 0.03125, %v480_v54  ;;  %v587_v19 = vsel %vm80_vm0, %v561_v52, 0.0 }
 0x25a   :  { %v1322_v60 = vsub.f32 %v1206_v3, %v524_v53  ;;  %588 = vadd.xlane.f32.xlu1 %v587_v19  ;;  %579 = vadd.xlane.f32.xlu0 %v578_v29  ;;  %v581_v1 = vsel %vm80_vm0, %v559_v59, 0.0 }
 0x25b   :  { %v1325_v33 = vsub.f32 %v1212_v43, %v525_v57  ;;  %v471_v61 = vpop.xlane.xlu0 %470 }
 0x25c   :  { %v522_v62 = vmul.f32 0.03125, %v471_v61  ;;  %v474_v20 = vpop.xlane.xlu1 %473  ;;  %v564_v15 = vmul.f32 %v1322_v60, %v1322_v60 }
 0x25d   :  { %v523_v63 = vmul.f32 0.03125, %v474_v20  ;;  %v565_v4 = vmul.f32 %v1325_v33, %v1325_v33 }
 0x25e   :  { %v1333_v3 = vsub.f32 %v1215_v44, %v522_v62  ;;  %582 = vadd.xlane.f32.xlu1 %v581_v1  ;;  %v596_v9 = vsel %vm80_vm0, %v564_v15, 0.0 }
 0x25f   :  { %v1337_v43 = vsub.f32 %v1220_v46, %v523_v63  ;;  %597 = vadd.xlane.f32.xlu0 %v596_v9  ;;  %v489_v13 = vpop.xlane.xlu0 %488  ;;  %v599_v5 = vsel %vm80_vm0, %v565_v4, 0.0 }
 0x260   :  { %v528_v25 = vmul.f32 0.03125, %v489_v13  ;;  %v492_v18 = vpop.xlane.xlu1 %491  ;;  %v562_v24 = vmul.f32 %v1333_v3, %v1333_v3 }
 0x261   :  { %v529_v30 = vmul.f32 0.03125, %v492_v18  ;;  %v563_v44 = vmul.f32 %v1337_v43, %v1337_v43 }
 0x262   :  { %v1345_v26 = vsub.f32 %v1230_v8, %v528_v25  ;;  %600 = vadd.xlane.f32.xlu1 %v599_v5  ;;  %v590_v46 = vsel %vm80_vm0, %v562_v24, 0.0 }
 0x263   :  { %v1349_v21 = vsub.f32 %v1236_v55, %v529_v30  ;;  %591 = vadd.xlane.f32.xlu0 %v590_v46  ;;  %v483_v34 = vpop.xlane.xlu0 %482  ;;  %v593_v27 = vsel %vm80_vm0, %v563_v44, 0.0 }
 0x264   :  { %v526_v35 = vmul.f32 0.03125, %v483_v34  ;;  %v486_v22 = vpop.xlane.xlu1 %485  ;;  %v568_v37 = vmul.f32 %v1345_v26, %v1345_v26 }
 0x265   :  { %v527_v39 = vmul.f32 0.03125, %v486_v22  ;;  %v569_v8 = vmul.f32 %v1349_v21, %v1349_v21 }
 0x266   :  { %v1357_v0 = vsub.f32 %v1239_v56, %v526_v35  ;;  %594 = vadd.xlane.f32.xlu1 %v593_v27  ;;  %v608_v55 = vsel %vm80_vm0, %v568_v37, 0.0 }
 0x267   :  { %v1361_v28 = vsub.f32 %v1244_v58, %v527_v39  ;;  %609 = vadd.xlane.f32.xlu0 %v608_v55  ;;  %v501_v41 = vpop.xlane.xlu0 %500  ;;  %v611_v48 = vsel %vm80_vm0, %v569_v8, 0.0 }
 0x268   :  { %v532_v31 = vmul.f32 0.03125, %v501_v41  ;;  %v504_v42 = vpop.xlane.xlu1 %503  ;;  %v566_v32 = vmul.f32 %v1357_v0, %v1357_v0 }
 0x269   :  { %v533_v47 = vmul.f32 0.03125, %v504_v42  ;;  %v567_v56 = vmul.f32 %v1361_v28, %v1361_v28 }
 0x26a   :  { %v1369_v49 = vsub.f32 %v1254_v16, %v532_v31  ;;  %612 = vadd.xlane.f32.xlu1 %v611_v48  ;;  %v602_v58 = vsel %vm80_vm0, %v566_v32, 0.0 }
 0x26b   :  { %v1373_v50 = vsub.f32 %v1260_v36, %v533_v47  ;;  %603 = vadd.xlane.f32.xlu0 %v602_v58  ;;  %v495_v7 = vpop.xlane.xlu0 %494  ;;  %v605_v54 = vsel %vm80_vm0, %v567_v56, 0.0 }
 0x26c   :  { %v530_v51 = vmul.f32 0.03125, %v495_v7  ;;  %v498_v23 = vpop.xlane.xlu1 %497  ;;  %v572_v52 = vmul.f32 %v1369_v49, %v1369_v49 }
 0x26d   :  { %v531_v53 = vmul.f32 0.03125, %v498_v23  ;;  %v573_v16 = vmul.f32 %v1373_v50, %v1373_v50 }
 0x26e   :  { %v1381_v57 = vsub.f32 %v1263_v10, %v530_v51  ;;  %606 = vadd.xlane.f32.xlu1 %v605_v54  ;;  %v620_v36 = vsel %vm80_vm0, %v572_v52, 0.0  ;;  %v1421_v54 = vld [vmem:[%s1573_s5] ss:$0 sm:$0xff] }
 0x26f   :  { %v1385_v19 = vsub.f32 %v1268_v14, %v531_v53  ;;  %621 = vadd.xlane.f32.xlu0 %v620_v36  ;;  %v507_v29 = vpop.xlane.xlu0 %506  ;;  %v623_v20 = vsel %vm80_vm0, %v573_v16, 0.0 }
 0x270   :  { %v534_v59 = vmul.f32 0.03125, %v507_v29  ;;  %v570_v61 = vmul.f32 %v1381_v57, %v1381_v57 }
 0x271   :  { %v510_v62 = vpop.xlane.xlu1 %509  ;;  %v571_v15 = vmul.f32 %v1385_v19, %v1385_v19 }
 0x272   :  { %v1393_v10 = vsub.f32 %v1279_v2, %v534_v59  ;;  %v535_v63 = vmul.f32 0.03125, %v510_v62  ;;  %624 = vadd.xlane.f32.xlu1 %v623_v20  ;;  %v614_v14 = vsel %vm80_vm0, %v570_v61, 0.0  ;;  %v1427_v61 = vld [vmem:[%s1574_s6] ss:$0 sm:$0xff] }
 0x273   :  { %615 = vadd.xlane.f32.xlu0 %v614_v14  ;;  %v513_v1 = vpop.xlane.xlu0 %512  ;;  %v617_v18 = vsel %vm80_vm0, %v571_v15, 0.0 }
 0x274   :  { %v1397_v4 = vsub.f32 %v1284_v6, %v535_v63  ;;  %v536_v9 = vmul.f32 0.03125, %v513_v1  ;;  %v574_v13 = vmul.f32 %v1393_v10, %v1393_v10 }
 0x275   :  { %v516_v25 = vpop.xlane.xlu1 %515 }
 0x276   :  { %v1403_v24 = vsub.f32 %v1287_v38, %v536_v9  ;;  %v537_v2 = vmul.f32 0.03125, %v516_v25  ;;  %618 = vadd.xlane.f32.xlu1 %v617_v18  ;;  %v626_v30 = vsel %vm80_vm0, %v574_v13, 0.0  ;;  %v575_v5 = vmul.f32 %v1397_v4, %v1397_v4 }
 0x277   :  { %627 = vadd.xlane.f32.xlu0 %v626_v30 }
 0x278   :  { %v1409_v6 = vsub.f32 %v1292_v40, %v537_v2  ;;  %v629_v44 = vsel %vm80_vm0, %v575_v5, 0.0  ;;  %v576_v46 = vmul.f32 %v1403_v24, %v1403_v24 }
 0x27a   :  { %630 = vadd.xlane.f32.xlu1 %v629_v44  ;;  %v632_v38 = vsel %vm80_vm0, %v576_v46, 0.0  ;;  %v577_v34 = vmul.f32 %v1409_v6, %v1409_v6 }
 0x27b   :  { %633 = vadd.xlane.f32.xlu0 %v632_v38 }
 0x27c   :  { %v635_v35 = vsel %vm80_vm0, %v577_v34, 0.0 }
 0x27e   :  { %636 = vadd.xlane.f32.xlu1 %v635_v35 }
 0x2e3   :  { %v586_v22 = vpop.xlane.xlu0 %585 }
 0x2e4   :  { %v640_v37 = vmul.f32 0.03125, %v586_v22 }
 0x2e6   :  { %v660_v39 = vadd.f32 1e-05, %v640_v37 }
 0x2e7   :  { %v589_v40 = vpop.xlane.xlu1 %588  ;;  %v580_v27 = vpop.xlane.xlu0 %579 }
 0x2e8   :  { %910 = vrsqrt.f32 %v660_v39  ;;  %v641_v8 = vmul.f32 0.03125, %v589_v40  ;;  %v638_v55 = vmul.f32 0.03125, %v580_v27 }
 0x2ea   :  { %v661_v41 = vadd.f32 1e-05, %v641_v8  ;;  %v658_v31 = vadd.f32 1e-05, %v638_v55 }
 0x2eb   :  { %v583_v42 = vpop.xlane.xlu1 %582 }
 0x2ec   :  { %912 = vrsqrt.f32 %v661_v41  ;;  %v639_v32 = vmul.f32 0.03125, %v583_v42  ;;  %v598_v47 = vpop.xlane.xlu0 %597 }
 0x2ed   :  { %914 = vrsqrt.f32 %v658_v31  ;;  %v644_v48 = vmul.f32 0.03125, %v598_v47 }
 0x2ee   :  { %v659_v56 = vadd.f32 1e-05, %v639_v32 }
 0x2ef   :  { %v664_v58 = vadd.f32 1e-05, %v644_v48  ;;  %v601_v7 = vpop.xlane.xlu1 %600 }
 0x2f0   :  { %916 = vrsqrt.f32 %v659_v56  ;;  %v645_v51 = vmul.f32 0.03125, %v601_v7  ;;  %v592_v23 = vpop.xlane.xlu0 %591 }
 0x2f1   :  { %918 = vrsqrt.f32 %v664_v58  ;;  %v642_v52 = vmul.f32 0.03125, %v592_v23 }
 0x2f2   :  { %v911_v53 = vpop.eup %910  ;;  %v665_v16 = vadd.f32 1e-05, %v645_v51 }
 0x2f3   :  { %v700_v36 = vmul.f32 %v911_v53, %v1299_v45  ;;  %v662_v29 = vadd.f32 1e-05, %v642_v52  ;;  %v595_v59 = vpop.xlane.xlu1 %594 }
 0x2f4   :  { %920 = vrsqrt.f32 %v665_v16  ;;  %v643_v62 = vmul.f32 0.03125, %v595_v59  ;;  %v610_v20 = vpop.xlane.xlu0 %609 }
 0x2f5   :  { %v727_v15 = vmul.f32 %v1421_v54, %v700_v36  ;;  %922 = vrsqrt.f32 %v662_v29  ;;  %v648_v63 = vmul.f32 0.03125, %v610_v20 }
 0x2f6   :  { %v913_v14 = vpop.eup %912  ;;  %v663_v1 = vadd.f32 1e-05, %v643_v62 }
 0x2f7   :  { %v915_v9 = vpop.eup %914  ;;  %v754_v13 = vadd.f32 %v1427_v61, %v727_v15  ;;  %v701_v45 = vmul.f32 %v913_v14, %v1307_v12  ;;  %v668_v25 = vadd.f32 1e-05, %v648_v63  ;;  %v613_v18 = vpop.xlane.xlu1 %612 }
 0x2f8   :  { %v698_v2 = vmul.f32 %v915_v9, %v1302_v11  ;;  %924 = vrsqrt.f32 %v663_v1  ;;  %v649_v30 = vmul.f32 0.03125, %v613_v18  ;;  %v604_v5 = vpop.xlane.xlu0 %603 }
 0x2f9   :  { %774 = vst.msk [vmem:[%s1575_s7 + $0x10] sm:$0xff] %vm80_vm0, %v754_v13  ;;  %v728_v44 = vmul.f32 %v1421_v54, %v701_v45  ;;  %926 = vrsqrt.f32 %v668_v25  ;;  %v646_v46 = vmul.f32 0.03125, %v604_v5 }
 0x2fa   :  { %v917_v38 = vpop.eup %916  ;;  %v725_v34 = vmul.f32 %v1421_v54, %v698_v2  ;;  %v669_v12 = vadd.f32 1e-05, %v649_v30 }
 0x2fb   :  { %v919_v35 = vpop.eup %918  ;;  %v755_v22 = vadd.f32 %v1427_v61, %v728_v44  ;;  %v699_v11 = vmul.f32 %v917_v38, %v1313_v17  ;;  %v666_v37 = vadd.f32 1e-05, %v646_v46  ;;  %v607_v39 = vpop.xlane.xlu1 %606 }
 0x2fc   :  { %v752_v40 = vadd.f32 %v1427_v61, %v725_v34  ;;  %v704_v27 = vmul.f32 %v919_v35, %v1322_v60  ;;  %928 = vrsqrt.f32 %v669_v12  ;;  %v647_v8 = vmul.f32 0.03125, %v607_v39  ;;  %v622_v55 = vpop.xlane.xlu0 %621 }
 0x2fd   :  { %775 = vst.msk [vmem:[%s1575_s7 + $0x18] sm:$0xff] %vm80_vm0, %v755_v22  ;;  %v726_v41 = vmul.f32 %v1421_v54, %v699_v11  ;;  %930 = vrsqrt.f32 %v666_v37  ;;  %v652_v31 = vmul.f32 0.03125, %v622_v55 }
 0x2fe   :  { %v921_v42 = vpop.eup %920  ;;  %772 = vst.msk [vmem:[%s1575_s7] sm:$0xff] %vm80_vm0, %v752_v40  ;;  %v731_v17 = vmul.f32 %v1421_v54, %v704_v27  ;;  %v667_v60 = vadd.f32 1e-05, %v647_v8 }
 0x2ff   :  { %v923_v32 = vpop.eup %922  ;;  %v753_v47 = vadd.f32 %v1427_v61, %v726_v41  ;;  %v705_v48 = vmul.f32 %v921_v42, %v1325_v33  ;;  %v672_v56 = vadd.f32 1e-05, %v652_v31  ;;  %v625_v58 = vpop.xlane.xlu1 %624 }
 0x300   :  { %v758_v7 = vadd.f32 %v1427_v61, %v731_v17  ;;  %v702_v51 = vmul.f32 %v923_v32, %v1333_v3  ;;  %932 = vrsqrt.f32 %v667_v60  ;;  %v653_v23 = vmul.f32 0.03125, %v625_v58  ;;  %v616_v52 = vpop.xlane.xlu0 %615 }
 0x301   :  { %773 = vst.msk [vmem:[%s1575_s7 + $0x8] sm:$0xff] %vm80_vm0, %v753_v47  ;;  %v732_v53 = vmul.f32 %v1421_v54, %v705_v48  ;;  %934 = vrsqrt.f32 %v672_v56  ;;  %v650_v16 = vmul.f32 0.03125, %v616_v52 }
 0x302   :  { %v925_v36 = vpop.eup %924  ;;  %778 = vst.msk [vmem:[%s1575_s7 + $0x30] sm:$0xff] %vm80_vm0, %v758_v7  ;;  %v729_v33 = vmul.f32 %v1421_v54, %v702_v51  ;;  %v673_v3 = vadd.f32 1e-05, %v653_v23 }
 0x303   :  { %v927_v29 = vpop.eup %926  ;;  %v759_v59 = vadd.f32 %v1427_v61, %v732_v53  ;;  %v703_v62 = vmul.f32 %v925_v36, %v1337_v43  ;;  %v670_v20 = vadd.f32 1e-05, %v650_v16  ;;  %v619_v15 = vpop.xlane.xlu1 %618 }
 0x304   :  { %v756_v63 = vadd.f32 %v1427_v61, %v729_v33  ;;  %v708_v14 = vmul.f32 %v927_v29, %v1345_v26  ;;  %936 = vrsqrt.f32 %v673_v3  ;;  %v651_v1 = vmul.f32 0.03125, %v619_v15  ;;  %v628_v9 = vpop.xlane.xlu0 %627 }
 0x305   :  { %779 = vst.msk [vmem:[%s1575_s7 + $0x38] sm:$0xff] %vm80_vm0, %v759_v59  ;;  %v730_v13 = vmul.f32 %v1421_v54, %v703_v62  ;;  %938 = vrsqrt.f32 %v670_v20  ;;  %v654_v45 = vmul.f32 0.03125, %v628_v9 }
 0x306   :  { %v929_v25 = vpop.eup %928  ;;  %776 = vst.msk [vmem:[%s1575_s7 + $0x20] sm:$0xff] %vm80_vm0, %v756_v63  ;;  %v735_v43 = vmul.f32 %v1421_v54, %v708_v14  ;;  %v671_v26 = vadd.f32 1e-05, %v651_v1 }
 0x307   :  { %v931_v18 = vpop.eup %930  ;;  %v757_v2 = vadd.f32 %v1427_v61, %v730_v13  ;;  %v709_v30 = vmul.f32 %v929_v25, %v1349_v21  ;;  %v674_v5 = vadd.f32 1e-05, %v654_v45  ;;  %v631_v44 = vpop.xlane.xlu1 %630 }
 0x308   :  { %v762_v46 = vadd.f32 %v1427_v61, %v735_v43  ;;  %v706_v38 = vmul.f32 %v931_v18, %v1357_v0  ;;  %940 = vrsqrt.f32 %v671_v26  ;;  %v655_v34 = vmul.f32 0.03125, %v631_v44  ;;  %v634_v12 = vpop.xlane.xlu0 %633 }
 0x309   :  { %777 = vst.msk [vmem:[%s1575_s7 + $0x28] sm:$0xff] %vm80_vm0, %v757_v2  ;;  %v736_v35 = vmul.f32 %v1421_v54, %v709_v30  ;;  %942 = vrsqrt.f32 %v674_v5  ;;  %v656_v22 = vmul.f32 0.03125, %v634_v12 }
 0x30a   :  { %v933_v11 = vpop.eup %932  ;;  %782 = vst.msk [vmem:[%s1575_s7 + $0x50] sm:$0xff] %vm80_vm0, %v762_v46  ;;  %v733_v21 = vmul.f32 %v1421_v54, %v706_v38  ;;  %v675_v0 = vadd.f32 1e-05, %v655_v34 }
 0x30b   :  { %v935_v37 = vpop.eup %934  ;;  %v763_v39 = vadd.f32 %v1427_v61, %v736_v35  ;;  %v707_v40 = vmul.f32 %v933_v11, %v1361_v28  ;;  %v676_v27 = vadd.f32 1e-05, %v656_v22  ;;  %v637_v8 = vpop.xlane.xlu1 %636 }
 0x30c   :  { %v760_v55 = vadd.f32 %v1427_v61, %v733_v21  ;;  %v712_v41 = vmul.f32 %v935_v37, %v1369_v49  ;;  %944 = vrsqrt.f32 %v675_v0  ;;  %v657_v31 = vmul.f32 0.03125, %v637_v8 }
 0x30d   :  { %783 = vst.msk [vmem:[%s1575_s7 + $0x58] sm:$0xff] %vm80_vm0, %v763_v39  ;;  %v734_v42 = vmul.f32 %v1421_v54, %v707_v40  ;;  %946 = vrsqrt.f32 %v676_v27 }
 0x30e   :  { %v937_v17 = vpop.eup %936  ;;  %780 = vst.msk [vmem:[%s1575_s7 + $0x40] sm:$0xff] %vm80_vm0, %v760_v55  ;;  %v739_v28 = vmul.f32 %v1421_v54, %v712_v41  ;;  %v677_v60 = vadd.f32 1e-05, %v657_v31 }
 0x30f   :  { %v939_v49 = vpop.eup %938  ;;  %v761_v32 = vadd.f32 %v1427_v61, %v734_v42  ;;  %v713_v47 = vmul.f32 %v937_v17, %v1373_v50 }
 0x310   :  { %v766_v48 = vadd.f32 %v1427_v61, %v739_v28  ;;  %v710_v56 = vmul.f32 %v939_v49, %v1381_v57  ;;  %948 = vrsqrt.f32 %v677_v60 }
 0x311   :  { %781 = vst.msk [vmem:[%s1575_s7 + $0x48] sm:$0xff] %vm80_vm0, %v761_v32  ;;  %v740_v58 = vmul.f32 %v1421_v54, %v713_v47 }
 0x312   :  { %v941_v7 = vpop.eup %940  ;;  %786 = vst.msk [vmem:[%s1575_s7 + $0x70] sm:$0xff] %vm80_vm0, %v766_v48  ;;  %v737_v50 = vmul.f32 %v1421_v54, %v710_v56 }
 0x313   :  { %v943_v51 = vpop.eup %942  ;;  %v767_v23 = vadd.f32 %v1427_v61, %v740_v58  ;;  %v711_v57 = vmul.f32 %v941_v7, %v1385_v19 }
 0x314   :  { %v764_v52 = vadd.f32 %v1427_v61, %v737_v50  ;;  %v714_v53 = vmul.f32 %v943_v51, %v1393_v10 }
 0x315   :  { %787 = vst.msk [vmem:[%s1575_s7 + $0x78] sm:$0xff] %vm80_vm0, %v767_v23  ;;  %v738_v16 = vmul.f32 %v1421_v54, %v711_v57 }
 0x316   :  { %v945_v36 = vpop.eup %944  ;;  %784 = vst.msk [vmem:[%s1575_s7 + $0x60] sm:$0xff] %vm80_vm0, %v764_v52  ;;  %v741_v33 = vmul.f32 %v1421_v54, %v714_v53 }
 0x317   :  { %v947_v19 = vpop.eup %946  ;;  %v765_v3 = vadd.f32 %v1427_v61, %v738_v16  ;;  %v715_v10 = vmul.f32 %v945_v36, %v1397_v4 }
 0x318   :  { %v768_v29 = vadd.f32 %v1427_v61, %v741_v33  ;;  %v716_v59 = vmul.f32 %v947_v19, %v1403_v24 }
 0x319   :  { %785 = vst.msk [vmem:[%s1575_s7 + $0x68] sm:$0xff] %vm80_vm0, %v765_v3  ;;  %v742_v62 = vmul.f32 %v1421_v54, %v715_v10 }
 0x31a   :  { %v949_v20 = vpop.eup %948  ;;  %788 = vst.msk [vmem:[%s1575_s7 + $0x80] sm:$0xff] %vm80_vm0, %v768_v29  ;;  %v743_v15 = vmul.f32 %v1421_v54, %v716_v59 }
 0x31b   :  { %v769_v4 = vadd.f32 %v1427_v61, %v742_v62  ;;  %v717_v63 = vmul.f32 %v949_v20, %v1409_v6 }
 0x31c   :  { %v770_v24 = vadd.f32 %v1427_v61, %v743_v15 }
 0x31d   :  { %789 = vst.msk [vmem:[%s1575_s7 + $0x88] sm:$0xff] %vm80_vm0, %v769_v4  ;;  %v744_v14 = vmul.f32 %v1421_v54, %v717_v63 }
 0x31e   :  { %790 = vst.msk [vmem:[%s1575_s7 + $0x90] sm:$0xff] %vm80_vm0, %v770_v24 }
 0x31f   :  { %v771_v1 = vadd.f32 %v1427_v61, %v744_v14 }
 0x321   :  { %791 = vst.msk [vmem:[%s1575_s7 + $0x98] sm:$0xff] %vm80_vm0, %v771_v1 }

// kernel: _lambda_.37
= control target key start
LH: loop header
LB: loop body
LE: loop exit
PB: predicated region body
PF: predicated region fallthrough
CT: control target
= control target key end

     0   :  { %v373_v0 = vmov 0.0   ;;  %vm374_vm0 = vmmov 0   ;;  %vm56_vm1 = vcmask 261120   ;;  %vm219_vm2 = vcmask 97344   ;;  %s376_s15 = smov 124   ;;  %s377_s16 = smov 116   ;;  %s520_s4 = inlined_call_operand.vmem [shape: bf16[32,16], index: 4, kind: input, shape index: {}]   ;;  %s521_s0 = inlined_call_operand.vmem [shape: f32[16,32], index: 0, kind: input, shape index: {}]   ;;  %s522_s1 = inlined_call_operand.vmem [shape: f32[16,32], index: 1, kind: input, shape index: {}]   ;;  %s523_s5 = inlined_call_operand.vmem [shape: f32[1,16], index: 5, kind: input, shape index: {}]   ;;  %s524_s2 = inlined_call_operand.vmem [shape: bf16[32,32], index: 2, kind: input, shape index: {}]   ;;  %s525_s3 = inlined_call_operand.vmem [shape: f32[1,32], index: 3, kind: input, shape index: {}]   ;;  %s526_s6 = inlined_call_operand.vmem [shape: f32[16,32], index: 6, kind: output, shape index: {0}]   ;;  %s527_s7 = inlined_call_operand.vmem [shape: f32[16,16], index: 7, kind: output, shape index: {1}]  }
   0x1   :  { %324 = vmatprep.subr.bf16.mxu1 %v373_v0  ;;  %v337_v1 = vld [vmem:[%s520_s4] sm:$0xff]   ;;  %328 = vmatprep.mubr.msk.bf16.mxu1 %vm374_vm0, %v373_v0  ;;  %v338_v2 = vld [vmem:[%s520_s4 + $0x8] sm:$0xff]   ;;  %vm188_vm3 = vcmask 64544   ;;  %vm250_vm4 = vcmask 130144   ;;  %vm165_vm5 = vcmask 31744   ;;  %vm283_vm6 = vcmask 64512  }
   0x2   :  { %316 = vmatprep.subr.bf16.mxu0 %v373_v0  ;;  %320 = vmatprep.mubr.msk.bf16.mxu0 %vm374_vm0, %v373_v0  ;;  %v26_v3 = vld [vmem:[%s521_s0] sm:$0xff]  ;;  %v27_v4 = vld [vmem:[%s521_s0 + $0x8] sm:$0xff]  ;;  %vm286_vm7 = vcmask 97280   ;;  %vm289_vm8 = vcmask 130048  }
   0x3   :  { %325 = vmatpush3.bf16.msra.mxu1 %v337_v1  ;;  %v28_v5 = vld [vmem:[%s522_s1] sm:$0xff]  ;;  %v29_v6 = vld [vmem:[%s522_s1 + $0x8] sm:$0xff] }
   0x4   :  { %326 = vmatprep.subr.bf16.mxu1 %v373_v0  ;;  %v30_v7 = vadd.f32 %v28_v5, %v26_v3  ;;  %v31_v8 = vadd.f32 %v29_v6, %v27_v4  ;;  %v306_v10 = vld [vmem:[%s523_s5] ss:$0 sm:$0xff]  ;;  %v340_v26 = vld [vmem:[%s524_s2 + $0x8] sm:$0xff]  }
   0x5   :  { %v339_v25 = vld [vmem:[%s524_s2] sm:$0xff]   ;;  %s375_s2 = smov 120  }
   0x6   :  { %v32_v9 = vpack.c.bf16 %v31_v8, %v30_v7  ;;  %317 = vmatpush3.bf16.msra.mxu0 %v339_v25 }
   0x7   :  { %327 = vmatpush3.bf16.msra.mxu1 %v338_v2  ;;  %318 = vmatprep.subr.bf16.mxu0 %v373_v0 }
   0xa   :  { %329 = vmatmul.mubr.msk.bf16.vlgmr.msra.gmra.mrb[0].mxu1 %vm56_vm1, %v32_v9  ;;  %319 = vmatpush3.bf16.msra.mxu0 %v340_v26 }
   0xd   :  { %321 = vmatmul.mubr.msk.bf16.vlgmr.msra.gmra.mrb[0].mxu0 %vm56_vm1, %v32_v9 }
  0xdd   :  { %v158_v11 = vpop.f32.mrb[0].mxu1 }
  0xde   :  { %v440_v12 = vadd.f32 %v306_v10, %v158_v11  ;;  %v330_v13 = vpop.f32.mrb[1].mxu1 }
  0xdf   :  { %v161_v14 = vpop.f32.mrb[2].mxu1 }
  0xe0   :  { %v442_v15 = vadd.f32 %v306_v10, %v161_v14  ;;  %v331_v16 = vpop.f32.mrb[3].mxu1  ;;  %v220_v17 = vsel %vm219_vm2, %v440_v12, -inf  ;;  %v189_v18 = vsel %vm188_vm3, %v440_v12, -inf  ;;  %v251_v22 = vsel %vm250_vm4, %v440_v12, -inf  ;;  %v94_v9 = vpop.f32.mrb[0].mxu0 }
  0xe1   :  { %221 = vmax.xlane.f32.xlu1 %v220_v17  ;;  %190 = vmax.xlane.f32.xlu0 %v189_v18  ;;  %v166_v23 = vsel %vm165_vm5, %v440_v12, -inf  ;;  %v322_v10 = vpop.f32.mrb[1].mxu0 }
  0xe2   :  { %v223_v19 = vsel %vm219_vm2, %v442_v15, -inf  ;;  %v192_v20 = vsel %vm188_vm3, %v442_v15, -inf  ;;  %v254_v21 = vsel %vm250_vm4, %v442_v15, -inf  ;;  %v169_v24 = vsel %vm165_vm5, %v442_v15, -inf  ;;  %v97_v11 = vpop.f32.mrb[2].mxu0 }
  0xe3   :  { %v323_v13 = vpop.f32.mrb[3].mxu0 }
  0xe5   :  { %224 = vmax.xlane.f32.xlu1 %v223_v19  ;;  %193 = vmax.xlane.f32.xlu0 %v192_v20 }
  0xe9   :  { %255 = vmax.xlane.f32.xlu1 %v254_v21  ;;  %252 = vmax.xlane.f32.xlu0 %v251_v22 }
  0xed   :  { %167 = vmax.xlane.f32.xlu0 %v166_v23  ;;  %170 = vmax.xlane.f32.xlu1 %v169_v24 }
 0x16e   :  { %v222_v27 = vpop.xlane.xlu1 %221  ;;  %v191_v28 = vpop.xlane.xlu0 %190 }
 0x16f   :  { %v226_v29 = vsub.f32 %v440_v12, %v222_v27  ;;  %v195_v30 = vsub.f32 %v440_v12, %v191_v28 }
 0x171   :  { %v228_v31 = vmul.f32 1.442695, %v226_v29  ;;  %v197_v32 = vmul.f32 1.442695, %v195_v30 }
 0x172   :  { %v225_v33 = vpop.xlane.xlu1 %224  ;;  %v194_v34 = vpop.xlane.xlu0 %193 }
 0x173   :  { %341 = vpow2.f32 %v228_v31  ;;  %v227_v35 = vsub.f32 %v442_v15, %v225_v33  ;;  %v196_v36 = vsub.f32 %v442_v15, %v194_v34 }
 0x174   :  { %343 = vpow2.f32 %v197_v32 }
 0x175   :  { %v199_v37 = vmul.f32 1.442695, %v196_v36  ;;  %v230_v40 = vmul.f32 1.442695, %v227_v35 }
 0x176   :  { %v256_v38 = vpop.xlane.xlu1 %255  ;;  %v253_v39 = vpop.xlane.xlu0 %252 }
 0x177   :  { %v257_v41 = vsub.f32 %v440_v12, %v253_v39  ;;  %345 = vpow2.f32 %v199_v37  ;;  %v258_v42 = vsub.f32 %v442_v15, %v256_v38 }
 0x178   :  { %347 = vpow2.f32 %v230_v40 }
 0x179   :  { %v259_v43 = vmul.f32 1.442695, %v257_v41  ;;  %v261_v44 = vmul.f32 1.442695, %v258_v42 }
 0x17a   :  { %v168_v51 = vpop.xlane.xlu0 %167  ;;  %v171_v54 = vpop.xlane.xlu1 %170 }
 0x17b   :  { %349 = vpow2.f32 %v259_v43  ;;  %v172_v52 = vsub.f32 %v440_v12, %v168_v51  ;;  %v173_v55 = vsub.f32 %v442_v15, %v171_v54  ;;  %v302_v12 = vld [vmem:[%s525_s3] ss:$0 sm:$0xff] }
 0x17c   :  { %351 = vpow2.f32 %v261_v44  ;;  %v95_v14 = vadd.f32 %v302_v12, %v94_v9  ;;  %v98_v15 = vadd.f32 %v302_v12, %v97_v11 }
 0x17d   :  { %v467_v45 = vpop.eup %341  ;;  %v174_v53 = vmul.f32 1.442695, %v172_v52  ;;  %v176_v56 = vmul.f32 1.442695, %v173_v55 }
 0x17e   :  { %v469_v46 = vpop.eup %343  ;;  %234 = vrot.lane.b32.xlu1 %v467_v45, %s375_s2  ;;  %292 = vst.msk [vmem:[%s526_s6] sm:$0xff] %vm56_vm1, %v95_v14  ;;  %293 = vst.msk [vmem:[%s526_s6 + $0x8] sm:$0xff] %vm56_vm1, %v98_v15 }
 0x17f   :  { %203 = vrot.lane.b32.xlu0 %v469_v46, %s376_s15  ;;  %353 = vpow2.f32 %v174_v53 }
 0x180   :  { %355 = vpow2.f32 %v176_v56 }
 0x181   :  { %v473_v47 = vpop.eup %345 }
 0x182   :  { %205 = vrot.lane.b32.xlu1 %v473_v47, %s376_s15  ;;  %v476_v48 = vpop.eup %347 }
 0x185   :  { %v478_v49 = vpop.eup %349 }
 0x186   :  { %265 = vrot.lane.b32.xlu0 %v478_v49, %s377_s16  ;;  %236 = vrot.lane.b32.xlu1 %v476_v48, %s375_s2  ;;  %v482_v50 = vpop.eup %351 }
 0x189   :  { %v354_v57 = vpop.eup %353 }
 0x18a   :  { %267 = vrot.lane.b32.xlu1 %v482_v50, %s377_s16  ;;  %v178_v58 = vsel %vm165_vm5, %v354_v57, 0.0  ;;  %v356_v59 = vpop.eup %355 }
 0x18b   :  { %v181_v60 = vsel %vm165_vm5, %v356_v59, 0.0 }
 0x1a5   :  { %179 = vadd.xlane.f32.xlu0 %v178_v58 }
 0x1ae   :  { %182 = vadd.xlane.f32.xlu1 %v181_v60 }
 0x1f0   :  { %v235_v61 = vpop.permute.xlu1 %234 }
 0x1f1   :  { %v204_v62 = vpop.permute.xlu0 %203  ;;  %v240_v1 = vsel %vm165_vm5, %v235_v61, 0.0 }
 0x1f2   :  { %v209_v63 = vsel %vm165_vm5, %v204_v62, 0.0 }
 0x1f3   :  { %210 = vadd.xlane.f32.xlu0 %v209_v63 }
 0x1f4   :  { %v206_v0 = vpop.permute.xlu1 %205 }
 0x1f5   :  { %v212_v3 = vsel %vm165_vm5, %v206_v0, 0.0 }
 0x1f7   :  { %241 = vadd.xlane.f32.xlu0 %v240_v1 }
 0x1f8   :  { %v237_v2 = vpop.permute.xlu1 %236  ;;  %v266_v5 = vpop.permute.xlu0 %265 }
 0x1f9   :  { %v243_v4 = vsel %vm165_vm5, %v237_v2, 0.0  ;;  %v271_v7 = vsel %vm165_vm5, %v266_v5, 0.0 }
 0x1fa   :  { %244 = vadd.xlane.f32.xlu1 %v243_v4 }
 0x1fb   :  { %213 = vadd.xlane.f32.xlu0 %v212_v3 }
 0x1fc   :  { %v268_v6 = vpop.permute.xlu1 %267 }
 0x1fd   :  { %v274_v8 = vsel %vm165_vm5, %v268_v6, 0.0 }
 0x1fe   :  { %275 = vadd.xlane.f32.xlu1 %v274_v8 }
 0x1ff   :  { %272 = vadd.xlane.f32.xlu0 %v271_v7 }
 0x232   :  { %v180_v16 = vpop.xlane.xlu0 %179 }
 0x233   :  { %357 = vrcp.f32 %v180_v16 }
 0x23b   :  { %v183_v18 = vpop.xlane.xlu1 %182 }
 0x23c   :  { %359 = vrcp.f32 %v183_v18 }
 0x23d   :  { %v358_v24 = vpop.eup %357 }
 0x23e   :  { %v186_v34 = vmul.f32 %v358_v24, %v354_v57 }
 0x246   :  { %v360_v25 = vpop.eup %359 }
 0x247   :  { %v187_v32 = vmul.f32 %v360_v25, %v356_v59 }
 0x280   :  { %v211_v17 = vpop.xlane.xlu0 %210 }
 0x281   :  { %361 = vrcp.f32 %v211_v17 }
 0x284   :  { %v242_v19 = vpop.xlane.xlu0 %241 }
 0x285   :  { %363 = vrcp.f32 %v242_v19 }
 0x287   :  { %v245_v21 = vpop.xlane.xlu1 %244 }
 0x288   :  { %v214_v20 = vpop.xlane.xlu0 %213 }
 0x289   :  { %365 = vrcp.f32 %v214_v20 }
 0x28a   :  { %367 = vrcp.f32 %v245_v21 }
 0x28b   :  { %v276_v23 = vpop.xlane.xlu1 %275  ;;  %v362_v26 = vpop.eup %361 }
 0x28c   :  { %v273_v22 = vpop.xlane.xlu0 %272  ;;  %v217_v30 = vmul.f32 %v362_v26, %v469_v46 }
 0x28d   :  { %369 = vrcp.f32 %v273_v22 }
 0x28e   :  { %371 = vrcp.f32 %v276_v23  ;;  %v281_v39 = vsel %vm165_vm5, %v186_v34, %v217_v30 }
 0x28f   :  { %v364_v27 = vpop.eup %363 }
 0x290   :  { %v248_v33 = vmul.f32 %v364_v27, %v467_v45 }
 0x292   :  { %v284_v41 = vsel %vm283_vm6, %v281_v39, %v248_v33 }
 0x293   :  { %v366_v28 = vpop.eup %365 }
 0x294   :  { %v368_v29 = vpop.eup %367  ;;  %v218_v31 = vmul.f32 %v366_v28, %v473_v47 }
 0x295   :  { %v249_v35 = vmul.f32 %v368_v29, %v476_v48 }
 0x296   :  { %v282_v37 = vsel %vm165_vm5, %v187_v32, %v218_v31 }
 0x297   :  { %v370_v36 = vpop.eup %369  ;;  %v285_v43 = vsel %vm283_vm6, %v282_v37, %v249_v35 }
 0x298   :  { %v372_v38 = vpop.eup %371  ;;  %v279_v40 = vmul.f32 %v370_v36, %v478_v49 }
 0x299   :  { %v280_v42 = vmul.f32 %v372_v38, %v482_v50 }
 0x29a   :  { %v287_v44 = vsel %vm286_vm7, %v284_v41, %v279_v40 }
 0x29b   :  { %290 = vst.msk [vmem:[%s527_s7] sm:$0xff] %vm289_vm8, %v287_v44  ;;  %v288_v45 = vsel %vm286_vm7, %v285_v43, %v280_v42 }
 0x29c   :  { %291 = vst.msk [vmem:[%s527_s7 + $0x8] sm:$0xff] %vm289_vm8, %v288_v45 }

// kernel: _lambda_.38
= control target key start
LH: loop header
LB: loop body
LE: loop exit
PB: predicated region body
PF: predicated region fallthrough
CT: control target
= control target key end

     0   :  { %v111_v0 = vmov 0.0   ;;  %vm112_vm0 = vmmov 0   ;;  %vm41_vm1 = vcmask 261120   ;;  %s154_s1 = inlined_call_operand.vmem [shape: bf16[32,32], index: 1, kind: input, shape index: {}]   ;;  %s155_s0 = inlined_call_operand.vmem [shape: f32[16,32], index: 0, kind: input, shape index: {}]   ;;  %s156_s2 = inlined_call_operand.vmem [shape: f32[1,32], index: 2, kind: input, shape index: {}]   ;;  %s157_s3 = inlined_call_operand.vmem [shape: f32[16,32], index: 3, kind: output, shape index: {}]  }
   0x1   :  { %99 = vmatprep.subr.bf16.mxu0 %v111_v0  ;;  %v109_v1 = vld [vmem:[%s154_s1] sm:$0xff]   ;;  %103 = vmatprep.mubr.msk.bf16.mxu0 %vm112_vm0, %v111_v0  ;;  %v110_v2 = vld [vmem:[%s154_s1 + $0x8] sm:$0xff]  }
   0x2   :  { %100 = vmatpush3.bf16.msra.mxu0 %v109_v1  ;;  %v15_v3 = vld [vmem:[%s155_s0] sm:$0xff]  ;;  %v16_v4 = vld [vmem:[%s155_s0 + $0x8] sm:$0xff] }
   0x3   :  { %101 = vmatprep.subr.bf16.mxu0 %v111_v0  ;;  %v17_v5 = vpack.c.bf16 %v16_v4, %v15_v3  ;;  %v92_v6 = vld [vmem:[%s156_s2] ss:$0 sm:$0xff] }
   0x6   :  { %102 = vmatpush3.bf16.msra.mxu0 %v110_v2 }
   0x9   :  { %104 = vmatmul.mubr.msk.bf16.vlgmr.msra.gmra.mrb[0].mxu0 %vm41_vm1, %v17_v5 }
  0xdc   :  { %v79_v7 = vpop.f32.mrb[0].mxu0 }
  0xdd   :  { %v80_v8 = vadd.f32 %v92_v6, %v79_v7  ;;  %v105_v9 = vpop.f32.mrb[1].mxu0 }
  0xde   :  { %v82_v10 = vpop.f32.mrb[2].mxu0 }
  0xdf   :  { %86 = vst.msk [vmem:[%s157_s3] sm:$0xff] %vm41_vm1, %v80_v8  ;;  %v83_v11 = vadd.f32 %v92_v6, %v82_v10  ;;  %v106_v12 = vpop.f32.mrb[3].mxu0 }
  0xe1   :  { %87 = vst.msk [vmem:[%s157_s3 + $0x8] sm:$0xff] %vm41_vm1, %v83_v11 }

// kernel: _lambda_.40
= control target key start
LH: loop header
LB: loop body
LE: loop exit
PB: predicated region body
PF: predicated region fallthrough
CT: control target
= control target key end

     0   :  { %v290_v0 = vmov 0.0   ;;  %vm291_vm0 = vmmov 0   ;;  %vm53_vm1 = vcmask 261120   ;;  %vm140_vm2 = vcmask 523264   ;;  %s381_s1 = inlined_call_operand.vmem [shape: bf16[32,64], index: 1, kind: input, shape index: {}]   ;;  %s382_s0 = inlined_call_operand.vmem [shape: f32[16,32], index: 0, kind: input, shape index: {}]   ;;  %s383_s3 = inlined_call_operand.vmem [shape: bf16[64,32], index: 3, kind: input, shape index: {}]   ;;  %s384_s2 = inlined_call_operand.vmem [shape: f32[1,64], index: 2, kind: input, shape index: {}]   ;;  %s385_s4 = inlined_call_operand.vmem [shape: f32[1,32], index: 4, kind: input, shape index: {}]   ;;  %s386_s5 = inlined_call_operand.vmem [shape: f32[1,32], index: 5, kind: input, shape index: {}]   ;;  %s387_s6 = inlined_call_operand.vmem [shape: f32[1,32], index: 6, kind: input, shape index: {}]   ;;  %s388_s7 = inlined_call_operand.vmem [shape: f32[16,32], index: 7, kind: output, shape index: {}]  }
   0x1   :  { %258 = vmatprep.subr.bf16.mxu0 %v290_v0  ;;  %v280_v1 = vld [vmem:[%s381_s1] sm:$0xff]   ;;  %262 = vmatprep.mubr.msk.bf16.mxu0 %vm291_vm0, %v290_v0  ;;  %v281_v2 = vld [vmem:[%s381_s1 + $0x8] sm:$0xff]   ;;  %v284_v8 = vld [vmem:[%s383_s3 + $0x10] sm:$0xff]  }
   0x2   :  { %266 = vmatprep.subr.bf16.mxu1 %v290_v0  ;;  %274 = vmatprep.mubr.msk.bf16.mxu1 %vm291_vm0, %v290_v0  ;;  %v27_v3 = vld [vmem:[%s382_s0] sm:$0xff]  ;;  %v28_v4 = vld [vmem:[%s382_s0 + $0x8] sm:$0xff]  ;;  %v285_v9 = vld [vmem:[%s383_s3 + $0x18] sm:$0xff]  }
   0x3   :  { %259 = vmatpush3.bf16.msra.mxu0 %v280_v1  ;;  %v282_v5 = vld [vmem:[%s383_s3] sm:$0xff]   ;;  %v283_v6 = vld [vmem:[%s383_s3 + $0x8] sm:$0xff]   ;;  %v29_v7 = vpack.c.bf16 %v28_v4, %v27_v3 }
   0x4   :  { %260 = vmatprep.subr.bf16.mxu0 %v290_v0  ;;  %267 = vmatpush3.bf16.msra.mxu1 %v282_v5  ;;  %v238_v10 = vld [vmem:[%s384_s2] ss:$0 sm:$0xff] }
   0x5   :  { %268 = vmatprep.subr.bf16.mxu1 %v290_v0  ;;  %v242_v20 = vld [vmem:[%s385_s4] ss:$0 sm:$0xff] }
   0x6   :  { %v248_v48 = vld [vmem:[%s386_s5] ss:$0 sm:$0xff] }
   0x7   :  { %261 = vmatpush3.bf16.msra.mxu0 %v281_v2  ;;  %v249_v50 = vld [vmem:[%s387_s6] ss:$0 sm:$0xff] }
   0x8   :  { %269 = vmatpush3.bf16.msra.mxu1 %v283_v6 }
   0x9   :  { %270 = vmatprep.subr.bf16.mxu1 %v290_v0 }
   0xa   :  { %263 = vmatmul.mubr.msk.bf16.vlgmr.msra.gmra.mrb[0].mxu0 %vm53_vm1, %v29_v7 }
   0xc   :  { %271 = vmatpush3.bf16.msra.mxu1 %v284_v8 }
   0xd   :  { %272 = vmatprep.subr.bf16.mxu1 %v290_v0 }
  0x10   :  { %273 = vmatpush3.bf16.msra.mxu1 %v285_v9 }
  0xdd   :  { %v91_v11 = vpop.f32.mrb[0].mxu0 }
  0xde   :  { %v92_v12 = vadd.f32 %v238_v10, %v91_v11  ;;  %v264_v13 = vpop.f32.mrb[1].mxu0 }
  0xdf   :  { %v94_v14 = vpop.f32.mrb[2].mxu0 }
  0xe0   :  { %v95_v15 = vadd.f32 %v238_v10, %v94_v14  ;;  %v265_v16 = vpop.f32.mrb[3].mxu0  ;;  %v98_v17 = vmax.f32 %v92_v12, 0.0 }
  0xe2   :  { %v99_v18 = vmax.f32 %v95_v15, 0.0 }
  0xe4   :  { %v100_v19 = vpack.c.bf16 %v99_v18, %v98_v17 }
  0xe6   :  { %275 = vmatmul.mubr.msk.bf16.vlgmr.msra.gmra.mrb[0].mxu1 %vm140_vm2, %v100_v19 }
 0x1b9   :  { %v178_v21 = vpop.f32.mrb[0].mxu1 }
 0x1ba   :  { %v179_v22 = vadd.f32 %v242_v20, %v178_v21  ;;  %v276_v23 = vpop.f32.mrb[1].mxu1 }
 0x1bb   :  { %v181_v24 = vpop.f32.mrb[2].mxu1 }
 0x1bc   :  { %v182_v25 = vadd.f32 %v242_v20, %v181_v24  ;;  %v277_v26 = vpop.f32.mrb[3].mxu1  ;;  %v185_v27 = vadd.f32 %v179_v22, %v27_v3 }
 0x1be   :  { %v187_v28 = vsel %vm53_vm1, %v185_v27, 0.0  ;;  %v186_v29 = vadd.f32 %v182_v25, %v28_v4 }
 0x1bf   :  { %188 = vadd.xlane.f32.xlu0 %v187_v28 }
 0x1c0   :  { %v190_v30 = vsel %vm53_vm1, %v186_v29, 0.0 }
 0x1c3   :  { %191 = vadd.xlane.f32.xlu0 %v190_v30 }
 0x24c   :  { %v189_v31 = vpop.xlane.xlu0 %188 }
 0x24d   :  { %v194_v32 = vmul.f32 0.03125, %v189_v31 }
 0x24f   :  { %v196_v33 = vsub.f32 %v185_v27, %v194_v32 }
 0x250   :  { %v192_v34 = vpop.xlane.xlu0 %191 }
 0x251   :  { %v195_v35 = vmul.f32 0.03125, %v192_v34  ;;  %v198_v36 = vmul.f32 %v196_v33, %v196_v33 }
 0x253   :  { %v197_v37 = vsub.f32 %v186_v29, %v195_v35  ;;  %v200_v38 = vsel %vm53_vm1, %v198_v36, 0.0 }
 0x254   :  { %201 = vadd.xlane.f32.xlu1 %v200_v38 }
 0x255   :  { %v199_v39 = vmul.f32 %v197_v37, %v197_v37 }
 0x257   :  { %v203_v40 = vsel %vm53_vm1, %v199_v39, 0.0 }
 0x258   :  { %204 = vadd.xlane.f32.xlu1 %v203_v40 }
 0x2e1   :  { %v202_v41 = vpop.xlane.xlu1 %201 }
 0x2e2   :  { %v206_v42 = vmul.f32 0.03125, %v202_v41 }
 0x2e4   :  { %v208_v43 = vadd.f32 1e-05, %v206_v42 }
 0x2e5   :  { %v205_v44 = vpop.xlane.xlu1 %204 }
 0x2e6   :  { %286 = vrsqrt.f32 %v208_v43  ;;  %v207_v45 = vmul.f32 0.03125, %v205_v44 }
 0x2e8   :  { %v209_v46 = vadd.f32 1e-05, %v207_v45 }
 0x2ea   :  { %288 = vrsqrt.f32 %v209_v46 }
 0x2f0   :  { %v287_v47 = vpop.eup %286 }
 0x2f1   :  { %v212_v49 = vmul.f32 %v287_v47, %v196_v33 }
 0x2f3   :  { %v221_v51 = vmul.f32 %v248_v48, %v212_v49 }
 0x2f4   :  { %v289_v52 = vpop.eup %288 }
 0x2f5   :  { %v230_v53 = vadd.f32 %v249_v50, %v221_v51  ;;  %v213_v54 = vmul.f32 %v289_v52, %v197_v37 }
 0x2f7   :  { %232 = vst.msk [vmem:[%s388_s7] sm:$0xff] %vm53_vm1, %v230_v53  ;;  %v222_v55 = vmul.f32 %v248_v48, %v213_v54 }
 0x2f9   :  { %v231_v56 = vadd.f32 %v249_v50, %v222_v55 }
 0x2fb   :  { %233 = vst.msk [vmem:[%s388_s7 + $0x8] sm:$0xff] %vm53_vm1, %v231_v56 }

// kernel: _lambda_.47
= control target key start
LH: loop header
LB: loop body
LE: loop exit
PB: predicated region body
PF: predicated region fallthrough
CT: control target
= control target key end

     0   :  { %v330_v1 = vmov 0.0   ;;  %vm331_vm0 = vmmov 0   ;;  %vm54_vm1 = vcmask 261120   ;;  %s430_s0 = inlined_call_operand.vmem [shape: f32[16,32], index: 0, kind: input, shape index: {}]   ;;  %s431_s1 = inlined_call_operand.vmem [shape: bf16[32,64], index: 1, kind: input, shape index: {}]   ;;  %s432_s2 = inlined_call_operand.vmem [shape: f32[1,64], index: 2, kind: input, shape index: {}]   ;;  %s433_s3 = inlined_call_operand.vmem [shape: bf16[64,32], index: 3, kind: input, shape index: {}]   ;;  %s434_s4 = inlined_call_operand.vmem [shape: f32[1,32], index: 4, kind: input, shape index: {}]   ;;  %s435_s5 = inlined_call_operand.vmem [shape: f32[1,32], index: 5, kind: input, shape index: {}]   ;;  %s436_s6 = inlined_call_operand.vmem [shape: f32[1,32], index: 6, kind: input, shape index: {}]   ;;  %s437_s7 = inlined_call_operand.hbm [shape: f32[16,32], index: 7, kind: output, shape index: {}]  }
   0x1   :  { %v296_v0 = vld [vmem:[%s431_s1] sm:$0xff]   ;;  %271 = vmatprep.subr.bf16.mxu0 %v330_v1  ;;  %v297_v2 = vld [vmem:[%s431_s1 + $0x8] sm:$0xff]   ;;  %279 = vmatprep.subr.bf16.mxu1 %v330_v1 }
   0x2   :  { %272 = vmatpush3.bf16.msra.mxu0 %v296_v0  ;;  %275 = vmatprep.mubr.msk.bf16.mxu0 %vm331_vm0, %v330_v1  ;;  %v28_v3 = vld [vmem:[%s430_s0] sm:$0xff]  ;;  %v29_v4 = vld [vmem:[%s430_s0 + $0x8] sm:$0xff] }
   0x3   :  { %273 = vmatprep.subr.bf16.mxu0 %v330_v1  ;;  %v298_v5 = vld [vmem:[%s433_s3] sm:$0xff]   ;;  %287 = vmatprep.mubr.msk.bf16.mxu1 %vm331_vm0, %v330_v1  ;;  %v299_v6 = vld [vmem:[%s433_s3 + $0x8] sm:$0xff]   ;;  %v30_v7 = vpack.c.bf16 %v29_v4, %v28_v3 }
   0x4   :  { %280 = vmatpush3.bf16.msra.mxu1 %v298_v5 }
   0x5   :  { %281 = vmatprep.subr.bf16.mxu1 %v330_v1 }
   0x6   :  { %274 = vmatpush3.bf16.msra.mxu0 %v297_v2 }
   0x7   :  { %12 = vsyncpa [#allocation3], 0  ;;  %v300_v8 = vld [vmem:[%s433_s3 + $0x10] sm:$0xff]   ;;  %v301_v9 = vld [vmem:[%s433_s3 + $0x18] sm:$0xff]   ;;  %vm141_vm2 = vcmask 523264   ;;  %s332_s20 = smov [#allocation2]  }
   0x8   :  { %282 = vmatpush3.bf16.msra.mxu1 %v299_v6  ;;  %v251_v10 = vld [vmem:[%s432_s2] ss:$0 sm:$0xff]  ;;  %s240_s21 = sshll.u32 %s332_s20, 4  ;;  %s241_s21 = int_to_ptr.vmem [resolvable:$true] %s240_s21 }
   0x9   :  { %276 = vmatmul.mubr.msk.bf16.vlgmr.msra.gmra.mrb[0].mxu0 %vm54_vm1, %v30_v7  ;;  %283 = vmatprep.subr.bf16.mxu1 %v330_v1  ;;  %v255_v20 = vld [vmem:[%s434_s4] ss:$0 sm:$0xff]  ;;  %s306_s22 = scalar_lea.vmem %s241_s21, 256  ;;  %p311_p1 = scmp.lt.s32.totalorder %s241_s21, %s241_s21 }
   0xa   :  { %v261_v48 = vld [vmem:[%s435_s5] ss:$0 sm:$0xff]  ;;  %p307_p0 = scmp.ne.s32.totalorder %s241_s21, %s306_s22  ;;  %p312_p2 = scmp.lt.s32.totalorder %s306_s22, %s306_s22 }
   0xb   :  { %v262_v50 = vld [vmem:[%s436_s6] ss:$0 sm:$0xff] }
   0xc   :  { %284 = vmatpush3.bf16.msra.mxu1 %v300_v8  ;;  %p313_p3 = por %p312_p2, %p311_p1 }
   0xd   :  { %285 = vmatprep.subr.bf16.mxu1 %v330_v1 }
   0xe   :  { %p314_p4 = pnand %p313_p3, %p307_p0 }
  0x10   :  { %286 = vmatpush3.bf16.msra.mxu1 %v301_v9 }
  0xdc   :  { %v92_v11 = vpop.f32.mrb[0].mxu0 }
  0xdd   :  { %v93_v12 = vadd.f32 %v251_v10, %v92_v11  ;;  %v277_v13 = vpop.f32.mrb[1].mxu0 }
  0xde   :  { %v95_v14 = vpop.f32.mrb[2].mxu0 }
  0xdf   :  { %v96_v15 = vadd.f32 %v251_v10, %v95_v14  ;;  %v278_v16 = vpop.f32.mrb[3].mxu0  ;;  %v99_v17 = vmax.f32 %v93_v12, 0.0 }
  0xe1   :  { %v100_v18 = vmax.f32 %v96_v15, 0.0 }
  0xe3   :  { %v101_v19 = vpack.c.bf16 %v100_v18, %v99_v17 }
  0xe5   :  { %288 = vmatmul.mubr.msk.bf16.vlgmr.msra.gmra.mrb[0].mxu1 %vm141_vm2, %v101_v19 }
 0x1b8   :  { %v179_v21 = vpop.f32.mrb[0].mxu1 }
 0x1b9   :  { %v180_v22 = vadd.f32 %v255_v20, %v179_v21  ;;  %v289_v23 = vpop.f32.mrb[1].mxu1 }
 0x1ba   :  { %v182_v24 = vpop.f32.mrb[2].mxu1 }
 0x1bb   :  { %v183_v25 = vadd.f32 %v255_v20, %v182_v24  ;;  %v290_v26 = vpop.f32.mrb[3].mxu1  ;;  %v186_v27 = vadd.f32 %v180_v22, %v28_v3 }
 0x1bd   :  { %v188_v28 = vsel %vm54_vm1, %v186_v27, 0.0  ;;  %v187_v29 = vadd.f32 %v183_v25, %v29_v4 }
 0x1be   :  { %189 = vadd.xlane.f32.xlu0 %v188_v28 }
 0x1bf   :  { %v191_v30 = vsel %vm54_vm1, %v187_v29, 0.0 }
 0x1c2   :  { %192 = vadd.xlane.f32.xlu0 %v191_v30 }
 0x24b   :  { %v190_v31 = vpop.xlane.xlu0 %189 }
 0x24c   :  { %v195_v32 = vmul.f32 0.03125, %v190_v31 }
 0x24e   :  { %v197_v33 = vsub.f32 %v186_v27, %v195_v32 }
 0x24f   :  { %v193_v34 = vpop.xlane.xlu0 %192 }
 0x250   :  { %v196_v35 = vmul.f32 0.03125, %v193_v34  ;;  %v199_v36 = vmul.f32 %v197_v33, %v197_v33 }
 0x252   :  { %v198_v37 = vsub.f32 %v187_v29, %v196_v35  ;;  %v201_v38 = vsel %vm54_vm1, %v199_v36, 0.0 }
 0x253   :  { %202 = vadd.xlane.f32.xlu1 %v201_v38 }
 0x254   :  { %v200_v39 = vmul.f32 %v198_v37, %v198_v37 }
 0x256   :  { %v204_v40 = vsel %vm54_vm1, %v200_v39, 0.0 }
 0x257   :  { %205 = vadd.xlane.f32.xlu1 %v204_v40 }
 0x2e0   :  { %v203_v41 = vpop.xlane.xlu1 %202 }
 0x2e1   :  { %v207_v42 = vmul.f32 0.03125, %v203_v41 }
 0x2e3   :  { %v209_v43 = vadd.f32 1e-05, %v207_v42 }
 0x2e4   :  { %v206_v44 = vpop.xlane.xlu1 %205 }
 0x2e5   :  { %302 = vrsqrt.f32 %v209_v43  ;;  %v208_v45 = vmul.f32 0.03125, %v206_v44 }
 0x2e7   :  { %v210_v46 = vadd.f32 1e-05, %v208_v45 }
 0x2e9   :  { %304 = vrsqrt.f32 %v210_v46 }
 0x2ef   :  { %v303_v47 = vpop.eup %302 }
 0x2f0   :  { %v213_v49 = vmul.f32 %v303_v47, %v197_v33 }
 0x2f2   :  { %v222_v51 = vmul.f32 %v261_v48, %v213_v49 }
 0x2f3   :  { %v305_v52 = vpop.eup %304 }
 0x2f4   :  { %v214_v53 = vmul.f32 %v305_v52, %v198_v37  ;;  %v231_v54 = vadd.f32 %v262_v50, %v222_v51 }
 0x2f6   :  { %v223_v55 = vmul.f32 %v261_v48, %v214_v53  ;;  %233 = vst.msk [vmem:[#allocation2] sm:$0xff] %vm54_vm1, %v231_v54 }
 0x2f8   :  { %v232_v56 = vadd.f32 %v262_v50, %v223_v55 }
 0x2fa   :  { %234 = vst.msk [vmem:[#allocation2 + $0x8] sm:$0xff] %vm54_vm1, %v232_v56 }
 0x2fb   :  { %317 = shalt.err (!%p314_p4)
}
 0x2fc   :  { %s318_s23 = scalar_lea.hbm %s437_s7, 256 }
 0x2fd   :  { %p319_p5 = scmp.ne.s32.totalorder %s437_s7, %s318_s23  ;;  %p322_p6 = scmp.lt.u32.totalorder %s318_s23, %s437_s7 }
 0x2ff   :  { %p324_p7 = pnand %p322_p6, %p319_p5 }
 0x301   :  { %327 = shalt.err (!%p324_p7)
}
 0x302   :  { %s333_s28 = smov 128   ;;  %s334_s29 = smov 8  }
 0x303   :  { %246 = dma.vmem_to_hbm [thread:$0]  %s241_s21, 256, %s437_s7, [#allocation3], %s333_s28, %s333_s28, %s334_s29  }
 0x304   :  { %328 = dma.done.wait [#allocation3], 256  }
 0x305   :  { %329 = vsyncadd [#allocation3], 4294967040 }
 0x306   :  { %250 = vsyncpa [#allocation3], 1 }

</bundles_post_ra>
